<compile_context>
chip_gen: v5e
topology: v5e:2x2
jax: 0.10.0
libtpu: 0.0.40
codegen_flags: <defaults>
</compile_context>

<pallas_src>
import jax
import jax.numpy as jnp
from jax.experimental import pallas as pl
from jax.experimental.pallas import tpu as pltpu

INPUT_DIMS = 1024
PATCH_LENGTH = 4
SEQ_LENGTH = 1
IN_FEATURES = INPUT_DIMS * PATCH_LENGTH * SEQ_LENGTH  # 4096
HIDDEN_DIM = 512
FC1_DIMS = 256
FC2_DIMS = 128
N_ACTIONS = 4
ACTION_PAD = 128          # lane-dense padded action head (4 -> 128 lanes)
LN_EPS = 1e-5             # PyTorch nn.LayerNorm default
MAX_BATCH_TILE = 128      # keeps VMEM footprint ~13 MiB (v7x-safe)


def _layernorm(h, gamma, beta):
    mu = jnp.mean(h, axis=-1, keepdims=True)
    xc = h - mu
    var = jnp.mean(xc * xc, axis=-1, keepdims=True)
    inv = jax.lax.rsqrt(var + LN_EPS)
    return xc * inv * gamma + beta


def _elu(h):
    # ELU(alpha=1): x for x > 0, exp(x) - 1 otherwise.
    return jnp.where(h > 0, h, jnp.exp(jnp.minimum(h, 0.0)) - 1.0)


def actor_kernel(
    x_ref,
    w1_ref, b1_ref, g1_ref, be1_ref,
    w2_ref, b2_ref, g2_ref, be2_ref,
    w3_ref, b3_ref, g3_ref, be3_ref,
    w4_ref, b4_ref,
    out_ref,
):
    # fc1 -> ln1 -> elu.  bf16 x bf16 MXU feed, f32 accumulate; activation is
    # cast down in-kernel (weights are NOT upcast).
    h = jnp.dot(x_ref[...].astype(jnp.bfloat16), w1_ref[...],
                preferred_element_type=jnp.float32) + b1_ref[...]
    h = _elu(_layernorm(h, g1_ref[...], be1_ref[...]))

    # fc2 -> ln2 -> elu
    h = jnp.dot(h.astype(jnp.bfloat16), w2_ref[...],
                preferred_element_type=jnp.float32) + b2_ref[...]
    h = _elu(_layernorm(h, g2_ref[...], be2_ref[...]))

    # fc3 -> ln3 -> elu
    h = jnp.dot(h.astype(jnp.bfloat16), w3_ref[...],
                preferred_element_type=jnp.float32) + b3_ref[...]
    h = _elu(_layernorm(h, g3_ref[...], be3_ref[...]))

    # pi_lever -> softmax over the (padded, lane-dense) action head.
    logits = jnp.dot(h.astype(jnp.bfloat16), w4_ref[...],
                     preferred_element_type=jnp.float32) + b4_ref[...]
    m = jnp.max(logits, axis=-1, keepdims=True)
    e = jnp.exp(logits - m)                 # padded lanes: exp(-1e30 - m) == 0
    denom = jnp.sum(e, axis=-1, keepdims=True)
    # Exact divide: DMA-bound kernel, so this is wall-clock free and rows sum
    # to 1 exactly.
    out_ref[...] = (e / denom).astype(out_ref.dtype)


def _round_up(x, m):
    return (x + m - 1) // m * m


def actor_forward(x, params):
    """x: [B, 4096] float32. Returns [B, N_ACTIONS] action probabilities."""
    batch = x.shape[0]

    # Pad batch to an 8-sublane-aligned tile; shard large batches across cores.
    # NOTE: padded (all-zero) rows go through LayerNorm with var=0 -> rsqrt(eps);
    # the result is finite and sliced off below, so do not remove the eps.
    if batch <= MAX_BATCH_TILE:
        bt = _round_up(batch, 8)
        padded_b = bt
    else:
        bt = MAX_BATCH_TILE
        padded_b = _round_up(batch, MAX_BATCH_TILE)
    if padded_b != batch:
        x = jnp.pad(x, ((0, padded_b - batch), (0, 0)))

    args = (
        x,
        params["w1"], params["b1"], params["g1"], params["be1"],
        params["w2"], params["b2"], params["g2"], params["be2"],
        params["w3"], params["b3"], params["g3"], params["be3"],
        params["w4p"], params["b4p"],
    )

    def _fixed(shape):
        # Whole-array operand; block index never changes -> fetched once.
        return pl.BlockSpec(shape, lambda b: (0, 0))

    grid_spec = pltpu.PrefetchScalarGridSpec(
        num_scalar_prefetch=0,
        grid=(padded_b // bt,),
        in_specs=[
            pl.BlockSpec((bt, IN_FEATURES), lambda b: (b, 0)),    # x (batch-tiled)
            _fixed((IN_FEATURES, HIDDEN_DIM)),                    # W1 VMEM-resident
            _fixed((1, HIDDEN_DIM)), _fixed((1, HIDDEN_DIM)), _fixed((1, HIDDEN_DIM)),
            _fixed((HIDDEN_DIM, FC1_DIMS)),
            _fixed((1, FC1_DIMS)), _fixed((1, FC1_DIMS)), _fixed((1, FC1_DIMS)),
            _fixed((FC1_DIMS, FC2_DIMS)),
            _fixed((1, FC2_DIMS)), _fixed((1, FC2_DIMS)), _fixed((1, FC2_DIMS)),
            _fixed((FC2_DIMS, ACTION_PAD)),
            _fixed((1, ACTION_PAD)),
        ],
        out_specs=pl.BlockSpec((bt, ACTION_PAD), lambda b: (b, 0)),
    )

    pi_padded = pl.pallas_call(
        actor_kernel,
        out_shape=jax.ShapeDtypeStruct((padded_b, ACTION_PAD), jnp.float32),
        grid_spec=grid_spec,
        compiler_params=pltpu.CompilerParams(
            dimension_semantics=("parallel",),
            vmem_limit_bytes=28 << 20,
        ),
    )(*args)

    return pi_padded[:batch, :N_ACTIONS]


def init_params(key):
    """Synthetic parameters mimicking nn.Linear / nn.LayerNorm shapes.

    Linear weights are stored TRANSPOSED as [in, out] in bfloat16 (halves the
    HBM weight stream). Bias / LN vectors stay f32 as [1, dim] (lane-dense 2-D).
    The 4-wide action head is padded to 128 output lanes; padded bias = -1e30.
    """
    keys = jax.random.split(key, 8)

    def linear(kw, kb, fan_in, fan_out):
        bound = 1.0 / (fan_in ** 0.5)
        w = jax.random.uniform(kw, (fan_in, fan_out), jnp.float32, -bound, bound)
        b = jax.random.uniform(kb, (1, fan_out), jnp.float32, -bound, bound)
        return w.astype(jnp.bfloat16), b

    w1, b1 = linear(keys[0], keys[1], IN_FEATURES, HIDDEN_DIM)
    w2, b2 = linear(keys[2], keys[3], HIDDEN_DIM, FC1_DIMS)
    w3, b3 = linear(keys[4], keys[5], FC1_DIMS, FC2_DIMS)
    w4, b4 = linear(keys[6], keys[7], FC2_DIMS, N_ACTIONS)

    w4p = jnp.zeros((FC2_DIMS, ACTION_PAD), jnp.bfloat16).at[:, :N_ACTIONS].set(w4)
    b4p = jnp.full((1, ACTION_PAD), -1e30, jnp.float32).at[:, :N_ACTIONS].set(b4)

    return dict(
        w1=w1, b1=b1,
        g1=jnp.ones((1, HIDDEN_DIM), jnp.float32),
        be1=jnp.zeros((1, HIDDEN_DIM), jnp.float32),
        w2=w2, b2=b2,
        g2=jnp.ones((1, FC1_DIMS), jnp.float32),
        be2=jnp.zeros((1, FC1_DIMS), jnp.float32),
        w3=w3, b3=b3,
        g3=jnp.ones((1, FC2_DIMS), jnp.float32),
        be3=jnp.zeros((1, FC2_DIMS), jnp.float32),
        w4p=w4p, b4p=b4p,
    )


def reference_forward(x, params):
    """Pure-JAX reference with the same arithmetic as the kernel
    (bf16 x bf16 matmuls, f32 accumulation and post-matmul math)."""
    bf16 = lambda a: a.astype(jnp.bfloat16)

    def ln(h, g, b):
        mu = jnp.mean(h, axis=-1, keepdims=True)
        var = jnp.mean((h - mu) ** 2, axis=-1, keepdims=True)
        return (h - mu) / jnp.sqrt(var + LN_EPS) * g + b

    def elu(h):
        return jnp.where(h > 0, h, jnp.exp(jnp.minimum(h, 0.0)) - 1.0)

    def dot(a, w):
        return jnp.dot(bf16(a), w, preferred_element_type=jnp.float32)

    h = elu(ln(dot(x, params["w1"]) + params["b1"], params["g1"], params["be1"]))
    h = elu(ln(dot(h, params["w2"]) + params["b2"], params["g2"], params["be2"]))
    h = elu(ln(dot(h, params["w3"]) + params["b3"], params["g3"], params["be3"]))
    logits = dot(h, params["w4p"][:, :N_ACTIONS]) + params["b4p"][:, :N_ACTIONS]
    return jax.nn.softmax(logits, axis=1)


if __name__ == "__main__":
    key = jax.random.PRNGKey(0)
    pkey, xkey = jax.random.split(key)

    params = init_params(pkey)

    batch = 8
    # transformer_state: [B, input_dims * patch_length * seq_length] = [8, 4096]
    x = jax.random.normal(xkey, (batch, IN_FEATURES), jnp.float32)

    pi = actor_forward(x, params)
    pi = jax.block_until_ready(pi)

    ref = reference_forward(x, params)

    assert pi.shape == (batch, N_ACTIONS), pi.shape
    assert bool(jnp.all(jnp.isfinite(pi)))
    # Rows sum to 1 (exact divide in the softmax) and match the pure-JAX
    # reference; small tolerance covers accumulation-order differences only.
    assert jnp.allclose(jnp.sum(pi, axis=1), 1.0, atol=1e-4)
    assert jnp.allclose(pi, ref, atol=3e-3, rtol=3e-3)

    print("KERNEL_OK")
</pallas_src>

<mosaic_0001>
module attributes {stable_mosaic.version = 11 : i64} {
  func.func @actor_kernel(%arg0: i32, %arg1: memref<8x4096xf32, #tpu.memory_space<vmem>>, %arg2: memref<4096x512xbf16, #tpu.memory_space<vmem>>, %arg3: memref<1x512xf32, #tpu.memory_space<vmem>>, %arg4: memref<1x512xf32, #tpu.memory_space<vmem>>, %arg5: memref<1x512xf32, #tpu.memory_space<vmem>>, %arg6: memref<512x256xbf16, #tpu.memory_space<vmem>>, %arg7: memref<1x256xf32, #tpu.memory_space<vmem>>, %arg8: memref<1x256xf32, #tpu.memory_space<vmem>>, %arg9: memref<1x256xf32, #tpu.memory_space<vmem>>, %arg10: memref<256x128xbf16, #tpu.memory_space<vmem>>, %arg11: memref<1x128xf32, #tpu.memory_space<vmem>>, %arg12: memref<1x128xf32, #tpu.memory_space<vmem>>, %arg13: memref<1x128xf32, #tpu.memory_space<vmem>>, %arg14: memref<128x128xbf16, #tpu.memory_space<vmem>>, %arg15: memref<1x128xf32, #tpu.memory_space<vmem>>, %arg16: memref<8x128xf32, #tpu.memory_space<vmem>>) attributes {dimension_semantics = [#tpu.dimension_semantics<parallel>], iteration_bounds = array<i64: 1>, scalar_prefetch = 0 : i64, scratch_operands = 0 : i64, tpu.core_type = #tpu.core_type<tc>, window_params = [{transform_indices = @transform_0, window_bounds = array<i64: 8, 4096>}, {pipeline_mode = #tpu.pipeline_mode<synchronous>, transform_indices = @transform_1, window_bounds = array<i64: 4096, 512>}, {pipeline_mode = #tpu.pipeline_mode<synchronous>, transform_indices = @transform_2, window_bounds = array<i64: 1, 512>}, {pipeline_mode = #tpu.pipeline_mode<synchronous>, transform_indices = @transform_3, window_bounds = array<i64: 1, 512>}, {pipeline_mode = #tpu.pipeline_mode<synchronous>, transform_indices = @transform_4, window_bounds = array<i64: 1, 512>}, {pipeline_mode = #tpu.pipeline_mode<synchronous>, transform_indices = @transform_5, window_bounds = array<i64: 512, 256>}, {pipeline_mode = #tpu.pipeline_mode<synchronous>, transform_indices = @transform_6, window_bounds = array<i64: 1, 256>}, {pipeline_mode = #tpu.pipeline_mode<synchronous>, transform_indices = @transform_7, window_bounds = array<i64: 1, 256>}, {pipeline_mode = #tpu.pipeline_mode<synchronous>, transform_indices = @transform_8, window_bounds = array<i64: 1, 256>}, {pipeline_mode = #tpu.pipeline_mode<synchronous>, transform_indices = @transform_9, window_bounds = array<i64: 256, 128>}, {pipeline_mode = #tpu.pipeline_mode<synchronous>, transform_indices = @transform_10, window_bounds = array<i64: 1, 128>}, {pipeline_mode = #tpu.pipeline_mode<synchronous>, transform_indices = @transform_11, window_bounds = array<i64: 1, 128>}, {pipeline_mode = #tpu.pipeline_mode<synchronous>, transform_indices = @transform_12, window_bounds = array<i64: 1, 128>}, {pipeline_mode = #tpu.pipeline_mode<synchronous>, transform_indices = @transform_13, window_bounds = array<i64: 128, 128>}, {pipeline_mode = #tpu.pipeline_mode<synchronous>, transform_indices = @transform_14, window_bounds = array<i64: 1, 128>}, {transform_indices = @transform_15, window_bounds = array<i64: 8, 128>}]} {
    %c0 = arith.constant 0 : index
    %c0_0 = arith.constant 0 : index
    %0 = vector.load %arg1[%c0, %c0_0] : memref<8x4096xf32, #tpu.memory_space<vmem>>, vector<8x4096xf32>
    %1 = arith.truncf %0 : vector<8x4096xf32> to vector<8x4096xbf16>
    %c0_1 = arith.constant 0 : index
    %c0_2 = arith.constant 0 : index
    %2 = vector.load %arg2[%c0_1, %c0_2] : memref<4096x512xbf16, #tpu.memory_space<vmem>>, vector<4096x512xbf16>
    %cst = arith.constant dense<0.000000e+00> : vector<8x512xf32>
    %3 = tpu.matmul %1, %2, %cst {dimension_numbers = #tpu.dot_dimension_numbers<[1], [0], [0], [1], [0, 0, 1, 1], [], []>} : vector<8x4096xbf16>, vector<4096x512xbf16>, vector<8x512xf32> -> vector<8x512xf32>
    %c0_3 = arith.constant 0 : index
    %c0_4 = arith.constant 0 : index
    %4 = vector.load %arg3[%c0_3, %c0_4] : memref<1x512xf32, #tpu.memory_space<vmem>>, vector<1x512xf32>
    %5 = vector.broadcast %4 : vector<1x512xf32> to vector<8x512xf32>
    %6 = arith.addf %3, %5 : vector<8x512xf32>
    %c0_5 = arith.constant 0 : index
    %c0_6 = arith.constant 0 : index
    %7 = vector.load %arg4[%c0_5, %c0_6] : memref<1x512xf32, #tpu.memory_space<vmem>>, vector<1x512xf32>
    %c0_7 = arith.constant 0 : index
    %c0_8 = arith.constant 0 : index
    %8 = vector.load %arg5[%c0_7, %c0_8] : memref<1x512xf32, #tpu.memory_space<vmem>>, vector<1x512xf32>
    %cst_9 = arith.constant dense<0.000000e+00> : vector<8xf32>
    %9 = vector.multi_reduction <add>, %6, %cst_9 [1] : vector<8x512xf32> to vector<8xf32>
    %10 = vector.shape_cast %9 : vector<8xf32> to vector<8x1xf32>
    %cst_10 = arith.constant 5.120000e+02 : f32
    %11 = vector.broadcast %cst_10 : f32 to vector<8x1xf32>
    %12 = arith.divf %10, %11 : vector<8x1xf32>
    %13 = vector.broadcast %12 : vector<8x1xf32> to vector<8x512xf32>
    %14 = arith.subf %6, %13 : vector<8x512xf32>
    %15 = arith.mulf %14, %14 : vector<8x512xf32>
    %cst_11 = arith.constant dense<0.000000e+00> : vector<8xf32>
    %16 = vector.multi_reduction <add>, %15, %cst_11 [1] : vector<8x512xf32> to vector<8xf32>
    %17 = vector.shape_cast %16 : vector<8xf32> to vector<8x1xf32>
    %cst_12 = arith.constant 5.120000e+02 : f32
    %18 = vector.broadcast %cst_12 : f32 to vector<8x1xf32>
    %19 = arith.divf %17, %18 : vector<8x1xf32>
    %cst_13 = arith.constant 9.99999974E-6 : f32
    %20 = vector.broadcast %cst_13 : f32 to vector<8x1xf32>
    %21 = arith.addf %19, %20 : vector<8x1xf32>
    %22 = math.rsqrt %21 : vector<8x1xf32>
    %23 = vector.broadcast %22 : vector<8x1xf32> to vector<8x512xf32>
    %24 = arith.mulf %14, %23 : vector<8x512xf32>
    %25 = vector.broadcast %7 : vector<1x512xf32> to vector<8x512xf32>
    %26 = arith.mulf %24, %25 : vector<8x512xf32>
    %27 = vector.broadcast %8 : vector<1x512xf32> to vector<8x512xf32>
    %28 = arith.addf %26, %27 : vector<8x512xf32>
    %cst_14 = arith.constant 0.000000e+00 : f32
    %29 = vector.broadcast %cst_14 : f32 to vector<8x512xf32>
    %30 = arith.cmpf ogt, %28, %29 : vector<8x512xf32>
    %cst_15 = arith.constant 0.000000e+00 : f32
    %31 = vector.broadcast %cst_15 : f32 to vector<8x512xf32>
    %32 = arith.minimumf %28, %31 : vector<8x512xf32>
    %33 = math.exp %32 : vector<8x512xf32>
    %cst_16 = arith.constant 1.000000e+00 : f32
    %34 = vector.broadcast %cst_16 : f32 to vector<8x512xf32>
    %35 = arith.subf %33, %34 : vector<8x512xf32>
    %36 = arith.select %30, %28, %35 : vector<8x512xi1>, vector<8x512xf32>
    %37 = arith.truncf %36 : vector<8x512xf32> to vector<8x512xbf16>
    %c0_17 = arith.constant 0 : index
    %c0_18 = arith.constant 0 : index
    %38 = vector.load %arg6[%c0_17, %c0_18] : memref<512x256xbf16, #tpu.memory_space<vmem>>, vector<512x256xbf16>
    %cst_19 = arith.constant dense<0.000000e+00> : vector<8x256xf32>
    %39 = tpu.matmul %37, %38, %cst_19 {dimension_numbers = #tpu.dot_dimension_numbers<[1], [0], [0], [1], [0, 0, 1, 1], [], []>} : vector<8x512xbf16>, vector<512x256xbf16>, vector<8x256xf32> -> vector<8x256xf32>
    %c0_20 = arith.constant 0 : index
    %c0_21 = arith.constant 0 : index
    %40 = vector.load %arg7[%c0_20, %c0_21] : memref<1x256xf32, #tpu.memory_space<vmem>>, vector<1x256xf32>
    %41 = vector.broadcast %40 : vector<1x256xf32> to vector<8x256xf32>
    %42 = arith.addf %39, %41 : vector<8x256xf32>
    %c0_22 = arith.constant 0 : index
    %c0_23 = arith.constant 0 : index
    %43 = vector.load %arg8[%c0_22, %c0_23] : memref<1x256xf32, #tpu.memory_space<vmem>>, vector<1x256xf32>
    %c0_24 = arith.constant 0 : index
    %c0_25 = arith.constant 0 : index
    %44 = vector.load %arg9[%c0_24, %c0_25] : memref<1x256xf32, #tpu.memory_space<vmem>>, vector<1x256xf32>
    %cst_26 = arith.constant dense<0.000000e+00> : vector<8xf32>
    %45 = vector.multi_reduction <add>, %42, %cst_26 [1] : vector<8x256xf32> to vector<8xf32>
    %46 = vector.shape_cast %45 : vector<8xf32> to vector<8x1xf32>
    %cst_27 = arith.constant 2.560000e+02 : f32
    %47 = vector.broadcast %cst_27 : f32 to vector<8x1xf32>
    %48 = arith.divf %46, %47 : vector<8x1xf32>
    %49 = vector.broadcast %48 : vector<8x1xf32> to vector<8x256xf32>
    %50 = arith.subf %42, %49 : vector<8x256xf32>
    %51 = arith.mulf %50, %50 : vector<8x256xf32>
    %cst_28 = arith.constant dense<0.000000e+00> : vector<8xf32>
    %52 = vector.multi_reduction <add>, %51, %cst_28 [1] : vector<8x256xf32> to vector<8xf32>
    %53 = vector.shape_cast %52 : vector<8xf32> to vector<8x1xf32>
    %cst_29 = arith.constant 2.560000e+02 : f32
    %54 = vector.broadcast %cst_29 : f32 to vector<8x1xf32>
    %55 = arith.divf %53, %54 : vector<8x1xf32>
    %cst_30 = arith.constant 9.99999974E-6 : f32
    %56 = vector.broadcast %cst_30 : f32 to vector<8x1xf32>
    %57 = arith.addf %55, %56 : vector<8x1xf32>
    %58 = math.rsqrt %57 : vector<8x1xf32>
    %59 = vector.broadcast %58 : vector<8x1xf32> to vector<8x256xf32>
    %60 = arith.mulf %50, %59 : vector<8x256xf32>
    %61 = vector.broadcast %43 : vector<1x256xf32> to vector<8x256xf32>
    %62 = arith.mulf %60, %61 : vector<8x256xf32>
    %63 = vector.broadcast %44 : vector<1x256xf32> to vector<8x256xf32>
    %64 = arith.addf %62, %63 : vector<8x256xf32>
    %cst_31 = arith.constant 0.000000e+00 : f32
    %65 = vector.broadcast %cst_31 : f32 to vector<8x256xf32>
    %66 = arith.cmpf ogt, %64, %65 : vector<8x256xf32>
    %cst_32 = arith.constant 0.000000e+00 : f32
    %67 = vector.broadcast %cst_32 : f32 to vector<8x256xf32>
    %68 = arith.minimumf %64, %67 : vector<8x256xf32>
    %69 = math.exp %68 : vector<8x256xf32>
    %cst_33 = arith.constant 1.000000e+00 : f32
    %70 = vector.broadcast %cst_33 : f32 to vector<8x256xf32>
    %71 = arith.subf %69, %70 : vector<8x256xf32>
    %72 = arith.select %66, %64, %71 : vector<8x256xi1>, vector<8x256xf32>
    %73 = arith.truncf %72 : vector<8x256xf32> to vector<8x256xbf16>
    %c0_34 = arith.constant 0 : index
    %c0_35 = arith.constant 0 : index
    %74 = vector.load %arg10[%c0_34, %c0_35] : memref<256x128xbf16, #tpu.memory_space<vmem>>, vector<256x128xbf16>
    %cst_36 = arith.constant dense<0.000000e+00> : vector<8x128xf32>
    %75 = tpu.matmul %73, %74, %cst_36 {dimension_numbers = #tpu.dot_dimension_numbers<[1], [0], [0], [1], [0, 0, 1, 1], [], []>} : vector<8x256xbf16>, vector<256x128xbf16>, vector<8x128xf32> -> vector<8x128xf32>
    %c0_37 = arith.constant 0 : index
    %c0_38 = arith.constant 0 : index
    %76 = vector.load %arg11[%c0_37, %c0_38] : memref<1x128xf32, #tpu.memory_space<vmem>>, vector<1x128xf32>
    %77 = vector.broadcast %76 : vector<1x128xf32> to vector<8x128xf32>
    %78 = arith.addf %75, %77 : vector<8x128xf32>
    %c0_39 = arith.constant 0 : index
    %c0_40 = arith.constant 0 : index
    %79 = vector.load %arg12[%c0_39, %c0_40] : memref<1x128xf32, #tpu.memory_space<vmem>>, vector<1x128xf32>
    %c0_41 = arith.constant 0 : index
    %c0_42 = arith.constant 0 : index
    %80 = vector.load %arg13[%c0_41, %c0_42] : memref<1x128xf32, #tpu.memory_space<vmem>>, vector<1x128xf32>
    %cst_43 = arith.constant dense<0.000000e+00> : vector<8xf32>
    %81 = vector.multi_reduction <add>, %78, %cst_43 [1] : vector<8x128xf32> to vector<8xf32>
    %82 = vector.shape_cast %81 : vector<8xf32> to vector<8x1xf32>
    %cst_44 = arith.constant 1.280000e+02 : f32
    %83 = vector.broadcast %cst_44 : f32 to vector<8x1xf32>
    %84 = arith.divf %82, %83 : vector<8x1xf32>
    %85 = vector.broadcast %84 : vector<8x1xf32> to vector<8x128xf32>
    %86 = arith.subf %78, %85 : vector<8x128xf32>
    %87 = arith.mulf %86, %86 : vector<8x128xf32>
    %cst_45 = arith.constant dense<0.000000e+00> : vector<8xf32>
    %88 = vector.multi_reduction <add>, %87, %cst_45 [1] : vector<8x128xf32> to vector<8xf32>
    %89 = vector.shape_cast %88 : vector<8xf32> to vector<8x1xf32>
    %cst_46 = arith.constant 1.280000e+02 : f32
    %90 = vector.broadcast %cst_46 : f32 to vector<8x1xf32>
    %91 = arith.divf %89, %90 : vector<8x1xf32>
    %cst_47 = arith.constant 9.99999974E-6 : f32
    %92 = vector.broadcast %cst_47 : f32 to vector<8x1xf32>
    %93 = arith.addf %91, %92 : vector<8x1xf32>
    %94 = math.rsqrt %93 : vector<8x1xf32>
    %95 = vector.broadcast %94 : vector<8x1xf32> to vector<8x128xf32>
    %96 = arith.mulf %86, %95 : vector<8x128xf32>
    %97 = vector.broadcast %79 : vector<1x128xf32> to vector<8x128xf32>
    %98 = arith.mulf %96, %97 : vector<8x128xf32>
    %99 = vector.broadcast %80 : vector<1x128xf32> to vector<8x128xf32>
    %100 = arith.addf %98, %99 : vector<8x128xf32>
    %cst_48 = arith.constant 0.000000e+00 : f32
    %101 = vector.broadcast %cst_48 : f32 to vector<8x128xf32>
    %102 = arith.cmpf ogt, %100, %101 : vector<8x128xf32>
    %cst_49 = arith.constant 0.000000e+00 : f32
    %103 = vector.broadcast %cst_49 : f32 to vector<8x128xf32>
    %104 = arith.minimumf %100, %103 : vector<8x128xf32>
    %105 = math.exp %104 : vector<8x128xf32>
    %cst_50 = arith.constant 1.000000e+00 : f32
    %106 = vector.broadcast %cst_50 : f32 to vector<8x128xf32>
    %107 = arith.subf %105, %106 : vector<8x128xf32>
    %108 = arith.select %102, %100, %107 : vector<8x128xi1>, vector<8x128xf32>
    %109 = arith.truncf %108 : vector<8x128xf32> to vector<8x128xbf16>
    %c0_51 = arith.constant 0 : index
    %c0_52 = arith.constant 0 : index
    %110 = vector.load %arg14[%c0_51, %c0_52] : memref<128x128xbf16, #tpu.memory_space<vmem>>, vector<128x128xbf16>
    %cst_53 = arith.constant dense<0.000000e+00> : vector<8x128xf32>
    %111 = tpu.matmul %109, %110, %cst_53 {dimension_numbers = #tpu.dot_dimension_numbers<[1], [0], [0], [1], [0, 0, 1, 1], [], []>} : vector<8x128xbf16>, vector<128x128xbf16>, vector<8x128xf32> -> vector<8x128xf32>
    %c0_54 = arith.constant 0 : index
    %c0_55 = arith.constant 0 : index
    %112 = vector.load %arg15[%c0_54, %c0_55] : memref<1x128xf32, #tpu.memory_space<vmem>>, vector<1x128xf32>
    %113 = vector.broadcast %112 : vector<1x128xf32> to vector<8x128xf32>
    %114 = arith.addf %111, %113 : vector<8x128xf32>
    %cst_56 = arith.constant dense<0xFF800000> : vector<8xf32>
    %115 = vector.multi_reduction <maximumf>, %114, %cst_56 [1] : vector<8x128xf32> to vector<8xf32>
    %116 = vector.shape_cast %115 : vector<8xf32> to vector<8x1xf32>
    %117 = vector.broadcast %116 : vector<8x1xf32> to vector<8x128xf32>
    %118 = arith.subf %114, %117 : vector<8x128xf32>
    %119 = math.exp %118 : vector<8x128xf32>
    %cst_57 = arith.constant dense<0.000000e+00> : vector<8xf32>
    %120 = vector.multi_reduction <add>, %119, %cst_57 [1] : vector<8x128xf32> to vector<8xf32>
    %121 = vector.shape_cast %120 : vector<8xf32> to vector<8x1xf32>
    %122 = vector.broadcast %121 : vector<8x1xf32> to vector<8x128xf32>
    %123 = arith.divf %119, %122 : vector<8x128xf32>
    %c0_58 = arith.constant 0 : index
    %c0_59 = arith.constant 0 : index
    %124 = vector.load %arg16[%c0_58, %c0_59] : memref<8x128xf32, #tpu.memory_space<vmem>>, vector<8x128xf32>
    tpu.vector_store %arg16[%c0_58, %c0_59], %123 {strides = array<i32>} : memref<8x128xf32, #tpu.memory_space<vmem>>, vector<8x128xf32>,
    return
  }
  func.func @transform_0(%arg0: i32) -> (i32, i32) {
    %c0_i32 = arith.constant 0 : i32
    %c0_i32_0 = arith.constant 0 : i32
    return %arg0, %c0_i32 : i32, i32
  }
  func.func @transform_1(%arg0: i32) -> (i32, i32) {
    %c0_i32 = arith.constant 0 : i32
    %c0_i32_0 = arith.constant 0 : i32
    %c0_i32_1 = arith.constant 0 : i32
    return %c0_i32, %c0_i32_0 : i32, i32
  }
  func.func @transform_2(%arg0: i32) -> (i32, i32) {
    %c0_i32 = arith.constant 0 : i32
    %c0_i32_0 = arith.constant 0 : i32
    %c0_i32_1 = arith.constant 0 : i32
    return %c0_i32, %c0_i32_0 : i32, i32
  }
  func.func @transform_3(%arg0: i32) -> (i32, i32) {
    %c0_i32 = arith.constant 0 : i32
    %c0_i32_0 = arith.constant 0 : i32
    %c0_i32_1 = arith.constant 0 : i32
    return %c0_i32, %c0_i32_0 : i32, i32
  }
  func.func @transform_4(%arg0: i32) -> (i32, i32) {
    %c0_i32 = arith.constant 0 : i32
    %c0_i32_0 = arith.constant 0 : i32
    %c0_i32_1 = arith.constant 0 : i32
    return %c0_i32, %c0_i32_0 : i32, i32
  }
  func.func @transform_5(%arg0: i32) -> (i32, i32) {
    %c0_i32 = arith.constant 0 : i32
    %c0_i32_0 = arith.constant 0 : i32
    %c0_i32_1 = arith.constant 0 : i32
    return %c0_i32, %c0_i32_0 : i32, i32
  }
  func.func @transform_6(%arg0: i32) -> (i32, i32) {
    %c0_i32 = arith.constant 0 : i32
    %c0_i32_0 = arith.constant 0 : i32
    %c0_i32_1 = arith.constant 0 : i32
    return %c0_i32, %c0_i32_0 : i32, i32
  }
  func.func @transform_7(%arg0: i32) -> (i32, i32) {
    %c0_i32 = arith.constant 0 : i32
    %c0_i32_0 = arith.constant 0 : i32
    %c0_i32_1 = arith.constant 0 : i32
    return %c0_i32, %c0_i32_0 : i32, i32
  }
  func.func @transform_8(%arg0: i32) -> (i32, i32) {
    %c0_i32 = arith.constant 0 : i32
    %c0_i32_0 = arith.constant 0 : i32
    %c0_i32_1 = arith.constant 0 : i32
    return %c0_i32, %c0_i32_0 : i32, i32
  }
  func.func @transform_9(%arg0: i32) -> (i32, i32) {
    %c0_i32 = arith.constant 0 : i32
    %c0_i32_0 = arith.constant 0 : i32
    %c0_i32_1 = arith.constant 0 : i32
    return %c0_i32, %c0_i32_0 : i32, i32
  }
  func.func @transform_10(%arg0: i32) -> (i32, i32) {
    %c0_i32 = arith.constant 0 : i32
    %c0_i32_0 = arith.constant 0 : i32
    %c0_i32_1 = arith.constant 0 : i32
    return %c0_i32, %c0_i32_0 : i32, i32
  }
  func.func @transform_11(%arg0: i32) -> (i32, i32) {
    %c0_i32 = arith.constant 0 : i32
    %c0_i32_0 = arith.constant 0 : i32
    %c0_i32_1 = arith.constant 0 : i32
    return %c0_i32, %c0_i32_0 : i32, i32
  }
  func.func @transform_12(%arg0: i32) -> (i32, i32) {
    %c0_i32 = arith.constant 0 : i32
    %c0_i32_0 = arith.constant 0 : i32
    %c0_i32_1 = arith.constant 0 : i32
    return %c0_i32, %c0_i32_0 : i32, i32
  }
  func.func @transform_13(%arg0: i32) -> (i32, i32) {
    %c0_i32 = arith.constant 0 : i32
    %c0_i32_0 = arith.constant 0 : i32
    %c0_i32_1 = arith.constant 0 : i32
    return %c0_i32, %c0_i32_0 : i32, i32
  }
  func.func @transform_14(%arg0: i32) -> (i32, i32) {
    %c0_i32 = arith.constant 0 : i32
    %c0_i32_0 = arith.constant 0 : i32
    %c0_i32_1 = arith.constant 0 : i32
    return %c0_i32, %c0_i32_0 : i32, i32
  }
  func.func @transform_15(%arg0: i32) -> (i32, i32) {
    %c0_i32 = arith.constant 0 : i32
    %c0_i32_0 = arith.constant 0 : i32
    return %arg0, %c0_i32 : i32, i32
  }
}

</mosaic_0001>

<bundles_post_ra>
// kernel: tpu_custom_call.1
= control target key start
LH: loop header
LB: loop body
LE: loop exit
PB: predicated region body
PF: predicated region fallthrough
CT: control target
= control target key end

     0   :  { %20 = vsyncpa [#allocation3], 0  ;;  %s15647_s0 = inlined_call_operand.hbm [shape: f32[8,4096], index: 0, kind: input, shape index: {}]   ;;  %s15648_s1 = inlined_call_operand.hbm [shape: bf16[4096,512], index: 1, kind: input, shape index: {}]   ;;  %s15649_s2 = inlined_call_operand.hbm [shape: f32[1,512], index: 2, kind: input, shape index: {}]   ;;  %s15650_s3 = inlined_call_operand.hbm [shape: f32[1,512], index: 3, kind: input, shape index: {}]   ;;  %s15651_s4 = inlined_call_operand.hbm [shape: f32[1,512], index: 4, kind: input, shape index: {}]   ;;  %s15652_s5 = inlined_call_operand.hbm [shape: bf16[512,256], index: 5, kind: input, shape index: {}]   ;;  %s15653_s6 = inlined_call_operand.hbm [shape: f32[1,256], index: 6, kind: input, shape index: {}]   ;;  %s15654_s7 = inlined_call_operand.hbm [shape: f32[1,256], index: 7, kind: input, shape index: {}]   ;;  %s15655_s8 = inlined_call_operand.hbm [shape: f32[1,256], index: 8, kind: input, shape index: {}]   ;;  %s15656_s9 = inlined_call_operand.hbm [shape: bf16[256,128], index: 9, kind: input, shape index: {}]   ;;  %s15657_s10 = inlined_call_operand.hbm [shape: f32[1,128], index: 10, kind: input, shape index: {}]   ;;  %s15658_s11 = inlined_call_operand.hbm [shape: f32[1,128], index: 11, kind: input, shape index: {}]   ;;  %s15659_s12 = inlined_call_operand.hbm [shape: f32[1,128], index: 12, kind: input, shape index: {}]   ;;  %s15660_s13 = inlined_call_operand.hbm [shape: bf16[128,128], index: 13, kind: input, shape index: {}]   ;;  %s15661_s14 = inlined_call_operand.hbm [shape: f32[1,128], index: 14, kind: input, shape index: {}]   ;;  %s15662_s15 = inlined_call_operand.hbm [shape: f32[8,128], index: 15, kind: output, shape index: {}]  }
   0x1   :  { %21 = vsyncpa [#allocation6], 0 }
   0x2   :  { %22 = vsyncpa [#allocation9], 0 }
   0x3   :  { %23 = vsyncpa [#allocation12], 0 }
   0x4   :  { %24 = vsyncpa [#allocation15], 0 }
   0x5   :  { %25 = vsyncpa [#allocation18], 0 }
   0x6   :  { %26 = vsyncpa [#allocation21], 0 }
   0x7   :  { %27 = vsyncpa [#allocation24], 0  ;;  %s44_s20 = sshll.u32 %s15648_s1, 4  ;;  %s45_s20 = int_to_ptr.hbm [resolvable:$true] %s44_s20 }
   0x8   :  { %28 = vsyncpa [#allocation4], 0  ;;  %s15159_s21 = smov [#allocation5]   ;;  %s69_s25 = sshll.u32 %s15650_s3, 4  ;;  %s70_s25 = int_to_ptr.hbm [resolvable:$true] %s69_s25 }
   0x9   :  { %s46_s22 = sshll.u32 %s15159_s21, 4  ;;  %s15160_s26 = smov 256   ;;  %s47_s22 = int_to_ptr.vmem [resolvable:$true] %s46_s22 }
   0xa   :  { %s15161_s27 = smov 16   ;;  %s15162_s28 = smov [#allocation8]  }
   0xb   :  { %52 = dma.hbm_to_vmem [thread:$0]  %s45_s20, 131072, %s47_s22, [#allocation6], %s15160_s26, %s15160_s26, %s15161_s27  }
   0xc   :  { %s71_s29 = sshll.u32 %s15162_s28, 4  ;;  %s90_s17 = sshll.u32 %s15652_s5, 4  ;;  %s72_s29 = int_to_ptr.vmem [resolvable:$true] %s71_s29  ;;  %s91_s17 = int_to_ptr.hbm [resolvable:$true] %s90_s17 }
   0xd   :  { %74 = dma.hbm_to_vmem [thread:$0]  %s70_s25, 64, %s72_s29, [#allocation9]  }
   0xe   :  { %s15163_s1 = smov [#allocation11]   ;;  %s115_s3 = sshll.u32 %s15654_s7, 4  ;;  %s116_s3 = int_to_ptr.hbm [resolvable:$true] %s115_s3 }
   0xf   :  { %s92_s18 = sshll.u32 %s15163_s1, 4  ;;  %s15164_s23 = smov 128   ;;  %s93_s18 = int_to_ptr.vmem [resolvable:$true] %s92_s18 }
  0x10   :  { %s15165_s24 = smov 8   ;;  %s15166_s20 = smov [#allocation14]  }
  0x11   :  { %98 = dma.hbm_to_vmem [thread:$0]  %s91_s17, 8192, %s93_s18, [#allocation12], %s15164_s23, %s15164_s23, %s15165_s24  }
  0x12   :  { %s117_s22 = sshll.u32 %s15166_s20, 4  ;;  %s136_s5 = sshll.u32 %s15656_s9, 4  ;;  %s118_s22 = int_to_ptr.vmem [resolvable:$true] %s117_s22  ;;  %s137_s5 = int_to_ptr.hbm [resolvable:$true] %s136_s5 }
  0x13   :  { %120 = dma.hbm_to_vmem [thread:$0]  %s116_s3, 32, %s118_s22, [#allocation15]  }
  0x14   :  { %s15167_s25 = smov [#allocation17]   ;;  %s161_s7 = sshll.u32 %s15658_s11, 4  ;;  %s162_s7 = int_to_ptr.hbm [resolvable:$true] %s161_s7 }
  0x15   :  { %s138_s28 = sshll.u32 %s15167_s25, 4  ;;  %s15168_s16 = smov 64   ;;  %s139_s28 = int_to_ptr.vmem [resolvable:$true] %s138_s28 }
  0x16   :  { %s15169_s1 = smov 4   ;;  %s15170_s17 = smov [#allocation20]  }
  0x17   :  { %144 = dma.hbm_to_vmem [thread:$0]  %s137_s5, 2048, %s139_s28, [#allocation18], %s15168_s16, %s15168_s16, %s15169_s1  }
  0x18   :  { %s163_s18 = sshll.u32 %s15170_s17, 4  ;;  %s182_s9 = sshll.u32 %s15660_s13, 4  ;;  %s164_s18 = int_to_ptr.vmem [resolvable:$true] %s163_s18  ;;  %s183_s9 = int_to_ptr.hbm [resolvable:$true] %s182_s9 }
  0x19   :  { %166 = dma.hbm_to_vmem [thread:$0]  %s162_s7, 16, %s164_s18, [#allocation21]  }
  0x1a   :  { %s34_s24 = sshll.u32 %s15647_s0, 4  ;;  %s15171_s20 = smov [#allocation23]   ;;  %s35_s24 = int_to_ptr.hbm [resolvable:$true] %s34_s24 }
  0x1b   :  { %s184_s22 = sshll.u32 %s15171_s20, 4  ;;  %s15172_s11 = smov [#allocation2]   ;;  %s185_s22 = int_to_ptr.vmem [resolvable:$true] %s184_s22 }
  0x1c   :  { %190 = dma.hbm_to_vmem [thread:$0]  %s183_s9, 1024, %s185_s22, [#allocation24], %s15168_s16, %s15168_s16, %s15169_s1  }
  0x1d   :  { %s36_s26 = sshll.u32 %s15172_s11, 4  ;;  %s58_s25 = sshll.u32 %s15649_s2, 4  ;;  %s37_s26 = int_to_ptr.vmem [resolvable:$true] %s36_s26  ;;  %s59_s25 = int_to_ptr.hbm [resolvable:$true] %s58_s25 }
  0x1e   :  { %39 = dma.hbm_to_vmem [thread:$0]  %s35_s24, 4096, %s37_s26, [#allocation3]  }
  0x1f   :  { %s80_s29 = sshll.u32 %s15651_s4, 4  ;;  %s15173_s30 = smov [#allocation7]   ;;  %s81_s29 = int_to_ptr.hbm [resolvable:$true] %s80_s29 }
  0x20   :  { %s60_s0 = sshll.u32 %s15173_s30, 4  ;;  %s15174_s7 = smov [#allocation10]   ;;  %s61_s0 = int_to_ptr.vmem [resolvable:$true] %s60_s0 }
  0x21   :  { %63 = dma.hbm_to_vmem [thread:$0]  %s59_s25, 64, %s61_s0, [#allocation6]  }
  0x22   :  { %s82_s16 = sshll.u32 %s15174_s7, 4  ;;  %s104_s18 = sshll.u32 %s15653_s6, 4  ;;  %s83_s16 = int_to_ptr.vmem [resolvable:$true] %s82_s16  ;;  %s105_s18 = int_to_ptr.hbm [resolvable:$true] %s104_s18 }
  0x23   :  { %85 = dma.hbm_to_vmem [thread:$0]  %s81_s29, 64, %s83_s16, [#allocation9]  }
  0x24   :  { %s126_s21 = sshll.u32 %s15655_s8, 4  ;;  %s15175_s9 = smov [#allocation13]   ;;  %s127_s21 = int_to_ptr.hbm [resolvable:$true] %s126_s21 }
  0x25   :  { %s106_s4 = sshll.u32 %s15175_s9, 4  ;;  %s15176_s3 = smov [#allocation16]   ;;  %s107_s4 = int_to_ptr.vmem [resolvable:$true] %s106_s4 }
  0x26   :  { %109 = dma.hbm_to_vmem [thread:$0]  %s105_s18, 32, %s107_s4, [#allocation12]  }
  0x27   :  { %s128_s23 = sshll.u32 %s15176_s3, 4  ;;  %s150_s22 = sshll.u32 %s15657_s10, 4  ;;  %s129_s23 = int_to_ptr.vmem [resolvable:$true] %s128_s23  ;;  %s151_s22 = int_to_ptr.hbm [resolvable:$true] %s150_s22 }
  0x28   :  { %131 = dma.hbm_to_vmem [thread:$0]  %s127_s21, 32, %s129_s23, [#allocation15]  }
  0x29   :  { %s172_s26 = sshll.u32 %s15659_s12, 4  ;;  %s15177_s27 = smov [#allocation19]   ;;  %s173_s26 = int_to_ptr.hbm [resolvable:$true] %s172_s26 }
  0x2a   :  { %s152_s8 = sshll.u32 %s15177_s27, 4  ;;  %s15178_s5 = smov [#allocation22]   ;;  %s153_s8 = int_to_ptr.vmem [resolvable:$true] %s152_s8 }
  0x2b   :  { %155 = dma.hbm_to_vmem [thread:$0]  %s151_s22, 16, %s153_s8, [#allocation18]  }
  0x2c   :  { %s174_s25 = sshll.u32 %s15178_s5, 4  ;;  %s196_s29 = sshll.u32 %s15661_s14, 4  ;;  %s175_s25 = int_to_ptr.vmem [resolvable:$true] %s174_s25  ;;  %s197_s29 = int_to_ptr.hbm [resolvable:$true] %s196_s29 }
  0x2d   :  { %177 = dma.hbm_to_vmem [thread:$0]  %s173_s26, 16, %s175_s25, [#allocation21]  }
  0x2e   :  { %s15179_s10 = smov [#allocation25]  }
  0x2f   :  { %s198_s30 = sshll.u32 %s15179_s10, 4  ;;  %s199_s30 = int_to_ptr.vmem [resolvable:$true] %s198_s30 }
  0x30   :  { %201 = dma.hbm_to_vmem [thread:$0]  %s197_s29, 16, %s199_s30, [#allocation24]  }
  0x31   :  { %15141 = dma.done.wait [#allocation3], 4096  }
  0x32   :  { %15142 = vsyncadd [#allocation3], 4294963200 }
  0x33   :  { %15143 = dma.done.wait [#allocation6], 131136  }
  0x34   :  { %15144 = vsyncadd [#allocation6], 4294836160 }
  0x35   :  { %15145 = dma.done.wait [#allocation9], 128  }
  0x36   :  { %15146 = vsyncadd [#allocation9], 4294967168 }
  0x37   :  { %15147 = dma.done.wait [#allocation12], 8224  }
  0x38   :  { %15148 = vsyncadd [#allocation12], 4294959072 }
  0x39   :  { %15149 = dma.done.wait [#allocation15], 64  }
  0x3a   :  { %15150 = vsyncadd [#allocation15], 4294967232 }
  0x3b   :  { %15151 = dma.done.wait [#allocation18], 2064  }
  0x3c   :  { %15152 = vsyncadd [#allocation18], 4294965232 }
  0x3d   :  { %15153 = dma.done.wait [#allocation21], 32  }
  0x3e   :  { %15154 = vsyncadd [#allocation21], 4294967264 }
  0x3f   :  { %15155 = dma.done.wait [#allocation24], 1040  }
  0x40   :  { %15156 = vsyncadd [#allocation24], 4294966256  ;;  %v9242_v0 = vld [vmem:[#allocation5 + $0xe0] sm:$0xf]  ;;  %v13613_v1 = vld [vmem:[#allocation5 + $0xec] sm:$0xf0] }
  0x41   :  { %v9370_v2 = vld [vmem:[#allocation5 + $0x1e0] sm:$0xf]  ;;  %v9243_v3 = vor.u32 %v13613_v1, %v9242_v0  ;;  %v13645_v4 = vld [vmem:[#allocation5 + $0x1ec] sm:$0xf0]  ;;  %s15183_s12 = smov [#allocation26]   ;;  %s9111_s16 = sshll.u32 %s15662_s15, 4  ;;  %s9112_s16 = int_to_ptr.hbm [resolvable:$true] %s9111_s16 }
  0x42   :  { %v9498_v5 = vld [vmem:[#allocation5 + $0x2e0] sm:$0xf]  ;;  %v13677_v6 = vld [vmem:[#allocation5 + $0x2ec] sm:$0xf0]  ;;  %v9371_v7 = vor.u32 %v13645_v4, %v9370_v2  ;;  %s9109_s14 = sshll.u32 %s15183_s12, 4  ;;  %s9110_s14 = int_to_ptr.vmem [resolvable:$true] %s9109_s14 }
  0x43   :  { %v9499_v8 = vor.u32 %v13677_v6, %v9498_v5  ;;  %v9626_v9 = vld [vmem:[#allocation5 + $0x3e0] sm:$0xf]  ;;  %v13709_v10 = vld [vmem:[#allocation5 + $0x3ec] sm:$0xf0]  ;;  %6480 = vmatpush.bf16.msra.mxu0 %v9243_v3 }
  0x44   :  { %v9226_v11 = vld [vmem:[#allocation5 + $0xc0] sm:$0xf]  ;;  %v9627_v12 = vor.u32 %v13709_v10, %v9626_v9  ;;  %v13609_v13 = vld [vmem:[#allocation5 + $0xcc] sm:$0xf0]  ;;  %6493 = vmatpush.bf16.msra.mxu1 %v9371_v7 }
  0x45   :  { %v9354_v14 = vld [vmem:[#allocation5 + $0x1c0] sm:$0xf]  ;;  %v13641_v15 = vld [vmem:[#allocation5 + $0x1cc] sm:$0xf0]  ;;  %6506 = vmatpush.bf16.msra.mxu2 %v9499_v8  ;;  %v9227_v16 = vor.u32 %v13609_v13, %v9226_v11 }
  0x46   :  { %v9355_v17 = vor.u32 %v13641_v15, %v9354_v14  ;;  %v9482_v18 = vld [vmem:[#allocation5 + $0x2c0] sm:$0xf]  ;;  %v13673_v19 = vld [vmem:[#allocation5 + $0x2cc] sm:$0xf0]  ;;  %6519 = vmatpush.bf16.msra.mxu3 %v9627_v12 }
  0x47   :  { %v9610_v20 = vld [vmem:[#allocation5 + $0x3c0] sm:$0xf]  ;;  %v9483_v21 = vor.u32 %v13673_v19, %v9482_v18  ;;  %v13705_v22 = vld [vmem:[#allocation5 + $0x3cc] sm:$0xf0]  ;;  %6481 = vmatpush.bf16.msra.mxu0 %v9227_v16 }
  0x48   :  { %v9210_v23 = vld [vmem:[#allocation5 + $0xa0] sm:$0xf]  ;;  %v13605_v24 = vld [vmem:[#allocation5 + $0xac] sm:$0xf0]  ;;  %v9611_v25 = vor.u32 %v13705_v22, %v9610_v20  ;;  %6494 = vmatpush.bf16.msra.mxu1 %v9355_v17 }
  0x49   :  { %v9338_v26 = vld [vmem:[#allocation5 + $0x1a0] sm:$0xf]  ;;  %v13637_v27 = vld [vmem:[#allocation5 + $0x1ac] sm:$0xf0]  ;;  %v9211_v29 = vor.u32 %v13605_v24, %v9210_v23  ;;  %6507 = vmatpush.bf16.msra.mxu2 %v9483_v21 }
  0x4a   :  { %v9466_v28 = vld [vmem:[#allocation5 + $0x2a0] sm:$0xf]  ;;  %v13669_v30 = vld [vmem:[#allocation5 + $0x2ac] sm:$0xf0]  ;;  %v9339_v33 = vor.u32 %v13637_v27, %v9338_v26  ;;  %6520 = vmatpush.bf16.msra.mxu3 %v9611_v25 }
  0x4b   :  { %v9594_v31 = vld [vmem:[#allocation5 + $0x3a0] sm:$0xf]  ;;  %v13701_v32 = vld [vmem:[#allocation5 + $0x3ac] sm:$0xf0]  ;;  %v9467_v34 = vor.u32 %v13669_v30, %v9466_v28  ;;  %6482 = vmatpush.bf16.msra.mxu0 %v9211_v29 }
  0x4c   :  { %v9194_v35 = vld [vmem:[#allocation5 + $0x80] sm:$0xf]  ;;  %v13601_v36 = vld [vmem:[#allocation5 + $0x8c] sm:$0xf0]  ;;  %v9595_v38 = vor.u32 %v13701_v32, %v9594_v31  ;;  %6495 = vmatpush.bf16.msra.mxu1 %v9339_v33 }
  0x4d   :  { %v9322_v37 = vld [vmem:[#allocation5 + $0x180] sm:$0xf]  ;;  %v13633_v39 = vld [vmem:[#allocation5 + $0x18c] sm:$0xf0]  ;;  %v9195_v44 = vor.u32 %v13601_v36, %v9194_v35  ;;  %6508 = vmatpush.bf16.msra.mxu2 %v9467_v34 }
  0x4e   :  { %v9450_v40 = vld [vmem:[#allocation5 + $0x280] sm:$0xf]  ;;  %v13665_v41 = vld [vmem:[#allocation5 + $0x28c] sm:$0xf0]  ;;  %v9323_v45 = vor.u32 %v13633_v39, %v9322_v37  ;;  %6521 = vmatpush.bf16.msra.mxu3 %v9595_v38 }
  0x4f   :  { %v9578_v42 = vld [vmem:[#allocation5 + $0x380] sm:$0xf]  ;;  %v13697_v43 = vld [vmem:[#allocation5 + $0x38c] sm:$0xf0]  ;;  %v9451_v46 = vor.u32 %v13665_v41, %v9450_v40  ;;  %6483 = vmatpush.bf16.msra.mxu0 %v9195_v44 }
  0x50   :  { %v9178_v47 = vld [vmem:[#allocation5 + $0x60] sm:$0xf]  ;;  %v13597_v48 = vld [vmem:[#allocation5 + $0x6c] sm:$0xf0]  ;;  %v9579_v50 = vor.u32 %v13697_v43, %v9578_v42  ;;  %6496 = vmatpush.bf16.msra.mxu1 %v9323_v45 }
  0x51   :  { %v9306_v49 = vld [vmem:[#allocation5 + $0x160] sm:$0xf]  ;;  %v13629_v51 = vld [vmem:[#allocation5 + $0x16c] sm:$0xf0]  ;;  %v9179_v56 = vor.u32 %v13597_v48, %v9178_v47  ;;  %6509 = vmatpush.bf16.msra.mxu2 %v9451_v46 }
  0x52   :  { %v9434_v52 = vld [vmem:[#allocation5 + $0x260] sm:$0xf]  ;;  %v13661_v53 = vld [vmem:[#allocation5 + $0x26c] sm:$0xf0]  ;;  %v9307_v57 = vor.u32 %v13629_v51, %v9306_v49  ;;  %6522 = vmatpush.bf16.msra.mxu3 %v9579_v50 }
  0x53   :  { %v9562_v54 = vld [vmem:[#allocation5 + $0x360] sm:$0xf]  ;;  %v13693_v55 = vld [vmem:[#allocation5 + $0x36c] sm:$0xf0]  ;;  %v9435_v58 = vor.u32 %v13661_v53, %v9434_v52  ;;  %6484 = vmatpush.bf16.msra.mxu0 %v9179_v56 }
  0x54   :  { %v9162_v59 = vld [vmem:[#allocation5 + $0x40] sm:$0xf]  ;;  %v13593_v60 = vld [vmem:[#allocation5 + $0x4c] sm:$0xf0]  ;;  %v9563_v62 = vor.u32 %v13693_v55, %v9562_v54  ;;  %6497 = vmatpush.bf16.msra.mxu1 %v9307_v57 }
  0x55   :  { %v9290_v61 = vld [vmem:[#allocation5 + $0x140] sm:$0xf]  ;;  %v13625_v63 = vld [vmem:[#allocation5 + $0x14c] sm:$0xf0]  ;;  %v9163_v4 = vor.u32 %v13593_v60, %v9162_v59  ;;  %6510 = vmatpush.bf16.msra.mxu2 %v9435_v58 }
  0x56   :  { %v9418_v0 = vld [vmem:[#allocation5 + $0x240] sm:$0xf]  ;;  %v13657_v1 = vld [vmem:[#allocation5 + $0x24c] sm:$0xf0]  ;;  %v9291_v5 = vor.u32 %v13625_v63, %v9290_v61  ;;  %6523 = vmatpush.bf16.msra.mxu3 %v9563_v62 }
  0x57   :  { %v9546_v2 = vld [vmem:[#allocation5 + $0x340] sm:$0xf]  ;;  %v13689_v3 = vld [vmem:[#allocation5 + $0x34c] sm:$0xf0]  ;;  %v9419_v6 = vor.u32 %v13657_v1, %v9418_v0  ;;  %6485 = vmatpush.bf16.msra.mxu0 %v9163_v4 }
  0x58   :  { %v9146_v7 = vld [vmem:[#allocation5 + $0x20] sm:$0xf]  ;;  %v13589_v8 = vld [vmem:[#allocation5 + $0x2c] sm:$0xf0]  ;;  %v9547_v10 = vor.u32 %v13689_v3, %v9546_v2  ;;  %6498 = vmatpush.bf16.msra.mxu1 %v9291_v5 }
  0x59   :  { %v9274_v9 = vld [vmem:[#allocation5 + $0x120] sm:$0xf]  ;;  %v13621_v11 = vld [vmem:[#allocation5 + $0x12c] sm:$0xf0]  ;;  %v9147_v16 = vor.u32 %v13589_v8, %v9146_v7  ;;  %6511 = vmatpush.bf16.msra.mxu2 %v9419_v6 }
  0x5a   :  { %v9402_v12 = vld [vmem:[#allocation5 + $0x220] sm:$0xf]  ;;  %v13653_v13 = vld [vmem:[#allocation5 + $0x22c] sm:$0xf0]  ;;  %v9275_v19 = vor.u32 %v13621_v11, %v9274_v9  ;;  %6524 = vmatpush.bf16.msra.mxu3 %v9547_v10  ;;  %v265_v10 = vld [vmem:[#allocation2 + $0x18] sm:$0xff] }
  0x5b   :  { %v9530_v14 = vld [vmem:[#allocation5 + $0x320] sm:$0xf]  ;;  %v13685_v15 = vld [vmem:[#allocation5 + $0x32c] sm:$0xf0]  ;;  %v9403_v20 = vor.u32 %v13653_v13, %v9402_v12  ;;  %6486 = vmatpush.bf16.msra.mxu0 %v9147_v16 }
  0x5c   :  { %v9130_v17 = vld [vmem:[#allocation5] sm:$0xf]  ;;  %v13585_v18 = vld [vmem:[#allocation5 + $0xc] sm:$0xf0]  ;;  %v9531_v24 = vor.u32 %v13685_v15, %v9530_v14  ;;  %6499 = vmatpush.bf16.msra.mxu1 %v9275_v19  ;;  %v15313_v15 = vpack.c.bf16 %v265_v10, %v265_v10  ;;  %v263_v19 = vld [vmem:[#allocation2 + $0x8] sm:$0xff] }
  0x5d   :  { %v9258_v21 = vld [vmem:[#allocation5 + $0x100] sm:$0xf]  ;;  %v13617_v22 = vld [vmem:[#allocation5 + $0x10c] sm:$0xf0]  ;;  %v9131_v31 = vor.u32 %v13585_v18, %v9130_v17  ;;  %6512 = vmatpush.bf16.msra.mxu2 %v9403_v20 }
  0x5e   :  { %v9386_v23 = vld [vmem:[#allocation5 + $0x200] sm:$0xf]  ;;  %v13649_v25 = vld [vmem:[#allocation5 + $0x20c] sm:$0xf0]  ;;  %v9259_v35 = vor.u32 %v13617_v22, %v9258_v21  ;;  %6525 = vmatpush.bf16.msra.mxu3 %v9531_v24 }
  0x5f   :  { %v9514_v26 = vld [vmem:[#allocation5 + $0x300] sm:$0xf]  ;;  %v13681_v27 = vld [vmem:[#allocation5 + $0x30c] sm:$0xf0]  ;;  %v9387_v36 = vor.u32 %v13649_v25, %v9386_v23  ;;  %6487 = vmatpush.bf16.msra.mxu0 %v9131_v31  ;;  %v15318_v25 = vpack.c.bf16 %v263_v19, %v263_v19 }
  0x60   :  { %v9754_v28 = vld [vmem:[#allocation5 + $0x4e0] sm:$0xf]  ;;  %v13741_v29 = vld [vmem:[#allocation5 + $0x4ec] sm:$0xf0]  ;;  %v9515_v39 = vor.u32 %v13681_v27, %v9514_v26  ;;  %6500 = vmatpush.bf16.msra.mxu1 %v9259_v35 }
  0x61   :  { %v9882_v30 = vld [vmem:[#allocation5 + $0x5e0] sm:$0xf]  ;;  %v13773_v32 = vld [vmem:[#allocation5 + $0x5ec] sm:$0xf0]  ;;  %v9755_v40 = vor.u32 %v13741_v29, %v9754_v28  ;;  %6513 = vmatpush.bf16.msra.mxu2 %v9387_v36 }
  0x62   :  { %v10010_v33 = vld [vmem:[#allocation5 + $0x6e0] sm:$0xf]  ;;  %v13805_v34 = vld [vmem:[#allocation5 + $0x6ec] sm:$0xf0]  ;;  %v9883_v41 = vor.u32 %v13773_v32, %v9882_v30  ;;  %6526 = vmatpush.bf16.msra.mxu3 %v9515_v39 }
  0x63   :  { %v10138_v37 = vld [vmem:[#allocation5 + $0x7e0] sm:$0xf]  ;;  %v13837_v38 = vld [vmem:[#allocation5 + $0x7ec] sm:$0xf0]  ;;  %v10011_v42 = vor.u32 %v13805_v34, %v10010_v33  ;;  %6532 = vmatpush.bf16.msrb.mxu0 %v9755_v40  ;;  %6501 = vmatmul.bf16.vlgmr.msra.gmra.mxu1 %v15318_v25 }
  0x64   :  { %v9738_v43 = vld [vmem:[#allocation5 + $0x4c0] sm:$0xf]  ;;  %v13737_v44 = vld [vmem:[#allocation5 + $0x4cc] sm:$0xf0]  ;;  %v10139_v46 = vor.u32 %v13837_v38, %v10138_v37  ;;  %6545 = vmatpush.bf16.msrb.mxu1 %v9883_v41 }
  0x65   :  { %v9866_v45 = vld [vmem:[#allocation5 + $0x5c0] sm:$0xf]  ;;  %v13769_v47 = vld [vmem:[#allocation5 + $0x5cc] sm:$0xf0]  ;;  %v9739_v52 = vor.u32 %v13737_v44, %v9738_v43  ;;  %6558 = vmatpush.bf16.msrb.mxu2 %v10011_v42  ;;  %6527 = vmatmul.bf16.vlgmr.msra.gmra.mxu3 %v15313_v15 }
  0x66   :  { %v9994_v48 = vld [vmem:[#allocation5 + $0x6c0] sm:$0xf]  ;;  %v13801_v49 = vld [vmem:[#allocation5 + $0x6cc] sm:$0xf0]  ;;  %v9867_v54 = vor.u32 %v13769_v47, %v9866_v45  ;;  %6571 = vmatpush.bf16.msrb.mxu3 %v10139_v46 }
  0x67   :  { %v10122_v50 = vld [vmem:[#allocation5 + $0x7c0] sm:$0xf]  ;;  %v13833_v51 = vld [vmem:[#allocation5 + $0x7cc] sm:$0xf0]  ;;  %v9995_v55 = vor.u32 %v13801_v49, %v9994_v48  ;;  %6533 = vmatpush.bf16.msrb.mxu0 %v9739_v52 }
  0x68   :  { %v9722_v53 = vld [vmem:[#allocation5 + $0x4a0] sm:$0xf]  ;;  %v13733_v56 = vld [vmem:[#allocation5 + $0x4ac] sm:$0xf0]  ;;  %v10123_v59 = vor.u32 %v13833_v51, %v10122_v50  ;;  %6546 = vmatpush.bf16.msrb.mxu1 %v9867_v54 }
  0x69   :  { %v9850_v57 = vld [vmem:[#allocation5 + $0x5a0] sm:$0xf]  ;;  %v13765_v58 = vld [vmem:[#allocation5 + $0x5ac] sm:$0xf0]  ;;  %v9723_v0 = vor.u32 %v13733_v56, %v9722_v53  ;;  %6559 = vmatpush.bf16.msrb.mxu2 %v9995_v55 }
  0x6a   :  { %v9978_v60 = vld [vmem:[#allocation5 + $0x6a0] sm:$0xf]  ;;  %v13797_v61 = vld [vmem:[#allocation5 + $0x6ac] sm:$0xf0]  ;;  %v9851_v1 = vor.u32 %v13765_v58, %v9850_v57  ;;  %6572 = vmatpush.bf16.msrb.mxu3 %v10123_v59 }
  0x6b   :  { %v10106_v62 = vld [vmem:[#allocation5 + $0x7a0] sm:$0xf]  ;;  %v13829_v63 = vld [vmem:[#allocation5 + $0x7ac] sm:$0xf0]  ;;  %v9979_v5 = vor.u32 %v13797_v61, %v9978_v60  ;;  %6534 = vmatpush.bf16.msrb.mxu0 %v9723_v0 }
  0x6c   :  { %v9706_v2 = vld [vmem:[#allocation5 + $0x480] sm:$0xf]  ;;  %v264_v3 = vld [vmem:[#allocation2 + $0x10] sm:$0xff]  ;;  %v10107_v11 = vor.u32 %v13829_v63, %v10106_v62  ;;  %6547 = vmatpush.bf16.msrb.mxu1 %v9851_v1 }
  0x6d   :  { %v262_v4 = vld [vmem:[#allocation2] sm:$0xff]  ;;  %v13729_v6 = vld [vmem:[#allocation5 + $0x48c] sm:$0xf0]  ;;  %v15309_v8 = vpack.c.bf16 %v264_v3, %v264_v3  ;;  %6560 = vmatpush.bf16.msrb.mxu2 %v9979_v5 }
  0x6e   :  { %v9834_v7 = vld [vmem:[#allocation5 + $0x580] sm:$0xf]  ;;  %v15311_v9 = vpack.c.bf16 %v262_v4, %v262_v4  ;;  %v13761_v12 = vld [vmem:[#allocation5 + $0x58c] sm:$0xf0]  ;;  %v9707_v18 = vor.u32 %v13729_v6, %v9706_v2  ;;  %6573 = vmatpush.bf16.msrb.mxu3 %v10107_v11 }
  0x6f   :  { %v9962_v13 = vld [vmem:[#allocation5 + $0x680] sm:$0xf]  ;;  %v13793_v14 = vld [vmem:[#allocation5 + $0x68c] sm:$0xf0]  ;;  %6514 = vmatmul.bf16.vlgmr.msra.gmra.mxu2 %v15309_v8  ;;  %v9835_v20 = vor.u32 %v13761_v12, %v9834_v7 }
  0x70   :  { %v10090_v16 = vld [vmem:[#allocation5 + $0x780] sm:$0xf]  ;;  %v13825_v17 = vld [vmem:[#allocation5 + $0x78c] sm:$0xf0]  ;;  %6488 = vmatmul.bf16.vlgmr.msra.gmra.mxu0 %v15311_v9  ;;  %v9963_v21 = vor.u32 %v13793_v14, %v9962_v13 }
  0x71   :  { %v9690_v22 = vld [vmem:[#allocation5 + $0x460] sm:$0xf]  ;;  %v13725_v23 = vld [vmem:[#allocation5 + $0x46c] sm:$0xf0]  ;;  %v10091_v26 = vor.u32 %v13825_v17, %v10090_v16  ;;  %6535 = vmatpush.bf16.msrb.mxu0 %v9707_v18  ;;  %6548 = vmatpush.bf16.msrb.mxu1 %v9835_v20 }
  0x72   :  { %v9818_v24 = vld [vmem:[#allocation5 + $0x560] sm:$0xf]  ;;  %v13757_v27 = vld [vmem:[#allocation5 + $0x56c] sm:$0xf0]  ;;  %v9691_v32 = vor.u32 %v13725_v23, %v9690_v22  ;;  %6561 = vmatpush.bf16.msrb.mxu2 %v9963_v21  ;;  %v269_v23 = vld [vmem:[#allocation2 + $0x38] sm:$0xff] }
  0x73   :  { %v9946_v28 = vld [vmem:[#allocation5 + $0x660] sm:$0xf]  ;;  %v13789_v29 = vld [vmem:[#allocation5 + $0x66c] sm:$0xf0]  ;;  %v9819_v33 = vor.u32 %v13757_v27, %v9818_v24  ;;  %6574 = vmatpush.bf16.msrb.mxu3 %v10091_v26 }
  0x74   :  { %v10074_v30 = vld [vmem:[#allocation5 + $0x760] sm:$0xf]  ;;  %v13821_v31 = vld [vmem:[#allocation5 + $0x76c] sm:$0xf0]  ;;  %v9947_v34 = vor.u32 %v13789_v29, %v9946_v28  ;;  %v267_v29 = vld [vmem:[#allocation2 + $0x28] sm:$0xff] }
  0x75   :  { %v9674_v35 = vld [vmem:[#allocation5 + $0x440] sm:$0xf]  ;;  %v13721_v36 = vld [vmem:[#allocation5 + $0x44c] sm:$0xf0]  ;;  %v10075_v38 = vor.u32 %v13821_v31, %v10074_v30  ;;  %6536 = vmatpush.bf16.msrb.mxu0 %v9691_v32  ;;  %6549 = vmatpush.bf16.msrb.mxu1 %v9819_v33 }
  0x76   :  { %v9802_v37 = vld [vmem:[#allocation5 + $0x540] sm:$0xf]  ;;  %v13753_v39 = vld [vmem:[#allocation5 + $0x54c] sm:$0xf0]  ;;  %v9675_v44 = vor.u32 %v13721_v36, %v9674_v35  ;;  %6562 = vmatpush.bf16.msrb.mxu2 %v9947_v34 }
  0x77   :  { %v9930_v40 = vld [vmem:[#allocation5 + $0x640] sm:$0xf]  ;;  %v13785_v41 = vld [vmem:[#allocation5 + $0x64c] sm:$0xf0]  ;;  %v9803_v45 = vor.u32 %v13753_v39, %v9802_v37  ;;  %6575 = vmatpush.bf16.msrb.mxu3 %v10075_v38  ;;  %v15325_v38 = vpack.c.bf16 %v269_v23, %v269_v23 }
  0x78   :  { %v10058_v42 = vld [vmem:[#allocation5 + $0x740] sm:$0xf]  ;;  %v13817_v43 = vld [vmem:[#allocation5 + $0x74c] sm:$0xf0]  ;;  %v9931_v46 = vor.u32 %v13785_v41, %v9930_v40  ;;  %v15327_v40 = vpack.c.bf16 %v267_v29, %v267_v29 }
  0x79   :  { %v9658_v47 = vld [vmem:[#allocation5 + $0x420] sm:$0xf]  ;;  %v13717_v48 = vld [vmem:[#allocation5 + $0x42c] sm:$0xf0]  ;;  %v10059_v50 = vor.u32 %v13817_v43, %v10058_v42  ;;  %6537 = vmatpush.bf16.msrb.mxu0 %v9675_v44  ;;  %6550 = vmatpush.bf16.msrb.mxu1 %v9803_v45 }
  0x7a   :  { %v9786_v49 = vld [vmem:[#allocation5 + $0x520] sm:$0xf]  ;;  %v13749_v51 = vld [vmem:[#allocation5 + $0x52c] sm:$0xf0]  ;;  %v9659_v56 = vor.u32 %v13717_v48, %v9658_v47  ;;  %6563 = vmatpush.bf16.msrb.mxu2 %v9931_v46 }
  0x7b   :  { %v9914_v52 = vld [vmem:[#allocation5 + $0x620] sm:$0xf]  ;;  %v13781_v53 = vld [vmem:[#allocation5 + $0x62c] sm:$0xf0]  ;;  %v9787_v59 = vor.u32 %v13749_v51, %v9786_v49  ;;  %6576 = vmatpush.bf16.msrb.mxu3 %v10059_v50 }
  0x7c   :  { %v10042_v54 = vld [vmem:[#allocation5 + $0x720] sm:$0xf]  ;;  %v13813_v55 = vld [vmem:[#allocation5 + $0x72c] sm:$0xf0]  ;;  %v9915_v60 = vor.u32 %v13781_v53, %v9914_v52 }
  0x7d   :  { %v9642_v57 = vld [vmem:[#allocation5 + $0x400] sm:$0xf]  ;;  %v13713_v58 = vld [vmem:[#allocation5 + $0x40c] sm:$0xf0]  ;;  %v10043_v0 = vor.u32 %v13813_v55, %v10042_v54  ;;  %6538 = vmatpush.bf16.msrb.mxu0 %v9659_v56  ;;  %6551 = vmatpush.bf16.msrb.mxu1 %v9787_v59 }
  0x7e   :  { %v9770_v61 = vld [vmem:[#allocation5 + $0x500] sm:$0xf]  ;;  %v13745_v62 = vld [vmem:[#allocation5 + $0x50c] sm:$0xf0]  ;;  %v9643_v7 = vor.u32 %v13713_v58, %v9642_v57  ;;  %6564 = vmatpush.bf16.msrb.mxu2 %v9915_v60 }
  0x7f   :  { %v9898_v63 = vld [vmem:[#allocation5 + $0x600] sm:$0xf]  ;;  %v13777_v1 = vld [vmem:[#allocation5 + $0x60c] sm:$0xf0]  ;;  %v9771_v13 = vor.u32 %v13745_v62, %v9770_v61  ;;  %6577 = vmatpush.bf16.msrb.mxu3 %v10043_v0 }
  0x80   :  { %v10026_v2 = vld [vmem:[#allocation5 + $0x700] sm:$0xf]  ;;  %v13809_v3 = vld [vmem:[#allocation5 + $0x70c] sm:$0xf0]  ;;  %v9899_v14 = vor.u32 %v13777_v1, %v9898_v63 }
  0x81   :  { %v10266_v4 = vld [vmem:[#allocation5 + $0x8e0] sm:$0xf]  ;;  %v13869_v5 = vld [vmem:[#allocation5 + $0x8ec] sm:$0xf0]  ;;  %v10027_v19 = vor.u32 %v13809_v3, %v10026_v2  ;;  %6539 = vmatpush.bf16.msrb.mxu0 %v9643_v7  ;;  %6552 = vmatpush.bf16.msrb.mxu1 %v9771_v13 }
  0x82   :  { %v10394_v6 = vld [vmem:[#allocation5 + $0x9e0] sm:$0xf]  ;;  %v13901_v10 = vld [vmem:[#allocation5 + $0x9ec] sm:$0xf0]  ;;  %v10267_v20 = vor.u32 %v13869_v5, %v10266_v4  ;;  %6565 = vmatpush.bf16.msrb.mxu2 %v9899_v14 }
  0x83   :  { %v10522_v11 = vld [vmem:[#allocation5 + $0xae0] sm:$0xf]  ;;  %v13933_v12 = vld [vmem:[#allocation5 + $0xaec] sm:$0xf0]  ;;  %v10395_v24 = vor.u32 %v13901_v10, %v10394_v6  ;;  %6578 = vmatpush.bf16.msrb.mxu3 %v10027_v19 }
  0x84   :  { %v10650_v16 = vld [vmem:[#allocation5 + $0xbe0] sm:$0xf]  ;;  %v13965_v17 = vld [vmem:[#allocation5 + $0xbec] sm:$0xf0]  ;;  %v10523_v26 = vor.u32 %v13933_v12, %v10522_v11  ;;  %6553 = vmatmul.bf16.vlgmr.msrb.gmra.mxu1 %v15327_v40 }
  0x85   :  { %v268_v18 = vld [vmem:[#allocation2 + $0x30] sm:$0xff]  ;;  %v10250_v21 = vld [vmem:[#allocation5 + $0x8c0] sm:$0xf]  ;;  %v10651_v30 = vor.u32 %v13965_v17, %v10650_v16  ;;  %6584 = vmatpush.bf16.msra.mxu0 %v10267_v20  ;;  %6597 = vmatpush.bf16.msra.mxu1 %v10395_v24 }
  0x86   :  { %v266_v22 = vld [vmem:[#allocation2 + $0x20] sm:$0xff]  ;;  %v13865_v27 = vld [vmem:[#allocation5 + $0x8cc] sm:$0xf0]  ;;  %v15321_v34 = vpack.c.bf16 %v268_v18, %v268_v18  ;;  %6610 = vmatpush.bf16.msra.mxu2 %v10523_v26  ;;  %6579 = vmatmul.bf16.vlgmr.msrb.gmra.mxu3 %v15325_v38 }
  0x87   :  { %v10378_v28 = vld [vmem:[#allocation5 + $0x9c0] sm:$0xf]  ;;  %v13897_v31 = vld [vmem:[#allocation5 + $0x9cc] sm:$0xf0]  ;;  %v15323_v37 = vpack.c.bf16 %v266_v22, %v266_v22  ;;  %v10251_v39 = vor.u32 %v13865_v27, %v10250_v21  ;;  %6623 = vmatpush.bf16.msra.mxu3 %v10651_v30 }
  0x88   :  { %v10506_v32 = vld [vmem:[#allocation5 + $0xac0] sm:$0xf]  ;;  %v13929_v33 = vld [vmem:[#allocation5 + $0xacc] sm:$0xf0]  ;;  %v10379_v41 = vor.u32 %v13897_v31, %v10378_v28  ;;  %6566 = vmatmul.bf16.vlgmr.msrb.gmra.mxu2 %v15321_v34 }
  0x89   :  { %v10634_v35 = vld [vmem:[#allocation5 + $0xbc0] sm:$0xf]  ;;  %v13961_v36 = vld [vmem:[#allocation5 + $0xbcc] sm:$0xf0]  ;;  %v10507_v42 = vor.u32 %v13929_v33, %v10506_v32  ;;  %6540 = vmatmul.bf16.vlgmr.msrb.gmra.mxu0 %v15323_v37 }
  0x8a   :  { %v10234_v43 = vld [vmem:[#allocation5 + $0x8a0] sm:$0xf]  ;;  %v13861_v44 = vld [vmem:[#allocation5 + $0x8ac] sm:$0xf0]  ;;  %v10635_v46 = vor.u32 %v13961_v36, %v10634_v35  ;;  %6585 = vmatpush.bf16.msra.mxu0 %v10251_v39  ;;  %6598 = vmatpush.bf16.msra.mxu1 %v10379_v41 }
  0x8b   :  { %v10362_v45 = vld [vmem:[#allocation5 + $0x9a0] sm:$0xf]  ;;  %v13893_v47 = vld [vmem:[#allocation5 + $0x9ac] sm:$0xf0]  ;;  %v10235_v52 = vor.u32 %v13861_v44, %v10234_v43  ;;  %6611 = vmatpush.bf16.msra.mxu2 %v10507_v42 }
  0x8c   :  { %v10490_v48 = vld [vmem:[#allocation5 + $0xaa0] sm:$0xf]  ;;  %v13925_v49 = vld [vmem:[#allocation5 + $0xaac] sm:$0xf0]  ;;  %v10363_v53 = vor.u32 %v13893_v47, %v10362_v45  ;;  %6624 = vmatpush.bf16.msra.mxu3 %v10635_v46 }
  0x8d   :  { %v10618_v50 = vld [vmem:[#allocation5 + $0xba0] sm:$0xf]  ;;  %v13957_v51 = vld [vmem:[#allocation5 + $0xbac] sm:$0xf0]  ;;  %v10491_v54 = vor.u32 %v13925_v49, %v10490_v48 }
  0x8e   :  { %v10218_v55 = vld [vmem:[#allocation5 + $0x880] sm:$0xf]  ;;  %v13857_v56 = vld [vmem:[#allocation5 + $0x88c] sm:$0xf0]  ;;  %v10619_v58 = vor.u32 %v13957_v51, %v10618_v50  ;;  %6586 = vmatpush.bf16.msra.mxu0 %v10235_v52  ;;  %6599 = vmatpush.bf16.msra.mxu1 %v10363_v53 }
  0x8f   :  { %v10346_v57 = vld [vmem:[#allocation5 + $0x980] sm:$0xf]  ;;  %v13889_v59 = vld [vmem:[#allocation5 + $0x98c] sm:$0xf0]  ;;  %v10219_v0 = vor.u32 %v13857_v56, %v10218_v55  ;;  %6612 = vmatpush.bf16.msra.mxu2 %v10491_v54 }
  0x90   :  { %v10474_v60 = vld [vmem:[#allocation5 + $0xa80] sm:$0xf]  ;;  %v13921_v61 = vld [vmem:[#allocation5 + $0xa8c] sm:$0xf0]  ;;  %v10347_v1 = vor.u32 %v13889_v59, %v10346_v57  ;;  %6625 = vmatpush.bf16.msra.mxu3 %v10619_v58 }
  0x91   :  { %v10602_v62 = vld [vmem:[#allocation5 + $0xb80] sm:$0xf]  ;;  %v13953_v63 = vld [vmem:[#allocation5 + $0xb8c] sm:$0xf0]  ;;  %v10475_v2 = vor.u32 %v13921_v61, %v10474_v60 }
  0x92   :  { %v10202_v3 = vld [vmem:[#allocation5 + $0x860] sm:$0xf]  ;;  %v13853_v4 = vld [vmem:[#allocation5 + $0x86c] sm:$0xf0]  ;;  %v10603_v6 = vor.u32 %v13953_v63, %v10602_v62  ;;  %6587 = vmatpush.bf16.msra.mxu0 %v10219_v0  ;;  %6600 = vmatpush.bf16.msra.mxu1 %v10347_v1 }
  0x93   :  { %v10330_v5 = vld [vmem:[#allocation5 + $0x960] sm:$0xf]  ;;  %v13885_v7 = vld [vmem:[#allocation5 + $0x96c] sm:$0xf0]  ;;  %v10203_v14 = vor.u32 %v13853_v4, %v10202_v3  ;;  %6613 = vmatpush.bf16.msra.mxu2 %v10475_v2 }
  0x94   :  { %v10458_v10 = vld [vmem:[#allocation5 + $0xa60] sm:$0xf]  ;;  %v13917_v11 = vld [vmem:[#allocation5 + $0xa6c] sm:$0xf0]  ;;  %v10331_v16 = vor.u32 %v13885_v7, %v10330_v5  ;;  %6626 = vmatpush.bf16.msra.mxu3 %v10603_v6  ;;  %v271_v7 = vld [vmem:[#allocation2 + $0x48] sm:$0xff] }
  0x95   :  { %v10586_v12 = vld [vmem:[#allocation5 + $0xb60] sm:$0xf]  ;;  %v13949_v13 = vld [vmem:[#allocation5 + $0xb6c] sm:$0xf0]  ;;  %v10459_v17 = vor.u32 %v13917_v11, %v10458_v10  ;;  %v273_v10 = vld [vmem:[#allocation2 + $0x58] sm:$0xff] }
  0x96   :  { %v10186_v18 = vld [vmem:[#allocation5 + $0x840] sm:$0xf]  ;;  %v13849_v19 = vld [vmem:[#allocation5 + $0x84c] sm:$0xf0]  ;;  %v10587_v21 = vor.u32 %v13949_v13, %v10586_v12  ;;  %6588 = vmatpush.bf16.msra.mxu0 %v10203_v14  ;;  %6601 = vmatpush.bf16.msra.mxu1 %v10331_v16 }
  0x97   :  { %v10314_v20 = vld [vmem:[#allocation5 + $0x940] sm:$0xf]  ;;  %v13881_v22 = vld [vmem:[#allocation5 + $0x94c] sm:$0xf0]  ;;  %v10187_v28 = vor.u32 %v13849_v19, %v10186_v18  ;;  %6614 = vmatpush.bf16.msra.mxu2 %v10459_v17 }
  0x98   :  { %v10442_v23 = vld [vmem:[#allocation5 + $0xa40] sm:$0xf]  ;;  %v13913_v24 = vld [vmem:[#allocation5 + $0xa4c] sm:$0xf0]  ;;  %v10315_v29 = vor.u32 %v13881_v22, %v10314_v20  ;;  %6627 = vmatpush.bf16.msra.mxu3 %v10587_v21 }
  0x99   :  { %v10570_v26 = vld [vmem:[#allocation5 + $0xb40] sm:$0xf]  ;;  %v13945_v27 = vld [vmem:[#allocation5 + $0xb4c] sm:$0xf0]  ;;  %v10443_v30 = vor.u32 %v13913_v24, %v10442_v23  ;;  %v15337_v23 = vpack.c.bf16 %v271_v7, %v271_v7 }
  0x9a   :  { %v10170_v31 = vld [vmem:[#allocation5 + $0x820] sm:$0xf]  ;;  %v13845_v32 = vld [vmem:[#allocation5 + $0x82c] sm:$0xf0]  ;;  %v10571_v35 = vor.u32 %v13945_v27, %v10570_v26  ;;  %6589 = vmatpush.bf16.msra.mxu0 %v10187_v28  ;;  %6602 = vmatpush.bf16.msra.mxu1 %v10315_v29  ;;  %v15339_v27 = vpack.c.bf16 %v273_v10, %v273_v10 }
  0x9b   :  { %v10298_v33 = vld [vmem:[#allocation5 + $0x920] sm:$0xf]  ;;  %v13877_v36 = vld [vmem:[#allocation5 + $0x92c] sm:$0xf0]  ;;  %v10171_v45 = vor.u32 %v13845_v32, %v10170_v31  ;;  %6615 = vmatpush.bf16.msra.mxu2 %v10443_v30 }
  0x9c   :  { %v10426_v39 = vld [vmem:[#allocation5 + $0xa20] sm:$0xf]  ;;  %v13909_v41 = vld [vmem:[#allocation5 + $0xa2c] sm:$0xf0]  ;;  %v10299_v49 = vor.u32 %v13877_v36, %v10298_v33  ;;  %6628 = vmatpush.bf16.msra.mxu3 %v10571_v35 }
  0x9d   :  { %v10554_v42 = vld [vmem:[#allocation5 + $0xb20] sm:$0xf]  ;;  %v13941_v43 = vld [vmem:[#allocation5 + $0xb2c] sm:$0xf0]  ;;  %v10427_v50 = vor.u32 %v13909_v41, %v10426_v39 }
  0x9e   :  { %v10154_v44 = vld [vmem:[#allocation5 + $0x800] sm:$0xf]  ;;  %v13841_v46 = vld [vmem:[#allocation5 + $0x80c] sm:$0xf0]  ;;  %v10555_v54 = vor.u32 %v13941_v43, %v10554_v42  ;;  %6590 = vmatpush.bf16.msra.mxu0 %v10171_v45  ;;  %6603 = vmatpush.bf16.msra.mxu1 %v10299_v49 }
  0x9f   :  { %v10282_v47 = vld [vmem:[#allocation5 + $0x900] sm:$0xf]  ;;  %v13873_v48 = vld [vmem:[#allocation5 + $0x90c] sm:$0xf0]  ;;  %v10155_v60 = vor.u32 %v13841_v46, %v10154_v44  ;;  %6616 = vmatpush.bf16.msra.mxu2 %v10427_v50 }
  0xa0   :  { %v10410_v51 = vld [vmem:[#allocation5 + $0xa00] sm:$0xf]  ;;  %v13905_v52 = vld [vmem:[#allocation5 + $0xa0c] sm:$0xf0]  ;;  %v10283_v63 = vor.u32 %v13873_v48, %v10282_v47  ;;  %6629 = vmatpush.bf16.msra.mxu3 %v10555_v54 }
  0xa1   :  { %v10538_v53 = vld [vmem:[#allocation5 + $0xb00] sm:$0xf]  ;;  %v13937_v55 = vld [vmem:[#allocation5 + $0xb0c] sm:$0xf0]  ;;  %v10411_v0 = vor.u32 %v13905_v52, %v10410_v51 }
  0xa2   :  { %v10778_v56 = vld [vmem:[#allocation5 + $0xce0] sm:$0xf]  ;;  %v13997_v57 = vld [vmem:[#allocation5 + $0xcec] sm:$0xf0]  ;;  %v10539_v4 = vor.u32 %v13937_v55, %v10538_v53  ;;  %6591 = vmatpush.bf16.msra.mxu0 %v10155_v60  ;;  %6604 = vmatpush.bf16.msra.mxu1 %v10283_v63 }
  0xa3   :  { %v10906_v58 = vld [vmem:[#allocation5 + $0xde0] sm:$0xf]  ;;  %v14029_v59 = vld [vmem:[#allocation5 + $0xdec] sm:$0xf0]  ;;  %v10779_v5 = vor.u32 %v13997_v57, %v10778_v56  ;;  %6617 = vmatpush.bf16.msra.mxu2 %v10411_v0 }
  0xa4   :  { %v11034_v61 = vld [vmem:[#allocation5 + $0xee0] sm:$0xf]  ;;  %v14061_v62 = vld [vmem:[#allocation5 + $0xeec] sm:$0xf0]  ;;  %v10907_v11 = vor.u32 %v14029_v59, %v10906_v58  ;;  %6630 = vmatpush.bf16.msra.mxu3 %v10539_v4 }
  0xa5   :  { %v11162_v1 = vld [vmem:[#allocation5 + $0xfe0] sm:$0xf]  ;;  %v14093_v2 = vld [vmem:[#allocation5 + $0xfec] sm:$0xf0]  ;;  %v11035_v12 = vor.u32 %v14061_v62, %v11034_v61  ;;  %6605 = vmatmul.bf16.vlgmr.msra.gmra.mxu1 %v15337_v23 }
  0xa6   :  { %v270_v3 = vld [vmem:[#allocation2 + $0x40] sm:$0xff]  ;;  %v272_v6 = vld [vmem:[#allocation2 + $0x50] sm:$0xff]  ;;  %v11163_v17 = vor.u32 %v14093_v2, %v11162_v1  ;;  %6636 = vmatpush.bf16.msrb.mxu0 %v10779_v5  ;;  %6649 = vmatpush.bf16.msrb.mxu1 %v10907_v11 }
  0xa7   :  { %v10762_v13 = vld [vmem:[#allocation5 + $0xcc0] sm:$0xf]  ;;  %v13993_v14 = vld [vmem:[#allocation5 + $0xccc] sm:$0xf0]  ;;  %v15333_v18 = vpack.c.bf16 %v270_v3, %v270_v3  ;;  %v15335_v22 = vpack.c.bf16 %v272_v6, %v272_v6  ;;  %6662 = vmatpush.bf16.msrb.mxu2 %v11035_v12  ;;  %6631 = vmatmul.bf16.vlgmr.msra.gmra.mxu3 %v15339_v27 }
  0xa8   :  { %v10890_v16 = vld [vmem:[#allocation5 + $0xdc0] sm:$0xf]  ;;  %v14025_v19 = vld [vmem:[#allocation5 + $0xdcc] sm:$0xf0]  ;;  %v10763_v28 = vor.u32 %v13993_v14, %v10762_v13  ;;  %6675 = vmatpush.bf16.msrb.mxu3 %v11163_v17 }
  0xa9   :  { %v11018_v20 = vld [vmem:[#allocation5 + $0xec0] sm:$0xf]  ;;  %v14057_v21 = vld [vmem:[#allocation5 + $0xecc] sm:$0xf0]  ;;  %v10891_v29 = vor.u32 %v14025_v19, %v10890_v16  ;;  %6592 = vmatmul.bf16.vlgmr.msra.gmra.mxu0 %v15333_v18  ;;  %6618 = vmatmul.bf16.vlgmr.msra.gmra.mxu2 %v15335_v22 }
  0xaa   :  { %v11146_v24 = vld [vmem:[#allocation5 + $0xfc0] sm:$0xf]  ;;  %v14089_v26 = vld [vmem:[#allocation5 + $0xfcc] sm:$0xf0]  ;;  %v11019_v30 = vor.u32 %v14057_v21, %v11018_v20  ;;  %6637 = vmatpush.bf16.msrb.mxu0 %v10763_v28 }
  0xab   :  { %v10746_v31 = vld [vmem:[#allocation5 + $0xca0] sm:$0xf]  ;;  %v13989_v32 = vld [vmem:[#allocation5 + $0xcac] sm:$0xf0]  ;;  %v11147_v35 = vor.u32 %v14089_v26, %v11146_v24  ;;  %6650 = vmatpush.bf16.msrb.mxu1 %v10891_v29 }
  0xac   :  { %v10874_v33 = vld [vmem:[#allocation5 + $0xda0] sm:$0xf]  ;;  %v14021_v36 = vld [vmem:[#allocation5 + $0xdac] sm:$0xf0]  ;;  %v10747_v44 = vor.u32 %v13989_v32, %v10746_v31  ;;  %6663 = vmatpush.bf16.msrb.mxu2 %v11019_v30 }
  0xad   :  { %v11002_v39 = vld [vmem:[#allocation5 + $0xea0] sm:$0xf]  ;;  %v14053_v41 = vld [vmem:[#allocation5 + $0xeac] sm:$0xf0]  ;;  %v10875_v45 = vor.u32 %v14021_v36, %v10874_v33  ;;  %6676 = vmatpush.bf16.msrb.mxu3 %v11147_v35 }
  0xae   :  { %v11130_v42 = vld [vmem:[#allocation5 + $0xfa0] sm:$0xf]  ;;  %v14085_v43 = vld [vmem:[#allocation5 + $0xfac] sm:$0xf0]  ;;  %v11003_v46 = vor.u32 %v14053_v41, %v11002_v39  ;;  %6638 = vmatpush.bf16.msrb.mxu0 %v10747_v44 }
  0xaf   :  { %v10730_v47 = vld [vmem:[#allocation5 + $0xc80] sm:$0xf]  ;;  %v13985_v48 = vld [vmem:[#allocation5 + $0xc8c] sm:$0xf0]  ;;  %v11131_v50 = vor.u32 %v14085_v43, %v11130_v42  ;;  %6651 = vmatpush.bf16.msrb.mxu1 %v10875_v45 }
  0xb0   :  { %v10858_v49 = vld [vmem:[#allocation5 + $0xd80] sm:$0xf]  ;;  %v14017_v51 = vld [vmem:[#allocation5 + $0xd8c] sm:$0xf0]  ;;  %v10731_v56 = vor.u32 %v13985_v48, %v10730_v47  ;;  %6664 = vmatpush.bf16.msrb.mxu2 %v11003_v46 }
  0xb1   :  { %v10986_v52 = vld [vmem:[#allocation5 + $0xe80] sm:$0xf]  ;;  %v14049_v53 = vld [vmem:[#allocation5 + $0xe8c] sm:$0xf0]  ;;  %v10859_v57 = vor.u32 %v14017_v51, %v10858_v49  ;;  %6677 = vmatpush.bf16.msrb.mxu3 %v11131_v50 }
  0xb2   :  { %v11114_v54 = vld [vmem:[#allocation5 + $0xf80] sm:$0xf]  ;;  %v14081_v55 = vld [vmem:[#allocation5 + $0xf8c] sm:$0xf0]  ;;  %v10987_v58 = vor.u32 %v14049_v53, %v10986_v52  ;;  %6639 = vmatpush.bf16.msrb.mxu0 %v10731_v56 }
  0xb3   :  { %v10714_v59 = vld [vmem:[#allocation5 + $0xc60] sm:$0xf]  ;;  %v13981_v60 = vld [vmem:[#allocation5 + $0xc6c] sm:$0xf0]  ;;  %v11115_v62 = vor.u32 %v14081_v55, %v11114_v54  ;;  %6652 = vmatpush.bf16.msrb.mxu1 %v10859_v57 }
  0xb4   :  { %v10842_v61 = vld [vmem:[#allocation5 + $0xd60] sm:$0xf]  ;;  %v14013_v63 = vld [vmem:[#allocation5 + $0xd6c] sm:$0xf0]  ;;  %v10715_v4 = vor.u32 %v13981_v60, %v10714_v59  ;;  %6665 = vmatpush.bf16.msrb.mxu2 %v10987_v58 }
  0xb5   :  { %v10970_v0 = vld [vmem:[#allocation5 + $0xe60] sm:$0xf]  ;;  %v14045_v1 = vld [vmem:[#allocation5 + $0xe6c] sm:$0xf0]  ;;  %v10843_v5 = vor.u32 %v14013_v63, %v10842_v61  ;;  %6678 = vmatpush.bf16.msrb.mxu3 %v11115_v62 }
  0xb6   :  { %v11098_v2 = vld [vmem:[#allocation5 + $0xf60] sm:$0xf]  ;;  %v14077_v3 = vld [vmem:[#allocation5 + $0xf6c] sm:$0xf0]  ;;  %v10971_v6 = vor.u32 %v14045_v1, %v10970_v0  ;;  %6640 = vmatpush.bf16.msrb.mxu0 %v10715_v4  ;;  %v277_v4 = vld [vmem:[#allocation2 + $0x78] sm:$0xff] }
  0xb7   :  { %v10698_v7 = vld [vmem:[#allocation5 + $0xc40] sm:$0xf]  ;;  %v13977_v10 = vld [vmem:[#allocation5 + $0xc4c] sm:$0xf0]  ;;  %v11099_v12 = vor.u32 %v14077_v3, %v11098_v2  ;;  %6653 = vmatpush.bf16.msrb.mxu1 %v10843_v5  ;;  %v275_v3 = vld [vmem:[#allocation2 + $0x68] sm:$0xff] }
  0xb8   :  { %v10826_v11 = vld [vmem:[#allocation5 + $0xd40] sm:$0xf]  ;;  %v14009_v13 = vld [vmem:[#allocation5 + $0xd4c] sm:$0xf0]  ;;  %v10699_v20 = vor.u32 %v13977_v10, %v10698_v7  ;;  %6666 = vmatpush.bf16.msrb.mxu2 %v10971_v6 }
  0xb9   :  { %v10954_v14 = vld [vmem:[#allocation5 + $0xe40] sm:$0xf]  ;;  %v14041_v16 = vld [vmem:[#allocation5 + $0xe4c] sm:$0xf0]  ;;  %v10827_v21 = vor.u32 %v14009_v13, %v10826_v11  ;;  %6679 = vmatpush.bf16.msrb.mxu3 %v11099_v12 }
  0xba   :  { %v11082_v17 = vld [vmem:[#allocation5 + $0xf40] sm:$0xf]  ;;  %v14073_v19 = vld [vmem:[#allocation5 + $0xf4c] sm:$0xf0]  ;;  %v10955_v24 = vor.u32 %v14041_v16, %v10954_v14  ;;  %6641 = vmatpush.bf16.msrb.mxu0 %v10699_v20  ;;  %v15349_v20 = vpack.c.bf16 %v275_v3, %v275_v3 }
  0xbb   :  { %v10682_v26 = vld [vmem:[#allocation5 + $0xc20] sm:$0xf]  ;;  %v13973_v28 = vld [vmem:[#allocation5 + $0xc2c] sm:$0xf0]  ;;  %v11083_v30 = vor.u32 %v14073_v19, %v11082_v17  ;;  %6654 = vmatpush.bf16.msrb.mxu1 %v10827_v21 }
  0xbc   :  { %v10810_v29 = vld [vmem:[#allocation5 + $0xd20] sm:$0xf]  ;;  %v14005_v31 = vld [vmem:[#allocation5 + $0xd2c] sm:$0xf0]  ;;  %v10683_v39 = vor.u32 %v13973_v28, %v10682_v26  ;;  %6667 = vmatpush.bf16.msrb.mxu2 %v10955_v24  ;;  %v15351_v26 = vpack.c.bf16 %v277_v4, %v277_v4 }
  0xbd   :  { %v10938_v32 = vld [vmem:[#allocation5 + $0xe20] sm:$0xf]  ;;  %v14037_v33 = vld [vmem:[#allocation5 + $0xe2c] sm:$0xf0]  ;;  %v10811_v43 = vor.u32 %v14005_v31, %v10810_v29  ;;  %6680 = vmatpush.bf16.msrb.mxu3 %v11083_v30 }
  0xbe   :  { %v11066_v35 = vld [vmem:[#allocation5 + $0xf20] sm:$0xf]  ;;  %v14069_v36 = vld [vmem:[#allocation5 + $0xf2c] sm:$0xf0]  ;;  %v10939_v44 = vor.u32 %v14037_v33, %v10938_v32  ;;  %6642 = vmatpush.bf16.msrb.mxu0 %v10683_v39 }
  0xbf   :  { %v10666_v41 = vld [vmem:[#allocation5 + $0xc00] sm:$0xf]  ;;  %v13969_v42 = vld [vmem:[#allocation5 + $0xc0c] sm:$0xf0]  ;;  %v11067_v48 = vor.u32 %v14069_v36, %v11066_v35  ;;  %6655 = vmatpush.bf16.msrb.mxu1 %v10811_v43 }
  0xc0   :  { %v10794_v45 = vld [vmem:[#allocation5 + $0xd00] sm:$0xf]  ;;  %v14001_v46 = vld [vmem:[#allocation5 + $0xd0c] sm:$0xf0]  ;;  %v10667_v55 = vor.u32 %v13969_v42, %v10666_v41  ;;  %6668 = vmatpush.bf16.msrb.mxu2 %v10939_v44 }
  0xc1   :  { %v10922_v47 = vld [vmem:[#allocation5 + $0xe00] sm:$0xf]  ;;  %v14033_v49 = vld [vmem:[#allocation5 + $0xe0c] sm:$0xf0]  ;;  %v10795_v59 = vor.u32 %v14001_v46, %v10794_v45  ;;  %6681 = vmatpush.bf16.msrb.mxu3 %v11067_v48 }
  0xc2   :  { %v11050_v50 = vld [vmem:[#allocation5 + $0xf00] sm:$0xf]  ;;  %v14065_v51 = vld [vmem:[#allocation5 + $0xf0c] sm:$0xf0]  ;;  %v10923_v60 = vor.u32 %v14033_v49, %v10922_v47  ;;  %6643 = vmatpush.bf16.msrb.mxu0 %v10667_v55 }
  0xc3   :  { %v11290_v52 = vld [vmem:[#allocation5 + $0x10e0] sm:$0xf]  ;;  %v14125_v53 = vld [vmem:[#allocation5 + $0x10ec] sm:$0xf0]  ;;  %v11051_v0 = vor.u32 %v14065_v51, %v11050_v50  ;;  %6656 = vmatpush.bf16.msrb.mxu1 %v10795_v59 }
  0xc4   :  { %v11418_v54 = vld [vmem:[#allocation5 + $0x11e0] sm:$0xf]  ;;  %v14157_v56 = vld [vmem:[#allocation5 + $0x11ec] sm:$0xf0]  ;;  %v11291_v1 = vor.u32 %v14125_v53, %v11290_v52  ;;  %6669 = vmatpush.bf16.msrb.mxu2 %v10923_v60 }
  0xc5   :  { %v11546_v57 = vld [vmem:[#allocation5 + $0x12e0] sm:$0xf]  ;;  %v14189_v58 = vld [vmem:[#allocation5 + $0x12ec] sm:$0xf0]  ;;  %v11419_v5 = vor.u32 %v14157_v56, %v11418_v54  ;;  %6682 = vmatpush.bf16.msrb.mxu3 %v11051_v0 }
  0xc6   :  { %v11674_v61 = vld [vmem:[#allocation5 + $0x13e0] sm:$0xf]  ;;  %v14221_v62 = vld [vmem:[#allocation5 + $0x13ec] sm:$0xf0]  ;;  %v11547_v6 = vor.u32 %v14189_v58, %v11546_v57  ;;  %6688 = vmatpush.bf16.msra.mxu0 %v11291_v1  ;;  %6657 = vmatmul.bf16.vlgmr.msrb.gmra.mxu1 %v15349_v20 }
  0xc7   :  { %v274_v63 = vld [vmem:[#allocation2 + $0x60] sm:$0xff]  ;;  %v276_v2 = vld [vmem:[#allocation2 + $0x70] sm:$0xff]  ;;  %v11675_v12 = vor.u32 %v14221_v62, %v11674_v61  ;;  %6701 = vmatpush.bf16.msra.mxu1 %v11419_v5 }
  0xc8   :  { %v11274_v7 = vld [vmem:[#allocation5 + $0x10c0] sm:$0xf]  ;;  %v14121_v10 = vld [vmem:[#allocation5 + $0x10cc] sm:$0xf0]  ;;  %v15345_v13 = vpack.c.bf16 %v274_v63, %v274_v63  ;;  %v15347_v19 = vpack.c.bf16 %v276_v2, %v276_v2  ;;  %6714 = vmatpush.bf16.msra.mxu2 %v11547_v6  ;;  %6683 = vmatmul.bf16.vlgmr.msrb.gmra.mxu3 %v15351_v26 }
  0xc9   :  { %v11402_v11 = vld [vmem:[#allocation5 + $0x11c0] sm:$0xf]  ;;  %v14153_v14 = vld [vmem:[#allocation5 + $0x11cc] sm:$0xf0]  ;;  %v11275_v28 = vor.u32 %v14121_v10, %v11274_v7  ;;  %6727 = vmatpush.bf16.msra.mxu3 %v11675_v12 }
  0xca   :  { %v11530_v16 = vld [vmem:[#allocation5 + $0x12c0] sm:$0xf]  ;;  %v14185_v17 = vld [vmem:[#allocation5 + $0x12cc] sm:$0xf0]  ;;  %v11403_v29 = vor.u32 %v14153_v14, %v11402_v11  ;;  %6644 = vmatmul.bf16.vlgmr.msrb.gmra.mxu0 %v15345_v13  ;;  %6670 = vmatmul.bf16.vlgmr.msrb.gmra.mxu2 %v15347_v19 }
  0xcb   :  { %v11658_v21 = vld [vmem:[#allocation5 + $0x13c0] sm:$0xf]  ;;  %v14217_v24 = vld [vmem:[#allocation5 + $0x13cc] sm:$0xf0]  ;;  %v11531_v30 = vor.u32 %v14185_v17, %v11530_v16  ;;  %6689 = vmatpush.bf16.msra.mxu0 %v11275_v28 }
  0xcc   :  { %v11258_v31 = vld [vmem:[#allocation5 + $0x10a0] sm:$0xf]  ;;  %v14117_v32 = vld [vmem:[#allocation5 + $0x10ac] sm:$0xf0]  ;;  %v11659_v35 = vor.u32 %v14217_v24, %v11658_v21  ;;  %6702 = vmatpush.bf16.msra.mxu1 %v11403_v29 }
  0xcd   :  { %v11386_v33 = vld [vmem:[#allocation5 + $0x11a0] sm:$0xf]  ;;  %v14149_v36 = vld [vmem:[#allocation5 + $0x11ac] sm:$0xf0]  ;;  %v11259_v44 = vor.u32 %v14117_v32, %v11258_v31  ;;  %6715 = vmatpush.bf16.msra.mxu2 %v11531_v30 }
  0xce   :  { %v11514_v39 = vld [vmem:[#allocation5 + $0x12a0] sm:$0xf]  ;;  %v14181_v41 = vld [vmem:[#allocation5 + $0x12ac] sm:$0xf0]  ;;  %v11387_v45 = vor.u32 %v14149_v36, %v11386_v33  ;;  %6728 = vmatpush.bf16.msra.mxu3 %v11659_v35 }
  0xcf   :  { %v11642_v42 = vld [vmem:[#allocation5 + $0x13a0] sm:$0xf]  ;;  %v14213_v43 = vld [vmem:[#allocation5 + $0x13ac] sm:$0xf0]  ;;  %v11515_v46 = vor.u32 %v14181_v41, %v11514_v39  ;;  %6690 = vmatpush.bf16.msra.mxu0 %v11259_v44 }
  0xd0   :  { %v11242_v47 = vld [vmem:[#allocation5 + $0x1080] sm:$0xf]  ;;  %v14113_v48 = vld [vmem:[#allocation5 + $0x108c] sm:$0xf0]  ;;  %v11643_v50 = vor.u32 %v14213_v43, %v11642_v42  ;;  %6703 = vmatpush.bf16.msra.mxu1 %v11387_v45 }
  0xd1   :  { %v11370_v49 = vld [vmem:[#allocation5 + $0x1180] sm:$0xf]  ;;  %v14145_v51 = vld [vmem:[#allocation5 + $0x118c] sm:$0xf0]  ;;  %v11243_v56 = vor.u32 %v14113_v48, %v11242_v47  ;;  %6716 = vmatpush.bf16.msra.mxu2 %v11515_v46 }
  0xd2   :  { %v11498_v52 = vld [vmem:[#allocation5 + $0x1280] sm:$0xf]  ;;  %v14177_v53 = vld [vmem:[#allocation5 + $0x128c] sm:$0xf0]  ;;  %v11371_v57 = vor.u32 %v14145_v51, %v11370_v49  ;;  %6729 = vmatpush.bf16.msra.mxu3 %v11643_v50 }
  0xd3   :  { %v11626_v54 = vld [vmem:[#allocation5 + $0x1380] sm:$0xf]  ;;  %v14209_v55 = vld [vmem:[#allocation5 + $0x138c] sm:$0xf0]  ;;  %v11499_v58 = vor.u32 %v14177_v53, %v11498_v52  ;;  %6691 = vmatpush.bf16.msra.mxu0 %v11243_v56 }
  0xd4   :  { %v11226_v59 = vld [vmem:[#allocation5 + $0x1060] sm:$0xf]  ;;  %v14109_v60 = vld [vmem:[#allocation5 + $0x106c] sm:$0xf0]  ;;  %v11627_v62 = vor.u32 %v14209_v55, %v11626_v54  ;;  %6704 = vmatpush.bf16.msra.mxu1 %v11371_v57 }
  0xd5   :  { %v11354_v61 = vld [vmem:[#allocation5 + $0x1160] sm:$0xf]  ;;  %v14141_v63 = vld [vmem:[#allocation5 + $0x116c] sm:$0xf0]  ;;  %v11227_v4 = vor.u32 %v14109_v60, %v11226_v59  ;;  %6717 = vmatpush.bf16.msra.mxu2 %v11499_v58 }
  0xd6   :  { %v11482_v0 = vld [vmem:[#allocation5 + $0x1260] sm:$0xf]  ;;  %v14173_v1 = vld [vmem:[#allocation5 + $0x126c] sm:$0xf0]  ;;  %v11355_v5 = vor.u32 %v14141_v63, %v11354_v61  ;;  %6730 = vmatpush.bf16.msra.mxu3 %v11627_v62 }
  0xd7   :  { %v11610_v2 = vld [vmem:[#allocation5 + $0x1360] sm:$0xf]  ;;  %v14205_v3 = vld [vmem:[#allocation5 + $0x136c] sm:$0xf0]  ;;  %v11483_v6 = vor.u32 %v14173_v1, %v11482_v0  ;;  %6692 = vmatpush.bf16.msra.mxu0 %v11227_v4 }
  0xd8   :  { %v11210_v7 = vld [vmem:[#allocation5 + $0x1040] sm:$0xf]  ;;  %v14105_v10 = vld [vmem:[#allocation5 + $0x104c] sm:$0xf0]  ;;  %v11611_v12 = vor.u32 %v14205_v3, %v11610_v2  ;;  %6705 = vmatpush.bf16.msra.mxu1 %v11355_v5 }
  0xd9   :  { %v11338_v11 = vld [vmem:[#allocation5 + $0x1140] sm:$0xf]  ;;  %v14137_v14 = vld [vmem:[#allocation5 + $0x114c] sm:$0xf0]  ;;  %v11211_v28 = vor.u32 %v14105_v10, %v11210_v7  ;;  %6718 = vmatpush.bf16.msra.mxu2 %v11483_v6  ;;  %v279_v7 = vld [vmem:[#allocation2 + $0x88] sm:$0xff] }
  0xda   :  { %v11466_v16 = vld [vmem:[#allocation5 + $0x1240] sm:$0xf]  ;;  %v14169_v17 = vld [vmem:[#allocation5 + $0x124c] sm:$0xf0]  ;;  %v11339_v29 = vor.u32 %v14137_v14, %v11338_v11  ;;  %6731 = vmatpush.bf16.msra.mxu3 %v11611_v12  ;;  %v281_v10 = vld [vmem:[#allocation2 + $0x98] sm:$0xff] }
  0xdb   :  { %v11594_v21 = vld [vmem:[#allocation5 + $0x1340] sm:$0xf]  ;;  %v14201_v24 = vld [vmem:[#allocation5 + $0x134c] sm:$0xf0]  ;;  %v11467_v30 = vor.u32 %v14169_v17, %v11466_v16  ;;  %6693 = vmatpush.bf16.msra.mxu0 %v11211_v28 }
  0xdc   :  { %v11194_v31 = vld [vmem:[#allocation5 + $0x1020] sm:$0xf]  ;;  %v14101_v32 = vld [vmem:[#allocation5 + $0x102c] sm:$0xf0]  ;;  %v11595_v35 = vor.u32 %v14201_v24, %v11594_v21  ;;  %6706 = vmatpush.bf16.msra.mxu1 %v11339_v29 }
  0xdd   :  { %v11322_v33 = vld [vmem:[#allocation5 + $0x1120] sm:$0xf]  ;;  %v14133_v36 = vld [vmem:[#allocation5 + $0x112c] sm:$0xf0]  ;;  %v11195_v44 = vor.u32 %v14101_v32, %v11194_v31  ;;  %6719 = vmatpush.bf16.msra.mxu2 %v11467_v30  ;;  %v15361_v32 = vpack.c.bf16 %v279_v7, %v279_v7 }
  0xde   :  { %v11450_v39 = vld [vmem:[#allocation5 + $0x1220] sm:$0xf]  ;;  %v14165_v41 = vld [vmem:[#allocation5 + $0x122c] sm:$0xf0]  ;;  %v11323_v47 = vor.u32 %v14133_v36, %v11322_v33  ;;  %6732 = vmatpush.bf16.msra.mxu3 %v11595_v35  ;;  %v15363_v36 = vpack.c.bf16 %v281_v10, %v281_v10 }
  0xdf   :  { %v11578_v42 = vld [vmem:[#allocation5 + $0x1320] sm:$0xf]  ;;  %v14197_v43 = vld [vmem:[#allocation5 + $0x132c] sm:$0xf0]  ;;  %v11451_v48 = vor.u32 %v14165_v41, %v11450_v39  ;;  %6694 = vmatpush.bf16.msra.mxu0 %v11195_v44 }
  0xe0   :  { %v11178_v45 = vld [vmem:[#allocation5 + $0x1000] sm:$0xf]  ;;  %v14097_v46 = vld [vmem:[#allocation5 + $0x100c] sm:$0xf0]  ;;  %v11579_v52 = vor.u32 %v14197_v43, %v11578_v42  ;;  %6707 = vmatpush.bf16.msra.mxu1 %v11323_v47 }
  0xe1   :  { %v11306_v49 = vld [vmem:[#allocation5 + $0x1100] sm:$0xf]  ;;  %v14129_v50 = vld [vmem:[#allocation5 + $0x110c] sm:$0xf0]  ;;  %v11179_v59 = vor.u32 %v14097_v46, %v11178_v45  ;;  %6720 = vmatpush.bf16.msra.mxu2 %v11451_v48 }
  0xe2   :  { %v11434_v51 = vld [vmem:[#allocation5 + $0x1200] sm:$0xf]  ;;  %v14161_v53 = vld [vmem:[#allocation5 + $0x120c] sm:$0xf0]  ;;  %v11307_v63 = vor.u32 %v14129_v50, %v11306_v49  ;;  %6733 = vmatpush.bf16.msra.mxu3 %v11579_v52 }
  0xe3   :  { %v11562_v54 = vld [vmem:[#allocation5 + $0x1300] sm:$0xf]  ;;  %v14193_v55 = vld [vmem:[#allocation5 + $0x130c] sm:$0xf0]  ;;  %v11435_v0 = vor.u32 %v14161_v53, %v11434_v51  ;;  %6695 = vmatpush.bf16.msra.mxu0 %v11179_v59 }
  0xe4   :  { %v11802_v56 = vld [vmem:[#allocation5 + $0x14e0] sm:$0xf]  ;;  %v14253_v57 = vld [vmem:[#allocation5 + $0x14ec] sm:$0xf0]  ;;  %v11563_v4 = vor.u32 %v14193_v55, %v11562_v54  ;;  %6708 = vmatpush.bf16.msra.mxu1 %v11307_v63 }
  0xe5   :  { %v11930_v58 = vld [vmem:[#allocation5 + $0x15e0] sm:$0xf]  ;;  %v14285_v60 = vld [vmem:[#allocation5 + $0x15ec] sm:$0xf0]  ;;  %v11803_v5 = vor.u32 %v14253_v57, %v11802_v56  ;;  %6721 = vmatpush.bf16.msra.mxu2 %v11435_v0 }
  0xe6   :  { %v12058_v61 = vld [vmem:[#allocation5 + $0x16e0] sm:$0xf]  ;;  %v14317_v62 = vld [vmem:[#allocation5 + $0x16ec] sm:$0xf0]  ;;  %v11931_v11 = vor.u32 %v14285_v60, %v11930_v58  ;;  %6734 = vmatpush.bf16.msra.mxu3 %v11563_v4 }
  0xe7   :  { %v12186_v1 = vld [vmem:[#allocation5 + $0x17e0] sm:$0xf]  ;;  %v14349_v2 = vld [vmem:[#allocation5 + $0x17ec] sm:$0xf0]  ;;  %v12059_v12 = vor.u32 %v14317_v62, %v12058_v61  ;;  %6740 = vmatpush.bf16.msrb.mxu0 %v11803_v5  ;;  %6709 = vmatmul.bf16.vlgmr.msra.gmra.mxu1 %v15361_v32 }
  0xe8   :  { %v278_v3 = vld [vmem:[#allocation2 + $0x80] sm:$0xff]  ;;  %v280_v6 = vld [vmem:[#allocation2 + $0x90] sm:$0xff]  ;;  %v12187_v21 = vor.u32 %v14349_v2, %v12186_v1  ;;  %6753 = vmatpush.bf16.msrb.mxu1 %v11931_v11 }
  0xe9   :  { %v11786_v14 = vld [vmem:[#allocation5 + $0x14c0] sm:$0xf]  ;;  %v14249_v16 = vld [vmem:[#allocation5 + $0x14cc] sm:$0xf0]  ;;  %v15357_v24 = vpack.c.bf16 %v278_v3, %v278_v3  ;;  %v15359_v31 = vpack.c.bf16 %v280_v6, %v280_v6  ;;  %6766 = vmatpush.bf16.msrb.mxu2 %v12059_v12  ;;  %6735 = vmatmul.bf16.vlgmr.msra.gmra.mxu3 %v15363_v36 }
  0xea   :  { %v11914_v17 = vld [vmem:[#allocation5 + $0x15c0] sm:$0xf]  ;;  %v14281_v28 = vld [vmem:[#allocation5 + $0x15cc] sm:$0xf0]  ;;  %v11787_v39 = vor.u32 %v14249_v16, %v11786_v14  ;;  %6779 = vmatpush.bf16.msrb.mxu3 %v12187_v21 }
  0xeb   :  { %v12042_v29 = vld [vmem:[#allocation5 + $0x16c0] sm:$0xf]  ;;  %v14313_v30 = vld [vmem:[#allocation5 + $0x16cc] sm:$0xf0]  ;;  %v11915_v41 = vor.u32 %v14281_v28, %v11914_v17  ;;  %6696 = vmatmul.bf16.vlgmr.msra.gmra.mxu0 %v15357_v24  ;;  %6722 = vmatmul.bf16.vlgmr.msra.gmra.mxu2 %v15359_v31 }
  0xec   :  { %v12170_v33 = vld [vmem:[#allocation5 + $0x17c0] sm:$0xf]  ;;  %v14345_v35 = vld [vmem:[#allocation5 + $0x17cc] sm:$0xf0]  ;;  %v12043_v42 = vor.u32 %v14313_v30, %v12042_v29  ;;  %6741 = vmatpush.bf16.msrb.mxu0 %v11787_v39 }
  0xed   :  { %v11770_v43 = vld [vmem:[#allocation5 + $0x14a0] sm:$0xf]  ;;  %v14245_v44 = vld [vmem:[#allocation5 + $0x14ac] sm:$0xf0]  ;;  %v12171_v46 = vor.u32 %v14345_v35, %v12170_v33  ;;  %6754 = vmatpush.bf16.msrb.mxu1 %v11915_v41  ;;  %v6489_v28 = vpop.f32.mrf.mxu0 }
  0xee   :  { %v11898_v45 = vld [vmem:[#allocation5 + $0x15a0] sm:$0xf]  ;;  %v14277_v47 = vld [vmem:[#allocation5 + $0x15ac] sm:$0xf0]  ;;  %v11771_v52 = vor.u32 %v14245_v44, %v11770_v43  ;;  %6767 = vmatpush.bf16.msrb.mxu2 %v12043_v42 }
  0xef   :  { %v12026_v48 = vld [vmem:[#allocation5 + $0x16a0] sm:$0xf]  ;;  %v14309_v49 = vld [vmem:[#allocation5 + $0x16ac] sm:$0xf0]  ;;  %v11899_v54 = vor.u32 %v14277_v47, %v11898_v45  ;;  %6780 = vmatpush.bf16.msrb.mxu3 %v12171_v46 }
  0xf0   :  { %v12154_v50 = vld [vmem:[#allocation5 + $0x17a0] sm:$0xf]  ;;  %v14341_v51 = vld [vmem:[#allocation5 + $0x17ac] sm:$0xf0]  ;;  %v12027_v55 = vor.u32 %v14309_v49, %v12026_v48  ;;  %6742 = vmatpush.bf16.msrb.mxu0 %v11771_v52  ;;  %v6502_v49 = vpop.f32.mrf.mxu1 }
  0xf1   :  { %v11754_v53 = vld [vmem:[#allocation5 + $0x1480] sm:$0xf]  ;;  %v14241_v56 = vld [vmem:[#allocation5 + $0x148c] sm:$0xf0]  ;;  %v12155_v59 = vor.u32 %v14341_v51, %v12154_v50  ;;  %6755 = vmatpush.bf16.msrb.mxu1 %v11899_v54 }
  0xf2   :  { %v11882_v57 = vld [vmem:[#allocation5 + $0x1580] sm:$0xf]  ;;  %v14273_v58 = vld [vmem:[#allocation5 + $0x158c] sm:$0xf0]  ;;  %v11755_v1 = vor.u32 %v14241_v56, %v11754_v53  ;;  %6768 = vmatpush.bf16.msrb.mxu2 %v12027_v55 }
  0xf3   :  { %v12010_v60 = vld [vmem:[#allocation5 + $0x1680] sm:$0xf]  ;;  %v14305_v61 = vld [vmem:[#allocation5 + $0x168c] sm:$0xf0]  ;;  %v11883_v3 = vor.u32 %v14273_v58, %v11882_v57  ;;  %6781 = vmatpush.bf16.msrb.mxu3 %v12155_v59 }
  0xf4   :  { %v1350_v62 = vld [vmem:[#allocation7] sm:$0xf]  ;;  %v14337_v0 = vld [vmem:[#allocation5 + $0x178c] sm:$0xf0]  ;;  %v12011_v4 = vor.u32 %v14305_v61, %v12010_v60  ;;  %6743 = vmatpush.bf16.msrb.mxu0 %v11755_v1  ;;  %v6515_v60 = vpop.f32.mrf.mxu2 }
  0xf5   :  { %v12138_v63 = vld [vmem:[#allocation5 + $0x1780] sm:$0xf]  ;;  %v14237_v5 = vld [vmem:[#allocation5 + $0x146c] sm:$0xf0]  ;;  %v1352_v7 = vperm.slane %v1350_v62, 0  ;;  %6756 = vmatpush.bf16.msrb.mxu1 %v11883_v3 }
  0xf6   :  { %v11738_v2 = vld [vmem:[#allocation5 + $0x1460] sm:$0xf]  ;;  %v12139_v10 = vor.u32 %v14337_v0, %v12138_v63  ;;  %v14269_v11 = vld [vmem:[#allocation5 + $0x156c] sm:$0xf0]  ;;  %6769 = vmatpush.bf16.msrb.mxu2 %v12011_v4  ;;  %v6528_v0 = vpop.f32.mrf.mxu3  ;;  %v6491_v4 = vpop.f32.mrf.mxu0 }
  0xf7   :  { %v11866_v6 = vld [vmem:[#allocation5 + $0x1560] sm:$0xf]  ;;  %v14301_v14 = vld [vmem:[#allocation5 + $0x166c] sm:$0xf0]  ;;  %v11739_v21 = vor.u32 %v14237_v5, %v11738_v2  ;;  %v6490_v41 = vadd.f32 %v6489_v28, %v1352_v7 }
  0xf8   :  { %v11994_v12 = vld [vmem:[#allocation5 + $0x1660] sm:$0xf]  ;;  %v14333_v17 = vld [vmem:[#allocation5 + $0x176c] sm:$0xf0]  ;;  %v11867_v29 = vor.u32 %v14269_v11, %v11866_v6  ;;  %6782 = vmatpush.bf16.msrb.mxu3 %v12139_v10 }
  0xf9   :  { %v12122_v16 = vld [vmem:[#allocation5 + $0x1760] sm:$0xf]  ;;  %v11995_v30 = vor.u32 %v14301_v14, %v11994_v12  ;;  %v14233_v35 = vld [vmem:[#allocation5 + $0x144c] sm:$0xf0]  ;;  %6744 = vmatpush.bf16.msrb.mxu0 %v11739_v21  ;;  %v6503_v55 = vadd.f32 %v6502_v49, %v6490_v41 }
  0xfa   :  { %v11722_v33 = vld [vmem:[#allocation5 + $0x1440] sm:$0xf]  ;;  %v12123_v42 = vor.u32 %v14333_v17, %v12122_v16  ;;  %v14265_v43 = vld [vmem:[#allocation5 + $0x154c] sm:$0xf0]  ;;  %6757 = vmatpush.bf16.msrb.mxu1 %v11867_v29 }
  0xfb   :  { %v11850_v39 = vld [vmem:[#allocation5 + $0x1540] sm:$0xf]  ;;  %v14297_v45 = vld [vmem:[#allocation5 + $0x164c] sm:$0xf0]  ;;  %v11723_v48 = vor.u32 %v14233_v35, %v11722_v33  ;;  %6770 = vmatpush.bf16.msrb.mxu2 %v11995_v30  ;;  %v6516_v63 = vadd.f32 %v6515_v60, %v6503_v55 }
  0xfc   :  { %v11978_v44 = vld [vmem:[#allocation5 + $0x1640] sm:$0xf]  ;;  %v14329_v47 = vld [vmem:[#allocation5 + $0x174c] sm:$0xf0]  ;;  %v11851_v50 = vor.u32 %v14265_v43, %v11850_v39  ;;  %6783 = vmatpush.bf16.msrb.mxu3 %v12123_v42  ;;  %v6504_v42 = vpop.f32.mrf.mxu1 }
  0xfd   :  { %v12106_v46 = vld [vmem:[#allocation5 + $0x1740] sm:$0xf]  ;;  %v11979_v51 = vor.u32 %v14297_v45, %v11978_v44  ;;  %v14229_v53 = vld [vmem:[#allocation5 + $0x142c] sm:$0xf0]  ;;  %6745 = vmatpush.bf16.msrb.mxu0 %v11723_v48  ;;  %v15369_v12 = vadd.f32 %v6528_v0, %v6516_v63 }
  0xfe   :  { %v11706_v52 = vld [vmem:[#allocation5 + $0x1420] sm:$0xf]  ;;  %v12107_v56 = vor.u32 %v14329_v47, %v12106_v46  ;;  %v14261_v57 = vld [vmem:[#allocation5 + $0x152c] sm:$0xf0]  ;;  %6758 = vmatpush.bf16.msrb.mxu1 %v11851_v50 }
  0xff   :  { %v11834_v54 = vld [vmem:[#allocation5 + $0x1520] sm:$0xf]  ;;  %v14293_v59 = vld [vmem:[#allocation5 + $0x162c] sm:$0xf0]  ;;  %v11707_v1 = vor.u32 %v14229_v53, %v11706_v52  ;;  %6771 = vmatpush.bf16.msrb.mxu2 %v11979_v51  ;;  %v283_v51 = vld [vmem:[#allocation2 + $0xa8] sm:$0xff]  ;;  %v6517_v53 = vpop.f32.mrf.mxu2 }
 0x100   :  { %v11962_v58 = vld [vmem:[#allocation5 + $0x1620] sm:$0xf]  ;;  %v14325_v62 = vld [vmem:[#allocation5 + $0x172c] sm:$0xf0]  ;;  %v11835_v5 = vor.u32 %v14261_v57, %v11834_v54  ;;  %6784 = vmatpush.bf16.msrb.mxu3 %v12107_v56  ;;  %v285_v52 = vld [vmem:[#allocation2 + $0xb8] sm:$0xff] }
 0x101   :  { %v12090_v61 = vld [vmem:[#allocation5 + $0x1720] sm:$0xf]  ;;  %v14225_v3 = vld [vmem:[#allocation5 + $0x140c] sm:$0xf0]  ;;  %v11963_v6 = vor.u32 %v14293_v59, %v11962_v58  ;;  %6746 = vmatpush.bf16.msrb.mxu0 %v11707_v1  ;;  %v6530_v59 = vpop.f32.mrf.mxu3 }
 0x102   :  { %v11690_v2 = vld [vmem:[#allocation5 + $0x1400] sm:$0xf]  ;;  %v14257_v10 = vld [vmem:[#allocation5 + $0x150c] sm:$0xf0]  ;;  %v12091_v14 = vor.u32 %v14325_v62, %v12090_v61  ;;  %6759 = vmatpush.bf16.msrb.mxu1 %v11835_v5  ;;  %v15377_v5 = vpack.c.bf16 %v285_v52, %v285_v52 }
 0x103   :  { %v11818_v7 = vld [vmem:[#allocation5 + $0x1500] sm:$0xf]  ;;  %v14289_v16 = vld [vmem:[#allocation5 + $0x160c] sm:$0xf0]  ;;  %v11691_v33 = vor.u32 %v14225_v3, %v11690_v2  ;;  %6772 = vmatpush.bf16.msrb.mxu2 %v11963_v6  ;;  %v15375_v2 = vpack.c.bf16 %v283_v51, %v283_v51 }
 0x104   :  { %v11946_v11 = vld [vmem:[#allocation5 + $0x1600] sm:$0xf]  ;;  %v14321_v21 = vld [vmem:[#allocation5 + $0x170c] sm:$0xf0]  ;;  %v11819_v43 = vor.u32 %v14257_v10, %v11818_v7  ;;  %6785 = vmatpush.bf16.msrb.mxu3 %v12091_v14  ;;  %v6554_v59 = vpop.f32.mrf.mxu1 }
 0x105   :  { %v12074_v17 = vld [vmem:[#allocation5 + $0x1700] sm:$0xf]  ;;  %v14381_v29 = vld [vmem:[#allocation5 + $0x18ec] sm:$0xf0]  ;;  %v11947_v44 = vor.u32 %v14289_v16, %v11946_v11  ;;  %6747 = vmatpush.bf16.msrb.mxu0 %v11691_v33 }
 0x106   :  { %v12314_v28 = vld [vmem:[#allocation5 + $0x18e0] sm:$0xf]  ;;  %v14413_v35 = vld [vmem:[#allocation5 + $0x19ec] sm:$0xf0]  ;;  %v12075_v48 = vor.u32 %v14321_v21, %v12074_v17  ;;  %6760 = vmatpush.bf16.msrb.mxu1 %v11819_v43  ;;  %v6541_v52 = vpop.f32.mrf.mxu0 }
 0x107   :  { %v12442_v30 = vld [vmem:[#allocation5 + $0x19e0] sm:$0xf]  ;;  %v14445_v41 = vld [vmem:[#allocation5 + $0x1aec] sm:$0xf0]  ;;  %v12315_v49 = vor.u32 %v14381_v29, %v12314_v28  ;;  %6773 = vmatpush.bf16.msrb.mxu2 %v11947_v44 }
 0x108   :  { %v12570_v39 = vld [vmem:[#allocation5 + $0x1ae0] sm:$0xf]  ;;  %v14477_v46 = vld [vmem:[#allocation5 + $0x1bec] sm:$0xf0]  ;;  %v12443_v54 = vor.u32 %v14413_v35, %v12442_v30  ;;  %6786 = vmatpush.bf16.msrb.mxu3 %v12075_v48 }
 0x109   :  { %v12698_v45 = vld [vmem:[#allocation5 + $0x1be0] sm:$0xf]  ;;  %v284_v50 = vld [vmem:[#allocation2 + $0xb0] sm:$0xff]  ;;  %v12571_v55 = vor.u32 %v14445_v41, %v12570_v39  ;;  %6792 = vmatpush.bf16.msra.mxu0 %v12315_v49  ;;  %6761 = vmatmul.bf16.vlgmr.msrb.gmra.mxu1 %v15375_v2 }
 0x10a   :  { %v282_v47 = vld [vmem:[#allocation2 + $0xa0] sm:$0xff]  ;;  %v14377_v57 = vld [vmem:[#allocation5 + $0x18cc] sm:$0xf0]  ;;  %v12699_v60 = vor.u32 %v14477_v46, %v12698_v45  ;;  %v15373_v1 = vpack.c.bf16 %v284_v50, %v284_v50  ;;  %6805 = vmatpush.bf16.msra.mxu1 %v12443_v54 }
 0x10b   :  { %v12298_v56 = vld [vmem:[#allocation5 + $0x18c0] sm:$0xf]  ;;  %v15371_v61 = vpack.c.bf16 %v282_v47, %v282_v47  ;;  %v14409_v62 = vld [vmem:[#allocation5 + $0x19cc] sm:$0xf0]  ;;  %6818 = vmatpush.bf16.msra.mxu2 %v12571_v55  ;;  %6787 = vmatmul.bf16.vlgmr.msrb.gmra.mxu3 %v15377_v5 }
 0x10c   :  { %v12426_v58 = vld [vmem:[#allocation5 + $0x19c0] sm:$0xf]  ;;  %v14441_v0 = vld [vmem:[#allocation5 + $0x1acc] sm:$0xf0]  ;;  %v12299_v6 = vor.u32 %v14377_v57, %v12298_v56  ;;  %6831 = vmatpush.bf16.msra.mxu3 %v12699_v60  ;;  %6774 = vmatmul.bf16.vlgmr.msrb.gmra.mxu2 %v15373_v1 }
 0x10d   :  { %v12554_v63 = vld [vmem:[#allocation5 + $0x1ac0] sm:$0xf]  ;;  %v14473_v4 = vld [vmem:[#allocation5 + $0x1bcc] sm:$0xf0]  ;;  %v12427_v7 = vor.u32 %v14409_v62, %v12426_v58  ;;  %6748 = vmatmul.bf16.vlgmr.msrb.gmra.mxu0 %v15371_v61  ;;  %v6542_v58 = vadd.f32 %v6541_v52, %v15369_v12 }
 0x10e   :  { %v12682_v3 = vld [vmem:[#allocation5 + $0x1bc0] sm:$0xf]  ;;  %v12555_v10 = vor.u32 %v14441_v0, %v12554_v63  ;;  %v14373_v14 = vld [vmem:[#allocation5 + $0x18ac] sm:$0xf0]  ;;  %6793 = vmatpush.bf16.msra.mxu0 %v12299_v6 }
 0x10f   :  { %v12282_v11 = vld [vmem:[#allocation5 + $0x18a0] sm:$0xf]  ;;  %v12683_v17 = vor.u32 %v14473_v4, %v12682_v3  ;;  %v14405_v21 = vld [vmem:[#allocation5 + $0x19ac] sm:$0xf0]  ;;  %6806 = vmatpush.bf16.msra.mxu1 %v12427_v7  ;;  %v6555_v6 = vadd.f32 %v6554_v59, %v6542_v58 }
 0x110   :  { %v12410_v16 = vld [vmem:[#allocation5 + $0x19a0] sm:$0xf]  ;;  %v14437_v29 = vld [vmem:[#allocation5 + $0x1aac] sm:$0xf0]  ;;  %v12283_v35 = vor.u32 %v14373_v14, %v12282_v11  ;;  %6819 = vmatpush.bf16.msra.mxu2 %v12555_v10 }
 0x111   :  { %v12538_v28 = vld [vmem:[#allocation5 + $0x1aa0] sm:$0xf]  ;;  %v14469_v33 = vld [vmem:[#allocation5 + $0x1bac] sm:$0xf0]  ;;  %v12411_v39 = vor.u32 %v14405_v21, %v12410_v16  ;;  %6832 = vmatpush.bf16.msra.mxu3 %v12683_v17  ;;  %v6567_v21 = vpop.f32.mrf.mxu2 }
 0x112   :  { %v12666_v30 = vld [vmem:[#allocation5 + $0x1ba0] sm:$0xf]  ;;  %v12539_v41 = vor.u32 %v14437_v29, %v12538_v28  ;;  %v14369_v43 = vld [vmem:[#allocation5 + $0x188c] sm:$0xf0]  ;;  %6794 = vmatpush.bf16.msra.mxu0 %v12283_v35  ;;  %v6580_v35 = vpop.f32.mrf.mxu3 }
 0x113   :  { %v12266_v42 = vld [vmem:[#allocation5 + $0x1880] sm:$0xf]  ;;  %v12667_v45 = vor.u32 %v14469_v33, %v12666_v30  ;;  %v14401_v46 = vld [vmem:[#allocation5 + $0x198c] sm:$0xf0]  ;;  %6807 = vmatpush.bf16.msra.mxu1 %v12411_v39  ;;  %v6568_v33 = vadd.f32 %v6567_v21, %v6555_v6 }
 0x114   :  { %v12394_v44 = vld [vmem:[#allocation5 + $0x1980] sm:$0xf]  ;;  %v14433_v48 = vld [vmem:[#allocation5 + $0x1a8c] sm:$0xf0]  ;;  %v12267_v51 = vor.u32 %v14369_v43, %v12266_v42  ;;  %6820 = vmatpush.bf16.msra.mxu2 %v12539_v41 }
 0x115   :  { %v12522_v47 = vld [vmem:[#allocation5 + $0x1a80] sm:$0xf]  ;;  %v14465_v50 = vld [vmem:[#allocation5 + $0x1b8c] sm:$0xf0]  ;;  %v12395_v53 = vor.u32 %v14401_v46, %v12394_v44  ;;  %6833 = vmatpush.bf16.msra.mxu3 %v12667_v45  ;;  %v15384_v43 = vadd.f32 %v6580_v35, %v6568_v33  ;;  %v6543_v44 = vpop.f32.mrf.mxu0 }
 0x116   :  { %v12650_v49 = vld [vmem:[#allocation5 + $0x1b80] sm:$0xf]  ;;  %v12523_v54 = vor.u32 %v14433_v48, %v12522_v47  ;;  %v14365_v56 = vld [vmem:[#allocation5 + $0x186c] sm:$0xf0]  ;;  %6795 = vmatpush.bf16.msra.mxu0 %v12267_v51 }
 0x117   :  { %v12250_v55 = vld [vmem:[#allocation5 + $0x1860] sm:$0xf]  ;;  %v12651_v60 = vor.u32 %v14465_v50, %v12650_v49  ;;  %v14397_v62 = vld [vmem:[#allocation5 + $0x196c] sm:$0xf0]  ;;  %6808 = vmatpush.bf16.msra.mxu1 %v12395_v53  ;;  %v6556_v50 = vpop.f32.mrf.mxu1 }
 0x118   :  { %v12378_v57 = vld [vmem:[#allocation5 + $0x1960] sm:$0xf]  ;;  %v14429_v0 = vld [vmem:[#allocation5 + $0x1a6c] sm:$0xf0]  ;;  %v12251_v7 = vor.u32 %v14365_v56, %v12250_v55  ;;  %6821 = vmatpush.bf16.msra.mxu2 %v12523_v54 }
 0x119   :  { %v12506_v63 = vld [vmem:[#allocation5 + $0x1a60] sm:$0xf]  ;;  %v14461_v4 = vld [vmem:[#allocation5 + $0x1b6c] sm:$0xf0]  ;;  %v12379_v10 = vor.u32 %v14397_v62, %v12378_v57  ;;  %6834 = vmatpush.bf16.msra.mxu3 %v12651_v60 }
 0x11a   :  { %v12634_v3 = vld [vmem:[#allocation5 + $0x1b60] sm:$0xf]  ;;  %v12507_v11 = vor.u32 %v14429_v0, %v12506_v63  ;;  %v14361_v16 = vld [vmem:[#allocation5 + $0x184c] sm:$0xf0]  ;;  %6796 = vmatpush.bf16.msra.mxu0 %v12251_v7 }
 0x11b   :  { %v12234_v14 = vld [vmem:[#allocation5 + $0x1840] sm:$0xf]  ;;  %v12635_v12 = vor.u32 %v14461_v4, %v12634_v3  ;;  %v14393_v28 = vld [vmem:[#allocation5 + $0x194c] sm:$0xf0]  ;;  %6809 = vmatpush.bf16.msra.mxu1 %v12379_v10  ;;  %v6569_v4 = vpop.f32.mrf.mxu2 }
 0x11c   :  { %v12362_v17 = vld [vmem:[#allocation5 + $0x1940] sm:$0xf]  ;;  %v14425_v30 = vld [vmem:[#allocation5 + $0x1a4c] sm:$0xf0]  ;;  %v12235_v42 = vor.u32 %v14361_v16, %v12234_v14  ;;  %6822 = vmatpush.bf16.msra.mxu2 %v12507_v11  ;;  %v6582_v14 = vpop.f32.mrf.mxu3 }
 0x11d   :  { %v12490_v29 = vld [vmem:[#allocation5 + $0x1a40] sm:$0xf]  ;;  %v14457_v41 = vld [vmem:[#allocation5 + $0x1b4c] sm:$0xf0]  ;;  %v12363_v45 = vor.u32 %v14393_v28, %v12362_v17  ;;  %6835 = vmatpush.bf16.msra.mxu3 %v12635_v12 }
 0x11e   :  { %v12618_v39 = vld [vmem:[#allocation5 + $0x1b40] sm:$0xf]  ;;  %v12491_v46 = vor.u32 %v14425_v30, %v12490_v29  ;;  %v14357_v48 = vld [vmem:[#allocation5 + $0x182c] sm:$0xf0]  ;;  %6797 = vmatpush.bf16.msra.mxu0 %v12235_v42 }
 0x11f   :  { %v12218_v47 = vld [vmem:[#allocation5 + $0x1820] sm:$0xf]  ;;  %v12619_v51 = vor.u32 %v14457_v41, %v12618_v39  ;;  %v14389_v52 = vld [vmem:[#allocation5 + $0x192c] sm:$0xf0]  ;;  %6810 = vmatpush.bf16.msra.mxu1 %v12363_v45 }
 0x120   :  { %v12346_v49 = vld [vmem:[#allocation5 + $0x1920] sm:$0xf]  ;;  %v14421_v54 = vld [vmem:[#allocation5 + $0x1a2c] sm:$0xf0]  ;;  %v12219_v57 = vor.u32 %v14357_v48, %v12218_v47  ;;  %6823 = vmatpush.bf16.msra.mxu2 %v12491_v46  ;;  %v287_v47 = vld [vmem:[#allocation2 + $0xc8] sm:$0xff] }
 0x121   :  { %v12474_v53 = vld [vmem:[#allocation5 + $0x1a20] sm:$0xf]  ;;  %v14453_v56 = vld [vmem:[#allocation5 + $0x1b2c] sm:$0xf0]  ;;  %v12347_v60 = vor.u32 %v14389_v52, %v12346_v49  ;;  %6836 = vmatpush.bf16.msra.mxu3 %v12619_v51  ;;  %v289_v48 = vld [vmem:[#allocation2 + $0xd8] sm:$0xff] }
 0x122   :  { %v12602_v55 = vld [vmem:[#allocation5 + $0x1b20] sm:$0xf]  ;;  %v14353_v59 = vld [vmem:[#allocation5 + $0x180c] sm:$0xf0]  ;;  %v12475_v62 = vor.u32 %v14421_v54, %v12474_v53  ;;  %6798 = vmatpush.bf16.msra.mxu0 %v12219_v57 }
 0x123   :  { %v12202_v58 = vld [vmem:[#allocation5 + $0x1800] sm:$0xf]  ;;  %v14385_v0 = vld [vmem:[#allocation5 + $0x190c] sm:$0xf0]  ;;  %v12603_v6 = vor.u32 %v14453_v56, %v12602_v55  ;;  %6811 = vmatpush.bf16.msra.mxu1 %v12347_v60  ;;  %v15390_v60 = vpack.c.bf16 %v287_v47, %v287_v47 }
 0x124   :  { %v12330_v63 = vld [vmem:[#allocation5 + $0x1900] sm:$0xf]  ;;  %v14417_v7 = vld [vmem:[#allocation5 + $0x1a0c] sm:$0xf0]  ;;  %v12203_v12 = vor.u32 %v14353_v59, %v12202_v58  ;;  %6824 = vmatpush.bf16.msra.mxu2 %v12475_v62 }
 0x125   :  { %v12458_v3 = vld [vmem:[#allocation5 + $0x1a00] sm:$0xf]  ;;  %v14449_v11 = vld [vmem:[#allocation5 + $0x1b0c] sm:$0xf0]  ;;  %v12331_v33 = vor.u32 %v14385_v0, %v12330_v63  ;;  %6837 = vmatpush.bf16.msra.mxu3 %v12603_v6  ;;  %v15392_v0 = vpack.c.bf16 %v289_v48, %v289_v48 }
 0x126   :  { %v12586_v10 = vld [vmem:[#allocation5 + $0x1b00] sm:$0xf]  ;;  %v14509_v17 = vld [vmem:[#allocation5 + $0x1cec] sm:$0xf0]  ;;  %v12459_v35 = vor.u32 %v14417_v7, %v12458_v3  ;;  %6799 = vmatpush.bf16.msra.mxu0 %v12203_v12  ;;  %v6593_v47 = vpop.f32.mrf.mxu0 }
 0x127   :  { %v12826_v16 = vld [vmem:[#allocation5 + $0x1ce0] sm:$0xf]  ;;  %v14541_v28 = vld [vmem:[#allocation5 + $0x1dec] sm:$0xf0]  ;;  %v12587_v44 = vor.u32 %v14449_v11, %v12586_v10  ;;  %6812 = vmatpush.bf16.msra.mxu1 %v12331_v33 }
 0x128   :  { %v12954_v21 = vld [vmem:[#allocation5 + $0x1de0] sm:$0xf]  ;;  %v14573_v30 = vld [vmem:[#allocation5 + $0x1eec] sm:$0xf0]  ;;  %v12827_v45 = vor.u32 %v14509_v17, %v12826_v16  ;;  %6825 = vmatpush.bf16.msra.mxu2 %v12459_v35 }
 0x129   :  { %v13082_v29 = vld [vmem:[#allocation5 + $0x1ee0] sm:$0xf]  ;;  %v14605_v41 = vld [vmem:[#allocation5 + $0x1fec] sm:$0xf0]  ;;  %v12955_v49 = vor.u32 %v14541_v28, %v12954_v21  ;;  %6838 = vmatpush.bf16.msra.mxu3 %v12587_v44 }
 0x12a   :  { %v13210_v39 = vld [vmem:[#allocation5 + $0x1fe0] sm:$0xf]  ;;  %v288_v46 = vld [vmem:[#allocation2 + $0xd0] sm:$0xff]  ;;  %v13083_v50 = vor.u32 %v14573_v30, %v13082_v29  ;;  %6844 = vmatpush.bf16.msrb.mxu0 %v12827_v45  ;;  %6813 = vmatmul.bf16.vlgmr.msra.gmra.mxu1 %v15390_v60 }
 0x12b   :  { %v286_v42 = vld [vmem:[#allocation2 + $0xc0] sm:$0xff]  ;;  %v14505_v52 = vld [vmem:[#allocation5 + $0x1ccc] sm:$0xf0]  ;;  %v13211_v54 = vor.u32 %v14605_v41, %v13210_v39  ;;  %v15388_v59 = vpack.c.bf16 %v288_v46, %v288_v46  ;;  %6857 = vmatpush.bf16.msrb.mxu1 %v12955_v49 }
 0x12c   :  { %v12810_v51 = vld [vmem:[#allocation5 + $0x1cc0] sm:$0xf]  ;;  %v15386_v55 = vpack.c.bf16 %v286_v42, %v286_v42  ;;  %v14537_v56 = vld [vmem:[#allocation5 + $0x1dcc] sm:$0xf0]  ;;  %6870 = vmatpush.bf16.msrb.mxu2 %v13083_v50  ;;  %6839 = vmatmul.bf16.vlgmr.msra.gmra.mxu3 %v15392_v0  ;;  %v6594_v50 = vadd.f32 %v6593_v47, %v15384_v43 }
 0x12d   :  { %v12938_v53 = vld [vmem:[#allocation5 + $0x1dc0] sm:$0xf]  ;;  %v14569_v58 = vld [vmem:[#allocation5 + $0x1ecc] sm:$0xf0]  ;;  %v12811_v3 = vor.u32 %v14505_v52, %v12810_v51  ;;  %6883 = vmatpush.bf16.msrb.mxu3 %v13211_v54  ;;  %6826 = vmatmul.bf16.vlgmr.msra.gmra.mxu2 %v15388_v59  ;;  %v6606_v52 = vpop.f32.mrf.mxu1 }
 0x12e   :  { %v13066_v57 = vld [vmem:[#allocation5 + $0x1ec0] sm:$0xf]  ;;  %v14601_v63 = vld [vmem:[#allocation5 + $0x1fcc] sm:$0xf0]  ;;  %v12939_v4 = vor.u32 %v14537_v56, %v12938_v53  ;;  %6800 = vmatmul.bf16.vlgmr.msra.gmra.mxu0 %v15386_v55 }
 0x12f   :  { %v13194_v62 = vld [vmem:[#allocation5 + $0x1fc0] sm:$0xf]  ;;  %v13067_v6 = vor.u32 %v14569_v58, %v13066_v57  ;;  %v14501_v10 = vld [vmem:[#allocation5 + $0x1cac] sm:$0xf0]  ;;  %6845 = vmatpush.bf16.msrb.mxu0 %v12811_v3 }
 0x130   :  { %v12794_v7 = vld [vmem:[#allocation5 + $0x1ca0] sm:$0xf]  ;;  %v13195_v14 = vor.u32 %v14601_v63, %v13194_v62  ;;  %v14533_v16 = vld [vmem:[#allocation5 + $0x1dac] sm:$0xf0]  ;;  %6858 = vmatpush.bf16.msrb.mxu1 %v12939_v4  ;;  %v6607_v63 = vadd.f32 %v6606_v52, %v6594_v50 }
 0x131   :  { %v12922_v11 = vld [vmem:[#allocation5 + $0x1da0] sm:$0xf]  ;;  %v14565_v21 = vld [vmem:[#allocation5 + $0x1eac] sm:$0xf0]  ;;  %v12795_v29 = vor.u32 %v14501_v10, %v12794_v7  ;;  %6871 = vmatpush.bf16.msrb.mxu2 %v13067_v6 }
 0x132   :  { %v13050_v17 = vld [vmem:[#allocation5 + $0x1ea0] sm:$0xf]  ;;  %v14597_v28 = vld [vmem:[#allocation5 + $0x1fac] sm:$0xf0]  ;;  %v12923_v30 = vor.u32 %v14533_v16, %v12922_v11  ;;  %6884 = vmatpush.bf16.msrb.mxu3 %v13195_v14 }
 0x133   :  { %v13178_v12 = vld [vmem:[#allocation5 + $0x1fa0] sm:$0xf]  ;;  %v13051_v33 = vor.u32 %v14565_v21, %v13050_v17  ;;  %v14497_v39 = vld [vmem:[#allocation5 + $0x1c8c] sm:$0xf0]  ;;  %6846 = vmatpush.bf16.msrb.mxu0 %v12795_v29 }
 0x134   :  { %v12778_v35 = vld [vmem:[#allocation5 + $0x1c80] sm:$0xf]  ;;  %v13179_v42 = vor.u32 %v14597_v28, %v13178_v12  ;;  %v14529_v44 = vld [vmem:[#allocation5 + $0x1d8c] sm:$0xf0]  ;;  %6859 = vmatpush.bf16.msrb.mxu1 %v12923_v30  ;;  %v6619_v28 = vpop.f32.mrf.mxu2 }
 0x135   :  { %v12906_v41 = vld [vmem:[#allocation5 + $0x1d80] sm:$0xf]  ;;  %v14561_v46 = vld [vmem:[#allocation5 + $0x1e8c] sm:$0xf0]  ;;  %v12779_v51 = vor.u32 %v14497_v39, %v12778_v35  ;;  %6872 = vmatpush.bf16.msrb.mxu2 %v13051_v33  ;;  %v6620_v35 = vadd.f32 %v6619_v28, %v6607_v63  ;;  %v6632_v39 = vpop.f32.mrf.mxu3  ;;  %v13611_v28 = vld [vmem:[#allocation5 + $0xe4] sm:$0xf] }
 0x136   :  { %v13034_v45 = vld [vmem:[#allocation5 + $0x1e80] sm:$0xf]  ;;  %v14593_v49 = vld [vmem:[#allocation5 + $0x1f8c] sm:$0xf0]  ;;  %v12907_v53 = vor.u32 %v14529_v44, %v12906_v41  ;;  %6885 = vmatpush.bf16.msrb.mxu3 %v13179_v42  ;;  %v6595_v44 = vpop.f32.mrf.mxu0 }
 0x137   :  { %v13162_v48 = vld [vmem:[#allocation5 + $0x1f80] sm:$0xf]  ;;  %v13035_v54 = vor.u32 %v14561_v46, %v13034_v45  ;;  %v14493_v57 = vld [vmem:[#allocation5 + $0x1c6c] sm:$0xf0]  ;;  %6847 = vmatpush.bf16.msrb.mxu0 %v12779_v51  ;;  %v6608_v46 = vpop.f32.mrf.mxu1  ;;  %v15399_v47 = vadd.f32 %v6632_v39, %v6620_v35  ;;  %v9372_v39 = vld [vmem:[#allocation5 + $0x1f0] sm:$0xf0] }
 0x138   :  { %v12762_v56 = vld [vmem:[#allocation5 + $0x1c60] sm:$0xf]  ;;  %v13163_v62 = vor.u32 %v14593_v49, %v13162_v48  ;;  %v14525_v3 = vld [vmem:[#allocation5 + $0x1d6c] sm:$0xf0]  ;;  %6860 = vmatpush.bf16.msrb.mxu1 %v12907_v53  ;;  %v13707_v46 = vld [vmem:[#allocation5 + $0x3e4] sm:$0xf] }
 0x139   :  { %v12890_v58 = vld [vmem:[#allocation5 + $0x1d60] sm:$0xf]  ;;  %v14557_v6 = vld [vmem:[#allocation5 + $0x1e6c] sm:$0xf0]  ;;  %v12763_v11 = vor.u32 %v14493_v57, %v12762_v56  ;;  %6873 = vmatpush.bf16.msrb.mxu2 %v13035_v54 }
 0x13a   :  { %v13018_v4 = vld [vmem:[#allocation5 + $0x1e60] sm:$0xf]  ;;  %v14589_v10 = vld [vmem:[#allocation5 + $0x1f6c] sm:$0xf0]  ;;  %v12891_v43 = vor.u32 %v14525_v3, %v12890_v58  ;;  %6886 = vmatpush.bf16.msrb.mxu3 %v13163_v62 }
 0x13b   :  { %v13146_v7 = vld [vmem:[#allocation5 + $0x1f60] sm:$0xf]  ;;  %v13019_v14 = vor.u32 %v14557_v6, %v13018_v4  ;;  %v14489_v17 = vld [vmem:[#allocation5 + $0x1c4c] sm:$0xf0]  ;;  %6848 = vmatpush.bf16.msrb.mxu0 %v12763_v11 }
 0x13c   :  { %v12746_v16 = vld [vmem:[#allocation5 + $0x1c40] sm:$0xf]  ;;  %v13147_v12 = vor.u32 %v14589_v10, %v13146_v7  ;;  %v14521_v29 = vld [vmem:[#allocation5 + $0x1d4c] sm:$0xf0]  ;;  %6861 = vmatpush.bf16.msrb.mxu1 %v12891_v43 }
 0x13d   :  { %v12874_v21 = vld [vmem:[#allocation5 + $0x1d40] sm:$0xf]  ;;  %v14553_v33 = vld [vmem:[#allocation5 + $0x1e4c] sm:$0xf0]  ;;  %v12747_v45 = vor.u32 %v14489_v17, %v12746_v16  ;;  %6874 = vmatpush.bf16.msrb.mxu2 %v13019_v14 }
 0x13e   :  { %v13002_v30 = vld [vmem:[#allocation5 + $0x1e40] sm:$0xf]  ;;  %v14585_v42 = vld [vmem:[#allocation5 + $0x1f4c] sm:$0xf0]  ;;  %v12875_v48 = vor.u32 %v14521_v29, %v12874_v21  ;;  %6887 = vmatpush.bf16.msrb.mxu3 %v13147_v12  ;;  %v6621_v12 = vpop.f32.mrf.mxu2  ;;  %v9244_v29 = vld [vmem:[#allocation5 + $0xf0] sm:$0xf0] }
 0x13f   :  { %v13130_v41 = vld [vmem:[#allocation5 + $0x1f40] sm:$0xf]  ;;  %v13003_v49 = vor.u32 %v14553_v33, %v13002_v30  ;;  %v14485_v51 = vld [vmem:[#allocation5 + $0x1c2c] sm:$0xf0]  ;;  %6849 = vmatpush.bf16.msrb.mxu0 %v12747_v45  ;;  %v13643_v30 = vld [vmem:[#allocation5 + $0x1e4] sm:$0xf]  ;;  %v6634_v33 = vpop.f32.mrf.mxu3 }
 0x140   :  { %v12730_v50 = vld [vmem:[#allocation5 + $0x1c20] sm:$0xf]  ;;  %v13131_v53 = vor.u32 %v14585_v42, %v13130_v41  ;;  %v14517_v54 = vld [vmem:[#allocation5 + $0x1d2c] sm:$0xf0]  ;;  %6862 = vmatpush.bf16.msrb.mxu1 %v12875_v48  ;;  %v13675_v41 = vld [vmem:[#allocation5 + $0x2e4] sm:$0xf] }
 0x141   :  { %v12858_v52 = vld [vmem:[#allocation5 + $0x1d20] sm:$0xf]  ;;  %v14549_v57 = vld [vmem:[#allocation5 + $0x1e2c] sm:$0xf0]  ;;  %v12731_v63 = vor.u32 %v14485_v51, %v12730_v50  ;;  %6875 = vmatpush.bf16.msrb.mxu2 %v13003_v49  ;;  %v9500_v42 = vld [vmem:[#allocation5 + $0x2f0] sm:$0xf0]  ;;  %v9247_v51 = vor.u32 %v13611_v28, %v9244_v29 }
 0x142   :  { %v12986_v56 = vld [vmem:[#allocation5 + $0x1e20] sm:$0xf]  ;;  %v14581_v62 = vld [vmem:[#allocation5 + $0x1f2c] sm:$0xf0]  ;;  %v12859_v6 = vor.u32 %v14517_v54, %v12858_v52  ;;  %6888 = vmatpush.bf16.msrb.mxu3 %v13131_v53  ;;  %v9628_v48 = vld [vmem:[#allocation5 + $0x3f0] sm:$0xf0] }
 0x143   :  { %v13114_v58 = vld [vmem:[#allocation5 + $0x1f20] sm:$0xf]  ;;  %v14481_v4 = vld [vmem:[#allocation5 + $0x1c0c] sm:$0xf0]  ;;  %v12987_v7 = vor.u32 %v14549_v57, %v12986_v56  ;;  %6850 = vmatpush.bf16.msrb.mxu0 %v12731_v63  ;;  %v291_v53 = vld [vmem:[#allocation2 + $0xe8] sm:$0xff]  ;;  %v9375_v56 = vor.u32 %v13643_v30, %v9372_v39  ;;  %v9503_v57 = vor.u32 %v13675_v41, %v9500_v42 }
 0x144   :  { %v12714_v3 = vld [vmem:[#allocation5 + $0x1c00] sm:$0xf]  ;;  %v14513_v11 = vld [vmem:[#allocation5 + $0x1d0c] sm:$0xf0]  ;;  %v13115_v14 = vor.u32 %v14581_v62, %v13114_v58  ;;  %6863 = vmatpush.bf16.msrb.mxu1 %v12859_v6  ;;  %v293_v54 = vld [vmem:[#allocation2 + $0xf8] sm:$0xff] }
 0x145   :  { %v12842_v10 = vld [vmem:[#allocation5 + $0x1d00] sm:$0xf]  ;;  %v14545_v16 = vld [vmem:[#allocation5 + $0x1e0c] sm:$0xf0]  ;;  %v12715_v35 = vor.u32 %v14481_v4, %v12714_v3  ;;  %6876 = vmatpush.bf16.msrb.mxu2 %v12987_v7  ;;  %v13607_v58 = vld [vmem:[#allocation5 + $0xc4] sm:$0xf]  ;;  %v9631_v3 = vor.u32 %v13707_v46, %v9628_v48 }
 0x146   :  { %v12970_v43 = vld [vmem:[#allocation5 + $0x1e00] sm:$0xf]  ;;  %v14577_v21 = vld [vmem:[#allocation5 + $0x1f0c] sm:$0xf0]  ;;  %v12843_v44 = vor.u32 %v14513_v11, %v12842_v10  ;;  %6889 = vmatpush.bf16.msrb.mxu3 %v13115_v14  ;;  %v9228_v62 = vld [vmem:[#allocation5 + $0xd0] sm:$0xf0] }
 0x147   :  { %v13098_v17 = vld [vmem:[#allocation5 + $0x1f00] sm:$0xf]  ;;  %v12971_v45 = vor.u32 %v14545_v16, %v12970_v43  ;;  %v292_v52 = vld [vmem:[#allocation2 + $0xf0] sm:$0xff]  ;;  %v13639_v63 = vld [vmem:[#allocation5 + $0x1c4] sm:$0xf]  ;;  %6851 = vmatpush.bf16.msrb.mxu0 %v12715_v35  ;;  %v15405_v43 = vpack.c.bf16 %v291_v53, %v291_v53 }
 0x148   :  { %v290_v49 = vld [vmem:[#allocation2 + $0xe0] sm:$0xff]  ;;  %v13099_v50 = vor.u32 %v14577_v21, %v13098_v17  ;;  %v9356_v6 = vld [vmem:[#allocation5 + $0x1d0] sm:$0xf0]  ;;  %6864 = vmatpush.bf16.msrb.mxu1 %v12843_v44  ;;  %v15403_v11 = vpack.c.bf16 %v292_v52, %v292_v52  ;;  %v15407_v17 = vpack.c.bf16 %v293_v54, %v293_v54  ;;  %v9231_v21 = vor.u32 %v13607_v58, %v9228_v62  ;;  %v6645_v58 = vpop.f32.mrf.mxu0 }
 0x149   :  { %v15401_v4 = vpack.c.bf16 %v290_v49, %v290_v49  ;;  %v13671_v7 = vld [vmem:[#allocation5 + $0x2c4] sm:$0xf]  ;;  %v9484_v10 = vld [vmem:[#allocation5 + $0x2d0] sm:$0xf0]  ;;  %6877 = vmatpush.bf16.msrb.mxu2 %v12971_v45  ;;  %v9359_v12 = vor.u32 %v13639_v63, %v9356_v6 }
 0x14a   :  { %v13703_v14 = vld [vmem:[#allocation5 + $0x3c4] sm:$0xf]  ;;  %v9612_v16 = vld [vmem:[#allocation5 + $0x3d0] sm:$0xf0]  ;;  %6890 = vmatpush.bf16.msrb.mxu3 %v13099_v50  ;;  %v9487_v28 = vor.u32 %v13671_v7, %v9484_v10  ;;  %v6658_v7 = vpop.f32.mrf.mxu1 }
 0x14b   :  { %6896 = vmatpush.bf16.msra.mxu0 %v9247_v51  ;;  %v13603_v29 = vld [vmem:[#allocation5 + $0xa4] sm:$0xf]  ;;  %v9212_v30 = vld [vmem:[#allocation5 + $0xb0] sm:$0xf0]  ;;  %v9615_v35 = vor.u32 %v13703_v14, %v9612_v16  ;;  %6865 = vmatmul.bf16.vlgmr.msrb.gmra.mxu1 %v15405_v43 }
 0x14c   :  { %6909 = vmatpush.bf16.msra.mxu1 %v9375_v56  ;;  %v13635_v33 = vld [vmem:[#allocation5 + $0x1a4] sm:$0xf]  ;;  %6852 = vmatmul.bf16.vlgmr.msrb.gmra.mxu0 %v15401_v4  ;;  %v9340_v39 = vld [vmem:[#allocation5 + $0x1b0] sm:$0xf0]  ;;  %v9215_v46 = vor.u32 %v13603_v29, %v9212_v30 }
 0x14d   :  { %6922 = vmatpush.bf16.msra.mxu2 %v9503_v57  ;;  %v13667_v41 = vld [vmem:[#allocation5 + $0x2a4] sm:$0xf]  ;;  %v9468_v42 = vld [vmem:[#allocation5 + $0x2b0] sm:$0xf0]  ;;  %6891 = vmatmul.bf16.vlgmr.msrb.gmra.mxu3 %v15407_v17  ;;  %v9343_v48 = vor.u32 %v13635_v33, %v9340_v39 }
 0x14e   :  { %6935 = vmatpush.bf16.msra.mxu3 %v9631_v3  ;;  %6878 = vmatmul.bf16.vlgmr.msrb.gmra.mxu2 %v15403_v11  ;;  %v13699_v44 = vld [vmem:[#allocation5 + $0x3a4] sm:$0xf]  ;;  %v9596_v45 = vld [vmem:[#allocation5 + $0x3b0] sm:$0xf0]  ;;  %v9471_v49 = vor.u32 %v13667_v41, %v9468_v42  ;;  %v6646_v3 = vadd.f32 %v6645_v58, %v15399_v47 }
 0x14f   :  { %6897 = vmatpush.bf16.msra.mxu0 %v9231_v21  ;;  %v13599_v50 = vld [vmem:[#allocation5 + $0x84] sm:$0xf]  ;;  %v9196_v51 = vld [vmem:[#allocation5 + $0x90] sm:$0xf0]  ;;  %v9599_v53 = vor.u32 %v13699_v44, %v9596_v45 }
 0x150   :  { %6910 = vmatpush.bf16.msra.mxu1 %v9359_v12  ;;  %v13631_v52 = vld [vmem:[#allocation5 + $0x184] sm:$0xf]  ;;  %v9324_v54 = vld [vmem:[#allocation5 + $0x190] sm:$0xf0]  ;;  %v9199_v6 = vor.u32 %v13599_v50, %v9196_v51  ;;  %v6659_v29 = vadd.f32 %v6658_v7, %v6646_v3  ;;  %v6671_v50 = vpop.f32.mrf.mxu2 }
 0x151   :  { %6923 = vmatpush.bf16.msra.mxu2 %v9487_v28  ;;  %v13663_v56 = vld [vmem:[#allocation5 + $0x284] sm:$0xf]  ;;  %v9452_v57 = vld [vmem:[#allocation5 + $0x290] sm:$0xf0]  ;;  %v9327_v10 = vor.u32 %v13631_v52, %v9324_v54 }
 0x152   :  { %6936 = vmatpush.bf16.msra.mxu3 %v9615_v35  ;;  %v13695_v62 = vld [vmem:[#allocation5 + $0x384] sm:$0xf]  ;;  %v9580_v63 = vld [vmem:[#allocation5 + $0x390] sm:$0xf0]  ;;  %v9455_v14 = vor.u32 %v13663_v56, %v9452_v57  ;;  %v6672_v54 = vadd.f32 %v6671_v50, %v6659_v29  ;;  %v6684_v56 = vpop.f32.mrf.mxu3  ;;  %v6660_v3 = vpop.f32.mrf.mxu1 }
 0x153   :  { %6898 = vmatpush.bf16.msra.mxu0 %v9215_v46  ;;  %v13595_v16 = vld [vmem:[#allocation5 + $0x64] sm:$0xf]  ;;  %v9180_v21 = vld [vmem:[#allocation5 + $0x70] sm:$0xf0]  ;;  %v9583_v28 = vor.u32 %v13695_v62, %v9580_v63  ;;  %v6647_v62 = vpop.f32.mrf.mxu0 }
 0x154   :  { %6911 = vmatpush.bf16.msra.mxu1 %v9343_v48  ;;  %v13627_v12 = vld [vmem:[#allocation5 + $0x164] sm:$0xf]  ;;  %v9308_v30 = vld [vmem:[#allocation5 + $0x170] sm:$0xf0]  ;;  %v9183_v42 = vor.u32 %v13595_v16, %v9180_v21 }
 0x155   :  { %6924 = vmatpush.bf16.msra.mxu2 %v9471_v49  ;;  %v13659_v33 = vld [vmem:[#allocation5 + $0x264] sm:$0xf]  ;;  %v9436_v35 = vld [vmem:[#allocation5 + $0x270] sm:$0xf0]  ;;  %v9311_v47 = vor.u32 %v13627_v12, %v9308_v30 }
 0x156   :  { %6937 = vmatpush.bf16.msra.mxu3 %v9599_v53  ;;  %v13691_v39 = vld [vmem:[#allocation5 + $0x364] sm:$0xf]  ;;  %v9564_v41 = vld [vmem:[#allocation5 + $0x370] sm:$0xf0]  ;;  %v9439_v44 = vor.u32 %v13659_v33, %v9436_v35 }
 0x157   :  { %6899 = vmatpush.bf16.msra.mxu0 %v9199_v6  ;;  %v13591_v45 = vld [vmem:[#allocation5 + $0x44] sm:$0xf]  ;;  %v9164_v46 = vld [vmem:[#allocation5 + $0x50] sm:$0xf0]  ;;  %v9567_v49 = vor.u32 %v13691_v39, %v9564_v41  ;;  %v15414_v6 = vadd.f32 %v6684_v56, %v6672_v54 }
 0x158   :  { %6912 = vmatpush.bf16.msra.mxu1 %v9327_v10  ;;  %v13623_v48 = vld [vmem:[#allocation5 + $0x144] sm:$0xf]  ;;  %v9292_v51 = vld [vmem:[#allocation5 + $0x150] sm:$0xf0]  ;;  %v9167_v63 = vor.u32 %v13591_v45, %v9164_v46 }
 0x159   :  { %6925 = vmatpush.bf16.msra.mxu2 %v9455_v14  ;;  %v13655_v52 = vld [vmem:[#allocation5 + $0x244] sm:$0xf]  ;;  %v9420_v53 = vld [vmem:[#allocation5 + $0x250] sm:$0xf0]  ;;  %v9295_v7 = vor.u32 %v13623_v48, %v9292_v51 }
 0x15a   :  { %6938 = vmatpush.bf16.msra.mxu3 %v9583_v28  ;;  %v13687_v57 = vld [vmem:[#allocation5 + $0x344] sm:$0xf]  ;;  %v9548_v58 = vld [vmem:[#allocation5 + $0x350] sm:$0xf0]  ;;  %v9423_v10 = vor.u32 %v13655_v52, %v9420_v53  ;;  %v6673_v53 = vpop.f32.mrf.mxu2 }
 0x15b   :  { %6900 = vmatpush.bf16.msra.mxu0 %v9183_v42  ;;  %v13587_v14 = vld [vmem:[#allocation5 + $0x24] sm:$0xf]  ;;  %v9148_v16 = vld [vmem:[#allocation5 + $0x30] sm:$0xf0]  ;;  %v9551_v12 = vor.u32 %v13687_v57, %v9548_v58  ;;  %v6686_v58 = vpop.f32.mrf.mxu3 }
 0x15c   :  { %6913 = vmatpush.bf16.msra.mxu1 %v9311_v47  ;;  %v13619_v21 = vld [vmem:[#allocation5 + $0x124] sm:$0xf]  ;;  %v9276_v28 = vld [vmem:[#allocation5 + $0x130] sm:$0xf0]  ;;  %v9151_v39 = vor.u32 %v13587_v14, %v9148_v16 }
 0x15d   :  { %6926 = vmatpush.bf16.msra.mxu2 %v9439_v44  ;;  %v13651_v29 = vld [vmem:[#allocation5 + $0x224] sm:$0xf]  ;;  %v9404_v30 = vld [vmem:[#allocation5 + $0x230] sm:$0xf0]  ;;  %v9279_v47 = vor.u32 %v13619_v21, %v9276_v28 }
 0x15e   :  { %6939 = vmatpush.bf16.msra.mxu3 %v9567_v49  ;;  %v13683_v33 = vld [vmem:[#allocation5 + $0x324] sm:$0xf]  ;;  %v9532_v35 = vld [vmem:[#allocation5 + $0x330] sm:$0xf0]  ;;  %v9407_v44 = vor.u32 %v13651_v29, %v9404_v30 }
 0x15f   :  { %6901 = vmatpush.bf16.msra.mxu0 %v9167_v63  ;;  %v13583_v41 = vld [vmem:[#allocation5 + $0x4] sm:$0xf]  ;;  %v9132_v42 = vld [vmem:[#allocation5 + $0x10] sm:$0xf0]  ;;  %v9535_v50 = vor.u32 %v13683_v33, %v9532_v35 }
 0x160   :  { %6914 = vmatpush.bf16.msra.mxu1 %v9295_v7  ;;  %v13615_v45 = vld [vmem:[#allocation5 + $0x104] sm:$0xf]  ;;  %v9260_v46 = vld [vmem:[#allocation5 + $0x110] sm:$0xf0]  ;;  %v9135_v62 = vor.u32 %v13583_v41, %v9132_v42 }
 0x161   :  { %6927 = vmatpush.bf16.msra.mxu2 %v9423_v10  ;;  %v13647_v48 = vld [vmem:[#allocation5 + $0x204] sm:$0xf]  ;;  %v9388_v49 = vld [vmem:[#allocation5 + $0x210] sm:$0xf0]  ;;  %v9263_v10 = vor.u32 %v13615_v45, %v9260_v46 }
 0x162   :  { %6940 = vmatpush.bf16.msra.mxu3 %v9551_v12  ;;  %v13679_v51 = vld [vmem:[#allocation5 + $0x304] sm:$0xf]  ;;  %v9516_v52 = vld [vmem:[#allocation5 + $0x310] sm:$0xf0]  ;;  %v9391_v14 = vor.u32 %v13647_v48, %v9388_v49 }
 0x163   :  { %v13739_v54 = vld [vmem:[#allocation5 + $0x4e4] sm:$0xf]  ;;  %v9756_v56 = vld [vmem:[#allocation5 + $0x4f0] sm:$0xf0]  ;;  %6902 = vmatpush.bf16.msra.mxu0 %v9151_v39  ;;  %v9519_v12 = vor.u32 %v13679_v51, %v9516_v52 }
 0x164   :  { %v13771_v57 = vld [vmem:[#allocation5 + $0x5e4] sm:$0xf]  ;;  %v9884_v63 = vld [vmem:[#allocation5 + $0x5f0] sm:$0xf0]  ;;  %6915 = vmatpush.bf16.msra.mxu1 %v9279_v47  ;;  %v9759_v28 = vor.u32 %v13739_v54, %v9756_v56 }
 0x165   :  { %v13803_v3 = vld [vmem:[#allocation5 + $0x6e4] sm:$0xf]  ;;  %v10012_v7 = vld [vmem:[#allocation5 + $0x6f0] sm:$0xf0]  ;;  %6928 = vmatpush.bf16.msra.mxu2 %v9407_v44  ;;  %v9887_v29 = vor.u32 %v13771_v57, %v9884_v63 }
 0x166   :  { %v13835_v16 = vld [vmem:[#allocation5 + $0x7e4] sm:$0xf]  ;;  %v10140_v21 = vld [vmem:[#allocation5 + $0x7f0] sm:$0xf0]  ;;  %6941 = vmatpush.bf16.msra.mxu3 %v9535_v50  ;;  %v10015_v30 = vor.u32 %v13803_v3, %v10012_v7 }
 0x167   :  { %v13735_v33 = vld [vmem:[#allocation5 + $0x4c4] sm:$0xf]  ;;  %v9740_v35 = vld [vmem:[#allocation5 + $0x4d0] sm:$0xf0]  ;;  %6903 = vmatpush.bf16.msra.mxu0 %v9135_v62  ;;  %v10143_v39 = vor.u32 %v13835_v16, %v10140_v21 }
 0x168   :  { %v13767_v53 = vld [vmem:[#allocation5 + $0x5c4] sm:$0xf]  ;;  %v9868_v41 = vld [vmem:[#allocation5 + $0x5d0] sm:$0xf0]  ;;  %6916 = vmatpush.bf16.msra.mxu1 %v9263_v10  ;;  %v9743_v45 = vor.u32 %v13735_v33, %v9740_v35  ;;  %v6697_v33 = vpop.f32.mrf.mxu0 }
 0x169   :  { %v13799_v42 = vld [vmem:[#allocation5 + $0x6c4] sm:$0xf]  ;;  %v9996_v58 = vld [vmem:[#allocation5 + $0x6d0] sm:$0xf0]  ;;  %6929 = vmatpush.bf16.msra.mxu2 %v9391_v14  ;;  %v9871_v46 = vor.u32 %v13767_v53, %v9868_v41 }
 0x16a   :  { %v13831_v47 = vld [vmem:[#allocation5 + $0x7c4] sm:$0xf]  ;;  %v10124_v44 = vld [vmem:[#allocation5 + $0x7d0] sm:$0xf0]  ;;  %6942 = vmatpush.bf16.msra.mxu3 %v9519_v12  ;;  %v9999_v48 = vor.u32 %v13799_v42, %v9996_v58  ;;  %6904 = vmatmul.bf16.vlgmr.msra.gmra.mxu0 %v15311_v9  ;;  %v6710_v42 = vpop.f32.mrf.mxu1 }
 0x16b   :  { %6948 = vmatpush.bf16.msrb.mxu0 %v9759_v28  ;;  %v13731_v50 = vld [vmem:[#allocation5 + $0x4a4] sm:$0xf]  ;;  %v9724_v49 = vld [vmem:[#allocation5 + $0x4b0] sm:$0xf0]  ;;  %v10127_v52 = vor.u32 %v13831_v47, %v10124_v44  ;;  %6917 = vmatmul.bf16.vlgmr.msra.gmra.mxu1 %v15318_v25 }
 0x16c   :  { %6961 = vmatpush.bf16.msrb.mxu1 %v9887_v29  ;;  %v13763_v51 = vld [vmem:[#allocation5 + $0x5a4] sm:$0xf]  ;;  %v9852_v54 = vld [vmem:[#allocation5 + $0x5b0] sm:$0xf0]  ;;  %6930 = vmatmul.bf16.vlgmr.msra.gmra.mxu2 %v15309_v8  ;;  %v9727_v3 = vor.u32 %v13731_v50, %v9724_v49 }
 0x16d   :  { %6974 = vmatpush.bf16.msrb.mxu2 %v10015_v30  ;;  %v13795_v56 = vld [vmem:[#allocation5 + $0x6a4] sm:$0xf]  ;;  %v9980_v57 = vld [vmem:[#allocation5 + $0x6b0] sm:$0xf0]  ;;  %6943 = vmatmul.bf16.vlgmr.msra.gmra.mxu3 %v15313_v15  ;;  %v9855_v7 = vor.u32 %v13763_v51, %v9852_v54 }
 0x16e   :  { %6987 = vmatpush.bf16.msrb.mxu3 %v10143_v39  ;;  %v13827_v62 = vld [vmem:[#allocation5 + $0x7a4] sm:$0xf]  ;;  %v10108_v63 = vld [vmem:[#allocation5 + $0x7b0] sm:$0xf0]  ;;  %v9983_v10 = vor.u32 %v13795_v56, %v9980_v57  ;;  %v6698_v39 = vadd.f32 %v6697_v33, %v15414_v6 }
 0x16f   :  { %6949 = vmatpush.bf16.msrb.mxu0 %v9743_v45  ;;  %v13727_v14 = vld [vmem:[#allocation5 + $0x484] sm:$0xf]  ;;  %v9708_v16 = vld [vmem:[#allocation5 + $0x490] sm:$0xf0]  ;;  %v10111_v12 = vor.u32 %v13827_v62, %v10108_v63 }
 0x170   :  { %6962 = vmatpush.bf16.msrb.mxu1 %v9871_v46  ;;  %v13759_v21 = vld [vmem:[#allocation5 + $0x584] sm:$0xf]  ;;  %v9836_v28 = vld [vmem:[#allocation5 + $0x590] sm:$0xf0]  ;;  %v9711_v41 = vor.u32 %v13727_v14, %v9708_v16  ;;  %v6711_v50 = vadd.f32 %v6710_v42, %v6698_v39  ;;  %v6723_v14 = vpop.f32.mrf.mxu2 }
 0x171   :  { %6975 = vmatpush.bf16.msrb.mxu2 %v9999_v48  ;;  %v13791_v29 = vld [vmem:[#allocation5 + $0x684] sm:$0xf]  ;;  %v9964_v30 = vld [vmem:[#allocation5 + $0x690] sm:$0xf0]  ;;  %v9839_v58 = vor.u32 %v13759_v21, %v9836_v28 }
 0x172   :  { %6988 = vmatpush.bf16.msrb.mxu3 %v10127_v52  ;;  %v13823_v35 = vld [vmem:[#allocation5 + $0x784] sm:$0xf]  ;;  %v10092_v53 = vld [vmem:[#allocation5 + $0x790] sm:$0xf0]  ;;  %v9967_v47 = vor.u32 %v13791_v29, %v9964_v30  ;;  %v6724_v28 = vadd.f32 %v6723_v14, %v6711_v50  ;;  %v6736_v29 = vpop.f32.mrf.mxu3  ;;  %v6712_v39 = vpop.f32.mrf.mxu1 }
 0x173   :  { %6950 = vmatpush.bf16.msrb.mxu0 %v9727_v3  ;;  %v13723_v44 = vld [vmem:[#allocation5 + $0x464] sm:$0xf]  ;;  %v9692_v45 = vld [vmem:[#allocation5 + $0x470] sm:$0xf0]  ;;  %v10095_v48 = vor.u32 %v13823_v35, %v10092_v53  ;;  %v6699_v35 = vpop.f32.mrf.mxu0 }
 0x174   :  { %6963 = vmatpush.bf16.msrb.mxu1 %v9855_v7  ;;  %v13755_v46 = vld [vmem:[#allocation5 + $0x564] sm:$0xf]  ;;  %v9820_v49 = vld [vmem:[#allocation5 + $0x570] sm:$0xf0]  ;;  %v9695_v57 = vor.u32 %v13723_v44, %v9692_v45 }
 0x175   :  { %6976 = vmatpush.bf16.msrb.mxu2 %v9983_v10  ;;  %v13787_v51 = vld [vmem:[#allocation5 + $0x664] sm:$0xf]  ;;  %v9948_v52 = vld [vmem:[#allocation5 + $0x670] sm:$0xf0]  ;;  %v9823_v6 = vor.u32 %v13755_v46, %v9820_v49 }
 0x176   :  { %6989 = vmatpush.bf16.msrb.mxu3 %v10111_v12  ;;  %v13819_v54 = vld [vmem:[#allocation5 + $0x764] sm:$0xf]  ;;  %v10076_v56 = vld [vmem:[#allocation5 + $0x770] sm:$0xf0]  ;;  %v9951_v62 = vor.u32 %v13787_v51, %v9948_v52 }
 0x177   :  { %6951 = vmatpush.bf16.msrb.mxu0 %v9711_v41  ;;  %v13719_v63 = vld [vmem:[#allocation5 + $0x444] sm:$0xf]  ;;  %v9676_v3 = vld [vmem:[#allocation5 + $0x450] sm:$0xf0]  ;;  %v10079_v10 = vor.u32 %v13819_v54, %v10076_v56  ;;  %v15421_v41 = vadd.f32 %v6736_v29, %v6724_v28 }
 0x178   :  { %6964 = vmatpush.bf16.msrb.mxu1 %v9839_v58  ;;  %v13751_v7 = vld [vmem:[#allocation5 + $0x544] sm:$0xf]  ;;  %v9804_v16 = vld [vmem:[#allocation5 + $0x550] sm:$0xf0]  ;;  %v9679_v53 = vor.u32 %v13719_v63, %v9676_v3 }
 0x179   :  { %6977 = vmatpush.bf16.msrb.mxu2 %v9967_v47  ;;  %v13783_v21 = vld [vmem:[#allocation5 + $0x644] sm:$0xf]  ;;  %v9932_v12 = vld [vmem:[#allocation5 + $0x650] sm:$0xf0]  ;;  %v9807_v42 = vor.u32 %v13751_v7, %v9804_v16 }
 0x17a   :  { %6990 = vmatpush.bf16.msrb.mxu3 %v10095_v48  ;;  %v13815_v30 = vld [vmem:[#allocation5 + $0x744] sm:$0xf]  ;;  %v10060_v33 = vld [vmem:[#allocation5 + $0x750] sm:$0xf0]  ;;  %v9935_v58 = vor.u32 %v13783_v21, %v9932_v12  ;;  %v6725_v12 = vpop.f32.mrf.mxu2 }
 0x17b   :  { %6952 = vmatpush.bf16.msrb.mxu0 %v9695_v57  ;;  %v13715_v47 = vld [vmem:[#allocation5 + $0x424] sm:$0xf]  ;;  %v9660_v44 = vld [vmem:[#allocation5 + $0x430] sm:$0xf0]  ;;  %v10063_v46 = vor.u32 %v13815_v30, %v10060_v33  ;;  %v6738_v33 = vpop.f32.mrf.mxu3 }
 0x17c   :  { %6965 = vmatpush.bf16.msrb.mxu1 %v9823_v6  ;;  %v13747_v45 = vld [vmem:[#allocation5 + $0x524] sm:$0xf]  ;;  %v9788_v48 = vld [vmem:[#allocation5 + $0x530] sm:$0xf0]  ;;  %v9663_v54 = vor.u32 %v13715_v47, %v9660_v44 }
 0x17d   :  { %6978 = vmatpush.bf16.msrb.mxu2 %v9951_v62  ;;  %v13779_v50 = vld [vmem:[#allocation5 + $0x624] sm:$0xf]  ;;  %v9916_v49 = vld [vmem:[#allocation5 + $0x630] sm:$0xf0]  ;;  %v9791_v6 = vor.u32 %v13747_v45, %v9788_v48 }
 0x17e   :  { %6991 = vmatpush.bf16.msrb.mxu3 %v10079_v10  ;;  %v13811_v51 = vld [vmem:[#allocation5 + $0x724] sm:$0xf]  ;;  %v10044_v52 = vld [vmem:[#allocation5 + $0x730] sm:$0xf0]  ;;  %v9919_v62 = vor.u32 %v13779_v50, %v9916_v49 }
 0x17f   :  { %6953 = vmatpush.bf16.msrb.mxu0 %v9679_v53  ;;  %v13711_v56 = vld [vmem:[#allocation5 + $0x404] sm:$0xf]  ;;  %v9644_v57 = vld [vmem:[#allocation5 + $0x410] sm:$0xf0]  ;;  %v10047_v14 = vor.u32 %v13811_v51, %v10044_v52 }
 0x180   :  { %6966 = vmatpush.bf16.msrb.mxu1 %v9807_v42  ;;  %v13743_v63 = vld [vmem:[#allocation5 + $0x504] sm:$0xf]  ;;  %v9772_v3 = vld [vmem:[#allocation5 + $0x510] sm:$0xf0]  ;;  %v9647_v35 = vor.u32 %v13711_v56, %v9644_v57 }
 0x181   :  { %6979 = vmatpush.bf16.msrb.mxu2 %v9935_v58  ;;  %v13775_v7 = vld [vmem:[#allocation5 + $0x604] sm:$0xf]  ;;  %v9900_v10 = vld [vmem:[#allocation5 + $0x610] sm:$0xf0]  ;;  %v9775_v58 = vor.u32 %v13743_v63, %v9772_v3 }
 0x182   :  { %6992 = vmatpush.bf16.msrb.mxu3 %v10063_v46  ;;  %v13807_v16 = vld [vmem:[#allocation5 + $0x704] sm:$0xf]  ;;  %v10028_v21 = vld [vmem:[#allocation5 + $0x710] sm:$0xf0]  ;;  %v9903_v47 = vor.u32 %v13775_v7, %v9900_v10 }
 0x183   :  { %v13867_v28 = vld [vmem:[#allocation5 + $0x8e4] sm:$0xf]  ;;  %v10268_v29 = vld [vmem:[#allocation5 + $0x8f0] sm:$0xf0]  ;;  %6954 = vmatpush.bf16.msrb.mxu0 %v9663_v54  ;;  %v10031_v46 = vor.u32 %v13807_v16, %v10028_v21 }
 0x184   :  { %v13899_v30 = vld [vmem:[#allocation5 + $0x9e4] sm:$0xf]  ;;  %v10396_v53 = vld [vmem:[#allocation5 + $0x9f0] sm:$0xf0]  ;;  %6967 = vmatpush.bf16.msrb.mxu1 %v9791_v6  ;;  %v10271_v48 = vor.u32 %v13867_v28, %v10268_v29 }
 0x185   :  { %v13931_v39 = vld [vmem:[#allocation5 + $0xae4] sm:$0xf]  ;;  %v10524_v42 = vld [vmem:[#allocation5 + $0xaf0] sm:$0xf0]  ;;  %6980 = vmatpush.bf16.msrb.mxu2 %v9919_v62  ;;  %v10399_v50 = vor.u32 %v13899_v30, %v10396_v53 }
 0x186   :  { %v13963_v44 = vld [vmem:[#allocation5 + $0xbe4] sm:$0xf]  ;;  %v10652_v45 = vld [vmem:[#allocation5 + $0xbf0] sm:$0xf0]  ;;  %6993 = vmatpush.bf16.msrb.mxu3 %v10047_v14  ;;  %v10527_v49 = vor.u32 %v13931_v39, %v10524_v42 }
 0x187   :  { %v13863_v51 = vld [vmem:[#allocation5 + $0x8c4] sm:$0xf]  ;;  %v10252_v52 = vld [vmem:[#allocation5 + $0x8d0] sm:$0xf0]  ;;  %6955 = vmatpush.bf16.msrb.mxu0 %v9647_v35  ;;  %v10655_v54 = vor.u32 %v13963_v44, %v10652_v45 }
 0x188   :  { %v13895_v12 = vld [vmem:[#allocation5 + $0x9c4] sm:$0xf]  ;;  %v10380_v56 = vld [vmem:[#allocation5 + $0x9d0] sm:$0xf0]  ;;  %6968 = vmatpush.bf16.msrb.mxu1 %v9775_v58  ;;  %v10255_v63 = vor.u32 %v13863_v51, %v10252_v52 }
 0x189   :  { %v13927_v57 = vld [vmem:[#allocation5 + $0xac4] sm:$0xf]  ;;  %v10508_v33 = vld [vmem:[#allocation5 + $0xad0] sm:$0xf0]  ;;  %6981 = vmatpush.bf16.msrb.mxu2 %v9903_v47  ;;  %v10383_v3 = vor.u32 %v13895_v12, %v10380_v56 }
 0x18a   :  { %v13959_v6 = vld [vmem:[#allocation5 + $0xbc4] sm:$0xf]  ;;  %v10636_v62 = vld [vmem:[#allocation5 + $0xbd0] sm:$0xf0]  ;;  %6994 = vmatpush.bf16.msrb.mxu3 %v10031_v46  ;;  %v10511_v7 = vor.u32 %v13927_v57, %v10508_v33  ;;  %6956 = vmatmul.bf16.vlgmr.msrb.gmra.mxu0 %v15323_v37  ;;  %v6749_v51 = vpop.f32.mrf.mxu0  ;;  %v6762_v57 = vpop.f32.mrf.mxu1 }
 0x18b   :  { %7000 = vmatpush.bf16.msra.mxu0 %v10271_v48  ;;  %v13859_v14 = vld [vmem:[#allocation5 + $0x8a4] sm:$0xf]  ;;  %v10236_v10 = vld [vmem:[#allocation5 + $0x8b0] sm:$0xf0]  ;;  %v10639_v21 = vor.u32 %v13959_v6, %v10636_v62  ;;  %6969 = vmatmul.bf16.vlgmr.msrb.gmra.mxu1 %v15327_v40 }
 0x18c   :  { %7013 = vmatpush.bf16.msra.mxu1 %v10399_v50  ;;  %v13891_v16 = vld [vmem:[#allocation5 + $0x9a4] sm:$0xf]  ;;  %6982 = vmatmul.bf16.vlgmr.msrb.gmra.mxu2 %v15321_v34  ;;  %v10364_v28 = vld [vmem:[#allocation5 + $0x9b0] sm:$0xf0]  ;;  %v10239_v39 = vor.u32 %v13859_v14, %v10236_v10 }
 0x18d   :  { %7026 = vmatpush.bf16.msra.mxu2 %v10527_v49  ;;  %v13923_v29 = vld [vmem:[#allocation5 + $0xaa4] sm:$0xf]  ;;  %v10492_v30 = vld [vmem:[#allocation5 + $0xab0] sm:$0xf0]  ;;  %6995 = vmatmul.bf16.vlgmr.msrb.gmra.mxu3 %v15325_v38  ;;  %v10367_v42 = vor.u32 %v13891_v16, %v10364_v28 }
 0x18e   :  { %7039 = vmatpush.bf16.msra.mxu3 %v10655_v54  ;;  %v13955_v35 = vld [vmem:[#allocation5 + $0xba4] sm:$0xf]  ;;  %v10620_v53 = vld [vmem:[#allocation5 + $0xbb0] sm:$0xf0]  ;;  %v10495_v58 = vor.u32 %v13923_v29, %v10492_v30  ;;  %v6750_v54 = vadd.f32 %v6749_v51, %v15421_v41 }
 0x18f   :  { %7001 = vmatpush.bf16.msra.mxu0 %v10255_v63  ;;  %v13855_v47 = vld [vmem:[#allocation5 + $0x884] sm:$0xf]  ;;  %v10220_v44 = vld [vmem:[#allocation5 + $0x890] sm:$0xf0]  ;;  %v10623_v46 = vor.u32 %v13955_v35, %v10620_v53 }
 0x190   :  { %7014 = vmatpush.bf16.msra.mxu1 %v10383_v3  ;;  %v13887_v45 = vld [vmem:[#allocation5 + $0x984] sm:$0xf]  ;;  %v10348_v48 = vld [vmem:[#allocation5 + $0x990] sm:$0xf0]  ;;  %v10223_v56 = vor.u32 %v13855_v47, %v10220_v44  ;;  %v6763_v14 = vadd.f32 %v6762_v57, %v6750_v54  ;;  %v6775_v47 = vpop.f32.mrf.mxu2 }
 0x191   :  { %7027 = vmatpush.bf16.msra.mxu2 %v10511_v7  ;;  %v13919_v50 = vld [vmem:[#allocation5 + $0xa84] sm:$0xf]  ;;  %v10476_v49 = vld [vmem:[#allocation5 + $0xa90] sm:$0xf0]  ;;  %v10351_v33 = vor.u32 %v13887_v45, %v10348_v48 }
 0x192   :  { %7040 = vmatpush.bf16.msra.mxu3 %v10639_v21  ;;  %v13951_v52 = vld [vmem:[#allocation5 + $0xb84] sm:$0xf]  ;;  %v10604_v12 = vld [vmem:[#allocation5 + $0xb90] sm:$0xf0]  ;;  %v10479_v6 = vor.u32 %v13919_v50, %v10476_v49  ;;  %v6776_v48 = vadd.f32 %v6775_v47, %v6763_v14  ;;  %v6788_v50 = vpop.f32.mrf.mxu3  ;;  %v6764_v54 = vpop.f32.mrf.mxu1 }
 0x193   :  { %7002 = vmatpush.bf16.msra.mxu0 %v10239_v39  ;;  %v13851_v62 = vld [vmem:[#allocation5 + $0x864] sm:$0xf]  ;;  %v10204_v63 = vld [vmem:[#allocation5 + $0x870] sm:$0xf0]  ;;  %v10607_v7 = vor.u32 %v13951_v52, %v10604_v12  ;;  %v6751_v52 = vpop.f32.mrf.mxu0 }
 0x194   :  { %7015 = vmatpush.bf16.msra.mxu1 %v10367_v42  ;;  %v13883_v3 = vld [vmem:[#allocation5 + $0x964] sm:$0xf]  ;;  %v10332_v10 = vld [vmem:[#allocation5 + $0x970] sm:$0xf0]  ;;  %v10207_v30 = vor.u32 %v13851_v62, %v10204_v63 }
 0x195   :  { %7028 = vmatpush.bf16.msra.mxu2 %v10495_v58  ;;  %v13915_v16 = vld [vmem:[#allocation5 + $0xa64] sm:$0xf]  ;;  %v10460_v21 = vld [vmem:[#allocation5 + $0xa70] sm:$0xf0]  ;;  %v10335_v41 = vor.u32 %v13883_v3, %v10332_v10 }
 0x196   :  { %7041 = vmatpush.bf16.msra.mxu3 %v10623_v46  ;;  %v13947_v28 = vld [vmem:[#allocation5 + $0xb64] sm:$0xf]  ;;  %v10588_v29 = vld [vmem:[#allocation5 + $0xb70] sm:$0xf0]  ;;  %v10463_v35 = vor.u32 %v13915_v16, %v10460_v21 }
 0x197   :  { %7003 = vmatpush.bf16.msra.mxu0 %v10223_v56  ;;  %v13847_v53 = vld [vmem:[#allocation5 + $0x844] sm:$0xf]  ;;  %v10188_v39 = vld [vmem:[#allocation5 + $0x850] sm:$0xf0]  ;;  %v10591_v58 = vor.u32 %v13947_v28, %v10588_v29  ;;  %v15428_v56 = vadd.f32 %v6788_v50, %v6776_v48 }
 0x198   :  { %7016 = vmatpush.bf16.msra.mxu1 %v10351_v33  ;;  %v13879_v42 = vld [vmem:[#allocation5 + $0x944] sm:$0xf]  ;;  %v10316_v44 = vld [vmem:[#allocation5 + $0x950] sm:$0xf0]  ;;  %v10191_v12 = vor.u32 %v13847_v53, %v10188_v39 }
 0x199   :  { %7029 = vmatpush.bf16.msra.mxu2 %v10479_v6  ;;  %v13911_v45 = vld [vmem:[#allocation5 + $0xa44] sm:$0xf]  ;;  %v10444_v46 = vld [vmem:[#allocation5 + $0xa50] sm:$0xf0]  ;;  %v10319_v57 = vor.u32 %v13879_v42, %v10316_v44 }
 0x19a   :  { %7042 = vmatpush.bf16.msra.mxu3 %v10607_v7  ;;  %v13943_v49 = vld [vmem:[#allocation5 + $0xb44] sm:$0xf]  ;;  %v10572_v51 = vld [vmem:[#allocation5 + $0xb50] sm:$0xf0]  ;;  %v10447_v33 = vor.u32 %v13911_v45, %v10444_v46  ;;  %v6777_v46 = vpop.f32.mrf.mxu2 }
 0x19b   :  { %7004 = vmatpush.bf16.msra.mxu0 %v10207_v30  ;;  %v13843_v6 = vld [vmem:[#allocation5 + $0x824] sm:$0xf]  ;;  %v10172_v62 = vld [vmem:[#allocation5 + $0x830] sm:$0xf0]  ;;  %v10575_v3 = vor.u32 %v13943_v49, %v10572_v51  ;;  %v6790_v51 = vpop.f32.mrf.mxu3 }
 0x19c   :  { %7017 = vmatpush.bf16.msra.mxu1 %v10335_v41  ;;  %v13875_v63 = vld [vmem:[#allocation5 + $0x924] sm:$0xf]  ;;  %v10300_v7 = vld [vmem:[#allocation5 + $0x930] sm:$0xf0]  ;;  %v10175_v28 = vor.u32 %v13843_v6, %v10172_v62 }
 0x19d   :  { %7030 = vmatpush.bf16.msra.mxu2 %v10463_v35  ;;  %v13907_v14 = vld [vmem:[#allocation5 + $0xa24] sm:$0xf]  ;;  %v10428_v10 = vld [vmem:[#allocation5 + $0xa30] sm:$0xf0]  ;;  %v10303_v41 = vor.u32 %v13875_v63, %v10300_v7 }
 0x19e   :  { %7043 = vmatpush.bf16.msra.mxu3 %v10591_v58  ;;  %v13939_v16 = vld [vmem:[#allocation5 + $0xb24] sm:$0xf]  ;;  %v10556_v21 = vld [vmem:[#allocation5 + $0xb30] sm:$0xf0]  ;;  %v10431_v35 = vor.u32 %v13907_v14, %v10428_v10 }
 0x19f   :  { %7005 = vmatpush.bf16.msra.mxu0 %v10191_v12  ;;  %v13839_v29 = vld [vmem:[#allocation5 + $0x804] sm:$0xf]  ;;  %v10156_v30 = vld [vmem:[#allocation5 + $0x810] sm:$0xf0]  ;;  %v10559_v47 = vor.u32 %v13939_v16, %v10556_v21 }
 0x1a0   :  { %7018 = vmatpush.bf16.msra.mxu1 %v10319_v57  ;;  %v13871_v53 = vld [vmem:[#allocation5 + $0x904] sm:$0xf]  ;;  %v10284_v39 = vld [vmem:[#allocation5 + $0x910] sm:$0xf0]  ;;  %v10159_v52 = vor.u32 %v13839_v29, %v10156_v30 }
 0x1a1   :  { %7031 = vmatpush.bf16.msra.mxu2 %v10447_v33  ;;  %v13903_v42 = vld [vmem:[#allocation5 + $0xa04] sm:$0xf]  ;;  %v10412_v58 = vld [vmem:[#allocation5 + $0xa10] sm:$0xf0]  ;;  %v10287_v33 = vor.u32 %v13871_v53, %v10284_v39 }
 0x1a2   :  { %7044 = vmatpush.bf16.msra.mxu3 %v10575_v3  ;;  %v13935_v44 = vld [vmem:[#allocation5 + $0xb04] sm:$0xf]  ;;  %v10540_v45 = vld [vmem:[#allocation5 + $0xb10] sm:$0xf0]  ;;  %v10415_v6 = vor.u32 %v13903_v42, %v10412_v58 }
 0x1a3   :  { %v13995_v48 = vld [vmem:[#allocation5 + $0xce4] sm:$0xf]  ;;  %v10780_v50 = vld [vmem:[#allocation5 + $0xcf0] sm:$0xf0]  ;;  %7006 = vmatpush.bf16.msra.mxu0 %v10175_v28  ;;  %v10543_v3 = vor.u32 %v13935_v44, %v10540_v45 }
 0x1a4   :  { %v14027_v49 = vld [vmem:[#allocation5 + $0xde4] sm:$0xf]  ;;  %v10908_v12 = vld [vmem:[#allocation5 + $0xdf0] sm:$0xf0]  ;;  %7019 = vmatpush.bf16.msra.mxu1 %v10303_v41  ;;  %v10783_v7 = vor.u32 %v13995_v48, %v10780_v50 }
 0x1a5   :  { %v14059_v54 = vld [vmem:[#allocation5 + $0xee4] sm:$0xf]  ;;  %v11036_v57 = vld [vmem:[#allocation5 + $0xef0] sm:$0xf0]  ;;  %7032 = vmatpush.bf16.msra.mxu2 %v10431_v35  ;;  %v10911_v14 = vor.u32 %v14027_v49, %v10908_v12 }
 0x1a6   :  { %v14091_v62 = vld [vmem:[#allocation5 + $0xfe4] sm:$0xf]  ;;  %v11164_v63 = vld [vmem:[#allocation5 + $0xff0] sm:$0xf0]  ;;  %7045 = vmatpush.bf16.msra.mxu3 %v10559_v47  ;;  %v11039_v10 = vor.u32 %v14059_v54, %v11036_v57 }
 0x1a7   :  { %v13991_v16 = vld [vmem:[#allocation5 + $0xcc4] sm:$0xf]  ;;  %v10764_v21 = vld [vmem:[#allocation5 + $0xcd0] sm:$0xf0]  ;;  %7007 = vmatpush.bf16.msra.mxu0 %v10159_v52  ;;  %v11167_v28 = vor.u32 %v14091_v62, %v11164_v63 }
 0x1a8   :  { %v14023_v46 = vld [vmem:[#allocation5 + $0xdc4] sm:$0xf]  ;;  %v10892_v29 = vld [vmem:[#allocation5 + $0xdd0] sm:$0xf0]  ;;  %7020 = vmatpush.bf16.msra.mxu1 %v10287_v33  ;;  %v10767_v53 = vor.u32 %v13991_v16, %v10764_v21 }
 0x1a9   :  { %v14055_v30 = vld [vmem:[#allocation5 + $0xec4] sm:$0xf]  ;;  %v11020_v51 = vld [vmem:[#allocation5 + $0xed0] sm:$0xf0]  ;;  %7033 = vmatpush.bf16.msra.mxu2 %v10415_v6  ;;  %v10895_v39 = vor.u32 %v14023_v46, %v10892_v29 }
 0x1aa   :  { %v14087_v41 = vld [vmem:[#allocation5 + $0xfc4] sm:$0xf]  ;;  %v11148_v35 = vld [vmem:[#allocation5 + $0xfd0] sm:$0xf0]  ;;  %7046 = vmatpush.bf16.msra.mxu3 %v10543_v3  ;;  %v11023_v42 = vor.u32 %v14055_v30, %v11020_v51  ;;  %7008 = vmatmul.bf16.vlgmr.msra.gmra.mxu0 %v15333_v18  ;;  %v6814_v30 = vpop.f32.mrf.mxu1 }
 0x1ab   :  { %7052 = vmatpush.bf16.msrb.mxu0 %v10783_v7  ;;  %v13987_v47 = vld [vmem:[#allocation5 + $0xca4] sm:$0xf]  ;;  %v10748_v58 = vld [vmem:[#allocation5 + $0xcb0] sm:$0xf0]  ;;  %v11151_v45 = vor.u32 %v14087_v41, %v11148_v35  ;;  %7021 = vmatmul.bf16.vlgmr.msra.gmra.mxu1 %v15337_v23  ;;  %v6801_v16 = vpop.f32.mrf.mxu0 }
 0x1ac   :  { %7065 = vmatpush.bf16.msrb.mxu1 %v10911_v14  ;;  %v14019_v44 = vld [vmem:[#allocation5 + $0xda4] sm:$0xf]  ;;  %v10876_v48 = vld [vmem:[#allocation5 + $0xdb0] sm:$0xf0]  ;;  %7034 = vmatmul.bf16.vlgmr.msra.gmra.mxu2 %v15335_v22  ;;  %v10751_v54 = vor.u32 %v13987_v47, %v10748_v58 }
 0x1ad   :  { %7078 = vmatpush.bf16.msrb.mxu2 %v11039_v10  ;;  %v14051_v50 = vld [vmem:[#allocation5 + $0xea4] sm:$0xf]  ;;  %v11004_v49 = vld [vmem:[#allocation5 + $0xeb0] sm:$0xf0]  ;;  %7047 = vmatmul.bf16.vlgmr.msra.gmra.mxu3 %v15339_v27  ;;  %v10879_v57 = vor.u32 %v14019_v44, %v10876_v48 }
 0x1ae   :  { %7091 = vmatpush.bf16.msrb.mxu3 %v11167_v28  ;;  %v14083_v52 = vld [vmem:[#allocation5 + $0xfa4] sm:$0xf]  ;;  %v11132_v12 = vld [vmem:[#allocation5 + $0xfb0] sm:$0xf0]  ;;  %v11007_v33 = vor.u32 %v14051_v50, %v11004_v49  ;;  %v6802_v28 = vadd.f32 %v6801_v16, %v15428_v56 }
 0x1af   :  { %7053 = vmatpush.bf16.msrb.mxu0 %v10767_v53  ;;  %v13983_v6 = vld [vmem:[#allocation5 + $0xc84] sm:$0xf]  ;;  %v10732_v62 = vld [vmem:[#allocation5 + $0xc90] sm:$0xf0]  ;;  %v11135_v3 = vor.u32 %v14083_v52, %v11132_v12 }
 0x1b0   :  { %7066 = vmatpush.bf16.msrb.mxu1 %v10895_v39  ;;  %v14015_v63 = vld [vmem:[#allocation5 + $0xd84] sm:$0xf]  ;;  %v10860_v7 = vld [vmem:[#allocation5 + $0xd90] sm:$0xf0]  ;;  %v10735_v29 = vor.u32 %v13983_v6, %v10732_v62  ;;  %v6815_v47 = vadd.f32 %v6814_v30, %v6802_v28  ;;  %v6827_v6 = vpop.f32.mrf.mxu2 }
 0x1b1   :  { %7079 = vmatpush.bf16.msrb.mxu2 %v11023_v42  ;;  %v14047_v14 = vld [vmem:[#allocation5 + $0xe84] sm:$0xf]  ;;  %v10988_v10 = vld [vmem:[#allocation5 + $0xe90] sm:$0xf0]  ;;  %v10863_v51 = vor.u32 %v14015_v63, %v10860_v7 }
 0x1b2   :  { %7092 = vmatpush.bf16.msrb.mxu3 %v11151_v45  ;;  %v14079_v21 = vld [vmem:[#allocation5 + $0xf84] sm:$0xf]  ;;  %v11116_v46 = vld [vmem:[#allocation5 + $0xf90] sm:$0xf0]  ;;  %v10991_v41 = vor.u32 %v14047_v14, %v10988_v10  ;;  %v6828_v7 = vadd.f32 %v6827_v6, %v6815_v47  ;;  %v6840_v14 = vpop.f32.mrf.mxu3  ;;  %v6816_v28 = vpop.f32.mrf.mxu1 }
 0x1b3   :  { %7054 = vmatpush.bf16.msrb.mxu0 %v10751_v54  ;;  %v13979_v35 = vld [vmem:[#allocation5 + $0xc64] sm:$0xf]  ;;  %v10716_v53 = vld [vmem:[#allocation5 + $0xc70] sm:$0xf0]  ;;  %v11119_v42 = vor.u32 %v14079_v21, %v11116_v46  ;;  %v6803_v21 = vpop.f32.mrf.mxu0 }
 0x1b4   :  { %7067 = vmatpush.bf16.msrb.mxu1 %v10879_v57  ;;  %v14011_v39 = vld [vmem:[#allocation5 + $0xd64] sm:$0xf]  ;;  %v10844_v58 = vld [vmem:[#allocation5 + $0xd70] sm:$0xf0]  ;;  %v10719_v49 = vor.u32 %v13979_v35, %v10716_v53 }
 0x1b5   :  { %7080 = vmatpush.bf16.msrb.mxu2 %v11007_v33  ;;  %v14043_v44 = vld [vmem:[#allocation5 + $0xe64] sm:$0xf]  ;;  %v10972_v45 = vld [vmem:[#allocation5 + $0xe70] sm:$0xf0]  ;;  %v10847_v56 = vor.u32 %v14011_v39, %v10844_v58 }
 0x1b6   :  { %7093 = vmatpush.bf16.msrb.mxu3 %v11135_v3  ;;  %v14075_v48 = vld [vmem:[#allocation5 + $0xf64] sm:$0xf]  ;;  %v11100_v50 = vld [vmem:[#allocation5 + $0xf70] sm:$0xf0]  ;;  %v10975_v52 = vor.u32 %v14043_v44, %v10972_v45 }
 0x1b7   :  { %7055 = vmatpush.bf16.msrb.mxu0 %v10735_v29  ;;  %v13975_v12 = vld [vmem:[#allocation5 + $0xc44] sm:$0xf]  ;;  %v10700_v54 = vld [vmem:[#allocation5 + $0xc50] sm:$0xf0]  ;;  %v11103_v33 = vor.u32 %v14075_v48, %v11100_v50  ;;  %v15435_v29 = vadd.f32 %v6840_v14, %v6828_v7 }
 0x1b8   :  { %7068 = vmatpush.bf16.msrb.mxu1 %v10863_v51  ;;  %v14007_v57 = vld [vmem:[#allocation5 + $0xd44] sm:$0xf]  ;;  %v10828_v62 = vld [vmem:[#allocation5 + $0xd50] sm:$0xf0]  ;;  %v10703_v46 = vor.u32 %v13975_v12, %v10700_v54 }
 0x1b9   :  { %7081 = vmatpush.bf16.msrb.mxu2 %v10991_v41  ;;  %v14039_v63 = vld [vmem:[#allocation5 + $0xe44] sm:$0xf]  ;;  %v10956_v3 = vld [vmem:[#allocation5 + $0xe50] sm:$0xf0]  ;;  %v10831_v30 = vor.u32 %v14007_v57, %v10828_v62 }
 0x1ba   :  { %7094 = vmatpush.bf16.msrb.mxu3 %v11119_v42  ;;  %v14071_v10 = vld [vmem:[#allocation5 + $0xf44] sm:$0xf]  ;;  %v11084_v16 = vld [vmem:[#allocation5 + $0xf50] sm:$0xf0]  ;;  %v10959_v51 = vor.u32 %v14039_v63, %v10956_v3  ;;  %v6829_v3 = vpop.f32.mrf.mxu2 }
 0x1bb   :  { %7056 = vmatpush.bf16.msrb.mxu0 %v10719_v49  ;;  %v13971_v41 = vld [vmem:[#allocation5 + $0xc24] sm:$0xf]  ;;  %v10684_v35 = vld [vmem:[#allocation5 + $0xc30] sm:$0xf0]  ;;  %v11087_v39 = vor.u32 %v14071_v10, %v11084_v16  ;;  %v6842_v16 = vpop.f32.mrf.mxu3 }
 0x1bc   :  { %7069 = vmatpush.bf16.msrb.mxu1 %v10847_v56  ;;  %v14003_v53 = vld [vmem:[#allocation5 + $0xd24] sm:$0xf]  ;;  %v10812_v42 = vld [vmem:[#allocation5 + $0xd30] sm:$0xf0]  ;;  %v10687_v48 = vor.u32 %v13971_v41, %v10684_v35 }
 0x1bd   :  { %7082 = vmatpush.bf16.msrb.mxu2 %v10975_v52  ;;  %v14035_v47 = vld [vmem:[#allocation5 + $0xe24] sm:$0xf]  ;;  %v10940_v58 = vld [vmem:[#allocation5 + $0xe30] sm:$0xf0]  ;;  %v10815_v56 = vor.u32 %v14003_v53, %v10812_v42 }
 0x1be   :  { %7095 = vmatpush.bf16.msrb.mxu3 %v11103_v33  ;;  %v14067_v44 = vld [vmem:[#allocation5 + $0xf24] sm:$0xf]  ;;  %v11068_v45 = vld [vmem:[#allocation5 + $0xf30] sm:$0xf0]  ;;  %v10943_v52 = vor.u32 %v14035_v47, %v10940_v58 }
 0x1bf   :  { %7057 = vmatpush.bf16.msrb.mxu0 %v10703_v46  ;;  %v13967_v50 = vld [vmem:[#allocation5 + $0xc04] sm:$0xf]  ;;  %v10668_v49 = vld [vmem:[#allocation5 + $0xc10] sm:$0xf0]  ;;  %v11071_v6 = vor.u32 %v14067_v44, %v11068_v45 }
 0x1c0   :  { %7070 = vmatpush.bf16.msrb.mxu1 %v10831_v30  ;;  %v13999_v12 = vld [vmem:[#allocation5 + $0xd04] sm:$0xf]  ;;  %v10796_v54 = vld [vmem:[#allocation5 + $0xd10] sm:$0xf0]  ;;  %v10671_v21 = vor.u32 %v13967_v50, %v10668_v49 }
 0x1c1   :  { %7083 = vmatpush.bf16.msrb.mxu2 %v10959_v51  ;;  %v14031_v57 = vld [vmem:[#allocation5 + $0xe04] sm:$0xf]  ;;  %v10924_v33 = vld [vmem:[#allocation5 + $0xe10] sm:$0xf0]  ;;  %v10799_v51 = vor.u32 %v13999_v12, %v10796_v54 }
 0x1c2   :  { %7096 = vmatpush.bf16.msrb.mxu3 %v11087_v39  ;;  %v14063_v62 = vld [vmem:[#allocation5 + $0xf04] sm:$0xf]  ;;  %v11052_v63 = vld [vmem:[#allocation5 + $0xf10] sm:$0xf0]  ;;  %v10927_v41 = vor.u32 %v14031_v57, %v10924_v33 }
 0x1c3   :  { %v14123_v7 = vld [vmem:[#allocation5 + $0x10e4] sm:$0xf]  ;;  %v11292_v14 = vld [vmem:[#allocation5 + $0x10f0] sm:$0xf0]  ;;  %7058 = vmatpush.bf16.msrb.mxu0 %v10687_v48  ;;  %v11055_v39 = vor.u32 %v14063_v62, %v11052_v63 }
 0x1c4   :  { %v14155_v10 = vld [vmem:[#allocation5 + $0x11e4] sm:$0xf]  ;;  %v11420_v46 = vld [vmem:[#allocation5 + $0x11f0] sm:$0xf0]  ;;  %7071 = vmatpush.bf16.msrb.mxu1 %v10815_v56  ;;  %v11295_v42 = vor.u32 %v14123_v7, %v11292_v14 }
 0x1c5   :  { %v14187_v28 = vld [vmem:[#allocation5 + $0x12e4] sm:$0xf]  ;;  %v11548_v30 = vld [vmem:[#allocation5 + $0x12f0] sm:$0xf0]  ;;  %7084 = vmatpush.bf16.msrb.mxu2 %v10943_v52  ;;  %v11423_v47 = vor.u32 %v14155_v10, %v11420_v46 }
 0x1c6   :  { %v14219_v35 = vld [vmem:[#allocation5 + $0x13e4] sm:$0xf]  ;;  %v11676_v53 = vld [vmem:[#allocation5 + $0x13f0] sm:$0xf0]  ;;  %7097 = vmatpush.bf16.msrb.mxu3 %v11071_v6  ;;  %v11551_v58 = vor.u32 %v14187_v28, %v11548_v30 }
 0x1c7   :  { %v14119_v44 = vld [vmem:[#allocation5 + $0x10c4] sm:$0xf]  ;;  %v11276_v45 = vld [vmem:[#allocation5 + $0x10d0] sm:$0xf0]  ;;  %7059 = vmatpush.bf16.msrb.mxu0 %v10671_v21  ;;  %v11679_v48 = vor.u32 %v14219_v35, %v11676_v53 }
 0x1c8   :  { %v14151_v3 = vld [vmem:[#allocation5 + $0x11c4] sm:$0xf]  ;;  %v11404_v50 = vld [vmem:[#allocation5 + $0x11d0] sm:$0xf0]  ;;  %7072 = vmatpush.bf16.msrb.mxu1 %v10799_v51  ;;  %v11279_v12 = vor.u32 %v14119_v44, %v11276_v45 }
 0x1c9   :  { %v14183_v49 = vld [vmem:[#allocation5 + $0x12c4] sm:$0xf]  ;;  %v11532_v16 = vld [vmem:[#allocation5 + $0x12d0] sm:$0xf0]  ;;  %7085 = vmatpush.bf16.msrb.mxu2 %v10927_v41  ;;  %v11407_v54 = vor.u32 %v14151_v3, %v11404_v50  ;;  %v6853_v44 = vpop.f32.mrf.mxu0 }
 0x1ca   :  { %v14215_v56 = vld [vmem:[#allocation5 + $0x13c4] sm:$0xf]  ;;  %v11660_v52 = vld [vmem:[#allocation5 + $0x13d0] sm:$0xf0]  ;;  %7098 = vmatpush.bf16.msrb.mxu3 %v11055_v39  ;;  %v11535_v57 = vor.u32 %v14183_v49, %v11532_v16  ;;  %7060 = vmatmul.bf16.vlgmr.msrb.gmra.mxu0 %v15345_v13  ;;  %v6866_v49 = vpop.f32.mrf.mxu1 }
 0x1cb   :  { %7104 = vmatpush.bf16.msra.mxu0 %v11295_v42  ;;  %v14115_v6 = vld [vmem:[#allocation5 + $0x10a4] sm:$0xf]  ;;  %v11260_v33 = vld [vmem:[#allocation5 + $0x10b0] sm:$0xf0]  ;;  %v11663_v63 = vor.u32 %v14215_v56, %v11660_v52  ;;  %7073 = vmatmul.bf16.vlgmr.msrb.gmra.mxu1 %v15349_v20 }
 0x1cc   :  { %7117 = vmatpush.bf16.msra.mxu1 %v11423_v47  ;;  %v14147_v62 = vld [vmem:[#allocation5 + $0x11a4] sm:$0xf]  ;;  %v11388_v7 = vld [vmem:[#allocation5 + $0x11b0] sm:$0xf0]  ;;  %7086 = vmatmul.bf16.vlgmr.msrb.gmra.mxu2 %v15347_v19  ;;  %v11263_v28 = vor.u32 %v14115_v6, %v11260_v33 }
 0x1cd   :  { %7130 = vmatpush.bf16.msra.mxu2 %v11551_v58  ;;  %v14179_v14 = vld [vmem:[#allocation5 + $0x12a4] sm:$0xf]  ;;  %v11516_v10 = vld [vmem:[#allocation5 + $0x12b0] sm:$0xf0]  ;;  %7099 = vmatmul.bf16.vlgmr.msrb.gmra.mxu3 %v15351_v26  ;;  %v11391_v30 = vor.u32 %v14147_v62, %v11388_v7 }
 0x1ce   :  { %7143 = vmatpush.bf16.msra.mxu3 %v11679_v48  ;;  %v14211_v21 = vld [vmem:[#allocation5 + $0x13a4] sm:$0xf]  ;;  %v11644_v46 = vld [vmem:[#allocation5 + $0x13b0] sm:$0xf0]  ;;  %v11519_v51 = vor.u32 %v14179_v14, %v11516_v10  ;;  %v6854_v48 = vadd.f32 %v6853_v44, %v15435_v29 }
 0x1cf   :  { %7105 = vmatpush.bf16.msra.mxu0 %v11279_v12  ;;  %v14111_v41 = vld [vmem:[#allocation5 + $0x1084] sm:$0xf]  ;;  %v11244_v35 = vld [vmem:[#allocation5 + $0x1090] sm:$0xf0]  ;;  %v11647_v39 = vor.u32 %v14211_v21, %v11644_v46 }
 0x1d0   :  { %7118 = vmatpush.bf16.msra.mxu1 %v11407_v54  ;;  %v14143_v53 = vld [vmem:[#allocation5 + $0x1184] sm:$0xf]  ;;  %v11372_v42 = vld [vmem:[#allocation5 + $0x1190] sm:$0xf0]  ;;  %v11247_v50 = vor.u32 %v14111_v41, %v11244_v35  ;;  %v6867_v6 = vadd.f32 %v6866_v49, %v6854_v48 }
 0x1d1   :  { %7131 = vmatpush.bf16.msra.mxu2 %v11535_v57  ;;  %v14175_v47 = vld [vmem:[#allocation5 + $0x1284] sm:$0xf]  ;;  %v11500_v58 = vld [vmem:[#allocation5 + $0x1290] sm:$0xf0]  ;;  %v11375_v16 = vor.u32 %v14143_v53, %v11372_v42  ;;  %v6879_v41 = vpop.f32.mrf.mxu2 }
 0x1d2   :  { %7144 = vmatpush.bf16.msra.mxu3 %v11663_v63  ;;  %v14207_v45 = vld [vmem:[#allocation5 + $0x1384] sm:$0xf]  ;;  %v11628_v3 = vld [vmem:[#allocation5 + $0x1390] sm:$0xf0]  ;;  %v11503_v56 = vor.u32 %v14175_v47, %v11500_v58  ;;  %v6880_v42 = vadd.f32 %v6879_v41, %v6867_v6  ;;  %v6892_v47 = vpop.f32.mrf.mxu3  ;;  %v6868_v48 = vpop.f32.mrf.mxu1 }
 0x1d3   :  { %7106 = vmatpush.bf16.msra.mxu0 %v11263_v28  ;;  %v14107_v52 = vld [vmem:[#allocation5 + $0x1064] sm:$0xf]  ;;  %v11228_v12 = vld [vmem:[#allocation5 + $0x1070] sm:$0xf0]  ;;  %v11631_v57 = vor.u32 %v14207_v45, %v11628_v3  ;;  %v6855_v45 = vpop.f32.mrf.mxu0 }
 0x1d4   :  { %7119 = vmatpush.bf16.msra.mxu1 %v11391_v30  ;;  %v14139_v54 = vld [vmem:[#allocation5 + $0x1164] sm:$0xf]  ;;  %v11356_v33 = vld [vmem:[#allocation5 + $0x1170] sm:$0xf0]  ;;  %v11231_v10 = vor.u32 %v14107_v52, %v11228_v12 }
 0x1d5   :  { %7132 = vmatpush.bf16.msra.mxu2 %v11519_v51  ;;  %v14171_v62 = vld [vmem:[#allocation5 + $0x1264] sm:$0xf]  ;;  %v11484_v63 = vld [vmem:[#allocation5 + $0x1270] sm:$0xf0]  ;;  %v11359_v29 = vor.u32 %v14139_v54, %v11356_v33 }
 0x1d6   :  { %7145 = vmatpush.bf16.msra.mxu3 %v11647_v39  ;;  %v14203_v7 = vld [vmem:[#allocation5 + $0x1364] sm:$0xf]  ;;  %v11612_v14 = vld [vmem:[#allocation5 + $0x1370] sm:$0xf0]  ;;  %v11487_v21 = vor.u32 %v14171_v62, %v11484_v63 }
 0x1d7   :  { %7107 = vmatpush.bf16.msra.mxu0 %v11247_v50  ;;  %v14103_v46 = vld [vmem:[#allocation5 + $0x1044] sm:$0xf]  ;;  %v11212_v28 = vld [vmem:[#allocation5 + $0x1050] sm:$0xf0]  ;;  %v11615_v51 = vor.u32 %v14203_v7, %v11612_v14  ;;  %v15442_v50 = vadd.f32 %v6892_v47, %v6880_v42 }
 0x1d8   :  { %7120 = vmatpush.bf16.msra.mxu1 %v11375_v16  ;;  %v14135_v30 = vld [vmem:[#allocation5 + $0x1144] sm:$0xf]  ;;  %v11340_v35 = vld [vmem:[#allocation5 + $0x1150] sm:$0xf0]  ;;  %v11215_v3 = vor.u32 %v14103_v46, %v11212_v28 }
 0x1d9   :  { %7133 = vmatpush.bf16.msra.mxu2 %v11503_v56  ;;  %v14167_v53 = vld [vmem:[#allocation5 + $0x1244] sm:$0xf]  ;;  %v11468_v39 = vld [vmem:[#allocation5 + $0x1250] sm:$0xf0]  ;;  %15665 = vst [vmem:[#allocation36_spill] sm:$0xff] %v15442_v50  ;;  %v11343_v49 = vor.u32 %v14135_v30, %v11340_v35 }
 0x1da   :  { %7146 = vmatpush.bf16.msra.mxu3 %v11631_v57  ;;  %v14199_v58 = vld [vmem:[#allocation5 + $0x1344] sm:$0xf]  ;;  %v11596_v44 = vld [vmem:[#allocation5 + $0x1350] sm:$0xf0]  ;;  %v11471_v16 = vor.u32 %v14167_v53, %v11468_v39  ;;  %v6881_v39 = vpop.f32.mrf.mxu2 }
 0x1db   :  { %7108 = vmatpush.bf16.msra.mxu0 %v11231_v10  ;;  %v14099_v56 = vld [vmem:[#allocation5 + $0x1024] sm:$0xf]  ;;  %v11196_v52 = vld [vmem:[#allocation5 + $0x1030] sm:$0xf0]  ;;  %v11599_v54 = vor.u32 %v14199_v58, %v11596_v44  ;;  %v6894_v44 = vpop.f32.mrf.mxu3 }
 0x1dc   :  { %7121 = vmatpush.bf16.msra.mxu1 %v11359_v29  ;;  %v14131_v12 = vld [vmem:[#allocation5 + $0x1124] sm:$0xf]  ;;  %v11324_v57 = vld [vmem:[#allocation5 + $0x1130] sm:$0xf0]  ;;  %v11199_v7 = vor.u32 %v14099_v56, %v11196_v52 }
 0x1dd   :  { %7134 = vmatpush.bf16.msra.mxu2 %v11487_v21  ;;  %v14163_v6 = vld [vmem:[#allocation5 + $0x1224] sm:$0xf]  ;;  %v11452_v33 = vld [vmem:[#allocation5 + $0x1230] sm:$0xf0]  ;;  %v11327_v29 = vor.u32 %v14131_v12, %v11324_v57 }
 0x1de   :  { %7147 = vmatpush.bf16.msra.mxu3 %v11615_v51  ;;  %v14195_v62 = vld [vmem:[#allocation5 + $0x1324] sm:$0xf]  ;;  %v11580_v63 = vld [vmem:[#allocation5 + $0x1330] sm:$0xf0]  ;;  %v11455_v21 = vor.u32 %v14163_v6, %v11452_v33 }
 0x1df   :  { %7109 = vmatpush.bf16.msra.mxu0 %v11215_v3  ;;  %v14095_v14 = vld [vmem:[#allocation5 + $0x1004] sm:$0xf]  ;;  %v11180_v10 = vld [vmem:[#allocation5 + $0x1010] sm:$0xf0]  ;;  %v11583_v41 = vor.u32 %v14195_v62, %v11580_v63 }
 0x1e0   :  { %7122 = vmatpush.bf16.msra.mxu1 %v11343_v49  ;;  %v14127_v46 = vld [vmem:[#allocation5 + $0x1104] sm:$0xf]  ;;  %v11308_v28 = vld [vmem:[#allocation5 + $0x1110] sm:$0xf0]  ;;  %v11183_v45 = vor.u32 %v14095_v14, %v11180_v10 }
 0x1e1   :  { %7135 = vmatpush.bf16.msra.mxu2 %v11471_v16  ;;  %v14159_v30 = vld [vmem:[#allocation5 + $0x1204] sm:$0xf]  ;;  %v11436_v51 = vld [vmem:[#allocation5 + $0x1210] sm:$0xf0]  ;;  %v11311_v16 = vor.u32 %v14127_v46, %v11308_v28 }
 0x1e2   :  { %7148 = vmatpush.bf16.msra.mxu3 %v11599_v54  ;;  %v14191_v35 = vld [vmem:[#allocation5 + $0x1304] sm:$0xf]  ;;  %v11564_v53 = vld [vmem:[#allocation5 + $0x1310] sm:$0xf0]  ;;  %v11439_v56 = vor.u32 %v14159_v30, %v11436_v51 }
 0x1e3   :  { %v14251_v42 = vld [vmem:[#allocation5 + $0x14e4] sm:$0xf]  ;;  %v11804_v47 = vld [vmem:[#allocation5 + $0x14f0] sm:$0xf0]  ;;  %7110 = vmatpush.bf16.msra.mxu0 %v11199_v7  ;;  %v11567_v54 = vor.u32 %v14191_v35, %v11564_v53 }
 0x1e4   :  { %v14283_v58 = vld [vmem:[#allocation5 + $0x15e4] sm:$0xf]  ;;  %v11932_v3 = vld [vmem:[#allocation5 + $0x15f0] sm:$0xf0]  ;;  %7123 = vmatpush.bf16.msra.mxu1 %v11327_v29  ;;  %v11807_v57 = vor.u32 %v14251_v42, %v11804_v47 }
 0x1e5   :  { %v14315_v48 = vld [vmem:[#allocation5 + $0x16e4] sm:$0xf]  ;;  %v12060_v49 = vld [vmem:[#allocation5 + $0x16f0] sm:$0xf0]  ;;  %7136 = vmatpush.bf16.msra.mxu2 %v11455_v21  ;;  %v11935_v6 = vor.u32 %v14283_v58, %v11932_v3 }
 0x1e6   :  { %v14347_v52 = vld [vmem:[#allocation5 + $0x17e4] sm:$0xf]  ;;  %v12188_v12 = vld [vmem:[#allocation5 + $0x17f0] sm:$0xf0]  ;;  %7149 = vmatpush.bf16.msra.mxu3 %v11583_v41  ;;  %v12063_v33 = vor.u32 %v14315_v48, %v12060_v49 }
 0x1e7   :  { %v14247_v62 = vld [vmem:[#allocation5 + $0x14c4] sm:$0xf]  ;;  %v11788_v63 = vld [vmem:[#allocation5 + $0x14d0] sm:$0xf0]  ;;  %7111 = vmatpush.bf16.msra.mxu0 %v11183_v45  ;;  %v12191_v7 = vor.u32 %v14347_v52, %v12188_v12 }
 0x1e8   :  { %v14279_v39 = vld [vmem:[#allocation5 + $0x15c4] sm:$0xf]  ;;  %v11916_v14 = vld [vmem:[#allocation5 + $0x15d0] sm:$0xf0]  ;;  %7124 = vmatpush.bf16.msra.mxu1 %v11311_v16  ;;  %v11791_v46 = vor.u32 %v14247_v62, %v11788_v63 }
 0x1e9   :  { %v14311_v10 = vld [vmem:[#allocation5 + $0x16c4] sm:$0xf]  ;;  %v12044_v44 = vld [vmem:[#allocation5 + $0x16d0] sm:$0xf0]  ;;  %7137 = vmatpush.bf16.msra.mxu2 %v11439_v56  ;;  %v11919_v28 = vor.u32 %v14279_v39, %v11916_v14 }
 0x1ea   :  { %v14343_v29 = vld [vmem:[#allocation5 + $0x17c4] sm:$0xf]  ;;  %v12172_v21 = vld [vmem:[#allocation5 + $0x17d0] sm:$0xf0]  ;;  %7150 = vmatpush.bf16.msra.mxu3 %v11567_v54  ;;  %v12047_v30 = vor.u32 %v14311_v10, %v12044_v44  ;;  %7112 = vmatmul.bf16.vlgmr.msra.gmra.mxu0 %v15357_v24  ;;  %v14754_v54 = vld [vmem:[#allocation7] sm:$0xf]  ;;  %v6905_v10 = vpop.f32.mrf.mxu0 }
 0x1eb   :  { %7156 = vmatpush.bf16.msrb.mxu0 %v11807_v57  ;;  %v14243_v41 = vld [vmem:[#allocation5 + $0x14a4] sm:$0xf]  ;;  %v11772_v51 = vld [vmem:[#allocation5 + $0x14b0] sm:$0xf0]  ;;  %v12175_v53 = vor.u32 %v14343_v29, %v12172_v21  ;;  %7125 = vmatmul.bf16.vlgmr.msra.gmra.mxu1 %v15361_v32  ;;  %v1353_v57 = vperm.slane %v14754_v54, 1 }
 0x1ec   :  { %7169 = vmatpush.bf16.msrb.mxu1 %v11935_v6  ;;  %v14275_v35 = vld [vmem:[#allocation5 + $0x15a4] sm:$0xf]  ;;  %v11900_v42 = vld [vmem:[#allocation5 + $0x15b0] sm:$0xf0]  ;;  %7138 = vmatmul.bf16.vlgmr.msra.gmra.mxu2 %v15359_v31  ;;  %v11775_v48 = vor.u32 %v14243_v41, %v11772_v51  ;;  %v6918_v41 = vpop.f32.mrf.mxu1 }
 0x1ed   :  { %7182 = vmatpush.bf16.msrb.mxu2 %v12063_v33  ;;  %v14307_v47 = vld [vmem:[#allocation5 + $0x16a4] sm:$0xf]  ;;  %v12028_v58 = vld [vmem:[#allocation5 + $0x16b0] sm:$0xf0]  ;;  %7151 = vmatmul.bf16.vlgmr.msra.gmra.mxu3 %v15363_v36  ;;  %v11903_v16 = vor.u32 %v14275_v35, %v11900_v42 }
 0x1ee   :  { %7195 = vmatpush.bf16.msrb.mxu3 %v12191_v7  ;;  %v14339_v45 = vld [vmem:[#allocation5 + $0x17a4] sm:$0xf]  ;;  %v12156_v3 = vld [vmem:[#allocation5 + $0x17b0] sm:$0xf0]  ;;  %v12031_v56 = vor.u32 %v14307_v47, %v12028_v58 }
 0x1ef   :  { %7157 = vmatpush.bf16.msrb.mxu0 %v11791_v46  ;;  %v14239_v49 = vld [vmem:[#allocation5 + $0x1484] sm:$0xf]  ;;  %v11756_v52 = vld [vmem:[#allocation5 + $0x1490] sm:$0xf0]  ;;  %v12159_v6 = vor.u32 %v14339_v45, %v12156_v3 }
 0x1f0   :  { %7170 = vmatpush.bf16.msrb.mxu1 %v11919_v28  ;;  %v14271_v12 = vld [vmem:[#allocation5 + $0x1584] sm:$0xf]  ;;  %v11884_v33 = vld [vmem:[#allocation5 + $0x1590] sm:$0xf0]  ;;  %v11759_v14 = vor.u32 %v14239_v49, %v11756_v52 }
 0x1f1   :  { %7183 = vmatpush.bf16.msrb.mxu2 %v12047_v30  ;;  %v14303_v62 = vld [vmem:[#allocation5 + $0x1684] sm:$0xf]  ;;  %v12012_v63 = vld [vmem:[#allocation5 + $0x1690] sm:$0xf0]  ;;  %v11887_v44 = vor.u32 %v14271_v12, %v11884_v33  ;;  %v6906_v30 = vadd.f32 %v6905_v10, %v1353_v57  ;;  %v6931_v12 = vpop.f32.mrf.mxu2 }
 0x1f2   :  { %7196 = vmatpush.bf16.msrb.mxu3 %v12175_v53  ;;  %v14335_v39 = vld [vmem:[#allocation5 + $0x1784] sm:$0xf]  ;;  %v12140_v7 = vld [vmem:[#allocation5 + $0x1790] sm:$0xf0]  ;;  %v12015_v29 = vor.u32 %v14303_v62, %v12012_v63  ;;  %v6944_v63 = vpop.f32.mrf.mxu3 }
 0x1f3   :  { %7158 = vmatpush.bf16.msrb.mxu0 %v11775_v48  ;;  %v14235_v21 = vld [vmem:[#allocation5 + $0x1464] sm:$0xf]  ;;  %v11740_v46 = vld [vmem:[#allocation5 + $0x1470] sm:$0xf0]  ;;  %v12143_v51 = vor.u32 %v14335_v39, %v12140_v7  ;;  %v6919_v45 = vadd.f32 %v6918_v41, %v6906_v30 }
 0x1f4   :  { %7171 = vmatpush.bf16.msrb.mxu1 %v11903_v16  ;;  %v14267_v28 = vld [vmem:[#allocation5 + $0x1564] sm:$0xf]  ;;  %v11868_v35 = vld [vmem:[#allocation5 + $0x1570] sm:$0xf0]  ;;  %v11743_v3 = vor.u32 %v14235_v21, %v11740_v46  ;;  %v6920_v41 = vpop.f32.mrf.mxu1 }
 0x1f5   :  { %7184 = vmatpush.bf16.msrb.mxu2 %v12031_v56  ;;  %v14299_v53 = vld [vmem:[#allocation5 + $0x1664] sm:$0xf]  ;;  %v11996_v42 = vld [vmem:[#allocation5 + $0x1670] sm:$0xf0]  ;;  %v11871_v48 = vor.u32 %v14267_v28, %v11868_v35  ;;  %v6932_v62 = vadd.f32 %v6931_v12, %v6919_v45 }
 0x1f6   :  { %7197 = vmatpush.bf16.msrb.mxu3 %v12159_v6  ;;  %v14331_v47 = vld [vmem:[#allocation5 + $0x1764] sm:$0xf]  ;;  %v12124_v58 = vld [vmem:[#allocation5 + $0x1770] sm:$0xf0]  ;;  %v11999_v49 = vor.u32 %v14299_v53, %v11996_v42 }
 0x1f7   :  { %7159 = vmatpush.bf16.msrb.mxu0 %v11759_v14  ;;  %v14231_v16 = vld [vmem:[#allocation5 + $0x1444] sm:$0xf]  ;;  %v11724_v56 = vld [vmem:[#allocation5 + $0x1450] sm:$0xf0]  ;;  %v12127_v54 = vor.u32 %v14331_v47, %v12124_v58  ;;  %v15448_v10 = vadd.f32 %v6944_v63, %v6932_v62 }
 0x1f8   :  { %7172 = vmatpush.bf16.msrb.mxu1 %v11887_v44  ;;  %v14263_v52 = vld [vmem:[#allocation5 + $0x1544] sm:$0xf]  ;;  %v11852_v57 = vld [vmem:[#allocation5 + $0x1550] sm:$0xf0]  ;;  %v11727_v14 = vor.u32 %v14231_v16, %v11724_v56  ;;  %v6907_v44 = vpop.f32.mrf.mxu0 }
 0x1f9   :  { %7185 = vmatpush.bf16.msrb.mxu2 %v12015_v29  ;;  %v14295_v6 = vld [vmem:[#allocation5 + $0x1644] sm:$0xf]  ;;  %v11980_v33 = vld [vmem:[#allocation5 + $0x1650] sm:$0xf0]  ;;  %v11855_v29 = vor.u32 %v14263_v52, %v11852_v57  ;;  %v6933_v57 = vpop.f32.mrf.mxu2 }
 0x1fa   :  { %7198 = vmatpush.bf16.msrb.mxu3 %v12143_v51  ;;  %v14327_v39 = vld [vmem:[#allocation5 + $0x1744] sm:$0xf]  ;;  %v12108_v7 = vld [vmem:[#allocation5 + $0x1750] sm:$0xf0]  ;;  %v11983_v21 = vor.u32 %v14295_v6, %v11980_v33  ;;  %v6946_v63 = vpop.f32.mrf.mxu3 }
 0x1fb   :  { %7160 = vmatpush.bf16.msrb.mxu0 %v11743_v3  ;;  %v14227_v46 = vld [vmem:[#allocation5 + $0x1424] sm:$0xf]  ;;  %v11708_v28 = vld [vmem:[#allocation5 + $0x1430] sm:$0xf0]  ;;  %v12111_v51 = vor.u32 %v14327_v39, %v12108_v7 }
 0x1fc   :  { %7173 = vmatpush.bf16.msrb.mxu1 %v11871_v48  ;;  %v14259_v30 = vld [vmem:[#allocation5 + $0x1524] sm:$0xf]  ;;  %v11836_v35 = vld [vmem:[#allocation5 + $0x1530] sm:$0xf0]  ;;  %v11711_v45 = vor.u32 %v14227_v46, %v11708_v28 }
 0x1fd   :  { %7186 = vmatpush.bf16.msrb.mxu2 %v11999_v49  ;;  %v14291_v53 = vld [vmem:[#allocation5 + $0x1624] sm:$0xf]  ;;  %v11964_v42 = vld [vmem:[#allocation5 + $0x1630] sm:$0xf0]  ;;  %v11839_v48 = vor.u32 %v14259_v30, %v11836_v35 }
 0x1fe   :  { %7199 = vmatpush.bf16.msrb.mxu3 %v12127_v54  ;;  %v14323_v47 = vld [vmem:[#allocation5 + $0x1724] sm:$0xf]  ;;  %v12092_v58 = vld [vmem:[#allocation5 + $0x1730] sm:$0xf0]  ;;  %v11967_v49 = vor.u32 %v14291_v53, %v11964_v42 }
 0x1ff   :  { %7161 = vmatpush.bf16.msrb.mxu0 %v11727_v14  ;;  %v14223_v3 = vld [vmem:[#allocation5 + $0x1404] sm:$0xf]  ;;  %v11692_v16 = vld [vmem:[#allocation5 + $0x1410] sm:$0xf0]  ;;  %v12095_v54 = vor.u32 %v14323_v47, %v12092_v58 }
 0x200   :  { %7174 = vmatpush.bf16.msrb.mxu1 %v11855_v29  ;;  %v14255_v56 = vld [vmem:[#allocation5 + $0x1504] sm:$0xf]  ;;  %v11820_v52 = vld [vmem:[#allocation5 + $0x1510] sm:$0xf0]  ;;  %v11695_v44 = vor.u32 %v14223_v3, %v11692_v16 }
 0x201   :  { %7187 = vmatpush.bf16.msrb.mxu2 %v11983_v21  ;;  %v14287_v12 = vld [vmem:[#allocation5 + $0x1604] sm:$0xf]  ;;  %v11948_v6 = vld [vmem:[#allocation5 + $0x1610] sm:$0xf0]  ;;  %v11823_v28 = vor.u32 %v14255_v56, %v11820_v52 }
 0x202   :  { %7200 = vmatpush.bf16.msrb.mxu3 %v12111_v51  ;;  %v14319_v33 = vld [vmem:[#allocation5 + $0x1704] sm:$0xf]  ;;  %v12076_v62 = vld [vmem:[#allocation5 + $0x1710] sm:$0xf0]  ;;  %v11951_v30 = vor.u32 %v14287_v12, %v11948_v6 }
 0x203   :  { %v14379_v39 = vld [vmem:[#allocation5 + $0x18e4] sm:$0xf]  ;;  %v12316_v7 = vld [vmem:[#allocation5 + $0x18f0] sm:$0xf0]  ;;  %7162 = vmatpush.bf16.msrb.mxu0 %v11711_v45  ;;  %v12079_v51 = vor.u32 %v14319_v33, %v12076_v62 }
 0x204   :  { %v14411_v14 = vld [vmem:[#allocation5 + $0x19e4] sm:$0xf]  ;;  %v12444_v46 = vld [vmem:[#allocation5 + $0x19f0] sm:$0xf0]  ;;  %7175 = vmatpush.bf16.msrb.mxu1 %v11839_v48  ;;  %v12319_v53 = vor.u32 %v14379_v39, %v12316_v7 }
 0x205   :  { %v14443_v29 = vld [vmem:[#allocation5 + $0x1ae4] sm:$0xf]  ;;  %v12572_v21 = vld [vmem:[#allocation5 + $0x1af0] sm:$0xf0]  ;;  %7188 = vmatpush.bf16.msrb.mxu2 %v11967_v49  ;;  %v12447_v42 = vor.u32 %v14411_v14, %v12444_v46 }
 0x206   :  { %v14475_v41 = vld [vmem:[#allocation5 + $0x1be4] sm:$0xf]  ;;  %v12700_v35 = vld [vmem:[#allocation5 + $0x1bf0] sm:$0xf0]  ;;  %7201 = vmatpush.bf16.msrb.mxu3 %v12095_v54  ;;  %v12575_v47 = vor.u32 %v14443_v29, %v12572_v21 }
 0x207   :  { %v14375_v58 = vld [vmem:[#allocation5 + $0x18c4] sm:$0xf]  ;;  %v12300_v57 = vld [vmem:[#allocation5 + $0x18d0] sm:$0xf0]  ;;  %7163 = vmatpush.bf16.msrb.mxu0 %v11695_v44  ;;  %v12703_v45 = vor.u32 %v14475_v41, %v12700_v35 }
 0x208   :  { %v14407_v63 = vld [vmem:[#allocation5 + $0x19c4] sm:$0xf]  ;;  %v12428_v3 = vld [vmem:[#allocation5 + $0x19d0] sm:$0xf0]  ;;  %7176 = vmatpush.bf16.msrb.mxu1 %v11823_v28  ;;  %v12303_v56 = vor.u32 %v14375_v58, %v12300_v57 }
 0x209   :  { %v14439_v16 = vld [vmem:[#allocation5 + $0x1ac4] sm:$0xf]  ;;  %v12556_v50 = vld [vmem:[#allocation5 + $0x1ad0] sm:$0xf0]  ;;  %7189 = vmatpush.bf16.msrb.mxu2 %v11951_v30  ;;  %v12431_v52 = vor.u32 %v14407_v63, %v12428_v3  ;;  %v6957_v63 = vpop.f32.mrf.mxu0 }
 0x20a   :  { %v14471_v48 = vld [vmem:[#allocation5 + $0x1bc4] sm:$0xf]  ;;  %v12684_v49 = vld [vmem:[#allocation5 + $0x1bd0] sm:$0xf0]  ;;  %7202 = vmatpush.bf16.msrb.mxu3 %v12079_v51  ;;  %v12559_v12 = vor.u32 %v14439_v16, %v12556_v50  ;;  %7164 = vmatmul.bf16.vlgmr.msrb.gmra.mxu0 %v15371_v61 }
 0x20b   :  { %7208 = vmatpush.bf16.msra.mxu0 %v12319_v53  ;;  %v14371_v54 = vld [vmem:[#allocation5 + $0x18a4] sm:$0xf]  ;;  %v12284_v6 = vld [vmem:[#allocation5 + $0x18b0] sm:$0xf0]  ;;  %v12687_v62 = vor.u32 %v14471_v48, %v12684_v49  ;;  %7177 = vmatmul.bf16.vlgmr.msrb.gmra.mxu1 %v15375_v2 }
 0x20c   :  { %7221 = vmatpush.bf16.msra.mxu1 %v12447_v42  ;;  %v14403_v33 = vld [vmem:[#allocation5 + $0x19a4] sm:$0xf]  ;;  %v12412_v39 = vld [vmem:[#allocation5 + $0x19b0] sm:$0xf0]  ;;  %7190 = vmatmul.bf16.vlgmr.msrb.gmra.mxu2 %v15373_v1  ;;  %v12287_v50 = vor.u32 %v14371_v54, %v12284_v6 }
 0x20d   :  { %7234 = vmatpush.bf16.msra.mxu2 %v12575_v47  ;;  %v14435_v7 = vld [vmem:[#allocation5 + $0x1aa4] sm:$0xf]  ;;  %v12540_v14 = vld [vmem:[#allocation5 + $0x1ab0] sm:$0xf0]  ;;  %7203 = vmatmul.bf16.vlgmr.msrb.gmra.mxu3 %v15377_v5  ;;  %v12415_v29 = vor.u32 %v14403_v33, %v12412_v39 }
 0x20e   :  { %7247 = vmatpush.bf16.msra.mxu3 %v12703_v45  ;;  %v14467_v44 = vld [vmem:[#allocation5 + $0x1ba4] sm:$0xf]  ;;  %v12668_v46 = vld [vmem:[#allocation5 + $0x1bb0] sm:$0xf0]  ;;  %v12543_v21 = vor.u32 %v14435_v7, %v12540_v14 }
 0x20f   :  { %7209 = vmatpush.bf16.msra.mxu0 %v12303_v56  ;;  %v14367_v28 = vld [vmem:[#allocation5 + $0x1884] sm:$0xf]  ;;  %v12268_v30 = vld [vmem:[#allocation5 + $0x1890] sm:$0xf0]  ;;  %v12671_v35 = vor.u32 %v14467_v44, %v12668_v46  ;;  %v6958_v56 = vadd.f32 %v6957_v63, %v15448_v10 }
 0x210   :  { %7222 = vmatpush.bf16.msra.mxu1 %v12431_v52  ;;  %v14399_v41 = vld [vmem:[#allocation5 + $0x1984] sm:$0xf]  ;;  %v12396_v51 = vld [vmem:[#allocation5 + $0x1990] sm:$0xf0]  ;;  %v12271_v57 = vor.u32 %v14367_v28, %v12268_v30  ;;  %v6970_v52 = vpop.f32.mrf.mxu1  ;;  %v6983_v28 = vpop.f32.mrf.mxu2 }
 0x211   :  { %7235 = vmatpush.bf16.msra.mxu2 %v12559_v12  ;;  %v14431_v53 = vld [vmem:[#allocation5 + $0x1a84] sm:$0xf]  ;;  %v12524_v42 = vld [vmem:[#allocation5 + $0x1a90] sm:$0xf0]  ;;  %v12399_v45 = vor.u32 %v14399_v41, %v12396_v51  ;;  %v6971_v7 = vadd.f32 %v6970_v52, %v6958_v56  ;;  %v6959_v63 = vpop.f32.mrf.mxu0 }
 0x212   :  { %7248 = vmatpush.bf16.msra.mxu3 %v12687_v62  ;;  %v14463_v47 = vld [vmem:[#allocation5 + $0x1b84] sm:$0xf]  ;;  %v12652_v58 = vld [vmem:[#allocation5 + $0x1b90] sm:$0xf0]  ;;  %v12527_v3 = vor.u32 %v14431_v53, %v12524_v42  ;;  %v6996_v53 = vpop.f32.mrf.mxu3 }
 0x213   :  { %7210 = vmatpush.bf16.msra.mxu0 %v12287_v50  ;;  %v14363_v16 = vld [vmem:[#allocation5 + $0x1864] sm:$0xf]  ;;  %v12252_v48 = vld [vmem:[#allocation5 + $0x1870] sm:$0xf0]  ;;  %v12655_v12 = vor.u32 %v14463_v47, %v12652_v58  ;;  %v6984_v51 = vadd.f32 %v6983_v28, %v6971_v7 }
 0x214   :  { %7223 = vmatpush.bf16.msra.mxu1 %v12415_v29  ;;  %v14395_v49 = vld [vmem:[#allocation5 + $0x1964] sm:$0xf]  ;;  %v12380_v54 = vld [vmem:[#allocation5 + $0x1970] sm:$0xf0]  ;;  %v12255_v14 = vor.u32 %v14363_v16, %v12252_v48 }
 0x215   :  { %7236 = vmatpush.bf16.msra.mxu2 %v12543_v21  ;;  %v14427_v6 = vld [vmem:[#allocation5 + $0x1a64] sm:$0xf]  ;;  %v12508_v33 = vld [vmem:[#allocation5 + $0x1a70] sm:$0xf0]  ;;  %v12383_v44 = vor.u32 %v14395_v49, %v12380_v54 }
 0x216   :  { %7249 = vmatpush.bf16.msra.mxu3 %v12671_v35  ;;  %v14459_v62 = vld [vmem:[#allocation5 + $0x1b64] sm:$0xf]  ;;  %v12636_v39 = vld [vmem:[#allocation5 + $0x1b70] sm:$0xf0]  ;;  %v12511_v46 = vor.u32 %v14427_v6, %v12508_v33 }
 0x217   :  { %7211 = vmatpush.bf16.msra.mxu0 %v12271_v57  ;;  %v14359_v50 = vld [vmem:[#allocation5 + $0x1844] sm:$0xf]  ;;  %v12236_v29 = vld [vmem:[#allocation5 + $0x1850] sm:$0xf0]  ;;  %v12639_v10 = vor.u32 %v14459_v62, %v12636_v39  ;;  %v15455_v57 = vadd.f32 %v6996_v53, %v6984_v51 }
 0x218   :  { %7224 = vmatpush.bf16.msra.mxu1 %v12399_v45  ;;  %v14391_v21 = vld [vmem:[#allocation5 + $0x1944] sm:$0xf]  ;;  %v12364_v30 = vld [vmem:[#allocation5 + $0x1950] sm:$0xf0]  ;;  %v12239_v58 = vor.u32 %v14359_v50, %v12236_v29  ;;  %v6972_v56 = vpop.f32.mrf.mxu1  ;;  %v6985_v28 = vpop.f32.mrf.mxu2 }
 0x219   :  { %7237 = vmatpush.bf16.msra.mxu2 %v12527_v3  ;;  %v14423_v41 = vld [vmem:[#allocation5 + $0x1a44] sm:$0xf]  ;;  %v12492_v35 = vld [vmem:[#allocation5 + $0x1a50] sm:$0xf0]  ;;  %v12367_v45 = vor.u32 %v14391_v21, %v12364_v30 }
 0x21a   :  { %7250 = vmatpush.bf16.msra.mxu3 %v12655_v12  ;;  %v14455_v42 = vld [vmem:[#allocation5 + $0x1b44] sm:$0xf]  ;;  %v12620_v47 = vld [vmem:[#allocation5 + $0x1b50] sm:$0xf0]  ;;  %v12495_v3 = vor.u32 %v14423_v41, %v12492_v35  ;;  %v6998_v51 = vpop.f32.mrf.mxu3 }
 0x21b   :  { %7212 = vmatpush.bf16.msra.mxu0 %v12255_v14  ;;  %v14355_v16 = vld [vmem:[#allocation5 + $0x1824] sm:$0xf]  ;;  %v12220_v48 = vld [vmem:[#allocation5 + $0x1830] sm:$0xf0]  ;;  %v12623_v52 = vor.u32 %v14455_v42, %v12620_v47 }
 0x21c   :  { %7225 = vmatpush.bf16.msra.mxu1 %v12383_v44  ;;  %v14387_v49 = vld [vmem:[#allocation5 + $0x1924] sm:$0xf]  ;;  %v12348_v12 = vld [vmem:[#allocation5 + $0x1930] sm:$0xf0]  ;;  %v12223_v39 = vor.u32 %v14355_v16, %v12220_v48 }
 0x21d   :  { %7238 = vmatpush.bf16.msra.mxu2 %v12511_v46  ;;  %v14419_v54 = vld [vmem:[#allocation5 + $0x1a24] sm:$0xf]  ;;  %v12476_v6 = vld [vmem:[#allocation5 + $0x1a30] sm:$0xf0]  ;;  %v12351_v44 = vor.u32 %v14387_v49, %v12348_v12 }
 0x21e   :  { %7251 = vmatpush.bf16.msra.mxu3 %v12639_v10  ;;  %v14451_v33 = vld [vmem:[#allocation5 + $0x1b24] sm:$0xf]  ;;  %v12604_v62 = vld [vmem:[#allocation5 + $0x1b30] sm:$0xf0]  ;;  %v12479_v46 = vor.u32 %v14419_v54, %v12476_v6 }
 0x21f   :  { %7213 = vmatpush.bf16.msra.mxu0 %v12239_v58  ;;  %v14351_v7 = vld [vmem:[#allocation5 + $0x1804] sm:$0xf]  ;;  %v12204_v14 = vld [vmem:[#allocation5 + $0x1810] sm:$0xf0]  ;;  %v12607_v10 = vor.u32 %v14451_v33, %v12604_v62 }
 0x220   :  { %7226 = vmatpush.bf16.msra.mxu1 %v12367_v45  ;;  %v14383_v50 = vld [vmem:[#allocation5 + $0x1904] sm:$0xf]  ;;  %v12332_v29 = vld [vmem:[#allocation5 + $0x1910] sm:$0xf0]  ;;  %v12207_v58 = vor.u32 %v14351_v7, %v12204_v14 }
 0x221   :  { %7239 = vmatpush.bf16.msra.mxu2 %v12495_v3  ;;  %v14415_v21 = vld [vmem:[#allocation5 + $0x1a04] sm:$0xf]  ;;  %v12460_v30 = vld [vmem:[#allocation5 + $0x1a10] sm:$0xf0]  ;;  %v12335_v16 = vor.u32 %v14383_v50, %v12332_v29 }
 0x222   :  { %7252 = vmatpush.bf16.msra.mxu3 %v12623_v52  ;;  %v14447_v41 = vld [vmem:[#allocation5 + $0x1b04] sm:$0xf]  ;;  %v12588_v35 = vld [vmem:[#allocation5 + $0x1b10] sm:$0xf0]  ;;  %v12463_v48 = vor.u32 %v14415_v21, %v12460_v30 }
 0x223   :  { %v14507_v53 = vld [vmem:[#allocation5 + $0x1ce4] sm:$0xf]  ;;  %v12828_v42 = vld [vmem:[#allocation5 + $0x1cf0] sm:$0xf0]  ;;  %7214 = vmatpush.bf16.msra.mxu0 %v12223_v39  ;;  %v12591_v52 = vor.u32 %v14447_v41, %v12588_v35 }
 0x224   :  { %v14539_v47 = vld [vmem:[#allocation5 + $0x1de4] sm:$0xf]  ;;  %v12956_v63 = vld [vmem:[#allocation5 + $0x1df0] sm:$0xf0]  ;;  %7227 = vmatpush.bf16.msra.mxu1 %v12351_v44  ;;  %v12831_v12 = vor.u32 %v14507_v53, %v12828_v42 }
 0x225   :  { %v14571_v45 = vld [vmem:[#allocation5 + $0x1ee4] sm:$0xf]  ;;  %v13084_v3 = vld [vmem:[#allocation5 + $0x1ef0] sm:$0xf0]  ;;  %7240 = vmatpush.bf16.msra.mxu2 %v12479_v46  ;;  %v12959_v54 = vor.u32 %v14539_v47, %v12956_v63 }
 0x226   :  { %v14603_v49 = vld [vmem:[#allocation5 + $0x1fe4] sm:$0xf]  ;;  %v13212_v56 = vld [vmem:[#allocation5 + $0x1ff0] sm:$0xf0]  ;;  %7253 = vmatpush.bf16.msra.mxu3 %v12607_v10  ;;  %v13087_v6 = vor.u32 %v14571_v45, %v13084_v3 }
 0x227   :  { %v14503_v33 = vld [vmem:[#allocation5 + $0x1cc4] sm:$0xf]  ;;  %v12812_v62 = vld [vmem:[#allocation5 + $0x1cd0] sm:$0xf0]  ;;  %7215 = vmatpush.bf16.msra.mxu0 %v12207_v58  ;;  %v13215_v39 = vor.u32 %v14603_v49, %v13212_v56 }
 0x228   :  { %v14535_v28 = vld [vmem:[#allocation5 + $0x1dc4] sm:$0xf]  ;;  %v12940_v7 = vld [vmem:[#allocation5 + $0x1dd0] sm:$0xf0]  ;;  %7228 = vmatpush.bf16.msra.mxu1 %v12335_v16  ;;  %v12815_v50 = vor.u32 %v14503_v33, %v12812_v62  ;;  %v7009_v33 = vpop.f32.mrf.mxu0 }
 0x229   :  { %v14567_v14 = vld [vmem:[#allocation5 + $0x1ec4] sm:$0xf]  ;;  %v13068_v51 = vld [vmem:[#allocation5 + $0x1ed0] sm:$0xf0]  ;;  %7241 = vmatpush.bf16.msra.mxu2 %v12463_v48  ;;  %v12943_v29 = vor.u32 %v14535_v28, %v12940_v7 }
 0x22a   :  { %v14599_v44 = vld [vmem:[#allocation5 + $0x1fc4] sm:$0xf]  ;;  %v13196_v46 = vld [vmem:[#allocation5 + $0x1fd0] sm:$0xf0]  ;;  %7254 = vmatpush.bf16.msra.mxu3 %v12591_v52  ;;  %v13071_v21 = vor.u32 %v14567_v14, %v13068_v51  ;;  %7216 = vmatmul.bf16.vlgmr.msra.gmra.mxu0 %v15386_v55  ;;  %v7022_v14 = vpop.f32.mrf.mxu1 }
 0x22b   :  { %7260 = vmatpush.bf16.msrb.mxu0 %v12831_v12  ;;  %v14499_v10 = vld [vmem:[#allocation5 + $0x1ca4] sm:$0xf]  ;;  %v12796_v30 = vld [vmem:[#allocation5 + $0x1cb0] sm:$0xf0]  ;;  %v13199_v35 = vor.u32 %v14599_v44, %v13196_v46  ;;  %7229 = vmatmul.bf16.vlgmr.msra.gmra.mxu1 %v15390_v60 }
 0x22c   :  { %7273 = vmatpush.bf16.msrb.mxu1 %v12959_v54  ;;  %v14531_v41 = vld [vmem:[#allocation5 + $0x1da4] sm:$0xf]  ;;  %v12924_v53 = vld [vmem:[#allocation5 + $0x1db0] sm:$0xf0]  ;;  %7242 = vmatmul.bf16.vlgmr.msra.gmra.mxu2 %v15388_v59  ;;  %v12799_v45 = vor.u32 %v14499_v10, %v12796_v30 }
 0x22d   :  { %7286 = vmatpush.bf16.msrb.mxu2 %v13087_v6  ;;  %v14563_v42 = vld [vmem:[#allocation5 + $0x1ea4] sm:$0xf]  ;;  %v13052_v47 = vld [vmem:[#allocation5 + $0x1eb0] sm:$0xf0]  ;;  %7255 = vmatmul.bf16.vlgmr.msra.gmra.mxu3 %v15392_v0  ;;  %v12927_v3 = vor.u32 %v14531_v41, %v12924_v53 }
 0x22e   :  { %7299 = vmatpush.bf16.msrb.mxu3 %v13215_v39  ;;  %v14595_v58 = vld [vmem:[#allocation5 + $0x1fa4] sm:$0xf]  ;;  %v13180_v63 = vld [vmem:[#allocation5 + $0x1fb0] sm:$0xf0]  ;;  %v13055_v16 = vor.u32 %v14563_v42, %v13052_v47  ;;  %v7010_v39 = vadd.f32 %v7009_v33, %v15455_v57 }
 0x22f   :  { %7261 = vmatpush.bf16.msrb.mxu0 %v12815_v50  ;;  %v14495_v48 = vld [vmem:[#allocation5 + $0x1c84] sm:$0xf]  ;;  %v12780_v49 = vld [vmem:[#allocation5 + $0x1c90] sm:$0xf0]  ;;  %v13183_v52 = vor.u32 %v14595_v58, %v13180_v63 }
 0x230   :  { %7274 = vmatpush.bf16.msrb.mxu1 %v12943_v29  ;;  %v14527_v56 = vld [vmem:[#allocation5 + $0x1d84] sm:$0xf]  ;;  %v12908_v12 = vld [vmem:[#allocation5 + $0x1d90] sm:$0xf0]  ;;  %v12783_v7 = vor.u32 %v14495_v48, %v12780_v49  ;;  %v7023_v10 = vadd.f32 %v7022_v14, %v7010_v39  ;;  %v7035_v48 = vpop.f32.mrf.mxu2 }
 0x231   :  { %7287 = vmatpush.bf16.msrb.mxu2 %v13071_v21  ;;  %v14559_v54 = vld [vmem:[#allocation5 + $0x1e84] sm:$0xf]  ;;  %v13036_v6 = vld [vmem:[#allocation5 + $0x1e90] sm:$0xf0]  ;;  %v12911_v51 = vor.u32 %v14527_v56, %v12908_v12 }
 0x232   :  { %7300 = vmatpush.bf16.msrb.mxu3 %v13199_v35  ;;  %v14591_v62 = vld [vmem:[#allocation5 + $0x1f84] sm:$0xf]  ;;  %v13164_v28 = vld [vmem:[#allocation5 + $0x1f90] sm:$0xf0]  ;;  %v13039_v44 = vor.u32 %v14559_v54, %v13036_v6  ;;  %v7036_v12 = vadd.f32 %v7035_v48, %v7023_v10  ;;  %v7048_v54 = vpop.f32.mrf.mxu3  ;;  %v7024_v39 = vpop.f32.mrf.mxu1 }
 0x233   :  { %7262 = vmatpush.bf16.msrb.mxu0 %v12799_v45  ;;  %v14491_v46 = vld [vmem:[#allocation5 + $0x1c64] sm:$0xf]  ;;  %v12764_v50 = vld [vmem:[#allocation5 + $0x1c70] sm:$0xf0]  ;;  %v13167_v21 = vor.u32 %v14591_v62, %v13164_v28  ;;  %v7011_v62 = vpop.f32.mrf.mxu0  ;;  %v9506_v39 = vld [vmem:[#allocation5 + $0x2e8] sm:$0xf] }
 0x234   :  { %7275 = vmatpush.bf16.msrb.mxu1 %v12927_v3  ;;  %v14523_v29 = vld [vmem:[#allocation5 + $0x1d64] sm:$0xf]  ;;  %v12892_v30 = vld [vmem:[#allocation5 + $0x1d70] sm:$0xf0]  ;;  %v12767_v47 = vor.u32 %v14491_v46, %v12764_v50 }
 0x235   :  { %7288 = vmatpush.bf16.msrb.mxu2 %v13055_v16  ;;  %v14555_v41 = vld [vmem:[#allocation5 + $0x1e64] sm:$0xf]  ;;  %v13020_v35 = vld [vmem:[#allocation5 + $0x1e70] sm:$0xf0]  ;;  %v12895_v57 = vor.u32 %v14523_v29, %v12892_v30 }
 0x236   :  { %7301 = vmatpush.bf16.msrb.mxu3 %v13183_v52  ;;  %v14587_v53 = vld [vmem:[#allocation5 + $0x1f64] sm:$0xf]  ;;  %v13148_v42 = vld [vmem:[#allocation5 + $0x1f70] sm:$0xf0]  ;;  %v13023_v58 = vor.u32 %v14555_v41, %v13020_v35 }
 0x237   :  { %7263 = vmatpush.bf16.msrb.mxu0 %v12783_v7  ;;  %v14487_v63 = vld [vmem:[#allocation5 + $0x1c44] sm:$0xf]  ;;  %v12748_v45 = vld [vmem:[#allocation5 + $0x1c50] sm:$0xf0]  ;;  %v13151_v16 = vor.u32 %v14587_v53, %v13148_v42  ;;  %v15462_v7 = vadd.f32 %v7048_v54, %v7036_v12  ;;  %v9250_v12 = vld [vmem:[#allocation5 + $0xe8] sm:$0xf] }
 0x238   :  { %7276 = vmatpush.bf16.msrb.mxu1 %v12911_v51  ;;  %v14519_v3 = vld [vmem:[#allocation5 + $0x1d44] sm:$0xf]  ;;  %v12876_v49 = vld [vmem:[#allocation5 + $0x1d50] sm:$0xf0]  ;;  %v12751_v28 = vor.u32 %v14487_v63, %v12748_v45  ;;  %v13614_v54 = vld [vmem:[#allocation5 + $0xf4] sm:$0xf0] }
 0x239   :  { %7289 = vmatpush.bf16.msrb.mxu2 %v13039_v44  ;;  %v14551_v56 = vld [vmem:[#allocation5 + $0x1e44] sm:$0xf]  ;;  %v13004_v52 = vld [vmem:[#allocation5 + $0x1e50] sm:$0xf0]  ;;  %v12879_v14 = vor.u32 %v14519_v3, %v12876_v49 }
 0x23a   :  { %7302 = vmatpush.bf16.msrb.mxu3 %v13167_v21  ;;  %v14583_v6 = vld [vmem:[#allocation5 + $0x1f44] sm:$0xf]  ;;  %v13132_v33 = vld [vmem:[#allocation5 + $0x1f50] sm:$0xf0]  ;;  %v13007_v51 = vor.u32 %v14551_v56, %v13004_v52  ;;  %v7037_v52 = vpop.f32.mrf.mxu2 }
 0x23b   :  { %7264 = vmatpush.bf16.msrb.mxu0 %v12767_v47  ;;  %v14483_v44 = vld [vmem:[#allocation5 + $0x1c24] sm:$0xf]  ;;  %v12732_v46 = vld [vmem:[#allocation5 + $0x1c30] sm:$0xf0]  ;;  %v13135_v29 = vor.u32 %v14583_v6, %v13132_v33  ;;  %v9378_v6 = vld [vmem:[#allocation5 + $0x1e8] sm:$0xf]  ;;  %v7050_v33 = vpop.f32.mrf.mxu3 }
 0x23c   :  { %7277 = vmatpush.bf16.msrb.mxu1 %v12895_v57  ;;  %v14515_v50 = vld [vmem:[#allocation5 + $0x1d24] sm:$0xf]  ;;  %v12860_v21 = vld [vmem:[#allocation5 + $0x1d30] sm:$0xf0]  ;;  %v12735_v53 = vor.u32 %v14483_v44, %v12732_v46  ;;  %v9634_v46 = vld [vmem:[#allocation5 + $0x3e8] sm:$0xf] }
 0x23d   :  { %7290 = vmatpush.bf16.msrb.mxu2 %v13023_v58  ;;  %v14547_v10 = vld [vmem:[#allocation5 + $0x1e24] sm:$0xf]  ;;  %v12988_v30 = vld [vmem:[#allocation5 + $0x1e30] sm:$0xf0]  ;;  %v12863_v57 = vor.u32 %v14515_v50, %v12860_v21  ;;  %v13710_v50 = vld [vmem:[#allocation5 + $0x3f4] sm:$0xf0]  ;;  %v9251_v21 = vor.u32 %v13614_v54, %v9250_v12 }
 0x23e   :  { %7303 = vmatpush.bf16.msrb.mxu3 %v13151_v16  ;;  %v14579_v41 = vld [vmem:[#allocation5 + $0x1f24] sm:$0xf]  ;;  %v13116_v35 = vld [vmem:[#allocation5 + $0x1f30] sm:$0xf0]  ;;  %v12991_v58 = vor.u32 %v14547_v10, %v12988_v30  ;;  %v9362_v52 = vld [vmem:[#allocation5 + $0x1c8] sm:$0xf] }
 0x23f   :  { %7265 = vmatpush.bf16.msrb.mxu0 %v12751_v28  ;;  %v14479_v42 = vld [vmem:[#allocation5 + $0x1c04] sm:$0xf]  ;;  %v12716_v47 = vld [vmem:[#allocation5 + $0x1c10] sm:$0xf0]  ;;  %v13119_v48 = vor.u32 %v14579_v41, %v13116_v35  ;;  %v13646_v28 = vld [vmem:[#allocation5 + $0x1f4] sm:$0xf0] }
 0x240   :  { %7278 = vmatpush.bf16.msrb.mxu1 %v12879_v14  ;;  %v14511_v63 = vld [vmem:[#allocation5 + $0x1d04] sm:$0xf]  ;;  %v12844_v45 = vld [vmem:[#allocation5 + $0x1d10] sm:$0xf0]  ;;  %v12719_v62 = vor.u32 %v14479_v42, %v12716_v47  ;;  %v13678_v14 = vld [vmem:[#allocation5 + $0x2f4] sm:$0xf0]  ;;  %v9379_v10 = vor.u32 %v13646_v28, %v9378_v6 }
 0x241   :  { %7291 = vmatpush.bf16.msrb.mxu2 %v13007_v51  ;;  %v14543_v3 = vld [vmem:[#allocation5 + $0x1e04] sm:$0xf]  ;;  %v12972_v16 = vld [vmem:[#allocation5 + $0x1e10] sm:$0xf0]  ;;  %v12847_v51 = vor.u32 %v14511_v63, %v12844_v45  ;;  %v9507_v30 = vor.u32 %v13678_v14, %v9506_v39  ;;  %v9234_v41 = vld [vmem:[#allocation5 + $0xc8] sm:$0xf] }
 0x242   :  { %7304 = vmatpush.bf16.msrb.mxu3 %v13135_v29  ;;  %v14575_v49 = vld [vmem:[#allocation5 + $0x1f04] sm:$0xf]  ;;  %v13100_v56 = vld [vmem:[#allocation5 + $0x1f10] sm:$0xf0]  ;;  %v12975_v44 = vor.u32 %v14543_v3, %v12972_v16  ;;  %v13610_v35 = vld [vmem:[#allocation5 + $0xd4] sm:$0xf0] }
 0x243   :  { %7266 = vmatpush.bf16.msrb.mxu0 %v12735_v53  ;;  %v13103_v29 = vor.u32 %v14575_v49, %v13100_v56  ;;  %v9635_v53 = vor.u32 %v13710_v50, %v9634_v46  ;;  %v13642_v42 = vld [vmem:[#allocation5 + $0x1d4] sm:$0xf0]  ;;  %v9490_v47 = vld [vmem:[#allocation5 + $0x2c8] sm:$0xf]  ;;  %v9235_v63 = vor.u32 %v13610_v35, %v9234_v41 }
 0x244   :  { %7279 = vmatpush.bf16.msrb.mxu1 %v12863_v57  ;;  %v13674_v33 = vld [vmem:[#allocation5 + $0x2d4] sm:$0xf0]  ;;  %v9618_v57 = vld [vmem:[#allocation5 + $0x3c8] sm:$0xf]  ;;  %v9363_v45 = vor.u32 %v13642_v42, %v9362_v52 }
 0x245   :  { %7292 = vmatpush.bf16.msrb.mxu2 %v12991_v58  ;;  %v13706_v58 = vld [vmem:[#allocation5 + $0x3d4] sm:$0xf0]  ;;  %v9491_v3 = vor.u32 %v13674_v33, %v9490_v47  ;;  %v9346_v49 = vld [vmem:[#allocation5 + $0x1a8] sm:$0xf] }
 0x246   :  { %7305 = vmatpush.bf16.msrb.mxu3 %v13119_v48  ;;  %v9218_v48 = vld [vmem:[#allocation5 + $0xa8] sm:$0xf]  ;;  %v13606_v16 = vld [vmem:[#allocation5 + $0xb4] sm:$0xf0]  ;;  %v9619_v56 = vor.u32 %v13706_v58, %v9618_v57 }
 0x247   :  { %7267 = vmatpush.bf16.msrb.mxu0 %v12719_v62  ;;  %v13638_v12 = vld [vmem:[#allocation5 + $0x1b4] sm:$0xf0]  ;;  %v9474_v54 = vld [vmem:[#allocation5 + $0x2a8] sm:$0xf]  ;;  %v9219_v39 = vor.u32 %v13606_v16, %v9218_v48  ;;  %v7061_v41 = vpop.f32.mrf.mxu0 }
 0x248   :  { %7280 = vmatpush.bf16.msrb.mxu1 %v12847_v51  ;;  %v13670_v6 = vld [vmem:[#allocation5 + $0x2b4] sm:$0xf0]  ;;  %v9602_v62 = vld [vmem:[#allocation5 + $0x3a8] sm:$0xf]  ;;  %v9347_v14 = vor.u32 %v13638_v12, %v9346_v49  ;;  %v7074_v47 = vpop.f32.mrf.mxu1 }
 0x249   :  { %7293 = vmatpush.bf16.msrb.mxu2 %v12975_v44  ;;  %v13702_v28 = vld [vmem:[#allocation5 + $0x3b4] sm:$0xf0]  ;;  %v9475_v51 = vor.u32 %v13670_v6, %v9474_v54  ;;  %v9202_v44 = vld [vmem:[#allocation5 + $0x88] sm:$0xf] }
 0x24a   :  { %7306 = vmatpush.bf16.msrb.mxu3 %v13103_v29  ;;  %7268 = vmatmul.bf16.vlgmr.msrb.gmra.mxu0 %v15401_v4  ;;  %v13602_v46 = vld [vmem:[#allocation5 + $0x94] sm:$0xf0]  ;;  %v9330_v50 = vld [vmem:[#allocation5 + $0x188] sm:$0xf]  ;;  %v9603_v29 = vor.u32 %v13702_v28, %v9602_v62 }
 0x24b   :  { %7312 = vmatpush.bf16.msra.mxu0 %v9251_v21  ;;  %7281 = vmatmul.bf16.vlgmr.msrb.gmra.mxu1 %v15405_v43  ;;  %v13634_v21 = vld [vmem:[#allocation5 + $0x194] sm:$0xf0]  ;;  %v9586_v35 = vld [vmem:[#allocation5 + $0x388] sm:$0xf]  ;;  %v9203_v42 = vor.u32 %v13602_v46, %v9202_v44 }
 0x24c   :  { %7325 = vmatpush.bf16.msra.mxu1 %v9379_v10  ;;  %7294 = vmatmul.bf16.vlgmr.msrb.gmra.mxu2 %v15403_v11  ;;  %v9458_v10 = vld [vmem:[#allocation5 + $0x288] sm:$0xf]  ;;  %v13698_v52 = vld [vmem:[#allocation5 + $0x394] sm:$0xf0]  ;;  %v9331_v33 = vor.u32 %v13634_v21, %v9330_v50 }
 0x24d   :  { %7338 = vmatpush.bf16.msra.mxu2 %v9507_v30  ;;  %7307 = vmatmul.bf16.vlgmr.msrb.gmra.mxu3 %v15407_v17  ;;  %v13666_v30 = vld [vmem:[#allocation5 + $0x294] sm:$0xf0]  ;;  %v9186_v58 = vld [vmem:[#allocation5 + $0x68] sm:$0xf] }
 0x24e   :  { %7351 = vmatpush.bf16.msra.mxu3 %v9635_v53  ;;  %v7062_v53 = vadd.f32 %v7061_v41, %v15462_v7  ;;  %v9459_v57 = vor.u32 %v13666_v30, %v9458_v10  ;;  %v13630_v16 = vld [vmem:[#allocation5 + $0x174] sm:$0xf0]  ;;  %v9442_v49 = vld [vmem:[#allocation5 + $0x268] sm:$0xf] }
 0x24f   :  { %7313 = vmatpush.bf16.msra.mxu0 %v9235_v63  ;;  %v13598_v63 = vld [vmem:[#allocation5 + $0x74] sm:$0xf0]  ;;  %v9570_v12 = vld [vmem:[#allocation5 + $0x368] sm:$0xf]  ;;  %v7087_v44 = vpop.f32.mrf.mxu2 }
 0x250   :  { %7326 = vmatpush.bf16.msra.mxu1 %v9363_v45  ;;  %v9314_v45 = vld [vmem:[#allocation5 + $0x168] sm:$0xf]  ;;  %v7075_v48 = vadd.f32 %v7074_v47, %v7062_v53  ;;  %v13694_v54 = vld [vmem:[#allocation5 + $0x374] sm:$0xf0]  ;;  %v9187_v6 = vor.u32 %v13598_v63, %v9186_v58  ;;  %v7100_v10 = vpop.f32.mrf.mxu3  ;;  %v7076_v53 = vpop.f32.mrf.mxu1 }
 0x251   :  { %7339 = vmatpush.bf16.msra.mxu2 %v9491_v3  ;;  %v9587_v3 = vor.u32 %v13698_v52, %v9586_v35  ;;  %v9315_v7 = vor.u32 %v13630_v16, %v9314_v45  ;;  %v9170_v28 = vld [vmem:[#allocation5 + $0x48] sm:$0xf]  ;;  %v13626_v46 = vld [vmem:[#allocation5 + $0x154] sm:$0xf0]  ;;  %v7063_v35 = vpop.f32.mrf.mxu0 }
 0x252   :  { %7352 = vmatpush.bf16.msra.mxu3 %v9619_v56  ;;  %v13662_v56 = vld [vmem:[#allocation5 + $0x274] sm:$0xf0]  ;;  %v9426_v50 = vld [vmem:[#allocation5 + $0x248] sm:$0xf]  ;;  %v7088_v21 = vadd.f32 %v7087_v44, %v7075_v48 }
 0x253   :  { %7314 = vmatpush.bf16.msra.mxu0 %v9219_v39  ;;  %v9443_v62 = vor.u32 %v13662_v56, %v9442_v49  ;;  %v13594_v39 = vld [vmem:[#allocation5 + $0x54] sm:$0xf0]  ;;  %v9554_v30 = vld [vmem:[#allocation5 + $0x348] sm:$0xf] }
 0x254   :  { %7327 = vmatpush.bf16.msra.mxu1 %v9347_v14  ;;  %v9298_v14 = vld [vmem:[#allocation5 + $0x148] sm:$0xf]  ;;  %v13690_v41 = vld [vmem:[#allocation5 + $0x354] sm:$0xf0]  ;;  %v9171_v52 = vor.u32 %v13594_v39, %v9170_v28 }
 0x255   :  { %7340 = vmatpush.bf16.msra.mxu2 %v9475_v51  ;;  %v9571_v51 = vor.u32 %v13694_v54, %v9570_v12  ;;  %v9299_v47 = vor.u32 %v13626_v46, %v9298_v14  ;;  %v13590_v58 = vld [vmem:[#allocation5 + $0x34] sm:$0xf0]  ;;  %v9282_v63 = vld [vmem:[#allocation5 + $0x128] sm:$0xf]  ;;  %v9555_v45 = vor.u32 %v13690_v41, %v9554_v30 }
 0x256   :  { %7353 = vmatpush.bf16.msra.mxu3 %v9603_v29  ;;  %v13658_v29 = vld [vmem:[#allocation5 + $0x254] sm:$0xf0]  ;;  %v9410_v48 = vld [vmem:[#allocation5 + $0x228] sm:$0xf] }
 0x257   :  { %7315 = vmatpush.bf16.msra.mxu0 %v9203_v42  ;;  %v15469_v42 = vadd.f32 %v7100_v10, %v7088_v21  ;;  %v13654_v16 = vld [vmem:[#allocation5 + $0x234] sm:$0xf0]  ;;  %v9538_v49 = vld [vmem:[#allocation5 + $0x328] sm:$0xf] }
 0x258   :  { %7328 = vmatpush.bf16.msra.mxu1 %v9331_v33  ;;  %v9427_v33 = vor.u32 %v13658_v29, %v9426_v50  ;;  %v13686_v56 = vld [vmem:[#allocation5 + $0x334] sm:$0xf0]  ;;  %v9138_v54 = vld [vmem:[#allocation5 + $0x8] sm:$0xf]  ;;  %v7089_v29 = vpop.f32.mrf.mxu2  ;;  %v7102_v41 = vpop.f32.mrf.mxu3 }
 0x259   :  { %7341 = vmatpush.bf16.msra.mxu2 %v9459_v57  ;;  %v9154_v57 = vld [vmem:[#allocation5 + $0x28] sm:$0xf]  ;;  %v13618_v39 = vld [vmem:[#allocation5 + $0x114] sm:$0xf0]  ;;  %v9539_v44 = vor.u32 %v13686_v56, %v9538_v49 }
 0x25a   :  { %7354 = vmatpush.bf16.msra.mxu3 %v9587_v3  ;;  %v13622_v3 = vld [vmem:[#allocation5 + $0x134] sm:$0xf0]  ;;  %v9155_v12 = vor.u32 %v13590_v58, %v9154_v57  ;;  %v9266_v28 = vld [vmem:[#allocation5 + $0x108] sm:$0xf] }
 0x25b   :  { %7316 = vmatpush.bf16.msra.mxu0 %v9187_v6  ;;  %v13586_v6 = vld [vmem:[#allocation5 + $0x14] sm:$0xf0]  ;;  %v9394_v14 = vld [vmem:[#allocation5 + $0x208] sm:$0xf] }
 0x25c   :  { %7329 = vmatpush.bf16.msra.mxu1 %v9315_v7  ;;  %v9283_v7 = vor.u32 %v13622_v3, %v9282_v63  ;;  %v9522_v46 = vld [vmem:[#allocation5 + $0x308] sm:$0xf]  ;;  %v13682_v50 = vld [vmem:[#allocation5 + $0x314] sm:$0xf0]  ;;  %v9139_v35 = vor.u32 %v13586_v6, %v9138_v54 }
 0x25d   :  { %7342 = vmatpush.bf16.msra.mxu2 %v9443_v62  ;;  %v9411_v62 = vor.u32 %v13654_v16, %v9410_v48  ;;  %v9762_v21 = vld [vmem:[#allocation5 + $0x4e8] sm:$0xf]  ;;  %v13742_v10 = vld [vmem:[#allocation5 + $0x4f4] sm:$0xf0] }
 0x25e   :  { %7355 = vmatpush.bf16.msra.mxu3 %v9571_v51  ;;  %v13650_v51 = vld [vmem:[#allocation5 + $0x214] sm:$0xf0]  ;;  %v9890_v30 = vld [vmem:[#allocation5 + $0x5e8] sm:$0xf]  ;;  %v9763_v3 = vor.u32 %v13742_v10, %v9762_v21 }
 0x25f   :  { %7317 = vmatpush.bf16.msra.mxu0 %v9171_v52  ;;  %v13774_v52 = vld [vmem:[#allocation5 + $0x5f4] sm:$0xf0]  ;;  %v10018_v53 = vld [vmem:[#allocation5 + $0x6e8] sm:$0xf]  ;;  %v9395_v57 = vor.u32 %v13650_v51, %v9394_v14 }
 0x260   :  { %7330 = vmatpush.bf16.msra.mxu1 %v9299_v47  ;;  %v13806_v47 = vld [vmem:[#allocation5 + $0x6f4] sm:$0xf0]  ;;  %v10146_v58 = vld [vmem:[#allocation5 + $0x7e8] sm:$0xf]  ;;  %v9891_v48 = vor.u32 %v13774_v52, %v9890_v30 }
 0x261   :  { %7343 = vmatpush.bf16.msra.mxu2 %v9427_v33  ;;  %v9267_v33 = vor.u32 %v13618_v39, %v9266_v28  ;;  %v13838_v63 = vld [vmem:[#allocation5 + $0x7f4] sm:$0xf0]  ;;  %v10019_v16 = vor.u32 %v13806_v47, %v10018_v53  ;;  %v9746_v49 = vld [vmem:[#allocation5 + $0x4c8] sm:$0xf] }
 0x262   :  { %7356 = vmatpush.bf16.msra.mxu3 %v9555_v45  ;;  %v9523_v45 = vor.u32 %v13682_v50, %v9522_v46  ;;  %v13738_v56 = vld [vmem:[#allocation5 + $0x4d4] sm:$0xf0]  ;;  %v9874_v29 = vld [vmem:[#allocation5 + $0x5c8] sm:$0xf] }
 0x263   :  { %7318 = vmatpush.bf16.msra.mxu0 %v9155_v12  ;;  %v10147_v12 = vor.u32 %v13838_v63, %v10146_v58  ;;  %v13770_v54 = vld [vmem:[#allocation5 + $0x5d4] sm:$0xf0]  ;;  %v10002_v6 = vld [vmem:[#allocation5 + $0x6c8] sm:$0xf]  ;;  %v9747_v28 = vor.u32 %v13738_v56, %v9746_v49 }
 0x264   :  { %7331 = vmatpush.bf16.msra.mxu1 %v9283_v7  ;;  %v13802_v41 = vld [vmem:[#allocation5 + $0x6d4] sm:$0xf0]  ;;  %v10130_v7 = vld [vmem:[#allocation5 + $0x7c8] sm:$0xf]  ;;  %v9875_v39 = vor.u32 %v13770_v54, %v9874_v29 }
 0x265   :  { %7344 = vmatpush.bf16.msra.mxu2 %v9411_v62  ;;  %v13834_v62 = vld [vmem:[#allocation5 + $0x7d4] sm:$0xf0]  ;;  %v10003_v14 = vor.u32 %v13802_v41, %v10002_v6  ;;  %v9858_v46 = vld [vmem:[#allocation5 + $0x5a8] sm:$0xf] }
 0x266   :  { %7357 = vmatpush.bf16.msra.mxu3 %v9539_v44  ;;  %v9730_v44 = vld [vmem:[#allocation5 + $0x4a8] sm:$0xf]  ;;  %v13734_v51 = vld [vmem:[#allocation5 + $0x4b4] sm:$0xf0]  ;;  %v10131_v50 = vor.u32 %v13834_v62, %v10130_v7 }
 0x267   :  { %7319 = vmatpush.bf16.msra.mxu0 %v9139_v35  ;;  %v13766_v21 = vld [vmem:[#allocation5 + $0x5b4] sm:$0xf0]  ;;  %v9986_v10 = vld [vmem:[#allocation5 + $0x6a8] sm:$0xf]  ;;  %v9731_v53 = vor.u32 %v13734_v51, %v9730_v44  ;;  %v7113_v49 = vpop.f32.mrf.mxu0 }
 0x268   :  { %7332 = vmatpush.bf16.msra.mxu1 %v9267_v33  ;;  %v13798_v30 = vld [vmem:[#allocation5 + $0x6b4] sm:$0xf0]  ;;  %v10114_v35 = vld [vmem:[#allocation5 + $0x7a8] sm:$0xf]  ;;  %v9859_v47 = vor.u32 %v13766_v21, %v9858_v46  ;;  %v7126_v6 = vpop.f32.mrf.mxu1 }
 0x269   :  { %7345 = vmatpush.bf16.msra.mxu2 %v9395_v57  ;;  %v13830_v52 = vld [vmem:[#allocation5 + $0x7b4] sm:$0xf0]  ;;  %v9987_v33 = vor.u32 %v13798_v30, %v9986_v10  ;;  %v9714_v57 = vld [vmem:[#allocation5 + $0x488] sm:$0xf] }
 0x26a   :  { %7358 = vmatpush.bf16.msra.mxu3 %v9523_v45  ;;  %7320 = vmatmul.bf16.vlgmr.msra.gmra.mxu0 %v15311_v9  ;;  %v13730_v58 = vld [vmem:[#allocation5 + $0x494] sm:$0xf0]  ;;  %v9842_v63 = vld [vmem:[#allocation5 + $0x588] sm:$0xf]  ;;  %v10115_v45 = vor.u32 %v13830_v52, %v10114_v35 }
 0x26b   :  { %7364 = vmatpush.bf16.msrb.mxu0 %v9763_v3  ;;  %7333 = vmatmul.bf16.vlgmr.msra.gmra.mxu1 %v15318_v25  ;;  %v13762_v3 = vld [vmem:[#allocation5 + $0x594] sm:$0xf0]  ;;  %v10098_v56 = vld [vmem:[#allocation5 + $0x788] sm:$0xf]  ;;  %v9715_v54 = vor.u32 %v13730_v58, %v9714_v57 }
 0x26c   :  { %7377 = vmatpush.bf16.msrb.mxu1 %v9891_v48  ;;  %7346 = vmatmul.bf16.vlgmr.msra.gmra.mxu2 %v15309_v8  ;;  %v9970_v48 = vld [vmem:[#allocation5 + $0x688] sm:$0xf]  ;;  %v13826_v29 = vld [vmem:[#allocation5 + $0x794] sm:$0xf0]  ;;  %v9843_v41 = vor.u32 %v13762_v3, %v9842_v63 }
 0x26d   :  { %7390 = vmatpush.bf16.msrb.mxu2 %v10019_v16  ;;  %7359 = vmatmul.bf16.vlgmr.msra.gmra.mxu3 %v15313_v15  ;;  %v13794_v16 = vld [vmem:[#allocation5 + $0x694] sm:$0xf0]  ;;  %v9698_v62 = vld [vmem:[#allocation5 + $0x468] sm:$0xf] }
 0x26e   :  { %7403 = vmatpush.bf16.msrb.mxu3 %v10147_v12  ;;  %v7114_v12 = vadd.f32 %v7113_v49, %v15469_v42  ;;  %v9971_v7 = vor.u32 %v13794_v16, %v9970_v48  ;;  %v13758_v51 = vld [vmem:[#allocation5 + $0x574] sm:$0xf0]  ;;  %v9954_v46 = vld [vmem:[#allocation5 + $0x668] sm:$0xf] }
 0x26f   :  { %7365 = vmatpush.bf16.msrb.mxu0 %v9747_v28  ;;  %v13726_v28 = vld [vmem:[#allocation5 + $0x474] sm:$0xf0]  ;;  %v10082_v21 = vld [vmem:[#allocation5 + $0x768] sm:$0xf]  ;;  %v7139_v57 = vpop.f32.mrf.mxu2 }
 0x270   :  { %7378 = vmatpush.bf16.msrb.mxu1 %v9875_v39  ;;  %v9826_v39 = vld [vmem:[#allocation5 + $0x568] sm:$0xf]  ;;  %v7127_v44 = vadd.f32 %v7126_v6, %v7114_v12  ;;  %v13822_v10 = vld [vmem:[#allocation5 + $0x774] sm:$0xf0]  ;;  %v9699_v30 = vor.u32 %v13726_v28, %v9698_v62  ;;  %v7152_v48 = vpop.f32.mrf.mxu3  ;;  %v7128_v12 = vpop.f32.mrf.mxu1 }
 0x271   :  { %7391 = vmatpush.bf16.msrb.mxu2 %v10003_v14  ;;  %v10099_v14 = vor.u32 %v13826_v29, %v10098_v56  ;;  %v9827_v42 = vor.u32 %v13758_v51, %v9826_v39  ;;  %v9682_v52 = vld [vmem:[#allocation5 + $0x448] sm:$0xf]  ;;  %v13754_v58 = vld [vmem:[#allocation5 + $0x554] sm:$0xf0]  ;;  %v7115_v56 = vpop.f32.mrf.mxu0 }
 0x272   :  { %7404 = vmatpush.bf16.msrb.mxu3 %v10131_v50  ;;  %v13790_v50 = vld [vmem:[#allocation5 + $0x674] sm:$0xf0]  ;;  %v9938_v63 = vld [vmem:[#allocation5 + $0x648] sm:$0xf]  ;;  %v7140_v3 = vadd.f32 %v7139_v57, %v7127_v44 }
 0x273   :  { %7366 = vmatpush.bf16.msrb.mxu0 %v9731_v53  ;;  %v9955_v35 = vor.u32 %v13790_v50, %v9954_v46  ;;  %v13722_v53 = vld [vmem:[#allocation5 + $0x454] sm:$0xf0]  ;;  %v10066_v16 = vld [vmem:[#allocation5 + $0x748] sm:$0xf] }
 0x274   :  { %7379 = vmatpush.bf16.msrb.mxu1 %v9859_v47  ;;  %v9810_v47 = vld [vmem:[#allocation5 + $0x548] sm:$0xf]  ;;  %v13818_v49 = vld [vmem:[#allocation5 + $0x754] sm:$0xf0]  ;;  %v9683_v29 = vor.u32 %v13722_v53, %v9682_v52 }
 0x275   :  { %7392 = vmatpush.bf16.msrb.mxu2 %v9987_v33  ;;  %v10083_v33 = vor.u32 %v13822_v10, %v10082_v21  ;;  %v9811_v6 = vor.u32 %v13754_v58, %v9810_v47  ;;  %v13718_v62 = vld [vmem:[#allocation5 + $0x434] sm:$0xf0]  ;;  %v9794_v28 = vld [vmem:[#allocation5 + $0x528] sm:$0xf]  ;;  %v10067_v39 = vor.u32 %v13818_v49, %v10066_v16 }
 0x276   :  { %7405 = vmatpush.bf16.msrb.mxu3 %v10115_v45  ;;  %v13786_v45 = vld [vmem:[#allocation5 + $0x654] sm:$0xf0]  ;;  %v9922_v44 = vld [vmem:[#allocation5 + $0x628] sm:$0xf] }
 0x277   :  { %7367 = vmatpush.bf16.msrb.mxu0 %v9715_v54  ;;  %v15476_v54 = vadd.f32 %v7152_v48, %v7140_v3  ;;  %v13782_v51 = vld [vmem:[#allocation5 + $0x634] sm:$0xf0]  ;;  %v10050_v46 = vld [vmem:[#allocation5 + $0x728] sm:$0xf] }
 0x278   :  { %7380 = vmatpush.bf16.msrb.mxu1 %v9843_v41  ;;  %v9939_v41 = vor.u32 %v13786_v45, %v9938_v63  ;;  %v13814_v50 = vld [vmem:[#allocation5 + $0x734] sm:$0xf0]  ;;  %v9650_v10 = vld [vmem:[#allocation5 + $0x408] sm:$0xf]  ;;  %v7141_v45 = vpop.f32.mrf.mxu2  ;;  %v7154_v49 = vpop.f32.mrf.mxu3 }
 0x279   :  { %7393 = vmatpush.bf16.msrb.mxu2 %v9971_v7  ;;  %v9666_v7 = vld [vmem:[#allocation5 + $0x428] sm:$0xf]  ;;  %v13746_v53 = vld [vmem:[#allocation5 + $0x514] sm:$0xf0]  ;;  %v10051_v57 = vor.u32 %v13814_v50, %v10050_v46 }
 0x27a   :  { %7406 = vmatpush.bf16.msrb.mxu3 %v10099_v14  ;;  %v13750_v14 = vld [vmem:[#allocation5 + $0x534] sm:$0xf0]  ;;  %v9667_v21 = vor.u32 %v13718_v62, %v9666_v7  ;;  %v9778_v52 = vld [vmem:[#allocation5 + $0x508] sm:$0xf] }
 0x27b   :  { %7368 = vmatpush.bf16.msrb.mxu0 %v9699_v30  ;;  %v13714_v30 = vld [vmem:[#allocation5 + $0x414] sm:$0xf0]  ;;  %v9906_v47 = vld [vmem:[#allocation5 + $0x608] sm:$0xf] }
 0x27c   :  { %7381 = vmatpush.bf16.msrb.mxu1 %v9827_v42  ;;  %v9795_v42 = vor.u32 %v13750_v14, %v9794_v28  ;;  %v10034_v58 = vld [vmem:[#allocation5 + $0x708] sm:$0xf]  ;;  %v13810_v63 = vld [vmem:[#allocation5 + $0x714] sm:$0xf0]  ;;  %v9651_v56 = vor.u32 %v13714_v30, %v9650_v10 }
 0x27d   :  { %7394 = vmatpush.bf16.msrb.mxu2 %v9955_v35  ;;  %v9923_v35 = vor.u32 %v13782_v51, %v9922_v44  ;;  %v10274_v3 = vld [vmem:[#allocation5 + $0x8e8] sm:$0xf]  ;;  %v13870_v48 = vld [vmem:[#allocation5 + $0x8f4] sm:$0xf0] }
 0x27e   :  { %7407 = vmatpush.bf16.msrb.mxu3 %v10083_v33  ;;  %v13778_v33 = vld [vmem:[#allocation5 + $0x614] sm:$0xf0]  ;;  %v10402_v16 = vld [vmem:[#allocation5 + $0x9e8] sm:$0xf]  ;;  %v10275_v14 = vor.u32 %v13870_v48, %v10274_v3 }
 0x27f   :  { %7369 = vmatpush.bf16.msrb.mxu0 %v9683_v29  ;;  %v13902_v29 = vld [vmem:[#allocation5 + $0x9f4] sm:$0xf0]  ;;  %v10530_v12 = vld [vmem:[#allocation5 + $0xae8] sm:$0xf]  ;;  %v9907_v7 = vor.u32 %v13778_v33, %v9906_v47 }
 0x280   :  { %7382 = vmatpush.bf16.msrb.mxu1 %v9811_v6  ;;  %v13934_v6 = vld [vmem:[#allocation5 + $0xaf4] sm:$0xf0]  ;;  %v10658_v62 = vld [vmem:[#allocation5 + $0xbe8] sm:$0xf]  ;;  %v10403_v44 = vor.u32 %v13902_v29, %v10402_v16 }
 0x281   :  { %7395 = vmatpush.bf16.msrb.mxu2 %v9939_v41  ;;  %v9779_v41 = vor.u32 %v13746_v53, %v9778_v52  ;;  %v13966_v28 = vld [vmem:[#allocation5 + $0xbf4] sm:$0xf0]  ;;  %v10531_v51 = vor.u32 %v13934_v6, %v10530_v12  ;;  %v10258_v46 = vld [vmem:[#allocation5 + $0x8c8] sm:$0xf] }
 0x282   :  { %7408 = vmatpush.bf16.msrb.mxu3 %v10067_v39  ;;  %v10035_v39 = vor.u32 %v13810_v63, %v10034_v58  ;;  %v13866_v50 = vld [vmem:[#allocation5 + $0x8d4] sm:$0xf0]  ;;  %v10386_v45 = vld [vmem:[#allocation5 + $0x9c8] sm:$0xf] }
 0x283   :  { %7370 = vmatpush.bf16.msrb.mxu0 %v9667_v21  ;;  %v10659_v21 = vor.u32 %v13966_v28, %v10658_v62  ;;  %v13898_v10 = vld [vmem:[#allocation5 + $0x9d4] sm:$0xf0]  ;;  %v10514_v30 = vld [vmem:[#allocation5 + $0xac8] sm:$0xf]  ;;  %v10259_v52 = vor.u32 %v13866_v50, %v10258_v46 }
 0x284   :  { %7383 = vmatpush.bf16.msrb.mxu1 %v9795_v42  ;;  %v13930_v49 = vld [vmem:[#allocation5 + $0xad4] sm:$0xf0]  ;;  %v10642_v42 = vld [vmem:[#allocation5 + $0xbc8] sm:$0xf]  ;;  %v10387_v53 = vor.u32 %v13898_v10, %v10386_v45 }
 0x285   :  { %7396 = vmatpush.bf16.msrb.mxu2 %v9923_v35  ;;  %v13962_v35 = vld [vmem:[#allocation5 + $0xbd4] sm:$0xf0]  ;;  %v10515_v47 = vor.u32 %v13930_v49, %v10514_v30  ;;  %v10370_v58 = vld [vmem:[#allocation5 + $0x9a8] sm:$0xf] }
 0x286   :  { %7409 = vmatpush.bf16.msrb.mxu3 %v10051_v57  ;;  %v10242_v57 = vld [vmem:[#allocation5 + $0x8a8] sm:$0xf]  ;;  %v13862_v33 = vld [vmem:[#allocation5 + $0x8b4] sm:$0xf0]  ;;  %v10643_v63 = vor.u32 %v13962_v35, %v10642_v42 }
 0x287   :  { %7371 = vmatpush.bf16.msrb.mxu0 %v9651_v56  ;;  %v13894_v3 = vld [vmem:[#allocation5 + $0x9b4] sm:$0xf0]  ;;  %v10498_v48 = vld [vmem:[#allocation5 + $0xaa8] sm:$0xf]  ;;  %v10243_v12 = vor.u32 %v13862_v33, %v10242_v57  ;;  %v7165_v46 = vpop.f32.mrf.mxu0 }
 0x288   :  { %7384 = vmatpush.bf16.msrb.mxu1 %v9779_v41  ;;  %v13926_v16 = vld [vmem:[#allocation5 + $0xab4] sm:$0xf0]  ;;  %v10626_v56 = vld [vmem:[#allocation5 + $0xba8] sm:$0xf]  ;;  %v10371_v6 = vor.u32 %v13894_v3, %v10370_v58  ;;  %v7178_v30 = vpop.f32.mrf.mxu1 }
 0x289   :  { %7397 = vmatpush.bf16.msrb.mxu2 %v9907_v7  ;;  %v13958_v29 = vld [vmem:[#allocation5 + $0xbb4] sm:$0xf0]  ;;  %v10499_v41 = vor.u32 %v13926_v16, %v10498_v48  ;;  %v10226_v7 = vld [vmem:[#allocation5 + $0x888] sm:$0xf] }
 0x28a   :  { %7410 = vmatpush.bf16.msrb.mxu3 %v10035_v39  ;;  %7372 = vmatmul.bf16.vlgmr.msrb.gmra.mxu0 %v15323_v37  ;;  %v13858_v62 = vld [vmem:[#allocation5 + $0x894] sm:$0xf0]  ;;  %v10354_v28 = vld [vmem:[#allocation5 + $0x988] sm:$0xf]  ;;  %v10627_v39 = vor.u32 %v13958_v29, %v10626_v56 }
 0x28b   :  { %7416 = vmatpush.bf16.msra.mxu0 %v10275_v14  ;;  %7385 = vmatmul.bf16.vlgmr.msrb.gmra.mxu1 %v15327_v40  ;;  %v13890_v14 = vld [vmem:[#allocation5 + $0x994] sm:$0xf0]  ;;  %v10610_v50 = vld [vmem:[#allocation5 + $0xb88] sm:$0xf]  ;;  %v10227_v10 = vor.u32 %v13858_v62, %v10226_v7 }
 0x28c   :  { %7429 = vmatpush.bf16.msra.mxu1 %v10403_v44  ;;  %7398 = vmatmul.bf16.vlgmr.msrb.gmra.mxu2 %v15321_v34  ;;  %v10482_v44 = vld [vmem:[#allocation5 + $0xa88] sm:$0xf]  ;;  %v13954_v45 = vld [vmem:[#allocation5 + $0xb94] sm:$0xf0]  ;;  %v10355_v49 = vor.u32 %v13890_v14, %v10354_v28 }
 0x28d   :  { %7442 = vmatpush.bf16.msra.mxu2 %v10531_v51  ;;  %7411 = vmatmul.bf16.vlgmr.msrb.gmra.mxu3 %v15325_v38  ;;  %v13922_v51 = vld [vmem:[#allocation5 + $0xa94] sm:$0xf0]  ;;  %v10210_v35 = vld [vmem:[#allocation5 + $0x868] sm:$0xf] }
 0x28e   :  { %7455 = vmatpush.bf16.msra.mxu3 %v10659_v21  ;;  %v7166_v21 = vadd.f32 %v7165_v46, %v15476_v54  ;;  %v10483_v42 = vor.u32 %v13922_v51, %v10482_v44  ;;  %v13886_v33 = vld [vmem:[#allocation5 + $0x974] sm:$0xf0]  ;;  %v10466_v58 = vld [vmem:[#allocation5 + $0xa68] sm:$0xf] }
 0x28f   :  { %7417 = vmatpush.bf16.msra.mxu0 %v10259_v52  ;;  %v13854_v52 = vld [vmem:[#allocation5 + $0x874] sm:$0xf0]  ;;  %v10594_v3 = vld [vmem:[#allocation5 + $0xb68] sm:$0xf]  ;;  %v7191_v7 = vpop.f32.mrf.mxu2 }
 0x290   :  { %7430 = vmatpush.bf16.msra.mxu1 %v10387_v53  ;;  %v10338_v53 = vld [vmem:[#allocation5 + $0x968] sm:$0xf]  ;;  %v7179_v57 = vadd.f32 %v7178_v30, %v7166_v21  ;;  %v13950_v48 = vld [vmem:[#allocation5 + $0xb74] sm:$0xf0]  ;;  %v10211_v16 = vor.u32 %v13854_v52, %v10210_v35  ;;  %v7204_v44 = vpop.f32.mrf.mxu3  ;;  %v7180_v21 = vpop.f32.mrf.mxu1 }
 0x291   :  { %7443 = vmatpush.bf16.msra.mxu2 %v10515_v47  ;;  %v10611_v47 = vor.u32 %v13954_v45, %v10610_v50  ;;  %v10339_v54 = vor.u32 %v13886_v33, %v10338_v53  ;;  %v10194_v29 = vld [vmem:[#allocation5 + $0x848] sm:$0xf]  ;;  %v13882_v62 = vld [vmem:[#allocation5 + $0x954] sm:$0xf0]  ;;  %v7167_v50 = vpop.f32.mrf.mxu0 }
 0x292   :  { %7456 = vmatpush.bf16.msra.mxu3 %v10643_v63  ;;  %v13918_v63 = vld [vmem:[#allocation5 + $0xa74] sm:$0xf0]  ;;  %v10450_v28 = vld [vmem:[#allocation5 + $0xa48] sm:$0xf]  ;;  %v7192_v14 = vadd.f32 %v7191_v7, %v7179_v57 }
 0x293   :  { %7418 = vmatpush.bf16.msra.mxu0 %v10243_v12  ;;  %v10467_v56 = vor.u32 %v13918_v63, %v10466_v58  ;;  %v13850_v12 = vld [vmem:[#allocation5 + $0x854] sm:$0xf0]  ;;  %v10578_v51 = vld [vmem:[#allocation5 + $0xb48] sm:$0xf] }
 0x294   :  { %7431 = vmatpush.bf16.msra.mxu1 %v10371_v6  ;;  %v10322_v6 = vld [vmem:[#allocation5 + $0x948] sm:$0xf]  ;;  %v13946_v46 = vld [vmem:[#allocation5 + $0xb54] sm:$0xf0]  ;;  %v10195_v45 = vor.u32 %v13850_v12, %v10194_v29 }
 0x295   :  { %7444 = vmatpush.bf16.msra.mxu2 %v10499_v41  ;;  %v10595_v41 = vor.u32 %v13950_v48, %v10594_v3  ;;  %v10323_v30 = vor.u32 %v13882_v62, %v10322_v6  ;;  %v13846_v35 = vld [vmem:[#allocation5 + $0x834] sm:$0xf0]  ;;  %v10306_v52 = vld [vmem:[#allocation5 + $0x928] sm:$0xf]  ;;  %v10579_v53 = vor.u32 %v13946_v46, %v10578_v51 }
 0x296   :  { %7457 = vmatpush.bf16.msra.mxu3 %v10627_v39  ;;  %v13914_v39 = vld [vmem:[#allocation5 + $0xa54] sm:$0xf0]  ;;  %v10434_v57 = vld [vmem:[#allocation5 + $0xa28] sm:$0xf] }
 0x297   :  { %7419 = vmatpush.bf16.msra.mxu0 %v10227_v10  ;;  %v15483_v10 = vadd.f32 %v7204_v44, %v7192_v14  ;;  %v13910_v33 = vld [vmem:[#allocation5 + $0xa34] sm:$0xf0]  ;;  %v10562_v58 = vld [vmem:[#allocation5 + $0xb28] sm:$0xf] }
 0x298   :  { %7432 = vmatpush.bf16.msra.mxu1 %v10355_v49  ;;  %v10451_v49 = vor.u32 %v13914_v39, %v10450_v28  ;;  %v13942_v63 = vld [vmem:[#allocation5 + $0xb34] sm:$0xf0]  ;;  %v10162_v48 = vld [vmem:[#allocation5 + $0x808] sm:$0xf]  ;;  %v7193_v39 = vpop.f32.mrf.mxu2  ;;  %v7206_v46 = vpop.f32.mrf.mxu3 }
 0x299   :  { %7445 = vmatpush.bf16.msra.mxu2 %v10483_v42  ;;  %v10178_v42 = vld [vmem:[#allocation5 + $0x828] sm:$0xf]  ;;  %v13874_v12 = vld [vmem:[#allocation5 + $0x914] sm:$0xf0]  ;;  %v10563_v7 = vor.u32 %v13942_v63, %v10562_v58 }
 0x29a   :  { %7458 = vmatpush.bf16.msra.mxu3 %v10611_v47  ;;  %v13878_v47 = vld [vmem:[#allocation5 + $0x934] sm:$0xf0]  ;;  %v10179_v3 = vor.u32 %v13846_v35, %v10178_v42  ;;  %v10290_v29 = vld [vmem:[#allocation5 + $0x908] sm:$0xf] }
 0x29b   :  { %7420 = vmatpush.bf16.msra.mxu0 %v10211_v16  ;;  %v13842_v16 = vld [vmem:[#allocation5 + $0x814] sm:$0xf0]  ;;  %v10418_v6 = vld [vmem:[#allocation5 + $0xa08] sm:$0xf] }
 0x29c   :  { %7433 = vmatpush.bf16.msra.mxu1 %v10339_v54  ;;  %v10307_v54 = vor.u32 %v13878_v47, %v10306_v52  ;;  %v10546_v62 = vld [vmem:[#allocation5 + $0xb08] sm:$0xf]  ;;  %v13938_v28 = vld [vmem:[#allocation5 + $0xb14] sm:$0xf0]  ;;  %v10163_v50 = vor.u32 %v13842_v16, %v10162_v48 }
 0x29d   :  { %7446 = vmatpush.bf16.msra.mxu2 %v10467_v56  ;;  %v10435_v56 = vor.u32 %v13910_v33, %v10434_v57  ;;  %v10786_v14 = vld [vmem:[#allocation5 + $0xce8] sm:$0xf]  ;;  %v13998_v44 = vld [vmem:[#allocation5 + $0xcf4] sm:$0xf0] }
 0x29e   :  { %7459 = vmatpush.bf16.msra.mxu3 %v10595_v41  ;;  %v13906_v41 = vld [vmem:[#allocation5 + $0xa14] sm:$0xf0]  ;;  %v10914_v51 = vld [vmem:[#allocation5 + $0xde8] sm:$0xf]  ;;  %v10787_v47 = vor.u32 %v13998_v44, %v10786_v14 }
 0x29f   :  { %7421 = vmatpush.bf16.msra.mxu0 %v10195_v45  ;;  %v14030_v45 = vld [vmem:[#allocation5 + $0xdf4] sm:$0xf0]  ;;  %v11042_v21 = vld [vmem:[#allocation5 + $0xee8] sm:$0xf]  ;;  %v10419_v42 = vor.u32 %v13906_v41, %v10418_v6 }
 0x2a0   :  { %7434 = vmatpush.bf16.msra.mxu1 %v10323_v30  ;;  %v14062_v30 = vld [vmem:[#allocation5 + $0xef4] sm:$0xf0]  ;;  %v11170_v35 = vld [vmem:[#allocation5 + $0xfe8] sm:$0xf]  ;;  %v10915_v57 = vor.u32 %v14030_v45, %v10914_v51 }
 0x2a1   :  { %7447 = vmatpush.bf16.msra.mxu2 %v10451_v49  ;;  %v10291_v49 = vor.u32 %v13874_v12, %v10290_v29  ;;  %v14094_v52 = vld [vmem:[#allocation5 + $0xff4] sm:$0xf0]  ;;  %v11043_v33 = vor.u32 %v14062_v30, %v11042_v21  ;;  %v10770_v58 = vld [vmem:[#allocation5 + $0xcc8] sm:$0xf] }
 0x2a2   :  { %7460 = vmatpush.bf16.msra.mxu3 %v10579_v53  ;;  %v10547_v53 = vor.u32 %v13938_v28, %v10546_v62  ;;  %v13994_v63 = vld [vmem:[#allocation5 + $0xcd4] sm:$0xf0]  ;;  %v10898_v39 = vld [vmem:[#allocation5 + $0xdc8] sm:$0xf] }
 0x2a3   :  { %7422 = vmatpush.bf16.msra.mxu0 %v10179_v3  ;;  %v11171_v3 = vor.u32 %v14094_v52, %v11170_v35  ;;  %v14026_v48 = vld [vmem:[#allocation5 + $0xdd4] sm:$0xf0]  ;;  %v11026_v16 = vld [vmem:[#allocation5 + $0xec8] sm:$0xf]  ;;  %v10771_v29 = vor.u32 %v13994_v63, %v10770_v58 }
 0x2a4   :  { %7435 = vmatpush.bf16.msra.mxu1 %v10307_v54  ;;  %v14058_v46 = vld [vmem:[#allocation5 + $0xed4] sm:$0xf0]  ;;  %v11154_v54 = vld [vmem:[#allocation5 + $0xfc8] sm:$0xf]  ;;  %v10899_v12 = vor.u32 %v14026_v48, %v10898_v39 }
 0x2a5   :  { %7448 = vmatpush.bf16.msra.mxu2 %v10435_v56  ;;  %v14090_v56 = vld [vmem:[#allocation5 + $0xfd4] sm:$0xf0]  ;;  %v11027_v6 = vor.u32 %v14058_v46, %v11026_v16  ;;  %v10882_v62 = vld [vmem:[#allocation5 + $0xda8] sm:$0xf] }
 0x2a6   :  { %7461 = vmatpush.bf16.msra.mxu3 %v10563_v7  ;;  %v10754_v7 = vld [vmem:[#allocation5 + $0xca8] sm:$0xf]  ;;  %v13990_v41 = vld [vmem:[#allocation5 + $0xcb4] sm:$0xf0]  ;;  %v11155_v28 = vor.u32 %v14090_v56, %v11154_v54 }
 0x2a7   :  { %7423 = vmatpush.bf16.msra.mxu0 %v10163_v50  ;;  %v14022_v14 = vld [vmem:[#allocation5 + $0xdb4] sm:$0xf0]  ;;  %v11010_v44 = vld [vmem:[#allocation5 + $0xea8] sm:$0xf]  ;;  %v10755_v21 = vor.u32 %v13990_v41, %v10754_v7  ;;  %v7217_v58 = vpop.f32.mrf.mxu0 }
 0x2a8   :  { %7436 = vmatpush.bf16.msra.mxu1 %v10291_v49  ;;  %v14054_v51 = vld [vmem:[#allocation5 + $0xeb4] sm:$0xf0]  ;;  %v11138_v50 = vld [vmem:[#allocation5 + $0xfa8] sm:$0xf]  ;;  %v10883_v30 = vor.u32 %v14022_v14, %v10882_v62  ;;  %v7230_v16 = vpop.f32.mrf.mxu1 }
 0x2a9   :  { %7449 = vmatpush.bf16.msra.mxu2 %v10419_v42  ;;  %v14086_v45 = vld [vmem:[#allocation5 + $0xfb4] sm:$0xf0]  ;;  %v11011_v49 = vor.u32 %v14054_v51, %v11010_v44  ;;  %v10738_v42 = vld [vmem:[#allocation5 + $0xc88] sm:$0xf] }
 0x2aa   :  { %7462 = vmatpush.bf16.msra.mxu3 %v10547_v53  ;;  %7424 = vmatmul.bf16.vlgmr.msra.gmra.mxu0 %v15333_v18  ;;  %v13986_v35 = vld [vmem:[#allocation5 + $0xc94] sm:$0xf0]  ;;  %v10866_v52 = vld [vmem:[#allocation5 + $0xd88] sm:$0xf]  ;;  %v11139_v53 = vor.u32 %v14086_v45, %v11138_v50 }
 0x2ab   :  { %7468 = vmatpush.bf16.msrb.mxu0 %v10787_v47  ;;  %7437 = vmatmul.bf16.vlgmr.msra.gmra.mxu1 %v15337_v23  ;;  %v14018_v47 = vld [vmem:[#allocation5 + $0xd94] sm:$0xf0]  ;;  %v11122_v63 = vld [vmem:[#allocation5 + $0xf88] sm:$0xf]  ;;  %v10739_v48 = vor.u32 %v13986_v35, %v10738_v42 }
 0x2ac   :  { %7481 = vmatpush.bf16.msrb.mxu1 %v10915_v57  ;;  %7450 = vmatmul.bf16.vlgmr.msra.gmra.mxu2 %v15335_v22  ;;  %v10994_v57 = vld [vmem:[#allocation5 + $0xe88] sm:$0xf]  ;;  %v14082_v39 = vld [vmem:[#allocation5 + $0xf94] sm:$0xf0]  ;;  %v10867_v46 = vor.u32 %v14018_v47, %v10866_v52 }
 0x2ad   :  { %7494 = vmatpush.bf16.msrb.mxu2 %v11043_v33  ;;  %7463 = vmatmul.bf16.vlgmr.msra.gmra.mxu3 %v15339_v27  ;;  %v14050_v33 = vld [vmem:[#allocation5 + $0xe94] sm:$0xf0]  ;;  %v10722_v56 = vld [vmem:[#allocation5 + $0xc68] sm:$0xf] }
 0x2ae   :  { %7507 = vmatpush.bf16.msrb.mxu3 %v11171_v3  ;;  %v7218_v3 = vadd.f32 %v7217_v58, %v15483_v10  ;;  %v10995_v54 = vor.u32 %v14050_v33, %v10994_v57  ;;  %v14014_v41 = vld [vmem:[#allocation5 + $0xd74] sm:$0xf0]  ;;  %v10978_v62 = vld [vmem:[#allocation5 + $0xe68] sm:$0xf] }
 0x2af   :  { %7469 = vmatpush.bf16.msrb.mxu0 %v10771_v29  ;;  %v13982_v29 = vld [vmem:[#allocation5 + $0xc74] sm:$0xf0]  ;;  %v11106_v14 = vld [vmem:[#allocation5 + $0xf68] sm:$0xf]  ;;  %v7243_v42 = vpop.f32.mrf.mxu2 }
 0x2b0   :  { %7482 = vmatpush.bf16.msrb.mxu1 %v10899_v12  ;;  %v10850_v12 = vld [vmem:[#allocation5 + $0xd68] sm:$0xf]  ;;  %v7231_v7 = vadd.f32 %v7230_v16, %v7218_v3  ;;  %v14078_v44 = vld [vmem:[#allocation5 + $0xf74] sm:$0xf0]  ;;  %v10723_v51 = vor.u32 %v13982_v29, %v10722_v56  ;;  %v7256_v57 = vpop.f32.mrf.mxu3  ;;  %v7232_v3 = vpop.f32.mrf.mxu1 }
 0x2b1   :  { %7495 = vmatpush.bf16.msrb.mxu2 %v11027_v6  ;;  %v11123_v6 = vor.u32 %v14082_v39, %v11122_v63  ;;  %v10851_v10 = vor.u32 %v14014_v41, %v10850_v12  ;;  %v10706_v45 = vld [vmem:[#allocation5 + $0xc48] sm:$0xf]  ;;  %v14010_v35 = vld [vmem:[#allocation5 + $0xd54] sm:$0xf0]  ;;  %v7219_v63 = vpop.f32.mrf.mxu0 }
 0x2b2   :  { %7508 = vmatpush.bf16.msrb.mxu3 %v11155_v28  ;;  %v14046_v28 = vld [vmem:[#allocation5 + $0xe74] sm:$0xf0]  ;;  %v10962_v52 = vld [vmem:[#allocation5 + $0xe48] sm:$0xf]  ;;  %v7244_v47 = vadd.f32 %v7243_v42, %v7231_v7 }
 0x2b3   :  { %7470 = vmatpush.bf16.msrb.mxu0 %v10755_v21  ;;  %v10979_v50 = vor.u32 %v14046_v28, %v10978_v62  ;;  %v13978_v21 = vld [vmem:[#allocation5 + $0xc54] sm:$0xf0]  ;;  %v11090_v33 = vld [vmem:[#allocation5 + $0xf48] sm:$0xf] }
 0x2b4   :  { %7483 = vmatpush.bf16.msrb.mxu1 %v10883_v30  ;;  %v10834_v30 = vld [vmem:[#allocation5 + $0xd48] sm:$0xf]  ;;  %v14074_v58 = vld [vmem:[#allocation5 + $0xf54] sm:$0xf0]  ;;  %v10707_v39 = vor.u32 %v13978_v21, %v10706_v45 }
 0x2b5   :  { %7496 = vmatpush.bf16.msrb.mxu2 %v11011_v49  ;;  %v11107_v49 = vor.u32 %v14078_v44, %v11106_v14  ;;  %v10835_v16 = vor.u32 %v14010_v35, %v10834_v30  ;;  %v13974_v56 = vld [vmem:[#allocation5 + $0xc34] sm:$0xf0]  ;;  %v10818_v29 = vld [vmem:[#allocation5 + $0xd28] sm:$0xf]  ;;  %v11091_v12 = vor.u32 %v14074_v58, %v11090_v33 }
 0x2b6   :  { %7509 = vmatpush.bf16.msrb.mxu3 %v11139_v53  ;;  %v14042_v53 = vld [vmem:[#allocation5 + $0xe54] sm:$0xf0]  ;;  %v10946_v7 = vld [vmem:[#allocation5 + $0xe28] sm:$0xf] }
 0x2b7   :  { %7471 = vmatpush.bf16.msrb.mxu0 %v10739_v48  ;;  %v15490_v48 = vadd.f32 %v7256_v57, %v7244_v47  ;;  %v14038_v41 = vld [vmem:[#allocation5 + $0xe34] sm:$0xf0]  ;;  %v11074_v62 = vld [vmem:[#allocation5 + $0xf28] sm:$0xf] }
 0x2b8   :  { %7484 = vmatpush.bf16.msrb.mxu1 %v10867_v46  ;;  %v10963_v46 = vor.u32 %v14042_v53, %v10962_v52  ;;  %v14070_v28 = vld [vmem:[#allocation5 + $0xf34] sm:$0xf0]  ;;  %v10674_v44 = vld [vmem:[#allocation5 + $0xc08] sm:$0xf]  ;;  %v7245_v53 = vpop.f32.mrf.mxu2  ;;  %v7258_v58 = vpop.f32.mrf.mxu3 }
 0x2b9   :  { %7497 = vmatpush.bf16.msrb.mxu2 %v10995_v54  ;;  %v10690_v54 = vld [vmem:[#allocation5 + $0xc28] sm:$0xf]  ;;  %v14002_v21 = vld [vmem:[#allocation5 + $0xd14] sm:$0xf0]  ;;  %v11075_v42 = vor.u32 %v14070_v28, %v11074_v62 }
 0x2ba   :  { %7510 = vmatpush.bf16.msrb.mxu3 %v11123_v6  ;;  %v14006_v6 = vld [vmem:[#allocation5 + $0xd34] sm:$0xf0]  ;;  %v10691_v14 = vor.u32 %v13974_v56, %v10690_v54  ;;  %v10802_v45 = vld [vmem:[#allocation5 + $0xd08] sm:$0xf] }
 0x2bb   :  { %7472 = vmatpush.bf16.msrb.mxu0 %v10723_v51  ;;  %v13970_v51 = vld [vmem:[#allocation5 + $0xc14] sm:$0xf0]  ;;  %v10930_v30 = vld [vmem:[#allocation5 + $0xe08] sm:$0xf] }
 0x2bc   :  { %7485 = vmatpush.bf16.msrb.mxu1 %v10851_v10  ;;  %v10819_v10 = vor.u32 %v14006_v6, %v10818_v29  ;;  %v11058_v35 = vld [vmem:[#allocation5 + $0xf08] sm:$0xf]  ;;  %v14066_v52 = vld [vmem:[#allocation5 + $0xf14] sm:$0xf0]  ;;  %v10675_v63 = vor.u32 %v13970_v51, %v10674_v44 }
 0x2bd   :  { %7498 = vmatpush.bf16.msrb.mxu2 %v10979_v50  ;;  %v10947_v50 = vor.u32 %v14038_v41, %v10946_v7  ;;  %v11298_v47 = vld [vmem:[#allocation5 + $0x10e8] sm:$0xf]  ;;  %v14126_v57 = vld [vmem:[#allocation5 + $0x10f4] sm:$0xf0] }
 0x2be   :  { %7511 = vmatpush.bf16.msrb.mxu3 %v11107_v49  ;;  %v14034_v49 = vld [vmem:[#allocation5 + $0xe14] sm:$0xf0]  ;;  %v11426_v33 = vld [vmem:[#allocation5 + $0x11e8] sm:$0xf]  ;;  %v11299_v6 = vor.u32 %v14126_v57, %v11298_v47 }
 0x2bf   :  { %7473 = vmatpush.bf16.msrb.mxu0 %v10707_v39  ;;  %v14158_v39 = vld [vmem:[#allocation5 + $0x11f4] sm:$0xf0]  ;;  %v11554_v3 = vld [vmem:[#allocation5 + $0x12e8] sm:$0xf]  ;;  %v10931_v54 = vor.u32 %v14034_v49, %v10930_v30 }
 0x2c0   :  { %7486 = vmatpush.bf16.msrb.mxu1 %v10835_v16  ;;  %v14190_v16 = vld [vmem:[#allocation5 + $0x12f4] sm:$0xf0]  ;;  %v11682_v56 = vld [vmem:[#allocation5 + $0x13e8] sm:$0xf]  ;;  %v11427_v7 = vor.u32 %v14158_v39, %v11426_v33 }
 0x2c1   :  { %7499 = vmatpush.bf16.msrb.mxu2 %v10963_v46  ;;  %v10803_v46 = vor.u32 %v14002_v21, %v10802_v45  ;;  %v14222_v29 = vld [vmem:[#allocation5 + $0x13f4] sm:$0xf0]  ;;  %v11555_v41 = vor.u32 %v14190_v16, %v11554_v3  ;;  %v11282_v62 = vld [vmem:[#allocation5 + $0x10c8] sm:$0xf] }
 0x2c2   :  { %7512 = vmatpush.bf16.msrb.mxu3 %v11091_v12  ;;  %v11059_v12 = vor.u32 %v14066_v52, %v11058_v35  ;;  %v14122_v28 = vld [vmem:[#allocation5 + $0x10d4] sm:$0xf0]  ;;  %v11410_v53 = vld [vmem:[#allocation5 + $0x11c8] sm:$0xf] }
 0x2c3   :  { %7474 = vmatpush.bf16.msrb.mxu0 %v10691_v14  ;;  %v11683_v14 = vor.u32 %v14222_v29, %v11682_v56  ;;  %v14154_v44 = vld [vmem:[#allocation5 + $0x11d4] sm:$0xf0]  ;;  %v11538_v51 = vld [vmem:[#allocation5 + $0x12c8] sm:$0xf]  ;;  %v11283_v45 = vor.u32 %v14122_v28, %v11282_v62 }
 0x2c4   :  { %7487 = vmatpush.bf16.msrb.mxu1 %v10819_v10  ;;  %v14186_v58 = vld [vmem:[#allocation5 + $0x12d4] sm:$0xf0]  ;;  %v11666_v10 = vld [vmem:[#allocation5 + $0x13c8] sm:$0xf]  ;;  %v11411_v21 = vor.u32 %v14154_v44, %v11410_v53 }
 0x2c5   :  { %7500 = vmatpush.bf16.msrb.mxu2 %v10947_v50  ;;  %v14218_v50 = vld [vmem:[#allocation5 + $0x13d4] sm:$0xf0]  ;;  %v11539_v30 = vor.u32 %v14186_v58, %v11538_v51  ;;  %v11394_v35 = vld [vmem:[#allocation5 + $0x11a8] sm:$0xf] }
 0x2c6   :  { %7513 = vmatpush.bf16.msrb.mxu3 %v11075_v42  ;;  %v11266_v42 = vld [vmem:[#allocation5 + $0x10a8] sm:$0xf]  ;;  %v14118_v49 = vld [vmem:[#allocation5 + $0x10b4] sm:$0xf0]  ;;  %v11667_v52 = vor.u32 %v14218_v50, %v11666_v10 }
 0x2c7   :  { %7475 = vmatpush.bf16.msrb.mxu0 %v10675_v63  ;;  %v14150_v47 = vld [vmem:[#allocation5 + $0x11b4] sm:$0xf0]  ;;  %v11522_v57 = vld [vmem:[#allocation5 + $0x12a8] sm:$0xf]  ;;  %v11267_v3 = vor.u32 %v14118_v49, %v11266_v42  ;;  %v7269_v62 = vpop.f32.mrf.mxu0 }
 0x2c8   :  { %7488 = vmatpush.bf16.msrb.mxu1 %v10803_v46  ;;  %v14182_v33 = vld [vmem:[#allocation5 + $0x12b4] sm:$0xf0]  ;;  %v11650_v63 = vld [vmem:[#allocation5 + $0x13a8] sm:$0xf]  ;;  %v11395_v16 = vor.u32 %v14150_v47, %v11394_v35  ;;  %v7282_v51 = vpop.f32.mrf.mxu1 }
 0x2c9   :  { %7501 = vmatpush.bf16.msrb.mxu2 %v10931_v54  ;;  %v14214_v39 = vld [vmem:[#allocation5 + $0x13b4] sm:$0xf0]  ;;  %v11523_v46 = vor.u32 %v14182_v33, %v11522_v57  ;;  %v11250_v54 = vld [vmem:[#allocation5 + $0x1088] sm:$0xf] }
 0x2ca   :  { %7514 = vmatpush.bf16.msrb.mxu3 %v11059_v12  ;;  %7476 = vmatmul.bf16.vlgmr.msrb.gmra.mxu0 %v15345_v13  ;;  %v14114_v56 = vld [vmem:[#allocation5 + $0x1094] sm:$0xf0]  ;;  %v11378_v29 = vld [vmem:[#allocation5 + $0x1188] sm:$0xf]  ;;  %v11651_v12 = vor.u32 %v14214_v39, %v11650_v63 }
 0x2cb   :  { %7520 = vmatpush.bf16.msra.mxu0 %v11299_v6  ;;  %7489 = vmatmul.bf16.vlgmr.msrb.gmra.mxu1 %v15349_v20  ;;  %v14146_v6 = vld [vmem:[#allocation5 + $0x1194] sm:$0xf0]  ;;  %v11634_v28 = vld [vmem:[#allocation5 + $0x1388] sm:$0xf]  ;;  %v11251_v44 = vor.u32 %v14114_v56, %v11250_v54 }
 0x2cc   :  { %7533 = vmatpush.bf16.msra.mxu1 %v11427_v7  ;;  %7502 = vmatmul.bf16.vlgmr.msrb.gmra.mxu2 %v15347_v19  ;;  %v11506_v7 = vld [vmem:[#allocation5 + $0x1288] sm:$0xf]  ;;  %v14210_v53 = vld [vmem:[#allocation5 + $0x1394] sm:$0xf0]  ;;  %v11379_v58 = vor.u32 %v14146_v6, %v11378_v29 }
 0x2cd   :  { %7546 = vmatpush.bf16.msra.mxu2 %v11555_v41  ;;  %7515 = vmatmul.bf16.vlgmr.msrb.gmra.mxu3 %v15351_v26  ;;  %v14178_v41 = vld [vmem:[#allocation5 + $0x1294] sm:$0xf0]  ;;  %v11234_v50 = vld [vmem:[#allocation5 + $0x1068] sm:$0xf] }
 0x2ce   :  { %7559 = vmatpush.bf16.msra.mxu3 %v11683_v14  ;;  %v7270_v14 = vadd.f32 %v7269_v62, %v15490_v48  ;;  %v11507_v10 = vor.u32 %v14178_v41, %v11506_v7  ;;  %v14142_v49 = vld [vmem:[#allocation5 + $0x1174] sm:$0xf0]  ;;  %v11490_v35 = vld [vmem:[#allocation5 + $0x1268] sm:$0xf] }
 0x2cf   :  { %7521 = vmatpush.bf16.msra.mxu0 %v11283_v45  ;;  %v14110_v45 = vld [vmem:[#allocation5 + $0x1074] sm:$0xf0]  ;;  %v11618_v47 = vld [vmem:[#allocation5 + $0x1368] sm:$0xf]  ;;  %v7295_v54 = vpop.f32.mrf.mxu2 }
 0x2d0   :  { %7534 = vmatpush.bf16.msra.mxu1 %v11411_v21  ;;  %v11362_v21 = vld [vmem:[#allocation5 + $0x1168] sm:$0xf]  ;;  %v7283_v42 = vadd.f32 %v7282_v51, %v7270_v14  ;;  %v14206_v57 = vld [vmem:[#allocation5 + $0x1374] sm:$0xf0]  ;;  %v11235_v33 = vor.u32 %v14110_v45, %v11234_v50  ;;  %v7308_v7 = vpop.f32.mrf.mxu3  ;;  %v7284_v14 = vpop.f32.mrf.mxu1 }
 0x2d1   :  { %7547 = vmatpush.bf16.msra.mxu2 %v11539_v30  ;;  %v11635_v30 = vor.u32 %v14210_v53, %v11634_v28  ;;  %v11363_v48 = vor.u32 %v14142_v49, %v11362_v21  ;;  %v11218_v39 = vld [vmem:[#allocation5 + $0x1048] sm:$0xf]  ;;  %v14138_v56 = vld [vmem:[#allocation5 + $0x1154] sm:$0xf0]  ;;  %v7271_v28 = vpop.f32.mrf.mxu0 }
 0x2d2   :  { %7560 = vmatpush.bf16.msra.mxu3 %v11667_v52  ;;  %v14174_v52 = vld [vmem:[#allocation5 + $0x1274] sm:$0xf0]  ;;  %v11474_v29 = vld [vmem:[#allocation5 + $0x1248] sm:$0xf]  ;;  %v7296_v6 = vadd.f32 %v7295_v54, %v7283_v42 }
 0x2d3   :  { %7522 = vmatpush.bf16.msra.mxu0 %v11267_v3  ;;  %v11491_v63 = vor.u32 %v14174_v52, %v11490_v35  ;;  %v14106_v3 = vld [vmem:[#allocation5 + $0x1054] sm:$0xf0]  ;;  %v11602_v41 = vld [vmem:[#allocation5 + $0x1348] sm:$0xf] }
 0x2d4   :  { %7535 = vmatpush.bf16.msra.mxu1 %v11395_v16  ;;  %v11346_v16 = vld [vmem:[#allocation5 + $0x1148] sm:$0xf]  ;;  %v14202_v62 = vld [vmem:[#allocation5 + $0x1354] sm:$0xf0]  ;;  %v11219_v53 = vor.u32 %v14106_v3, %v11218_v39 }
 0x2d5   :  { %7548 = vmatpush.bf16.msra.mxu2 %v11523_v46  ;;  %v11619_v46 = vor.u32 %v14206_v57, %v11618_v47  ;;  %v11347_v51 = vor.u32 %v14138_v56, %v11346_v16  ;;  %v14102_v50 = vld [vmem:[#allocation5 + $0x1034] sm:$0xf0]  ;;  %v11330_v45 = vld [vmem:[#allocation5 + $0x1128] sm:$0xf]  ;;  %v11603_v21 = vor.u32 %v14202_v62, %v11602_v41 }
 0x2d6   :  { %7561 = vmatpush.bf16.msra.mxu3 %v11651_v12  ;;  %v14170_v12 = vld [vmem:[#allocation5 + $0x1254] sm:$0xf0]  ;;  %v11458_v42 = vld [vmem:[#allocation5 + $0x1228] sm:$0xf] }
 0x2d7   :  { %7523 = vmatpush.bf16.msra.mxu0 %v11251_v44  ;;  %v15497_v44 = vadd.f32 %v7308_v7, %v7296_v6  ;;  %v14166_v49 = vld [vmem:[#allocation5 + $0x1234] sm:$0xf0]  ;;  %v11586_v35 = vld [vmem:[#allocation5 + $0x1328] sm:$0xf] }
 0x2d8   :  { %7536 = vmatpush.bf16.msra.mxu1 %v11379_v58  ;;  %v11475_v58 = vor.u32 %v14170_v12, %v11474_v29  ;;  %v14198_v52 = vld [vmem:[#allocation5 + $0x1334] sm:$0xf0]  ;;  %v11186_v57 = vld [vmem:[#allocation5 + $0x1008] sm:$0xf]  ;;  %v7297_v12 = vpop.f32.mrf.mxu2  ;;  %v7310_v62 = vpop.f32.mrf.mxu3 }
 0x2d9   :  { %7549 = vmatpush.bf16.msra.mxu2 %v11507_v10  ;;  %15666 = vst [vmem:[#allocation37_spill] sm:$0xff] %v15497_v44  ;;  %v11202_v10 = vld [vmem:[#allocation5 + $0x1028] sm:$0xf]  ;;  %v14130_v3 = vld [vmem:[#allocation5 + $0x1114] sm:$0xf0]  ;;  %v11587_v54 = vor.u32 %v14198_v52, %v11586_v35 }
 0x2da   :  { %7562 = vmatpush.bf16.msra.mxu3 %v11635_v30  ;;  %v14134_v30 = vld [vmem:[#allocation5 + $0x1134] sm:$0xf0]  ;;  %v11203_v47 = vor.u32 %v14102_v50, %v11202_v10  ;;  %v11314_v39 = vld [vmem:[#allocation5 + $0x1108] sm:$0xf] }
 0x2db   :  { %7524 = vmatpush.bf16.msra.mxu0 %v11235_v33  ;;  %v14098_v33 = vld [vmem:[#allocation5 + $0x1014] sm:$0xf0]  ;;  %v11442_v16 = vld [vmem:[#allocation5 + $0x1208] sm:$0xf] }
 0x2dc   :  { %7537 = vmatpush.bf16.msra.mxu1 %v11363_v48  ;;  %v11331_v48 = vor.u32 %v14134_v30, %v11330_v45  ;;  %v11570_v56 = vld [vmem:[#allocation5 + $0x1308] sm:$0xf]  ;;  %v14194_v29 = vld [vmem:[#allocation5 + $0x1314] sm:$0xf0]  ;;  %v11187_v28 = vor.u32 %v14098_v33, %v11186_v57 }
 0x2dd   :  { %7550 = vmatpush.bf16.msra.mxu2 %v11491_v63  ;;  %v11459_v63 = vor.u32 %v14166_v49, %v11458_v42  ;;  %v11810_v6 = vld [vmem:[#allocation5 + $0x14e8] sm:$0xf]  ;;  %v14254_v7 = vld [vmem:[#allocation5 + $0x14f4] sm:$0xf0] }
 0x2de   :  { %7563 = vmatpush.bf16.msra.mxu3 %v11619_v46  ;;  %v14162_v46 = vld [vmem:[#allocation5 + $0x1214] sm:$0xf0]  ;;  %v11938_v41 = vld [vmem:[#allocation5 + $0x15e8] sm:$0xf]  ;;  %v11811_v30 = vor.u32 %v14254_v7, %v11810_v6 }
 0x2df   :  { %7525 = vmatpush.bf16.msra.mxu0 %v11219_v53  ;;  %v14286_v53 = vld [vmem:[#allocation5 + $0x15f4] sm:$0xf0]  ;;  %v12066_v14 = vld [vmem:[#allocation5 + $0x16e8] sm:$0xf]  ;;  %v11443_v10 = vor.u32 %v14162_v46, %v11442_v16 }
 0x2e0   :  { %7538 = vmatpush.bf16.msra.mxu1 %v11347_v51  ;;  %v14318_v51 = vld [vmem:[#allocation5 + $0x16f4] sm:$0xf0]  ;;  %v12194_v50 = vld [vmem:[#allocation5 + $0x17e8] sm:$0xf]  ;;  %v11939_v42 = vor.u32 %v14286_v53, %v11938_v41 }
 0x2e1   :  { %7551 = vmatpush.bf16.msra.mxu2 %v11475_v58  ;;  %v11315_v58 = vor.u32 %v14130_v3, %v11314_v39  ;;  %v14350_v45 = vld [vmem:[#allocation5 + $0x17f4] sm:$0xf0]  ;;  %v12067_v49 = vor.u32 %v14318_v51, %v12066_v14  ;;  %v11794_v35 = vld [vmem:[#allocation5 + $0x14c8] sm:$0xf] }
 0x2e2   :  { %7564 = vmatpush.bf16.msra.mxu3 %v11603_v21  ;;  %v11571_v21 = vor.u32 %v14194_v29, %v11570_v56  ;;  %v14250_v52 = vld [vmem:[#allocation5 + $0x14d4] sm:$0xf0]  ;;  %v11922_v12 = vld [vmem:[#allocation5 + $0x15c8] sm:$0xf] }
 0x2e3   :  { %7526 = vmatpush.bf16.msra.mxu0 %v11203_v47  ;;  %v12195_v47 = vor.u32 %v14350_v45, %v12194_v50  ;;  %v14282_v57 = vld [vmem:[#allocation5 + $0x15d4] sm:$0xf0]  ;;  %v12050_v33 = vld [vmem:[#allocation5 + $0x16c8] sm:$0xf]  ;;  %v11795_v39 = vor.u32 %v14250_v52, %v11794_v35 }
 0x2e4   :  { %7539 = vmatpush.bf16.msra.mxu1 %v11331_v48  ;;  %v14314_v62 = vld [vmem:[#allocation5 + $0x16d4] sm:$0xf0]  ;;  %v12178_v48 = vld [vmem:[#allocation5 + $0x17c8] sm:$0xf]  ;;  %v11923_v3 = vor.u32 %v14282_v57, %v11922_v12 }
 0x2e5   :  { %7552 = vmatpush.bf16.msra.mxu2 %v11459_v63  ;;  %v14346_v63 = vld [vmem:[#allocation5 + $0x17d4] sm:$0xf0]  ;;  %v12051_v16 = vor.u32 %v14314_v62, %v12050_v33  ;;  %v11906_v56 = vld [vmem:[#allocation5 + $0x15a8] sm:$0xf] }
 0x2e6   :  { %7565 = vmatpush.bf16.msra.mxu3 %v11587_v54  ;;  %v11778_v54 = vld [vmem:[#allocation5 + $0x14a8] sm:$0xf]  ;;  %v14246_v46 = vld [vmem:[#allocation5 + $0x14b4] sm:$0xf0]  ;;  %v12179_v29 = vor.u32 %v14346_v63, %v12178_v48 }
 0x2e7   :  { %7527 = vmatpush.bf16.msra.mxu0 %v11187_v28  ;;  %v14278_v6 = vld [vmem:[#allocation5 + $0x15b4] sm:$0xf0]  ;;  %v12034_v7 = vld [vmem:[#allocation5 + $0x16a8] sm:$0xf]  ;;  %v11779_v14 = vor.u32 %v14246_v46, %v11778_v54  ;;  %v7321_v33 = vpop.f32.mrf.mxu0 }
 0x2e8   :  { %7540 = vmatpush.bf16.msra.mxu1 %v11315_v58  ;;  %v14310_v41 = vld [vmem:[#allocation5 + $0x16b4] sm:$0xf0]  ;;  %v12162_v28 = vld [vmem:[#allocation5 + $0x17a8] sm:$0xf]  ;;  %v11907_v58 = vor.u32 %v14278_v6, %v11906_v56  ;;  %v7334_v54 = vpop.f32.mrf.mxu1 }
 0x2e9   :  { %7553 = vmatpush.bf16.msra.mxu2 %v11443_v10  ;;  %v14342_v53 = vld [vmem:[#allocation5 + $0x17b4] sm:$0xf0]  ;;  %v11762_v51 = vld [vmem:[#allocation5 + $0x1488] sm:$0xf]  ;;  %v12035_v10 = vor.u32 %v14310_v41, %v12034_v7 }
 0x2ea   :  { %7566 = vmatpush.bf16.msra.mxu3 %v11571_v21  ;;  %7528 = vmatmul.bf16.vlgmr.msra.gmra.mxu0 %v15357_v24  ;;  %v14242_v50 = vld [vmem:[#allocation5 + $0x1494] sm:$0xf0]  ;;  %v11890_v45 = vld [vmem:[#allocation5 + $0x1588] sm:$0xf]  ;;  %v14755_v21 = vld [vmem:[#allocation7] sm:$0xf] }
 0x2eb   :  { %7572 = vmatpush.bf16.msrb.mxu0 %v11811_v30  ;;  %7541 = vmatmul.bf16.vlgmr.msra.gmra.mxu1 %v15361_v32  ;;  %v1354_v30 = vperm.slane %v14755_v21, 2  ;;  %v12018_v35 = vld [vmem:[#allocation5 + $0x1688] sm:$0xf]  ;;  %v14306_v52 = vld [vmem:[#allocation5 + $0x1694] sm:$0xf0]  ;;  %v11763_v57 = vor.u32 %v14242_v50, %v11762_v51 }
 0x2ec   :  { %7585 = vmatpush.bf16.msrb.mxu1 %v11939_v42  ;;  %7554 = vmatmul.bf16.vlgmr.msra.gmra.mxu2 %v15359_v31  ;;  %v12163_v42 = vor.u32 %v14342_v53, %v12162_v28  ;;  %v12146_v12 = vld [vmem:[#allocation5 + $0x1788] sm:$0xf]  ;;  %v12019_v48 = vor.u32 %v14306_v52, %v12018_v35  ;;  %v14270_v56 = vld [vmem:[#allocation5 + $0x1574] sm:$0xf0] }
 0x2ed   :  { %7598 = vmatpush.bf16.msrb.mxu2 %v12067_v49  ;;  %7567 = vmatmul.bf16.vlgmr.msra.gmra.mxu3 %v15363_v36  ;;  %v14274_v49 = vld [vmem:[#allocation5 + $0x1594] sm:$0xf0]  ;;  %v11746_v63 = vld [vmem:[#allocation5 + $0x1468] sm:$0xf] }
 0x2ee   :  { %7611 = vmatpush.bf16.msrb.mxu3 %v12195_v47  ;;  %v14338_v47 = vld [vmem:[#allocation5 + $0x1794] sm:$0xf0]  ;;  %v11891_v62 = vor.u32 %v14274_v49, %v11890_v45  ;;  %v12130_v7 = vld [vmem:[#allocation5 + $0x1768] sm:$0xf] }
 0x2ef   :  { %7573 = vmatpush.bf16.msrb.mxu0 %v11795_v39  ;;  %v14238_v39 = vld [vmem:[#allocation5 + $0x1474] sm:$0xf0]  ;;  %v12147_v46 = vor.u32 %v14338_v47, %v12146_v12  ;;  %v11858_v50 = vld [vmem:[#allocation5 + $0x1548] sm:$0xf]  ;;  %v7347_v45 = vpop.f32.mrf.mxu2 }
 0x2f0   :  { %7586 = vmatpush.bf16.msrb.mxu1 %v11923_v3  ;;  %v11874_v3 = vld [vmem:[#allocation5 + $0x1568] sm:$0xf]  ;;  %v14302_v6 = vld [vmem:[#allocation5 + $0x1674] sm:$0xf0]  ;;  %v11747_v53 = vor.u32 %v14238_v39, %v11746_v63  ;;  %v7360_v52 = vpop.f32.mrf.mxu3 }
 0x2f1   :  { %7599 = vmatpush.bf16.msrb.mxu2 %v12051_v16  ;;  %v7322_v16 = vadd.f32 %v7321_v33, %v1354_v30  ;;  %v14334_v41 = vld [vmem:[#allocation5 + $0x1774] sm:$0xf0]  ;;  %v12114_v12 = vld [vmem:[#allocation5 + $0x1748] sm:$0xf] }
 0x2f2   :  { %7612 = vmatpush.bf16.msrb.mxu3 %v12179_v29  ;;  %v12002_v29 = vld [vmem:[#allocation5 + $0x1668] sm:$0xf]  ;;  %v12131_v21 = vor.u32 %v14334_v41, %v12130_v7  ;;  %v14266_v30 = vld [vmem:[#allocation5 + $0x1554] sm:$0xf0] }
 0x2f3   :  { %7574 = vmatpush.bf16.msrb.mxu0 %v11779_v14  ;;  %v7335_v28 = vadd.f32 %v7334_v54, %v7322_v16  ;;  %v11875_v14 = vor.u32 %v14270_v56, %v11874_v3  ;;  %v12003_v51 = vor.u32 %v14302_v6, %v12002_v29  ;;  %v14298_v49 = vld [vmem:[#allocation5 + $0x1654] sm:$0xf0]  ;;  %v11714_v39 = vld [vmem:[#allocation5 + $0x1428] sm:$0xf]  ;;  %v7336_v54 = vpop.f32.mrf.mxu1 }
 0x2f4   :  { %7587 = vmatpush.bf16.msrb.mxu1 %v11907_v58  ;;  %v11730_v58 = vld [vmem:[#allocation5 + $0x1448] sm:$0xf]  ;;  %v14330_v47 = vld [vmem:[#allocation5 + $0x1754] sm:$0xf0] }
 0x2f5   :  { %7600 = vmatpush.bf16.msrb.mxu2 %v12035_v10  ;;  %v14234_v10 = vld [vmem:[#allocation5 + $0x1454] sm:$0xf0]  ;;  %v7348_v35 = vadd.f32 %v7347_v45, %v7335_v28  ;;  %v11842_v16 = vld [vmem:[#allocation5 + $0x1528] sm:$0xf] }
 0x2f6   :  { %7613 = vmatpush.bf16.msrb.mxu3 %v12163_v42  ;;  %v11986_v42 = vld [vmem:[#allocation5 + $0x1648] sm:$0xf]  ;;  %v14230_v3 = vld [vmem:[#allocation5 + $0x1434] sm:$0xf0] }
 0x2f7   :  { %7575 = vmatpush.bf16.msrb.mxu0 %v11763_v57  ;;  %v11731_v57 = vor.u32 %v14234_v10, %v11730_v58  ;;  %v15503_v33 = vadd.f32 %v7360_v52, %v7348_v35  ;;  %v11987_v63 = vor.u32 %v14298_v49, %v11986_v42  ;;  %v14262_v56 = vld [vmem:[#allocation5 + $0x1534] sm:$0xf0]  ;;  %v11970_v29 = vld [vmem:[#allocation5 + $0x1628] sm:$0xf]  ;;  %v11715_v28 = vor.u32 %v14230_v3, %v11714_v39 }
 0x2f8   :  { %7588 = vmatpush.bf16.msrb.mxu1 %v11891_v62  ;;  %v7323_v62 = vpop.f32.mrf.mxu0  ;;  %v14294_v6 = vld [vmem:[#allocation5 + $0x1634] sm:$0xf0]  ;;  %v12098_v7 = vld [vmem:[#allocation5 + $0x1728] sm:$0xf]  ;;  %v7362_v52 = vpop.f32.mrf.mxu3 }
 0x2f9   :  { %7601 = vmatpush.bf16.msrb.mxu2 %v12019_v48  ;;  %v11859_v48 = vor.u32 %v14266_v30, %v11858_v50  ;;  %v14326_v41 = vld [vmem:[#allocation5 + $0x1734] sm:$0xf0]  ;;  %v11826_v10 = vld [vmem:[#allocation5 + $0x1508] sm:$0xf]  ;;  %v7349_v30 = vpop.f32.mrf.mxu2 }
 0x2fa   :  { %7614 = vmatpush.bf16.msrb.mxu3 %v12147_v46  ;;  %v12115_v46 = vor.u32 %v14330_v47, %v12114_v12  ;;  %v14226_v58 = vld [vmem:[#allocation5 + $0x1414] sm:$0xf0]  ;;  %v11954_v45 = vld [vmem:[#allocation5 + $0x1608] sm:$0xf] }
 0x2fb   :  { %7576 = vmatpush.bf16.msrb.mxu0 %v11747_v53  ;;  %v11698_v53 = vld [vmem:[#allocation5 + $0x1408] sm:$0xf]  ;;  %v14258_v50 = vld [vmem:[#allocation5 + $0x1514] sm:$0xf0] }
 0x2fc   :  { %7589 = vmatpush.bf16.msrb.mxu1 %v11875_v14  ;;  %v11843_v14 = vor.u32 %v14262_v56, %v11842_v16  ;;  %v14290_v42 = vld [vmem:[#allocation5 + $0x1614] sm:$0xf0]  ;;  %v12082_v49 = vld [vmem:[#allocation5 + $0x1708] sm:$0xf]  ;;  %v11699_v62 = vor.u32 %v14226_v58, %v11698_v53  ;;  %v11827_v3 = vor.u32 %v14258_v50, %v11826_v10 }
 0x2fd   :  { %7602 = vmatpush.bf16.msrb.mxu2 %v12003_v51  ;;  %v11971_v51 = vor.u32 %v14294_v6, %v11970_v29  ;;  %v14322_v35 = vld [vmem:[#allocation5 + $0x1714] sm:$0xf0]  ;;  %v12322_v12 = vld [vmem:[#allocation5 + $0x18e8] sm:$0xf]  ;;  %v11955_v16 = vor.u32 %v14290_v42, %v11954_v45 }
 0x2fe   :  { %7615 = vmatpush.bf16.msrb.mxu3 %v12131_v21  ;;  %v12099_v21 = vor.u32 %v14326_v41, %v12098_v7  ;;  %v14382_v47 = vld [vmem:[#allocation5 + $0x18f4] sm:$0xf0]  ;;  %v12706_v54 = vld [vmem:[#allocation5 + $0x1be8] sm:$0xf] }
 0x2ff   :  { %7577 = vmatpush.bf16.msrb.mxu0 %v11731_v57  ;;  %v12450_v57 = vld [vmem:[#allocation5 + $0x19e8] sm:$0xf]  ;;  %v14414_v39 = vld [vmem:[#allocation5 + $0x19f4] sm:$0xf0]  ;;  %v12323_v29 = vor.u32 %v14382_v47, %v12322_v12 }
 0x300   :  { %7590 = vmatpush.bf16.msrb.mxu1 %v11859_v48  ;;  %v12578_v48 = vld [vmem:[#allocation5 + $0x1ae8] sm:$0xf]  ;;  %v14478_v56 = vld [vmem:[#allocation5 + $0x1bf4] sm:$0xf0]  ;;  %v12451_v6 = vor.u32 %v14414_v39, %v12450_v57 }
 0x301   :  { %7603 = vmatpush.bf16.msrb.mxu2 %v11987_v63  ;;  %v14446_v63 = vld [vmem:[#allocation5 + $0x1af4] sm:$0xf0]  ;;  %v12306_v41 = vld [vmem:[#allocation5 + $0x18c8] sm:$0xf] }
 0x302   :  { %7616 = vmatpush.bf16.msrb.mxu3 %v12115_v46  ;;  %v12083_v46 = vor.u32 %v14322_v35, %v12082_v49  ;;  %v12579_v7 = vor.u32 %v14446_v63, %v12578_v48  ;;  %v14378_v30 = vld [vmem:[#allocation5 + $0x18d4] sm:$0xf0]  ;;  %v12434_v52 = vld [vmem:[#allocation5 + $0x19c8] sm:$0xf] }
 0x303   :  { %7578 = vmatpush.bf16.msrb.mxu0 %v11715_v28  ;;  %v12707_v28 = vor.u32 %v14478_v56, %v12706_v54  ;;  %v14410_v53 = vld [vmem:[#allocation5 + $0x19d4] sm:$0xf0]  ;;  %v12562_v58 = vld [vmem:[#allocation5 + $0x1ac8] sm:$0xf]  ;;  %v12307_v10 = vor.u32 %v14378_v30, %v12306_v41 }
 0x304   :  { %7591 = vmatpush.bf16.msrb.mxu1 %v11843_v14  ;;  %v14442_v44 = vld [vmem:[#allocation5 + $0x1ad4] sm:$0xf0]  ;;  %v12690_v14 = vld [vmem:[#allocation5 + $0x1bc8] sm:$0xf]  ;;  %v12435_v50 = vor.u32 %v14410_v53, %v12434_v52 }
 0x305   :  { %7604 = vmatpush.bf16.msrb.mxu2 %v11971_v51  ;;  %v14474_v51 = vld [vmem:[#allocation5 + $0x1bd4] sm:$0xf0]  ;;  %v12563_v45 = vor.u32 %v14442_v44, %v12562_v58  ;;  %v12418_v49 = vld [vmem:[#allocation5 + $0x19a8] sm:$0xf] }
 0x306   :  { %7617 = vmatpush.bf16.msrb.mxu3 %v12099_v21  ;;  %v12290_v21 = vld [vmem:[#allocation5 + $0x18a8] sm:$0xf]  ;;  %v14374_v42 = vld [vmem:[#allocation5 + $0x18b4] sm:$0xf0]  ;;  %v12691_v35 = vor.u32 %v14474_v51, %v12690_v14 }
 0x307   :  { %7579 = vmatpush.bf16.msrb.mxu0 %v11699_v62  ;;  %v14406_v12 = vld [vmem:[#allocation5 + $0x19b4] sm:$0xf0]  ;;  %v12546_v47 = vld [vmem:[#allocation5 + $0x1aa8] sm:$0xf]  ;;  %v12291_v44 = vor.u32 %v14374_v42, %v12290_v21  ;;  %v7373_v52 = vpop.f32.mrf.mxu0 }
 0x308   :  { %7592 = vmatpush.bf16.msrb.mxu1 %v11827_v3  ;;  %v14438_v57 = vld [vmem:[#allocation5 + $0x1ab4] sm:$0xf0]  ;;  %v12674_v62 = vld [vmem:[#allocation5 + $0x1ba8] sm:$0xf]  ;;  %v12419_v48 = vor.u32 %v14406_v12, %v12418_v49 }
 0x309   :  { %7605 = vmatpush.bf16.msrb.mxu2 %v11955_v16  ;;  %v14470_v39 = vld [vmem:[#allocation5 + $0x1bb4] sm:$0xf0]  ;;  %v12547_v63 = vor.u32 %v14438_v57, %v12546_v47  ;;  %v12274_v3 = vld [vmem:[#allocation5 + $0x1888] sm:$0xf] }
 0x30a   :  { %7618 = vmatpush.bf16.msrb.mxu3 %v12083_v46  ;;  %7580 = vmatmul.bf16.vlgmr.msrb.gmra.mxu0 %v15371_v61  ;;  %v14370_v16 = vld [vmem:[#allocation5 + $0x1894] sm:$0xf0]  ;;  %v12402_v54 = vld [vmem:[#allocation5 + $0x1988] sm:$0xf]  ;;  %v12675_v56 = vor.u32 %v14470_v39, %v12674_v62 }
 0x30b   :  { %7624 = vmatpush.bf16.msra.mxu0 %v12323_v29  ;;  %7593 = vmatmul.bf16.vlgmr.msrb.gmra.mxu1 %v15375_v2  ;;  %v14402_v46 = vld [vmem:[#allocation5 + $0x1994] sm:$0xf0]  ;;  %v12530_v29 = vld [vmem:[#allocation5 + $0x1a88] sm:$0xf]  ;;  %v12275_v30 = vor.u32 %v14370_v16, %v12274_v3 }
 0x30c   :  { %7637 = vmatpush.bf16.msra.mxu1 %v12451_v6  ;;  %7606 = vmatmul.bf16.vlgmr.msrb.gmra.mxu2 %v15373_v1  ;;  %v14434_v6 = vld [vmem:[#allocation5 + $0x1a94] sm:$0xf0]  ;;  %v12258_v58 = vld [vmem:[#allocation5 + $0x1868] sm:$0xf] }
 0x30d   :  { %7650 = vmatpush.bf16.msra.mxu2 %v12579_v7  ;;  %7619 = vmatmul.bf16.vlgmr.msrb.gmra.mxu3 %v15377_v5  ;;  %v12658_v7 = vld [vmem:[#allocation5 + $0x1b88] sm:$0xf]  ;;  %v14466_v41 = vld [vmem:[#allocation5 + $0x1b94] sm:$0xf0]  ;;  %v12531_v53 = vor.u32 %v14434_v6, %v12530_v29 }
 0x30e   :  { %7663 = vmatpush.bf16.msra.mxu3 %v12707_v28  ;;  %v12403_v28 = vor.u32 %v14402_v46, %v12402_v54  ;;  %v14366_v14 = vld [vmem:[#allocation5 + $0x1874] sm:$0xf0]  ;;  %v12386_v51 = vld [vmem:[#allocation5 + $0x1968] sm:$0xf] }
 0x30f   :  { %7625 = vmatpush.bf16.msra.mxu0 %v12307_v10  ;;  %v7374_v10 = vadd.f32 %v7373_v52, %v15503_v33  ;;  %v14398_v21 = vld [vmem:[#allocation5 + $0x1974] sm:$0xf0]  ;;  %v12514_v42 = vld [vmem:[#allocation5 + $0x1a68] sm:$0xf]  ;;  %v12259_v57 = vor.u32 %v14366_v14, %v12258_v58  ;;  %v7399_v3 = vpop.f32.mrf.mxu2  ;;  %v7375_v52 = vpop.f32.mrf.mxu0 }
 0x310   :  { %7638 = vmatpush.bf16.msra.mxu1 %v12435_v50  ;;  %v7386_v50 = vpop.f32.mrf.mxu1  ;;  %v14430_v49 = vld [vmem:[#allocation5 + $0x1a74] sm:$0xf0]  ;;  %v12387_v62 = vor.u32 %v14398_v21, %v12386_v51  ;;  %v12498_v54 = vld [vmem:[#allocation5 + $0x1a48] sm:$0xf]  ;;  %v7412_v29 = vpop.f32.mrf.mxu3 }
 0x311   :  { %7651 = vmatpush.bf16.msra.mxu2 %v12563_v45  ;;  %v12659_v45 = vor.u32 %v14466_v41, %v12658_v7  ;;  %v14462_v12 = vld [vmem:[#allocation5 + $0x1b74] sm:$0xf0]  ;;  %v7387_v47 = vadd.f32 %v7386_v50, %v7374_v10  ;;  %v12515_v39 = vor.u32 %v14430_v49, %v12514_v42  ;;  %v12626_v6 = vld [vmem:[#allocation5 + $0x1b48] sm:$0xf] }
 0x312   :  { %7664 = vmatpush.bf16.msra.mxu3 %v12691_v35  ;;  %v12642_v35 = vld [vmem:[#allocation5 + $0x1b68] sm:$0xf]  ;;  %v14394_v16 = vld [vmem:[#allocation5 + $0x1954] sm:$0xf0] }
 0x313   :  { %7626 = vmatpush.bf16.msra.mxu0 %v12291_v44  ;;  %v12242_v44 = vld [vmem:[#allocation5 + $0x1848] sm:$0xf]  ;;  %v12643_v33 = vor.u32 %v14462_v12, %v12642_v35  ;;  %v7400_v46 = vadd.f32 %v7399_v3, %v7387_v47  ;;  %v14458_v7 = vld [vmem:[#allocation5 + $0x1b54] sm:$0xf0] }
 0x314   :  { %7639 = vmatpush.bf16.msra.mxu1 %v12419_v48  ;;  %v14362_v48 = vld [vmem:[#allocation5 + $0x1854] sm:$0xf0]  ;;  %v12226_v58 = vld [vmem:[#allocation5 + $0x1828] sm:$0xf]  ;;  %v12627_v50 = vor.u32 %v14458_v7, %v12626_v6 }
 0x315   :  { %7652 = vmatpush.bf16.msra.mxu2 %v12547_v63  ;;  %v12370_v63 = vld [vmem:[#allocation5 + $0x1948] sm:$0xf]  ;;  %v12243_v41 = vor.u32 %v14362_v48, %v12242_v44  ;;  %v14358_v14 = vld [vmem:[#allocation5 + $0x1834] sm:$0xf0] }
 0x316   :  { %7665 = vmatpush.bf16.msra.mxu3 %v12675_v56  ;;  %v14426_v56 = vld [vmem:[#allocation5 + $0x1a54] sm:$0xf0]  ;;  %v12354_v51 = vld [vmem:[#allocation5 + $0x1928] sm:$0xf]  ;;  %v12227_v12 = vor.u32 %v14358_v14, %v12226_v58 }
 0x317   :  { %7627 = vmatpush.bf16.msra.mxu0 %v12275_v30  ;;  %v15510_v30 = vadd.f32 %v7412_v29, %v7400_v46  ;;  %v12482_v21 = vld [vmem:[#allocation5 + $0x1a28] sm:$0xf]  ;;  %v14422_v42 = vld [vmem:[#allocation5 + $0x1a34] sm:$0xf0]  ;;  %v7401_v3 = vpop.f32.mrf.mxu2 }
 0x318   :  { %7640 = vmatpush.bf16.msra.mxu1 %v12403_v28  ;;  %v12371_v28 = vor.u32 %v14394_v16, %v12370_v63  ;;  %v7388_v10 = vpop.f32.mrf.mxu1  ;;  %v12610_v49 = vld [vmem:[#allocation5 + $0x1b28] sm:$0xf]  ;;  %v14454_v35 = vld [vmem:[#allocation5 + $0x1b34] sm:$0xf0]  ;;  %v7414_v46 = vpop.f32.mrf.mxu3 }
 0x319   :  { %7653 = vmatpush.bf16.msra.mxu2 %v12531_v53  ;;  %v12499_v53 = vor.u32 %v14426_v56, %v12498_v54  ;;  %v12210_v47 = vld [vmem:[#allocation5 + $0x1808] sm:$0xf]  ;;  %v14386_v48 = vld [vmem:[#allocation5 + $0x1914] sm:$0xf0] }
 0x31a   :  { %7666 = vmatpush.bf16.msra.mxu3 %v12659_v45  ;;  %v14390_v45 = vld [vmem:[#allocation5 + $0x1934] sm:$0xf0]  ;;  %v12338_v44 = vld [vmem:[#allocation5 + $0x1908] sm:$0xf] }
 0x31b   :  { %7628 = vmatpush.bf16.msra.mxu0 %v12259_v57  ;;  %v14354_v57 = vld [vmem:[#allocation5 + $0x1814] sm:$0xf0]  ;;  %v12466_v63 = vld [vmem:[#allocation5 + $0x1a08] sm:$0xf]  ;;  %v12339_v58 = vor.u32 %v14386_v48, %v12338_v44 }
 0x31c   :  { %7641 = vmatpush.bf16.msra.mxu1 %v12387_v62  ;;  %v12355_v62 = vor.u32 %v14390_v45, %v12354_v51  ;;  %v14418_v16 = vld [vmem:[#allocation5 + $0x1a14] sm:$0xf0]  ;;  %v12594_v54 = vld [vmem:[#allocation5 + $0x1b08] sm:$0xf] }
 0x31d   :  { %7654 = vmatpush.bf16.msra.mxu2 %v12515_v39  ;;  %v12483_v39 = vor.u32 %v14422_v42, %v12482_v21  ;;  %v14450_v56 = vld [vmem:[#allocation5 + $0x1b14] sm:$0xf0]  ;;  %v12834_v29 = vld [vmem:[#allocation5 + $0x1ce8] sm:$0xf]  ;;  %v12467_v14 = vor.u32 %v14418_v16, %v12466_v63 }
 0x31e   :  { %7667 = vmatpush.bf16.msra.mxu3 %v12643_v33  ;;  %v12611_v33 = vor.u32 %v14454_v35, %v12610_v49  ;;  %v14510_v6 = vld [vmem:[#allocation5 + $0x1cf4] sm:$0xf0]  ;;  %v12962_v7 = vld [vmem:[#allocation5 + $0x1de8] sm:$0xf] }
 0x31f   :  { %7629 = vmatpush.bf16.msra.mxu0 %v12243_v41  ;;  %v12211_v41 = vor.u32 %v14354_v57, %v12210_v47  ;;  %v14542_v52 = vld [vmem:[#allocation5 + $0x1df4] sm:$0xf0]  ;;  %v13218_v51 = vld [vmem:[#allocation5 + $0x1fe8] sm:$0xf]  ;;  %v12835_v45 = vor.u32 %v14510_v6, %v12834_v29 }
 0x320   :  { %7642 = vmatpush.bf16.msra.mxu1 %v12371_v28  ;;  %v13090_v28 = vld [vmem:[#allocation5 + $0x1ee8] sm:$0xf]  ;;  %v14606_v10 = vld [vmem:[#allocation5 + $0x1ff4] sm:$0xf0]  ;;  %v12963_v21 = vor.u32 %v14542_v52, %v12962_v7 }
 0x321   :  { %7655 = vmatpush.bf16.msra.mxu2 %v12499_v53  ;;  %v14574_v53 = vld [vmem:[#allocation5 + $0x1ef4] sm:$0xf0]  ;;  %v12818_v49 = vld [vmem:[#allocation5 + $0x1cc8] sm:$0xf] }
 0x322   :  { %7668 = vmatpush.bf16.msra.mxu3 %v12627_v50  ;;  %v12595_v50 = vor.u32 %v14450_v56, %v12594_v54  ;;  %v13091_v42 = vor.u32 %v14574_v53, %v13090_v28  ;;  %v14506_v35 = vld [vmem:[#allocation5 + $0x1cd4] sm:$0xf0]  ;;  %v12946_v3 = vld [vmem:[#allocation5 + $0x1dc8] sm:$0xf] }
 0x323   :  { %7630 = vmatpush.bf16.msra.mxu0 %v12227_v12  ;;  %v13219_v12 = vor.u32 %v14606_v10, %v13218_v51  ;;  %v14538_v47 = vld [vmem:[#allocation5 + $0x1dd4] sm:$0xf0]  ;;  %v13074_v57 = vld [vmem:[#allocation5 + $0x1ec8] sm:$0xf]  ;;  %v12819_v44 = vor.u32 %v14506_v35, %v12818_v49 }
 0x324   :  { %7643 = vmatpush.bf16.msra.mxu1 %v12355_v62  ;;  %v14570_v46 = vld [vmem:[#allocation5 + $0x1ed4] sm:$0xf0]  ;;  %v13202_v62 = vld [vmem:[#allocation5 + $0x1fc8] sm:$0xf]  ;;  %v12947_v48 = vor.u32 %v14538_v47, %v12946_v3 }
 0x325   :  { %7656 = vmatpush.bf16.msra.mxu2 %v12483_v39  ;;  %v14602_v39 = vld [vmem:[#allocation5 + $0x1fd4] sm:$0xf0]  ;;  %v13075_v63 = vor.u32 %v14570_v46, %v13074_v57  ;;  %v12930_v54 = vld [vmem:[#allocation5 + $0x1da8] sm:$0xf] }
 0x326   :  { %7669 = vmatpush.bf16.msra.mxu3 %v12611_v33  ;;  %v12802_v33 = vld [vmem:[#allocation5 + $0x1ca8] sm:$0xf]  ;;  %v14502_v16 = vld [vmem:[#allocation5 + $0x1cb4] sm:$0xf0]  ;;  %v13203_v56 = vor.u32 %v14602_v39, %v13202_v62 }
 0x327   :  { %7631 = vmatpush.bf16.msra.mxu0 %v12211_v41  ;;  %v14534_v29 = vld [vmem:[#allocation5 + $0x1db4] sm:$0xf0]  ;;  %v13058_v6 = vld [vmem:[#allocation5 + $0x1ea8] sm:$0xf]  ;;  %v12803_v28 = vor.u32 %v14502_v16, %v12802_v33  ;;  %v7425_v49 = vpop.f32.mrf.mxu0 }
 0x328   :  { %7644 = vmatpush.bf16.msra.mxu1 %v12339_v58  ;;  %v14566_v7 = vld [vmem:[#allocation5 + $0x1eb4] sm:$0xf0]  ;;  %v13186_v41 = vld [vmem:[#allocation5 + $0x1fa8] sm:$0xf]  ;;  %v12931_v53 = vor.u32 %v14534_v29, %v12930_v54  ;;  %v7438_v57 = vpop.f32.mrf.mxu1 }
 0x329   :  { %7657 = vmatpush.bf16.msra.mxu2 %v12467_v14  ;;  %v14598_v52 = vld [vmem:[#allocation5 + $0x1fb4] sm:$0xf0]  ;;  %v13059_v58 = vor.u32 %v14566_v7, %v13058_v6  ;;  %v12786_v14 = vld [vmem:[#allocation5 + $0x1c88] sm:$0xf] }
 0x32a   :  { %7670 = vmatpush.bf16.msra.mxu3 %v12595_v50  ;;  %7632 = vmatmul.bf16.vlgmr.msra.gmra.mxu0 %v15386_v55  ;;  %v14498_v51 = vld [vmem:[#allocation5 + $0x1c94] sm:$0xf0]  ;;  %v12914_v10 = vld [vmem:[#allocation5 + $0x1d88] sm:$0xf]  ;;  %v13187_v50 = vor.u32 %v14598_v52, %v13186_v41 }
 0x32b   :  { %7676 = vmatpush.bf16.msrb.mxu0 %v12835_v45  ;;  %7645 = vmatmul.bf16.vlgmr.msra.gmra.mxu1 %v15390_v60  ;;  %v14530_v45 = vld [vmem:[#allocation5 + $0x1d94] sm:$0xf0]  ;;  %v13170_v35 = vld [vmem:[#allocation5 + $0x1f88] sm:$0xf]  ;;  %v12787_v47 = vor.u32 %v14498_v51, %v12786_v14 }
 0x32c   :  { %7689 = vmatpush.bf16.msrb.mxu1 %v12963_v21  ;;  %7658 = vmatmul.bf16.vlgmr.msra.gmra.mxu2 %v15388_v59  ;;  %v13042_v21 = vld [vmem:[#allocation5 + $0x1e88] sm:$0xf]  ;;  %v14594_v3 = vld [vmem:[#allocation5 + $0x1f94] sm:$0xf0]  ;;  %v12915_v46 = vor.u32 %v14530_v45, %v12914_v10 }
 0x32d   :  { %7702 = vmatpush.bf16.msrb.mxu2 %v13091_v42  ;;  %7671 = vmatmul.bf16.vlgmr.msra.gmra.mxu3 %v15392_v0  ;;  %v14562_v42 = vld [vmem:[#allocation5 + $0x1e94] sm:$0xf0]  ;;  %v12770_v39 = vld [vmem:[#allocation5 + $0x1c68] sm:$0xf] }
 0x32e   :  { %7715 = vmatpush.bf16.msrb.mxu3 %v13219_v12  ;;  %v7426_v12 = vadd.f32 %v7425_v49, %v15510_v30  ;;  %v13043_v62 = vor.u32 %v14562_v42, %v13042_v21  ;;  %v14526_v16 = vld [vmem:[#allocation5 + $0x1d74] sm:$0xf0]  ;;  %v13026_v54 = vld [vmem:[#allocation5 + $0x1e68] sm:$0xf] }
 0x32f   :  { %7677 = vmatpush.bf16.msrb.mxu0 %v12819_v44  ;;  %v14494_v44 = vld [vmem:[#allocation5 + $0x1c74] sm:$0xf0]  ;;  %v13154_v29 = vld [vmem:[#allocation5 + $0x1f68] sm:$0xf]  ;;  %v7451_v14 = vpop.f32.mrf.mxu2 }
 0x330   :  { %7690 = vmatpush.bf16.msrb.mxu1 %v12947_v48  ;;  %v12898_v48 = vld [vmem:[#allocation5 + $0x1d68] sm:$0xf]  ;;  %v7439_v33 = vadd.f32 %v7438_v57, %v7426_v12  ;;  %v14590_v6 = vld [vmem:[#allocation5 + $0x1f74] sm:$0xf0]  ;;  %v12771_v7 = vor.u32 %v14494_v44, %v12770_v39  ;;  %v7464_v21 = vpop.f32.mrf.mxu3  ;;  %v7440_v12 = vpop.f32.mrf.mxu1 }
 0x331   :  { %7703 = vmatpush.bf16.msrb.mxu2 %v13075_v63  ;;  %v13171_v63 = vor.u32 %v14594_v3, %v13170_v35  ;;  %v12899_v30 = vor.u32 %v14526_v16, %v12898_v48  ;;  %v12754_v52 = vld [vmem:[#allocation5 + $0x1c48] sm:$0xf]  ;;  %v14522_v51 = vld [vmem:[#allocation5 + $0x1d54] sm:$0xf0]  ;;  %v7427_v35 = vpop.f32.mrf.mxu0  ;;  %v13676_v12 = vld [vmem:[#allocation5 + $0x2ec] sm:$0xf] }
 0x332   :  { %7716 = vmatpush.bf16.msrb.mxu3 %v13203_v56  ;;  %v14558_v56 = vld [vmem:[#allocation5 + $0x1e74] sm:$0xf0]  ;;  %v13010_v10 = vld [vmem:[#allocation5 + $0x1e48] sm:$0xf]  ;;  %v7452_v45 = vadd.f32 %v7451_v14, %v7439_v33 }
 0x333   :  { %7678 = vmatpush.bf16.msrb.mxu0 %v12803_v28  ;;  %v13027_v41 = vor.u32 %v14558_v56, %v13026_v54  ;;  %v14490_v28 = vld [vmem:[#allocation5 + $0x1c54] sm:$0xf0]  ;;  %v13138_v42 = vld [vmem:[#allocation5 + $0x1f48] sm:$0xf] }
 0x334   :  { %7691 = vmatpush.bf16.msrb.mxu1 %v12931_v53  ;;  %v12882_v53 = vld [vmem:[#allocation5 + $0x1d48] sm:$0xf]  ;;  %v14586_v49 = vld [vmem:[#allocation5 + $0x1f54] sm:$0xf0]  ;;  %v12755_v3 = vor.u32 %v14490_v28, %v12754_v52 }
 0x335   :  { %7704 = vmatpush.bf16.msrb.mxu2 %v13059_v58  ;;  %v13155_v58 = vor.u32 %v14590_v6, %v13154_v29  ;;  %v12883_v57 = vor.u32 %v14522_v51, %v12882_v53  ;;  %v14486_v39 = vld [vmem:[#allocation5 + $0x1c34] sm:$0xf0]  ;;  %v12866_v44 = vld [vmem:[#allocation5 + $0x1d28] sm:$0xf]  ;;  %v13139_v48 = vor.u32 %v14586_v49, %v13138_v42  ;;  %v13644_v42 = vld [vmem:[#allocation5 + $0x1ec] sm:$0xf] }
 0x336   :  { %7717 = vmatpush.bf16.msrb.mxu3 %v13187_v50  ;;  %v14554_v50 = vld [vmem:[#allocation5 + $0x1e54] sm:$0xf0]  ;;  %v12994_v33 = vld [vmem:[#allocation5 + $0x1e28] sm:$0xf] }
 0x337   :  { %7679 = vmatpush.bf16.msrb.mxu0 %v12787_v47  ;;  %v15517_v47 = vadd.f32 %v7464_v21, %v7452_v45  ;;  %v14550_v16 = vld [vmem:[#allocation5 + $0x1e34] sm:$0xf0]  ;;  %v13122_v54 = vld [vmem:[#allocation5 + $0x1f28] sm:$0xf]  ;;  %v13612_v45 = vld [vmem:[#allocation5 + $0xec] sm:$0xf] }
 0x338   :  { %7692 = vmatpush.bf16.msrb.mxu1 %v12915_v46  ;;  %v13011_v46 = vor.u32 %v14554_v50, %v13010_v10  ;;  %v14582_v56 = vld [vmem:[#allocation5 + $0x1f34] sm:$0xf0]  ;;  %v12722_v6 = vld [vmem:[#allocation5 + $0x1c08] sm:$0xf]  ;;  %v7453_v50 = vpop.f32.mrf.mxu2  ;;  %v9252_v21 = vld [vmem:[#allocation5 + $0xf8] sm:$0xf0]  ;;  %v7466_v49 = vpop.f32.mrf.mxu3 }
 0x339   :  { %7705 = vmatpush.bf16.msrb.mxu2 %v13043_v62  ;;  %v12738_v62 = vld [vmem:[#allocation5 + $0x1c28] sm:$0xf]  ;;  %v14514_v28 = vld [vmem:[#allocation5 + $0x1d14] sm:$0xf0]  ;;  %v13123_v14 = vor.u32 %v14582_v56, %v13122_v54  ;;  %v13608_v54 = vld [vmem:[#allocation5 + $0xcc] sm:$0xf] }
 0x33a   :  { %7718 = vmatpush.bf16.msrb.mxu3 %v13171_v63  ;;  %v14518_v63 = vld [vmem:[#allocation5 + $0x1d34] sm:$0xf0]  ;;  %v12739_v29 = vor.u32 %v14486_v39, %v12738_v62  ;;  %v12850_v52 = vld [vmem:[#allocation5 + $0x1d08] sm:$0xf]  ;;  %v13708_v39 = vld [vmem:[#allocation5 + $0x3ec] sm:$0xf] }
 0x33b   :  { %7680 = vmatpush.bf16.msrb.mxu0 %v12771_v7  ;;  %v14482_v7 = vld [vmem:[#allocation5 + $0x1c14] sm:$0xf0]  ;;  %v12978_v53 = vld [vmem:[#allocation5 + $0x1e08] sm:$0xf]  ;;  %v9236_v56 = vld [vmem:[#allocation5 + $0xd8] sm:$0xf0] }
 0x33c   :  { %7693 = vmatpush.bf16.msrb.mxu1 %v12899_v30  ;;  %v12867_v30 = vor.u32 %v14518_v63, %v12866_v44  ;;  %v13106_v51 = vld [vmem:[#allocation5 + $0x1f08] sm:$0xf]  ;;  %v14578_v10 = vld [vmem:[#allocation5 + $0x1f14] sm:$0xf0]  ;;  %v12723_v35 = vor.u32 %v14482_v7, %v12722_v6  ;;  %v9636_v44 = vld [vmem:[#allocation5 + $0x3f8] sm:$0xf0]  ;;  %v9255_v63 = vor.u32 %v13612_v45, %v9252_v21 }
 0x33d   :  { %7706 = vmatpush.bf16.msrb.mxu2 %v13027_v41  ;;  %v12995_v41 = vor.u32 %v14550_v16, %v12994_v33  ;;  %v13640_v50 = vld [vmem:[#allocation5 + $0x1cc] sm:$0xf]  ;;  %v9364_v6 = vld [vmem:[#allocation5 + $0x1d8] sm:$0xf0] }
 0x33e   :  { %7719 = vmatpush.bf16.msrb.mxu3 %v13155_v58  ;;  %v14546_v58 = vld [vmem:[#allocation5 + $0x1e14] sm:$0xf0]  ;;  %v13672_v7 = vld [vmem:[#allocation5 + $0x2cc] sm:$0xf]  ;;  %v9492_v49 = vld [vmem:[#allocation5 + $0x2d8] sm:$0xf0] }
 0x33f   :  { %7681 = vmatpush.bf16.msrb.mxu0 %v12755_v3  ;;  %v9380_v3 = vld [vmem:[#allocation5 + $0x1f8] sm:$0xf0]  ;;  %v12979_v62 = vor.u32 %v14546_v58, %v12978_v53  ;;  %v9495_v53 = vor.u32 %v13672_v7, %v9492_v49  ;;  %v13668_v21 = vld [vmem:[#allocation5 + $0x2ac] sm:$0xf] }
 0x340   :  { %7694 = vmatpush.bf16.msrb.mxu1 %v12883_v57  ;;  %v9508_v57 = vld [vmem:[#allocation5 + $0x2f8] sm:$0xf0]  ;;  %v9383_v33 = vor.u32 %v13644_v42, %v9380_v3 }
 0x341   :  { %7707 = vmatpush.bf16.msrb.mxu2 %v13011_v46  ;;  %v12851_v46 = vor.u32 %v14514_v28, %v12850_v52  ;;  %v9511_v16 = vor.u32 %v13676_v12, %v9508_v57  ;;  %v9239_v52 = vor.u32 %v13608_v54, %v9236_v56  ;;  %v9367_v28 = vor.u32 %v13640_v50, %v9364_v6  ;;  %v9220_v58 = vld [vmem:[#allocation5 + $0xb8] sm:$0xf0]  ;;  %v13696_v56 = vld [vmem:[#allocation5 + $0x38c] sm:$0xf] }
 0x342   :  { %7720 = vmatpush.bf16.msrb.mxu3 %v13139_v48  ;;  %v13107_v48 = vor.u32 %v14578_v10, %v13106_v51  ;;  %v13636_v51 = vld [vmem:[#allocation5 + $0x1ac] sm:$0xf]  ;;  %v9348_v45 = vld [vmem:[#allocation5 + $0x1b8] sm:$0xf0] }
 0x343   :  { %7682 = vmatpush.bf16.msrb.mxu0 %v12739_v29  ;;  %v9639_v29 = vor.u32 %v13708_v39, %v9636_v44  ;;  %v9476_v42 = vld [vmem:[#allocation5 + $0x2b8] sm:$0xf0]  ;;  %v9351_v57 = vor.u32 %v13636_v51, %v9348_v45  ;;  %v13632_v44 = vld [vmem:[#allocation5 + $0x18c] sm:$0xf] }
 0x344   :  { %7695 = vmatpush.bf16.msrb.mxu1 %v12867_v30  ;;  %v13704_v30 = vld [vmem:[#allocation5 + $0x3cc] sm:$0xf]  ;;  %v9604_v3 = vld [vmem:[#allocation5 + $0x3b8] sm:$0xf0] }
 0x345   :  { %7708 = vmatpush.bf16.msrb.mxu2 %v12995_v41  ;;  %v9620_v41 = vld [vmem:[#allocation5 + $0x3d8] sm:$0xf0]  ;;  %v13660_v51 = vld [vmem:[#allocation5 + $0x26c] sm:$0xf] }
 0x346   :  { %7721 = vmatpush.bf16.msrb.mxu3 %v13123_v14  ;;  %v13604_v14 = vld [vmem:[#allocation5 + $0xac] sm:$0xf]  ;;  %v9623_v10 = vor.u32 %v13704_v30, %v9620_v41  ;;  %v9204_v39 = vld [vmem:[#allocation5 + $0x98] sm:$0xf0] }
 0x347   :  { %7683 = vmatpush.bf16.msrb.mxu0 %v12723_v35  ;;  %v13700_v35 = vld [vmem:[#allocation5 + $0x3ac] sm:$0xf]  ;;  %v9223_v12 = vor.u32 %v13604_v14, %v9220_v58  ;;  %v7477_v54 = vpop.f32.mrf.mxu0  ;;  %v9588_v50 = vld [vmem:[#allocation5 + $0x398] sm:$0xf0] }
 0x348   :  { %7696 = vmatpush.bf16.msrb.mxu1 %v12851_v46  ;;  %v9479_v46 = vor.u32 %v13668_v21, %v9476_v42  ;;  %v7490_v7 = vpop.f32.mrf.mxu1  ;;  %v13596_v41 = vld [vmem:[#allocation5 + $0x6c] sm:$0xf]  ;;  %v9316_v58 = vld [vmem:[#allocation5 + $0x178] sm:$0xf0] }
 0x349   :  { %7709 = vmatpush.bf16.msrb.mxu2 %v12979_v62  ;;  %v13600_v62 = vld [vmem:[#allocation5 + $0x8c] sm:$0xf]  ;;  %v9572_v21 = vld [vmem:[#allocation5 + $0x378] sm:$0xf0] }
 0x34a   :  { %7722 = vmatpush.bf16.msrb.mxu3 %v13107_v48  ;;  %7684 = vmatmul.bf16.vlgmr.msrb.gmra.mxu0 %v15401_v4  ;;  %v9607_v48 = vor.u32 %v13700_v35, %v9604_v3  ;;  %v9207_v6 = vor.u32 %v13600_v62, %v9204_v39  ;;  %v13692_v45 = vld [vmem:[#allocation5 + $0x36c] sm:$0xf]  ;;  %v9300_v39 = vld [vmem:[#allocation5 + $0x158] sm:$0xf0] }
 0x34b   :  { %7728 = vmatpush.bf16.msra.mxu0 %v9255_v63  ;;  %7697 = vmatmul.bf16.vlgmr.msrb.gmra.mxu1 %v15405_v43  ;;  %v9332_v63 = vld [vmem:[#allocation5 + $0x198] sm:$0xf0]  ;;  %v13592_v3 = vld [vmem:[#allocation5 + $0x4c] sm:$0xf] }
 0x34c   :  { %7741 = vmatpush.bf16.msra.mxu1 %v9383_v33  ;;  %7710 = vmatmul.bf16.vlgmr.msrb.gmra.mxu2 %v15403_v11  ;;  %v13664_v33 = vld [vmem:[#allocation5 + $0x28c] sm:$0xf]  ;;  %v9335_v49 = vor.u32 %v13632_v44, %v9332_v63 }
 0x34d   :  { %7754 = vmatpush.bf16.msra.mxu2 %v9511_v16  ;;  %7723 = vmatmul.bf16.vlgmr.msrb.gmra.mxu3 %v15407_v17  ;;  %v9460_v16 = vld [vmem:[#allocation5 + $0x298] sm:$0xf0]  ;;  %v13656_v44 = vld [vmem:[#allocation5 + $0x24c] sm:$0xf] }
 0x34e   :  { %7767 = vmatpush.bf16.msra.mxu3 %v9639_v29  ;;  %v7478_v29 = vadd.f32 %v7477_v54, %v15517_v47  ;;  %v9463_v30 = vor.u32 %v13664_v33, %v9460_v16  ;;  %v13688_v16 = vld [vmem:[#allocation5 + $0x34c] sm:$0xf]  ;;  %v9556_v54 = vld [vmem:[#allocation5 + $0x358] sm:$0xf0] }
 0x34f   :  { %7729 = vmatpush.bf16.msra.mxu0 %v9239_v52  ;;  %v9188_v52 = vld [vmem:[#allocation5 + $0x78] sm:$0xf0]  ;;  %v7503_v62 = vpop.f32.mrf.mxu2 }
 0x350   :  { %7742 = vmatpush.bf16.msra.mxu1 %v9367_v28  ;;  %v13628_v28 = vld [vmem:[#allocation5 + $0x16c] sm:$0xf]  ;;  %v7491_v14 = vadd.f32 %v7490_v7, %v7478_v29  ;;  %v9191_v42 = vor.u32 %v13596_v41, %v9188_v52  ;;  %v7516_v33 = vpop.f32.mrf.mxu3  ;;  %v7492_v29 = vpop.f32.mrf.mxu1  ;;  %v9156_v41 = vld [vmem:[#allocation5 + $0x38] sm:$0xf0] }
 0x351   :  { %7755 = vmatpush.bf16.msra.mxu2 %v9495_v53  ;;  %v9591_v53 = vor.u32 %v13696_v56, %v9588_v50  ;;  %v9319_v47 = vor.u32 %v13628_v28, %v9316_v58  ;;  %v7479_v56 = vpop.f32.mrf.mxu0  ;;  %v13620_v52 = vld [vmem:[#allocation5 + $0x12c] sm:$0xf]  ;;  %v9559_v28 = vor.u32 %v13688_v16, %v9556_v54  ;;  %v9412_v58 = vld [vmem:[#allocation5 + $0x238] sm:$0xf0] }
 0x352   :  { %7768 = vmatpush.bf16.msra.mxu3 %v9623_v10  ;;  %v9444_v10 = vld [vmem:[#allocation5 + $0x278] sm:$0xf0]  ;;  %v7504_v63 = vadd.f32 %v7503_v62, %v7491_v14  ;;  %v13652_v14 = vld [vmem:[#allocation5 + $0x22c] sm:$0xf] }
 0x353   :  { %7730 = vmatpush.bf16.msra.mxu0 %v9223_v12  ;;  %v9447_v35 = vor.u32 %v13660_v51, %v9444_v10  ;;  %v9172_v12 = vld [vmem:[#allocation5 + $0x58] sm:$0xf0]  ;;  %v13684_v51 = vld [vmem:[#allocation5 + $0x32c] sm:$0xf] }
 0x354   :  { %7743 = vmatpush.bf16.msra.mxu1 %v9351_v57  ;;  %v13624_v57 = vld [vmem:[#allocation5 + $0x14c] sm:$0xf]  ;;  %v9175_v50 = vor.u32 %v13592_v3, %v9172_v12  ;;  %v9540_v10 = vld [vmem:[#allocation5 + $0x338] sm:$0xf0] }
 0x355   :  { %7756 = vmatpush.bf16.msra.mxu2 %v9479_v46  ;;  %v9575_v46 = vor.u32 %v13692_v45, %v9572_v21  ;;  %v9303_v7 = vor.u32 %v13624_v57, %v9300_v39  ;;  %v13584_v21 = vld [vmem:[#allocation5 + $0xc] sm:$0xf]  ;;  %v9268_v12 = vld [vmem:[#allocation5 + $0x118] sm:$0xf0]  ;;  %v9543_v62 = vor.u32 %v13684_v51, %v9540_v10 }
 0x356   :  { %7769 = vmatpush.bf16.msra.mxu3 %v9607_v48  ;;  %v9428_v48 = vld [vmem:[#allocation5 + $0x258] sm:$0xf0]  ;;  %v13616_v3 = vld [vmem:[#allocation5 + $0x10c] sm:$0xf] }
 0x357   :  { %7731 = vmatpush.bf16.msra.mxu0 %v9207_v6  ;;  %v15524_v6 = vadd.f32 %v7516_v33, %v7504_v63  ;;  %v13648_v57 = vld [vmem:[#allocation5 + $0x20c] sm:$0xf]  ;;  %v9764_v33 = vld [vmem:[#allocation5 + $0x4f8] sm:$0xf0] }
 0x358   :  { %7744 = vmatpush.bf16.msra.mxu1 %v9335_v49  ;;  %v9431_v49 = vor.u32 %v13656_v44, %v9428_v48  ;;  %v13680_v39 = vld [vmem:[#allocation5 + $0x30c] sm:$0xf]  ;;  %v9524_v44 = vld [vmem:[#allocation5 + $0x318] sm:$0xf0]  ;;  %v7505_v48 = vpop.f32.mrf.mxu2  ;;  %v7518_v54 = vpop.f32.mrf.mxu3 }
 0x359   :  { %7757 = vmatpush.bf16.msra.mxu2 %v9463_v30  ;;  %v13588_v30 = vld [vmem:[#allocation5 + $0x2c] sm:$0xf]  ;;  %v9748_v10 = vld [vmem:[#allocation5 + $0x4d8] sm:$0xf0] }
 0x35a   :  { %7770 = vmatpush.bf16.msra.mxu3 %v9591_v53  ;;  %v9284_v53 = vld [vmem:[#allocation5 + $0x138] sm:$0xf0]  ;;  %v9159_v45 = vor.u32 %v13588_v30, %v9156_v41  ;;  %v13740_v63 = vld [vmem:[#allocation5 + $0x4ec] sm:$0xf] }
 0x35b   :  { %7732 = vmatpush.bf16.msra.mxu0 %v9191_v42  ;;  %v9140_v42 = vld [vmem:[#allocation5 + $0x18] sm:$0xf0]  ;;  %v13772_v16 = vld [vmem:[#allocation5 + $0x5ec] sm:$0xf] }
 0x35c   :  { %7745 = vmatpush.bf16.msra.mxu1 %v9319_v47  ;;  %v9287_v47 = vor.u32 %v13620_v52, %v9284_v53  ;;  %v9143_v56 = vor.u32 %v13584_v21, %v9140_v42  ;;  %v13804_v29 = vld [vmem:[#allocation5 + $0x6ec] sm:$0xf]  ;;  %v10148_v52 = vld [vmem:[#allocation5 + $0x7f8] sm:$0xf0]  ;;  %v9767_v53 = vor.u32 %v13740_v63, %v9764_v33 }
 0x35d   :  { %7758 = vmatpush.bf16.msra.mxu2 %v9447_v35  ;;  %v9415_v35 = vor.u32 %v13652_v14, %v9412_v58  ;;  %v13836_v41 = vld [vmem:[#allocation5 + $0x7ec] sm:$0xf]  ;;  %v9876_v21 = vld [vmem:[#allocation5 + $0x5d8] sm:$0xf0] }
 0x35e   :  { %7771 = vmatpush.bf16.msra.mxu3 %v9575_v46  ;;  %v9396_v46 = vld [vmem:[#allocation5 + $0x218] sm:$0xf0]  ;;  %v13736_v51 = vld [vmem:[#allocation5 + $0x4cc] sm:$0xf] }
 0x35f   :  { %7733 = vmatpush.bf16.msra.mxu0 %v9175_v50  ;;  %v9892_v50 = vld [vmem:[#allocation5 + $0x5f8] sm:$0xf0]  ;;  %v9399_v30 = vor.u32 %v13648_v57, %v9396_v46  ;;  %v13768_v48 = vld [vmem:[#allocation5 + $0x5cc] sm:$0xf] }
 0x360   :  { %7746 = vmatpush.bf16.msra.mxu1 %v9303_v7  ;;  %v10020_v7 = vld [vmem:[#allocation5 + $0x6f8] sm:$0xf0]  ;;  %v9895_v14 = vor.u32 %v13772_v16, %v9892_v50  ;;  %v13800_v42 = vld [vmem:[#allocation5 + $0x6cc] sm:$0xf] }
 0x361   :  { %7759 = vmatpush.bf16.msra.mxu2 %v9431_v49  ;;  %v9271_v49 = vor.u32 %v13616_v3, %v9268_v12  ;;  %v10023_v58 = vor.u32 %v13804_v29, %v10020_v7  ;;  %v10004_v54 = vld [vmem:[#allocation5 + $0x6d8] sm:$0xf0]  ;;  %v9751_v3 = vor.u32 %v13736_v51, %v9748_v10  ;;  %v9879_v12 = vor.u32 %v13768_v48, %v9876_v21  ;;  %v13796_v33 = vld [vmem:[#allocation5 + $0x6ac] sm:$0xf] }
 0x362   :  { %7772 = vmatpush.bf16.msra.mxu3 %v9559_v28  ;;  %v9527_v28 = vor.u32 %v13680_v39, %v9524_v44  ;;  %v10007_v57 = vor.u32 %v13800_v42, %v10004_v54  ;;  %v9732_v46 = vld [vmem:[#allocation5 + $0x4b8] sm:$0xf0]  ;;  %v13764_v39 = vld [vmem:[#allocation5 + $0x5ac] sm:$0xf] }
 0x363   :  { %7734 = vmatpush.bf16.msra.mxu0 %v9159_v45  ;;  %v10151_v45 = vor.u32 %v13836_v41, %v10148_v52  ;;  %v9860_v63 = vld [vmem:[#allocation5 + $0x5b8] sm:$0xf0]  ;;  %v13760_v52 = vld [vmem:[#allocation5 + $0x58c] sm:$0xf] }
 0x364   :  { %7747 = vmatpush.bf16.msra.mxu1 %v9287_v47  ;;  %v13832_v47 = vld [vmem:[#allocation5 + $0x7cc] sm:$0xf]  ;;  %v9988_v16 = vld [vmem:[#allocation5 + $0x6b8] sm:$0xf0]  ;;  %v9863_v7 = vor.u32 %v13764_v39, %v9860_v63 }
 0x365   :  { %7760 = vmatpush.bf16.msra.mxu2 %v9415_v35  ;;  %v10132_v35 = vld [vmem:[#allocation5 + $0x7d8] sm:$0xf0]  ;;  %v13724_v21 = vld [vmem:[#allocation5 + $0x46c] sm:$0xf] }
 0x366   :  { %7773 = vmatpush.bf16.msra.mxu3 %v9543_v62  ;;  %v13732_v62 = vld [vmem:[#allocation5 + $0x4ac] sm:$0xf]  ;;  %v10135_v44 = vor.u32 %v13832_v47, %v10132_v35  ;;  %v10116_v50 = vld [vmem:[#allocation5 + $0x7b8] sm:$0xf0] }
 0x367   :  { %7735 = vmatpush.bf16.msra.mxu0 %v9143_v56  ;;  %v13828_v56 = vld [vmem:[#allocation5 + $0x7ac] sm:$0xf]  ;;  %v9735_v29 = vor.u32 %v13732_v62, %v9732_v46  ;;  %v9716_v41 = vld [vmem:[#allocation5 + $0x498] sm:$0xf0] }
 0x368   :  { %7748 = vmatpush.bf16.msra.mxu1 %v9271_v49  ;;  %v9991_v49 = vor.u32 %v13796_v33, %v9988_v16  ;;  %v10100_v51 = vld [vmem:[#allocation5 + $0x798] sm:$0xf0]  ;;  %v13756_v54 = vld [vmem:[#allocation5 + $0x56c] sm:$0xf] }
 0x369   :  { %7761 = vmatpush.bf16.msra.mxu2 %v9399_v30  ;;  %v13728_v30 = vld [vmem:[#allocation5 + $0x48c] sm:$0xf]  ;;  %v9700_v42 = vld [vmem:[#allocation5 + $0x478] sm:$0xf0] }
 0x36a   :  { %7774 = vmatpush.bf16.msra.mxu3 %v9527_v28  ;;  %7736 = vmatmul.bf16.vlgmr.msra.gmra.mxu0 %v15311_v9  ;;  %v10119_v28 = vor.u32 %v13828_v56, %v10116_v50  ;;  %v13824_v9 = vld [vmem:[#allocation5 + $0x78c] sm:$0xf]  ;;  %v9719_v10 = vor.u32 %v13728_v30, %v9716_v41  ;;  %v10084_v46 = vld [vmem:[#allocation5 + $0x778] sm:$0xf0]  ;;  %v9703_v39 = vor.u32 %v13724_v21, %v9700_v42 }
 0x36b   :  { %7780 = vmatpush.bf16.msrb.mxu0 %v9767_v53  ;;  %7749 = vmatmul.bf16.vlgmr.msra.gmra.mxu1 %v15318_v25  ;;  %v13792_v53 = vld [vmem:[#allocation5 + $0x68c] sm:$0xf]  ;;  %v7542_v25 = vpop.f32.mrf.mxu1  ;;  %v10103_v47 = vor.u32 %v13824_v9, %v10100_v51  ;;  %v9684_v33 = vld [vmem:[#allocation5 + $0x458] sm:$0xf0] }
 0x36c   :  { %7793 = vmatpush.bf16.msrb.mxu1 %v9895_v14  ;;  %7762 = vmatmul.bf16.vlgmr.msra.gmra.mxu2 %v15309_v8  ;;  %v9844_v8 = vld [vmem:[#allocation5 + $0x598] sm:$0xf0]  ;;  %v13820_v62 = vld [vmem:[#allocation5 + $0x76c] sm:$0xf] }
 0x36d   :  { %7806 = vmatpush.bf16.msrb.mxu2 %v10023_v58  ;;  %7775 = vmatmul.bf16.vlgmr.msra.gmra.mxu3 %v15313_v15  ;;  %v9972_v14 = vld [vmem:[#allocation5 + $0x698] sm:$0xf0]  ;;  %v7529_v58 = vpop.f32.mrf.mxu0  ;;  %v9847_v48 = vor.u32 %v13760_v52, %v9844_v8  ;;  %v13720_v63 = vld [vmem:[#allocation5 + $0x44c] sm:$0xf]  ;;  %v10087_v56 = vor.u32 %v13820_v62, %v10084_v46 }
 0x36e   :  { %7819 = vmatpush.bf16.msrb.mxu3 %v10151_v45  ;;  %v7530_v15 = vadd.f32 %v7529_v58, %v15524_v6  ;;  %v9975_v45 = vor.u32 %v13792_v53, %v9972_v14  ;;  %v13752_v16 = vld [vmem:[#allocation5 + $0x54c] sm:$0xf]  ;;  %v9687_v53 = vor.u32 %v13720_v63, %v9684_v33  ;;  %v9924_v42 = vld [vmem:[#allocation5 + $0x638] sm:$0xf0] }
 0x36f   :  { %7781 = vmatpush.bf16.msrb.mxu0 %v9751_v3  ;;  %v9828_v3 = vld [vmem:[#allocation5 + $0x578] sm:$0xf0]  ;;  %v7555_v50 = vpop.f32.mrf.mxu2  ;;  %v13816_v52 = vld [vmem:[#allocation5 + $0x74c] sm:$0xf] }
 0x370   :  { %7794 = vmatpush.bf16.msrb.mxu1 %v9879_v12  ;;  %v7543_v35 = vadd.f32 %v7542_v25, %v7530_v15  ;;  %v13788_v12 = vld [vmem:[#allocation5 + $0x66c] sm:$0xf]  ;;  %v9831_v6 = vor.u32 %v13756_v54, %v9828_v3  ;;  %v7568_v41 = vpop.f32.mrf.mxu3  ;;  %v9908_v63 = vld [vmem:[#allocation5 + $0x618] sm:$0xf0] }
 0x371   :  { %7807 = vmatpush.bf16.msrb.mxu2 %v10007_v57  ;;  %v9956_v57 = vld [vmem:[#allocation5 + $0x678] sm:$0xf0]  ;;  %v13716_v15 = vld [vmem:[#allocation5 + $0x42c] sm:$0xf] }
 0x372   :  { %7820 = vmatpush.bf16.msrb.mxu3 %v10135_v44  ;;  %v9959_v44 = vor.u32 %v13788_v12, %v9956_v57  ;;  %v7556_v30 = vadd.f32 %v7555_v50, %v7543_v35  ;;  %v13748_v25 = vld [vmem:[#allocation5 + $0x52c] sm:$0xf]  ;;  %v9652_v12 = vld [vmem:[#allocation5 + $0x418] sm:$0xf0] }
 0x373   :  { %7782 = vmatpush.bf16.msrb.mxu0 %v9735_v29  ;;  %v9812_v29 = vld [vmem:[#allocation5 + $0x558] sm:$0xf0]  ;;  %v7544_v14 = vpop.f32.mrf.mxu1  ;;  %v13780_v21 = vld [vmem:[#allocation5 + $0x62c] sm:$0xf] }
 0x374   :  { %7795 = vmatpush.bf16.msrb.mxu1 %v9863_v7  ;;  %v13784_v7 = vld [vmem:[#allocation5 + $0x64c] sm:$0xf]  ;;  %v15531_v58 = vadd.f32 %v7568_v41, %v7556_v30  ;;  %v9815_v9 = vor.u32 %v13752_v16, %v9812_v29  ;;  %v9927_v62 = vor.u32 %v13780_v21, %v9924_v42  ;;  %v10036_v16 = vld [vmem:[#allocation5 + $0x718] sm:$0xf0] }
 0x375   :  { %7808 = vmatpush.bf16.msrb.mxu2 %v9991_v49  ;;  %v9940_v49 = vld [vmem:[#allocation5 + $0x658] sm:$0xf0]  ;;  %v7531_v8 = vpop.f32.mrf.mxu0  ;;  %v13812_v54 = vld [vmem:[#allocation5 + $0x72c] sm:$0xf] }
 0x376   :  { %7821 = vmatpush.bf16.msrb.mxu3 %v10119_v28  ;;  %v10068_v28 = vld [vmem:[#allocation5 + $0x758] sm:$0xf0]  ;;  %v9943_v51 = vor.u32 %v13784_v7, %v9940_v49  ;;  %v13712_v3 = vld [vmem:[#allocation5 + $0x40c] sm:$0xf] }
 0x377   :  { %7783 = vmatpush.bf16.msrb.mxu0 %v9719_v10  ;;  %v9668_v10 = vld [vmem:[#allocation5 + $0x438] sm:$0xf0]  ;;  %v13744_v46 = vld [vmem:[#allocation5 + $0x50c] sm:$0xf]  ;;  %v9655_v30 = vor.u32 %v13712_v3, %v9652_v12 }
 0x378   :  { %7796 = vmatpush.bf16.msrb.mxu1 %v9847_v48  ;;  %v10071_v48 = vor.u32 %v13816_v52, %v10068_v28  ;;  %v9671_v35 = vor.u32 %v13716_v15, %v9668_v10  ;;  %v13808_v33 = vld [vmem:[#allocation5 + $0x70c] sm:$0xf]  ;;  %v10276_v29 = vld [vmem:[#allocation5 + $0x8f8] sm:$0xf0]  ;;  %v7570_v49 = vpop.f32.mrf.mxu3 }
 0x379   :  { %7809 = vmatpush.bf16.msrb.mxu2 %v9975_v45  ;;  %v9796_v45 = vld [vmem:[#allocation5 + $0x538] sm:$0xf0]  ;;  %v13868_v50 = vld [vmem:[#allocation5 + $0x8ec] sm:$0xf] }
 0x37a   :  { %7822 = vmatpush.bf16.msrb.mxu3 %v10103_v47  ;;  %v10052_v47 = vld [vmem:[#allocation5 + $0x738] sm:$0xf0]  ;;  %v9799_v57 = vor.u32 %v13748_v25, %v9796_v45  ;;  %v13900_v7 = vld [vmem:[#allocation5 + $0x9ec] sm:$0xf]  ;;  %v10279_v15 = vor.u32 %v13868_v50, %v10276_v29 }
 0x37b   :  { %7784 = vmatpush.bf16.msrb.mxu0 %v9703_v39  ;;  %v9780_v39 = vld [vmem:[#allocation5 + $0x518] sm:$0xf0]  ;;  %v13932_v52 = vld [vmem:[#allocation5 + $0xaec] sm:$0xf] }
 0x37c   :  { %7797 = vmatpush.bf16.msrb.mxu1 %v9831_v6  ;;  %v13776_v6 = vld [vmem:[#allocation5 + $0x60c] sm:$0xf]  ;;  %v10404_v41 = vld [vmem:[#allocation5 + $0x9f8] sm:$0xf0]  ;;  %v9783_v8 = vor.u32 %v13744_v46, %v9780_v39 }
 0x37d   :  { %7810 = vmatpush.bf16.msrb.mxu2 %v9959_v44  ;;  %v10055_v44 = vor.u32 %v13812_v54, %v10052_v47  ;;  %v10532_v28 = vld [vmem:[#allocation5 + $0xaf8] sm:$0xf0]  ;;  %v13964_v14 = vld [vmem:[#allocation5 + $0xbec] sm:$0xf]  ;;  %v10407_v10 = vor.u32 %v13900_v7, %v10404_v41 }
 0x37e   :  { %7823 = vmatpush.bf16.msrb.mxu3 %v10087_v56  ;;  %v7557_v56 = vpop.f32.mrf.mxu2  ;;  %v10535_v25 = vor.u32 %v13932_v52, %v10532_v28  ;;  %v10260_v45 = vld [vmem:[#allocation5 + $0x8d8] sm:$0xf0]  ;;  %v13896_v21 = vld [vmem:[#allocation5 + $0x9cc] sm:$0xf] }
 0x37f   :  { %7785 = vmatpush.bf16.msrb.mxu0 %v9687_v53  ;;  %v9911_v53 = vor.u32 %v13776_v6, %v9908_v63  ;;  %v10388_v54 = vld [vmem:[#allocation5 + $0x9d8] sm:$0xf0]  ;;  %v13928_v47 = vld [vmem:[#allocation5 + $0xacc] sm:$0xf] }
 0x380   :  { %7798 = vmatpush.bf16.msrb.mxu1 %v9815_v9  ;;  %v10660_v9 = vld [vmem:[#allocation5 + $0xbf8] sm:$0xf0]  ;;  %v13960_v3 = vld [vmem:[#allocation5 + $0xbcc] sm:$0xf] }
 0x381   :  { %7811 = vmatpush.bf16.msrb.mxu2 %v9943_v51  ;;  %v10039_v51 = vor.u32 %v13808_v33, %v10036_v16  ;;  %v10663_v42 = vor.u32 %v13964_v14, %v10660_v9  ;;  %v10644_v12 = vld [vmem:[#allocation5 + $0xbd8] sm:$0xf0]  ;;  %v13860_v39 = vld [vmem:[#allocation5 + $0x8ac] sm:$0xf] }
 0x382   :  { %7824 = vmatpush.bf16.msrb.mxu3 %v10071_v48  ;;  %v13864_v48 = vld [vmem:[#allocation5 + $0x8cc] sm:$0xf]  ;;  %v10244_v6 = vld [vmem:[#allocation5 + $0x8b8] sm:$0xf0]  ;;  %v10647_v63 = vor.u32 %v13960_v3, %v10644_v12 }
 0x383   :  { %7786 = vmatpush.bf16.msrb.mxu0 %v9671_v35  ;;  %v10516_v35 = vld [vmem:[#allocation5 + $0xad8] sm:$0xf0]  ;;  %v13924_v16 = vld [vmem:[#allocation5 + $0xaac] sm:$0xf]  ;;  %v10247_v7 = vor.u32 %v13860_v39, %v10244_v6 }
 0x384   :  { %7799 = vmatpush.bf16.msrb.mxu1 %v9799_v57  ;;  %v10263_v57 = vor.u32 %v13864_v48, %v10260_v45  ;;  %v10519_v46 = vor.u32 %v13928_v47, %v10516_v35  ;;  %v10372_v33 = vld [vmem:[#allocation5 + $0x9b8] sm:$0xf0]  ;;  %v13956_v50 = vld [vmem:[#allocation5 + $0xbac] sm:$0xf] }
 0x385   :  { %7812 = vmatpush.bf16.msrb.mxu2 %v9927_v62  ;;  %v10391_v62 = vor.u32 %v13896_v21, %v10388_v54  ;;  %v10500_v56 = vld [vmem:[#allocation5 + $0xab8] sm:$0xf0]  ;;  %v13856_v41 = vld [vmem:[#allocation5 + $0x88c] sm:$0xf] }
 0x386   :  { %7825 = vmatpush.bf16.msrb.mxu3 %v10055_v44  ;;  %v13892_v44 = vld [vmem:[#allocation5 + $0x9ac] sm:$0xf]  ;;  %v10628_v29 = vld [vmem:[#allocation5 + $0xbb8] sm:$0xf0] }
 0x387   :  { %7787 = vmatpush.bf16.msrb.mxu0 %v9655_v30  ;;  %v10375_v49 = vor.u32 %v13892_v44, %v10372_v33  ;;  %v10503_v30 = vor.u32 %v13924_v16, %v10500_v56  ;;  %v10228_v52 = vld [vmem:[#allocation5 + $0x898] sm:$0xf0]  ;;  %v10631_v28 = vor.u32 %v13956_v50, %v10628_v29  ;;  %v7581_v9 = vpop.f32.mrf.mxu0  ;;  %v13852_v48 = vld [vmem:[#allocation5 + $0x86c] sm:$0xf] }
 0x388   :  { %7800 = vmatpush.bf16.msrb.mxu1 %v9783_v8  ;;  %v10356_v8 = vld [vmem:[#allocation5 + $0x998] sm:$0xf0]  ;;  %v13884_v21 = vld [vmem:[#allocation5 + $0x96c] sm:$0xf] }
 0x389   :  { %7813 = vmatpush.bf16.msrb.mxu2 %v9911_v53  ;;  %v13920_v53 = vld [vmem:[#allocation5 + $0xa8c] sm:$0xf]  ;;  %v10484_v14 = vld [vmem:[#allocation5 + $0xa98] sm:$0xf0] }
 0x38a   :  { %7826 = vmatpush.bf16.msrb.mxu3 %v10039_v51  ;;  %7788 = vmatmul.bf16.vlgmr.msrb.gmra.mxu0 %v15323_v37  ;;  %v13952_v37 = vld [vmem:[#allocation5 + $0xb8c] sm:$0xf]  ;;  %v10612_v51 = vld [vmem:[#allocation5 + $0xb98] sm:$0xf0] }
 0x38b   :  { %7832 = vmatpush.bf16.msra.mxu0 %v10279_v15  ;;  %7801 = vmatmul.bf16.vlgmr.msrb.gmra.mxu1 %v15327_v40  ;;  %v10231_v15 = vor.u32 %v13856_v41, %v10228_v52  ;;  %v7594_v40 = vpop.f32.mrf.mxu1  ;;  %v10212_v45 = vld [vmem:[#allocation5 + $0x878] sm:$0xf0]  ;;  %v13916_v35 = vld [vmem:[#allocation5 + $0xa6c] sm:$0xf] }
 0x38c   :  { %7845 = vmatpush.bf16.msra.mxu1 %v10407_v10  ;;  %7814 = vmatmul.bf16.vlgmr.msrb.gmra.mxu2 %v15321_v34  ;;  %v13888_v34 = vld [vmem:[#allocation5 + $0x98c] sm:$0xf]  ;;  %v10340_v47 = vld [vmem:[#allocation5 + $0x978] sm:$0xf0] }
 0x38d   :  { %7858 = vmatpush.bf16.msra.mxu2 %v10535_v25  ;;  %7827 = vmatmul.bf16.vlgmr.msrb.gmra.mxu3 %v15325_v38  ;;  %v7582_v38 = vadd.f32 %v7581_v9, %v15531_v58  ;;  %v10359_v10 = vor.u32 %v13888_v34, %v10356_v8  ;;  %v10487_v25 = vor.u32 %v13920_v53, %v10484_v14  ;;  %v10468_v3 = vld [vmem:[#allocation5 + $0xa78] sm:$0xf0]  ;;  %v13948_v12 = vld [vmem:[#allocation5 + $0xb6c] sm:$0xf] }
 0x38e   :  { %7871 = vmatpush.bf16.msra.mxu3 %v10663_v42  ;;  %v10615_v42 = vor.u32 %v13952_v37, %v10612_v51  ;;  %v10343_v58 = vor.u32 %v13884_v21, %v10340_v47  ;;  %v13848_v39 = vld [vmem:[#allocation5 + $0x84c] sm:$0xf]  ;;  %v10196_v6 = vld [vmem:[#allocation5 + $0x858] sm:$0xf0] }
 0x38f   :  { %7833 = vmatpush.bf16.msra.mxu0 %v10263_v57  ;;  %v7595_v54 = vadd.f32 %v7594_v40, %v7582_v38  ;;  %v10596_v57 = vld [vmem:[#allocation5 + $0xb78] sm:$0xf0]  ;;  %v13880_v44 = vld [vmem:[#allocation5 + $0x94c] sm:$0xf]  ;;  %v7607_v33 = vpop.f32.mrf.mxu2  ;;  %v7583_v41 = vpop.f32.mrf.mxu0  ;;  %v10199_v52 = vor.u32 %v13848_v39, %v10196_v6 }
 0x390   :  { %7846 = vmatpush.bf16.msra.mxu1 %v10391_v62  ;;  %v10215_v62 = vor.u32 %v13852_v48, %v10212_v45  ;;  %v10324_v16 = vld [vmem:[#allocation5 + $0x958] sm:$0xf0]  ;;  %v13912_v56 = vld [vmem:[#allocation5 + $0xa4c] sm:$0xf] }
 0x391   :  { %7859 = vmatpush.bf16.msra.mxu2 %v10519_v46  ;;  %v10471_v46 = vor.u32 %v13916_v35, %v10468_v3  ;;  %v10452_v50 = vld [vmem:[#allocation5 + $0xa58] sm:$0xf0]  ;;  %v7608_v29 = vadd.f32 %v7607_v33, %v7595_v54  ;;  %v10327_v8 = vor.u32 %v13880_v44, %v10324_v16  ;;  %v13844_v14 = vld [vmem:[#allocation5 + $0x82c] sm:$0xf] }
 0x392   :  { %7872 = vmatpush.bf16.msra.mxu3 %v10647_v63  ;;  %v10599_v63 = vor.u32 %v13948_v12, %v10596_v57  ;;  %v10455_v53 = vor.u32 %v13912_v56, %v10452_v50  ;;  %v10180_v9 = vld [vmem:[#allocation5 + $0x838] sm:$0xf0]  ;;  %v13876_v37 = vld [vmem:[#allocation5 + $0x92c] sm:$0xf] }
 0x393   :  { %7834 = vmatpush.bf16.msra.mxu0 %v10247_v7  ;;  %v7620_v7 = vpop.f32.mrf.mxu3  ;;  %v7596_v34 = vpop.f32.mrf.mxu1  ;;  %v10308_v38 = vld [vmem:[#allocation5 + $0x938] sm:$0xf0]  ;;  %v10183_v48 = vor.u32 %v13844_v14, %v10180_v9  ;;  %v13840_v45 = vld [vmem:[#allocation5 + $0x80c] sm:$0xf] }
 0x394   :  { %7847 = vmatpush.bf16.msra.mxu1 %v10375_v49  ;;  %v13944_v49 = vld [vmem:[#allocation5 + $0xb4c] sm:$0xf]  ;;  %v10436_v40 = vld [vmem:[#allocation5 + $0xa38] sm:$0xf0] }
 0x395   :  { %7860 = vmatpush.bf16.msra.mxu2 %v10503_v30  ;;  %v10580_v30 = vld [vmem:[#allocation5 + $0xb58] sm:$0xf0]  ;;  %v13872_v47 = vld [vmem:[#allocation5 + $0x90c] sm:$0xf] }
 0x396   :  { %7873 = vmatpush.bf16.msra.mxu3 %v10631_v28  ;;  %v15538_v28 = vadd.f32 %v7620_v7, %v7608_v29  ;;  %v10583_v51 = vor.u32 %v13944_v49, %v10580_v30  ;;  %v10164_v21 = vld [vmem:[#allocation5 + $0x818] sm:$0xf0]  ;;  %v13904_v3 = vld [vmem:[#allocation5 + $0xa0c] sm:$0xf] }
 0x397   :  { %7835 = vmatpush.bf16.msra.mxu0 %v10231_v15  ;;  %v13908_v15 = vld [vmem:[#allocation5 + $0xa2c] sm:$0xf]  ;;  %v10292_v35 = vld [vmem:[#allocation5 + $0x918] sm:$0xf0]  ;;  %v10167_v33 = vor.u32 %v13840_v45, %v10164_v21 }
 0x398   :  { %7848 = vmatpush.bf16.msra.mxu1 %v10359_v10  ;;  %v13940_v10 = vld [vmem:[#allocation5 + $0xb2c] sm:$0xf]  ;;  %v10439_v54 = vor.u32 %v13908_v15, %v10436_v40  ;;  %v10420_v57 = vld [vmem:[#allocation5 + $0xa18] sm:$0xf0]  ;;  %v10295_v29 = vor.u32 %v13872_v47, %v10292_v35 }
 0x399   :  { %7861 = vmatpush.bf16.msra.mxu2 %v10487_v25  ;;  %v10564_v25 = vld [vmem:[#allocation5 + $0xb38] sm:$0xf0]  ;;  %v13996_v39 = vld [vmem:[#allocation5 + $0xcec] sm:$0xf]  ;;  %v10423_v7 = vor.u32 %v13904_v3, %v10420_v57 }
 0x39a   :  { %7874 = vmatpush.bf16.msra.mxu3 %v10615_v42  ;;  %v10311_v42 = vor.u32 %v13876_v37, %v10308_v38  ;;  %v10567_v12 = vor.u32 %v13940_v10, %v10564_v25  ;;  %v10788_v6 = vld [vmem:[#allocation5 + $0xcf8] sm:$0xf0]  ;;  %v14028_v44 = vld [vmem:[#allocation5 + $0xdec] sm:$0xf] }
 0x39b   :  { %7836 = vmatpush.bf16.msra.mxu0 %v10215_v62  ;;  %v13936_v62 = vld [vmem:[#allocation5 + $0xb0c] sm:$0xf]  ;;  %v10916_v16 = vld [vmem:[#allocation5 + $0xdf8] sm:$0xf0] }
 0x39c   :  { %7849 = vmatpush.bf16.msra.mxu1 %v10343_v58  ;;  %v10548_v58 = vld [vmem:[#allocation5 + $0xb18] sm:$0xf0]  ;;  %v14060_v56 = vld [vmem:[#allocation5 + $0xeec] sm:$0xf]  ;;  %v10919_v34 = vor.u32 %v14028_v44, %v10916_v16 }
 0x39d   :  { %7862 = vmatpush.bf16.msra.mxu2 %v10471_v46  ;;  %v7609_v46 = vpop.f32.mrf.mxu2  ;;  %v11044_v50 = vld [vmem:[#allocation5 + $0xef8] sm:$0xf0]  ;;  %v14092_v49 = vld [vmem:[#allocation5 + $0xfec] sm:$0xf]  ;;  %v10551_v41 = vor.u32 %v13936_v62, %v10548_v58 }
 0x39e   :  { %7875 = vmatpush.bf16.msra.mxu3 %v10599_v63  ;;  %v7622_v63 = vpop.f32.mrf.mxu3  ;;  %v11172_v30 = vld [vmem:[#allocation5 + $0xff8] sm:$0xf0]  ;;  %v14024_v9 = vld [vmem:[#allocation5 + $0xdcc] sm:$0xf] }
 0x39f   :  { %7837 = vmatpush.bf16.msra.mxu0 %v10199_v52  ;;  %v10791_v52 = vor.u32 %v13996_v39, %v10788_v6  ;;  %v10772_v14 = vld [vmem:[#allocation5 + $0xcd8] sm:$0xf0]  ;;  %v11175_v37 = vor.u32 %v14092_v49, %v11172_v30  ;;  %v14056_v38 = vld [vmem:[#allocation5 + $0xecc] sm:$0xf] }
 0x3a0   :  { %7850 = vmatpush.bf16.msra.mxu1 %v10327_v8  ;;  %v11047_v8 = vor.u32 %v14060_v56, %v11044_v50  ;;  %v11028_v15 = vld [vmem:[#allocation5 + $0xed8] sm:$0xf0]  ;;  %v14088_v40 = vld [vmem:[#allocation5 + $0xfcc] sm:$0xf] }
 0x3a1   :  { %7863 = vmatpush.bf16.msra.mxu2 %v10455_v53  ;;  %v13992_v53 = vld [vmem:[#allocation5 + $0xccc] sm:$0xf]  ;;  %v11156_v10 = vld [vmem:[#allocation5 + $0xfd8] sm:$0xf0]  ;;  %v11031_v45 = vor.u32 %v14056_v38, %v11028_v15 }
 0x3a2   :  { %7876 = vmatpush.bf16.msra.mxu3 %v10583_v51  ;;  %v10900_v51 = vld [vmem:[#allocation5 + $0xdd8] sm:$0xf0]  ;;  %v10775_v25 = vor.u32 %v13992_v53, %v10772_v14  ;;  %v13988_v21 = vld [vmem:[#allocation5 + $0xcac] sm:$0xf]  ;;  %v11159_v47 = vor.u32 %v14088_v40, %v11156_v10 }
 0x3a3   :  { %7838 = vmatpush.bf16.msra.mxu0 %v10183_v48  ;;  %v10903_v48 = vor.u32 %v14024_v9, %v10900_v51  ;;  %v10884_v35 = vld [vmem:[#allocation5 + $0xdb8] sm:$0xf0]  ;;  %v14052_v3 = vld [vmem:[#allocation5 + $0xeac] sm:$0xf] }
 0x3a4   :  { %7851 = vmatpush.bf16.msra.mxu1 %v10311_v42  ;;  %v10756_v42 = vld [vmem:[#allocation5 + $0xcb8] sm:$0xf0]  ;;  %v14084_v57 = vld [vmem:[#allocation5 + $0xfac] sm:$0xf] }
 0x3a5   :  { %7864 = vmatpush.bf16.msra.mxu2 %v10439_v54  ;;  %v14020_v54 = vld [vmem:[#allocation5 + $0xdac] sm:$0xf]  ;;  %v11140_v62 = vld [vmem:[#allocation5 + $0xfb8] sm:$0xf0]  ;;  %v10759_v58 = vor.u32 %v13988_v21, %v10756_v42 }
 0x3a6   :  { %7877 = vmatpush.bf16.msra.mxu3 %v10567_v12  ;;  %v11012_v12 = vld [vmem:[#allocation5 + $0xeb8] sm:$0xf0]  ;;  %v10887_v46 = vor.u32 %v14020_v54, %v10884_v35  ;;  %v13984_v6 = vld [vmem:[#allocation5 + $0xc8c] sm:$0xf]  ;;  %v11143_v63 = vor.u32 %v14084_v57, %v11140_v62 }
 0x3a7   :  { %7839 = vmatpush.bf16.msra.mxu0 %v10167_v33  ;;  %v11015_v39 = vor.u32 %v14052_v3, %v11012_v12  ;;  %v14016_v44 = vld [vmem:[#allocation5 + $0xd8c] sm:$0xf]  ;;  %v10868_v33 = vld [vmem:[#allocation5 + $0xd98] sm:$0xf0]  ;;  %v7633_v56 = vpop.f32.mrf.mxu0 }
 0x3a8   :  { %7852 = vmatpush.bf16.msra.mxu1 %v10295_v29  ;;  %v14048_v16 = vld [vmem:[#allocation5 + $0xe8c] sm:$0xf]  ;;  %v11124_v50 = vld [vmem:[#allocation5 + $0xf98] sm:$0xf0]  ;;  %v10871_v49 = vor.u32 %v14016_v44, %v10868_v33 }
 0x3a9   :  { %7865 = vmatpush.bf16.msra.mxu2 %v10423_v7  ;;  %v7646_v7 = vpop.f32.mrf.mxu1  ;;  %v10852_v14 = vld [vmem:[#allocation5 + $0xd78] sm:$0xf0]  ;;  %v14044_v9 = vld [vmem:[#allocation5 + $0xe6c] sm:$0xf] }
 0x3aa   :  { %7878 = vmatpush.bf16.msra.mxu3 %v10551_v41  ;;  %7840 = vmatmul.bf16.vlgmr.msra.gmra.mxu0 %v15333_v18  ;;  %v10740_v18 = vld [vmem:[#allocation5 + $0xc98] sm:$0xf0]  ;;  %v13980_v41 = vld [vmem:[#allocation5 + $0xc6c] sm:$0xf] }
 0x3ab   :  { %7884 = vmatpush.bf16.msrb.mxu0 %v10791_v52  ;;  %7853 = vmatmul.bf16.vlgmr.msra.gmra.mxu1 %v15337_v23  ;;  %v14080_v23 = vld [vmem:[#allocation5 + $0xf8c] sm:$0xf]  ;;  %v10743_v29 = vor.u32 %v13984_v6, %v10740_v18  ;;  %v10724_v52 = vld [vmem:[#allocation5 + $0xc78] sm:$0xf0] }
 0x3ac   :  { %7897 = vmatpush.bf16.msrb.mxu1 %v10919_v34  ;;  %7866 = vmatmul.bf16.vlgmr.msra.gmra.mxu2 %v15335_v22  ;;  %v10996_v22 = vld [vmem:[#allocation5 + $0xe98] sm:$0xf0]  ;;  %v14012_v34 = vld [vmem:[#allocation5 + $0xd6c] sm:$0xf]  ;;  %v10727_v15 = vor.u32 %v13980_v41, %v10724_v52 }
 0x3ad   :  { %7910 = vmatpush.bf16.msrb.mxu2 %v11047_v8  ;;  %7879 = vmatmul.bf16.vlgmr.msra.gmra.mxu3 %v15339_v27  ;;  %v7634_v27 = vadd.f32 %v7633_v56, %v15538_v28  ;;  %v10999_v30 = vor.u32 %v14048_v16, %v10996_v22  ;;  %v11127_v8 = vor.u32 %v14080_v23, %v11124_v50  ;;  %v14076_v51 = vld [vmem:[#allocation5 + $0xf6c] sm:$0xf]  ;;  %v11108_v38 = vld [vmem:[#allocation5 + $0xf78] sm:$0xf0] }
 0x3ae   :  { %7923 = vmatpush.bf16.msrb.mxu3 %v11175_v37  ;;  %v10980_v37 = vld [vmem:[#allocation5 + $0xe78] sm:$0xf0]  ;;  %v10855_v28 = vor.u32 %v14012_v34, %v10852_v14  ;;  %v13976_v10 = vld [vmem:[#allocation5 + $0xc4c] sm:$0xf] }
 0x3af   :  { %7885 = vmatpush.bf16.msrb.mxu0 %v10775_v25  ;;  %v7647_v53 = vadd.f32 %v7646_v7, %v7634_v27  ;;  %v10983_v40 = vor.u32 %v14044_v9, %v10980_v37  ;;  %v10708_v25 = vld [vmem:[#allocation5 + $0xc58] sm:$0xf0]  ;;  %v7659_v21 = vpop.f32.mrf.mxu2  ;;  %v14040_v54 = vld [vmem:[#allocation5 + $0xe4c] sm:$0xf]  ;;  %v7635_v62 = vpop.f32.mrf.mxu0 }
 0x3b0   :  { %7898 = vmatpush.bf16.msrb.mxu1 %v10903_v48  ;;  %v14008_v48 = vld [vmem:[#allocation5 + $0xd4c] sm:$0xf]  ;;  %v10836_v42 = vld [vmem:[#allocation5 + $0xd58] sm:$0xf0]  ;;  %v7672_v3 = vpop.f32.mrf.mxu3 }
 0x3b1   :  { %7911 = vmatpush.bf16.msrb.mxu2 %v11031_v45  ;;  %v11111_v45 = vor.u32 %v14076_v51, %v11108_v38  ;;  %v7660_v35 = vadd.f32 %v7659_v21, %v7647_v53  ;;  %v14072_v12 = vld [vmem:[#allocation5 + $0xf4c] sm:$0xf]  ;;  %v11092_v57 = vld [vmem:[#allocation5 + $0xf58] sm:$0xf0]  ;;  %v10839_v6 = vor.u32 %v14008_v48, %v10836_v42 }
 0x3b2   :  { %7924 = vmatpush.bf16.msrb.mxu3 %v11159_v47  ;;  %v10964_v47 = vld [vmem:[#allocation5 + $0xe58] sm:$0xf0]  ;;  %v13972_v44 = vld [vmem:[#allocation5 + $0xc2c] sm:$0xf]  ;;  %v11095_v16 = vor.u32 %v14072_v12, %v11092_v57 }
 0x3b3   :  { %7886 = vmatpush.bf16.msrb.mxu0 %v10759_v58  ;;  %v10711_v58 = vor.u32 %v13976_v10, %v10708_v25  ;;  %v10967_v18 = vor.u32 %v14040_v54, %v10964_v47  ;;  %v14004_v33 = vld [vmem:[#allocation5 + $0xd2c] sm:$0xf]  ;;  %v10820_v22 = vld [vmem:[#allocation5 + $0xd38] sm:$0xf0] }
 0x3b4   :  { %7899 = vmatpush.bf16.msrb.mxu1 %v10887_v46  ;;  %v7648_v46 = vpop.f32.mrf.mxu1  ;;  %v14036_v56 = vld [vmem:[#allocation5 + $0xe2c] sm:$0xf]  ;;  %v10948_v23 = vld [vmem:[#allocation5 + $0xe38] sm:$0xf0] }
 0x3b5   :  { %7912 = vmatpush.bf16.msrb.mxu2 %v11015_v39  ;;  %v15545_v39 = vadd.f32 %v7672_v3, %v7660_v35  ;;  %v14068_v50 = vld [vmem:[#allocation5 + $0xf2c] sm:$0xf]  ;;  %v11076_v27 = vld [vmem:[#allocation5 + $0xf38] sm:$0xf0]  ;;  %v10951_v41 = vor.u32 %v14036_v56, %v10948_v23 }
 0x3b6   :  { %7925 = vmatpush.bf16.msrb.mxu3 %v11143_v63  ;;  %v10692_v63 = vld [vmem:[#allocation5 + $0xc38] sm:$0xf0]  ;;  %v13968_v7 = vld [vmem:[#allocation5 + $0xc0c] sm:$0xf]  ;;  %v11079_v53 = vor.u32 %v14068_v50, %v11076_v27 }
 0x3b7   :  { %7887 = vmatpush.bf16.msrb.mxu0 %v10743_v29  ;;  %v10695_v29 = vor.u32 %v13972_v44, %v10692_v63  ;;  %v14000_v52 = vld [vmem:[#allocation5 + $0xd0c] sm:$0xf]  ;;  %v10804_v34 = vld [vmem:[#allocation5 + $0xd18] sm:$0xf0]  ;;  %v7661_v51 = vpop.f32.mrf.mxu2 }
 0x3b8   :  { %7900 = vmatpush.bf16.msrb.mxu1 %v10871_v49  ;;  %v10676_v49 = vld [vmem:[#allocation5 + $0xc18] sm:$0xf0]  ;;  %v14064_v9 = vld [vmem:[#allocation5 + $0xf0c] sm:$0xf]  ;;  %v10807_v21 = vor.u32 %v14000_v52, %v10804_v34 }
 0x3b9   :  { %7913 = vmatpush.bf16.msrb.mxu2 %v10999_v30  ;;  %v10823_v30 = vor.u32 %v14004_v33, %v10820_v22  ;;  %v10932_v14 = vld [vmem:[#allocation5 + $0xe18] sm:$0xf0]  ;;  %v14124_v38 = vld [vmem:[#allocation5 + $0x10ec] sm:$0xf]  ;;  %v10679_v10 = vor.u32 %v13968_v7, %v10676_v49 }
 0x3ba   :  { %7926 = vmatpush.bf16.msrb.mxu3 %v11127_v8  ;;  %v14032_v8 = vld [vmem:[#allocation5 + $0xe0c] sm:$0xf]  ;;  %v11060_v37 = vld [vmem:[#allocation5 + $0xf18] sm:$0xf0] }
 0x3bb   :  { %7888 = vmatpush.bf16.msrb.mxu0 %v10727_v15  ;;  %v11300_v15 = vld [vmem:[#allocation5 + $0x10f8] sm:$0xf0]  ;;  %v14188_v48 = vld [vmem:[#allocation5 + $0x12ec] sm:$0xf]  ;;  %v10935_v42 = vor.u32 %v14032_v8, %v10932_v14  ;;  %v11063_v35 = vor.u32 %v14064_v9, %v11060_v37 }
 0x3bc   :  { %7901 = vmatpush.bf16.msrb.mxu1 %v10855_v28  ;;  %v14156_v28 = vld [vmem:[#allocation5 + $0x11ec] sm:$0xf]  ;;  %v11428_v25 = vld [vmem:[#allocation5 + $0x11f8] sm:$0xf0]  ;;  %v11303_v3 = vor.u32 %v14124_v38, %v11300_v15 }
 0x3bd   :  { %7914 = vmatpush.bf16.msrb.mxu2 %v10983_v40  ;;  %v7674_v40 = vpop.f32.mrf.mxu3  ;;  %v14220_v54 = vld [vmem:[#allocation5 + $0x13ec] sm:$0xf]  ;;  %v11684_v47 = vld [vmem:[#allocation5 + $0x13f8] sm:$0xf0]  ;;  %v11431_v12 = vor.u32 %v14156_v28, %v11428_v25 }
 0x3be   :  { %7927 = vmatpush.bf16.msrb.mxu3 %v11111_v45  ;;  %v11556_v45 = vld [vmem:[#allocation5 + $0x12f8] sm:$0xf0]  ;;  %v14120_v62 = vld [vmem:[#allocation5 + $0x10cc] sm:$0xf] }
 0x3bf   :  { %7889 = vmatpush.bf16.msrb.mxu0 %v10711_v58  ;;  %v11559_v57 = vor.u32 %v14188_v48, %v11556_v45  ;;  %v11284_v58 = vld [vmem:[#allocation5 + $0x10d8] sm:$0xf0]  ;;  %v14152_v46 = vld [vmem:[#allocation5 + $0x11cc] sm:$0xf] }
 0x3c0   :  { %7902 = vmatpush.bf16.msrb.mxu1 %v10839_v6  ;;  %v11687_v6 = vor.u32 %v14220_v54, %v11684_v47  ;;  %v14184_v44 = vld [vmem:[#allocation5 + $0x12cc] sm:$0xf]  ;;  %v11540_v63 = vld [vmem:[#allocation5 + $0x12d8] sm:$0xf0]  ;;  %v11287_v22 = vor.u32 %v14120_v62, %v11284_v58 }
 0x3c1   :  { %7915 = vmatpush.bf16.msrb.mxu2 %v10967_v18  ;;  %v11412_v18 = vld [vmem:[#allocation5 + $0x11d8] sm:$0xf0]  ;;  %v14216_v33 = vld [vmem:[#allocation5 + $0x13cc] sm:$0xf]  ;;  %v11543_v23 = vor.u32 %v14184_v44, %v11540_v63 }
 0x3c2   :  { %7928 = vmatpush.bf16.msrb.mxu3 %v11095_v16  ;;  %v11668_v16 = vld [vmem:[#allocation5 + $0x13d8] sm:$0xf0]  ;;  %v11415_v56 = vor.u32 %v14152_v46, %v11412_v18  ;;  %v14116_v50 = vld [vmem:[#allocation5 + $0x10ac] sm:$0xf] }
 0x3c3   :  { %7890 = vmatpush.bf16.msrb.mxu0 %v10695_v29  ;;  %v11268_v27 = vld [vmem:[#allocation5 + $0x10b8] sm:$0xf0]  ;;  %v14148_v29 = vld [vmem:[#allocation5 + $0x11ac] sm:$0xf]  ;;  %v11671_v7 = vor.u32 %v14216_v33, %v11668_v16 }
 0x3c4   :  { %7903 = vmatpush.bf16.msrb.mxu1 %v10823_v30  ;;  %v11396_v49 = vld [vmem:[#allocation5 + $0x11b8] sm:$0xf0]  ;;  %v14180_v30 = vld [vmem:[#allocation5 + $0x12ac] sm:$0xf]  ;;  %v11271_v8 = vor.u32 %v14116_v50, %v11268_v27 }
 0x3c5   :  { %7916 = vmatpush.bf16.msrb.mxu2 %v10951_v41  ;;  %v11524_v41 = vld [vmem:[#allocation5 + $0x12b8] sm:$0xf0]  ;;  %v14212_v52 = vld [vmem:[#allocation5 + $0x13ac] sm:$0xf] }
 0x3c6   :  { %7929 = vmatpush.bf16.msrb.mxu3 %v11079_v53  ;;  %v11652_v34 = vld [vmem:[#allocation5 + $0x13b8] sm:$0xf0]  ;;  %v11399_v53 = vor.u32 %v14148_v29, %v11396_v49  ;;  %v11527_v14 = vor.u32 %v14180_v30, %v11524_v41  ;;  %v14112_v9 = vld [vmem:[#allocation5 + $0x108c] sm:$0xf] }
 0x3c7   :  { %7891 = vmatpush.bf16.msrb.mxu0 %v10679_v10  ;;  %v14144_v37 = vld [vmem:[#allocation5 + $0x118c] sm:$0xf]  ;;  %v11655_v51 = vor.u32 %v14212_v52, %v11652_v34  ;;  %v11380_v38 = vld [vmem:[#allocation5 + $0x1198] sm:$0xf0]  ;;  %v7685_v28 = vpop.f32.mrf.mxu0 }
 0x3c8   :  { %7904 = vmatpush.bf16.msrb.mxu1 %v10807_v21  ;;  %v14176_v15 = vld [vmem:[#allocation5 + $0x128c] sm:$0xf]  ;;  %v11636_v40 = vld [vmem:[#allocation5 + $0x1398] sm:$0xf0]  ;;  %v7698_v25 = vpop.f32.mrf.mxu1  ;;  %v11383_v48 = vor.u32 %v14144_v37, %v11380_v38 }
 0x3c9   :  { %7917 = vmatpush.bf16.msrb.mxu2 %v10935_v42  ;;  %v14108_v21 = vld [vmem:[#allocation5 + $0x106c] sm:$0xf]  ;;  %v11236_v42 = vld [vmem:[#allocation5 + $0x1078] sm:$0xf0] }
 0x3ca   :  { %7930 = vmatpush.bf16.msrb.mxu3 %v11063_v35  ;;  %7892 = vmatmul.bf16.vlgmr.msrb.gmra.mxu0 %v15345_v13  ;;  %v11252_v13 = vld [vmem:[#allocation5 + $0x1098] sm:$0xf0]  ;;  %v14140_v54 = vld [vmem:[#allocation5 + $0x116c] sm:$0xf]  ;;  %v11239_v46 = vor.u32 %v14108_v21, %v11236_v42 }
 0x3cb   :  { %7936 = vmatpush.bf16.msra.mxu0 %v11303_v3  ;;  %7905 = vmatmul.bf16.vlgmr.msrb.gmra.mxu1 %v15349_v20  ;;  %v14208_v20 = vld [vmem:[#allocation5 + $0x138c] sm:$0xf]  ;;  %v11255_v10 = vor.u32 %v14112_v9, %v11252_v13  ;;  %v11364_v3 = vld [vmem:[#allocation5 + $0x1178] sm:$0xf0] }
 0x3cc   :  { %7949 = vmatpush.bf16.msra.mxu1 %v11431_v12  ;;  %7918 = vmatmul.bf16.vlgmr.msrb.gmra.mxu2 %v15347_v19  ;;  %v11508_v19 = vld [vmem:[#allocation5 + $0x1298] sm:$0xf0]  ;;  %v11639_v47 = vor.u32 %v14208_v20, %v11636_v40  ;;  %v14172_v12 = vld [vmem:[#allocation5 + $0x126c] sm:$0xf] }
 0x3cd   :  { %7962 = vmatpush.bf16.msra.mxu2 %v11559_v57  ;;  %7931 = vmatmul.bf16.vlgmr.msrb.gmra.mxu3 %v15351_v26  ;;  %v7686_v26 = vadd.f32 %v7685_v28, %v15545_v39  ;;  %v11511_v45 = vor.u32 %v14176_v15, %v11508_v19  ;;  %v11492_v57 = vld [vmem:[#allocation5 + $0x1278] sm:$0xf0]  ;;  %v14204_v62 = vld [vmem:[#allocation5 + $0x136c] sm:$0xf]  ;;  %v11367_v39 = vor.u32 %v14140_v54, %v11364_v3 }
 0x3ce   :  { %7975 = vmatpush.bf16.msra.mxu3 %v11687_v6  ;;  %v11620_v58 = vld [vmem:[#allocation5 + $0x1378] sm:$0xf0]  ;;  %v11495_v6 = vor.u32 %v14172_v12, %v11492_v57  ;;  %v14104_v18 = vld [vmem:[#allocation5 + $0x104c] sm:$0xf] }
 0x3cf   :  { %7937 = vmatpush.bf16.msra.mxu0 %v11287_v22  ;;  %v7699_v35 = vadd.f32 %v7698_v25, %v7686_v26  ;;  %v11220_v44 = vld [vmem:[#allocation5 + $0x1058] sm:$0xf0]  ;;  %v14136_v63 = vld [vmem:[#allocation5 + $0x114c] sm:$0xf]  ;;  %v11623_v33 = vor.u32 %v14204_v62, %v11620_v58  ;;  %v7711_v16 = vpop.f32.mrf.mxu2  ;;  %v7687_v49 = vpop.f32.mrf.mxu0 }
 0x3d0   :  { %7950 = vmatpush.bf16.msra.mxu1 %v11415_v56  ;;  %v11348_v22 = vld [vmem:[#allocation5 + $0x1158] sm:$0xf0]  ;;  %v14168_v56 = vld [vmem:[#allocation5 + $0x124c] sm:$0xf]  ;;  %v7724_v27 = vpop.f32.mrf.mxu3  ;;  %v11223_v30 = vor.u32 %v14104_v18, %v11220_v44  ;;  %v7700_v41 = vpop.f32.mrf.mxu1 }
 0x3d1   :  { %7963 = vmatpush.bf16.msra.mxu2 %v11543_v23  ;;  %v11476_v23 = vld [vmem:[#allocation5 + $0x1258] sm:$0xf0]  ;;  %v7712_v50 = vadd.f32 %v7711_v16, %v7699_v35  ;;  %v14200_v29 = vld [vmem:[#allocation5 + $0x134c] sm:$0xf]  ;;  %v11351_v34 = vor.u32 %v14136_v63, %v11348_v22 }
 0x3d2   :  { %7976 = vmatpush.bf16.msra.mxu3 %v11671_v7  ;;  %v11604_v7 = vld [vmem:[#allocation5 + $0x1358] sm:$0xf0]  ;;  %v14132_v9 = vld [vmem:[#allocation5 + $0x112c] sm:$0xf] }
 0x3d3   :  { %7938 = vmatpush.bf16.msra.mxu0 %v11271_v8  ;;  %v15552_v52 = vadd.f32 %v7724_v27, %v7712_v50  ;;  %v11479_v8 = vor.u32 %v14168_v56, %v11476_v23  ;;  %v11607_v13 = vor.u32 %v14200_v29, %v11604_v7  ;;  %v11332_v37 = vld [vmem:[#allocation5 + $0x1138] sm:$0xf0]  ;;  %v14196_v15 = vld [vmem:[#allocation5 + $0x132c] sm:$0xf] }
 0x3d4   :  { %7951 = vmatpush.bf16.msra.mxu1 %v11399_v53  ;;  %v14100_v53 = vld [vmem:[#allocation5 + $0x102c] sm:$0xf]  ;;  %v11460_v38 = vld [vmem:[#allocation5 + $0x1238] sm:$0xf0]  ;;  %v11335_v26 = vor.u32 %v14132_v9, %v11332_v37 }
 0x3d5   :  { %7964 = vmatpush.bf16.msra.mxu2 %v11527_v14  ;;  %v11204_v14 = vld [vmem:[#allocation5 + $0x1038] sm:$0xf0]  ;;  %v14096_v20 = vld [vmem:[#allocation5 + $0x100c] sm:$0xf] }
 0x3d6   :  { %7977 = vmatpush.bf16.msra.mxu3 %v11655_v51  ;;  %v14164_v51 = vld [vmem:[#allocation5 + $0x122c] sm:$0xf]  ;;  %v11588_v19 = vld [vmem:[#allocation5 + $0x1338] sm:$0xf0]  ;;  %v11207_v28 = vor.u32 %v14100_v53, %v11204_v14 }
 0x3d7   :  { %7939 = vmatpush.bf16.msra.mxu0 %v11255_v10  ;;  %v11188_v40 = vld [vmem:[#allocation5 + $0x1018] sm:$0xf0]  ;;  %v11463_v10 = vor.u32 %v14164_v51, %v11460_v38  ;;  %v14128_v25 = vld [vmem:[#allocation5 + $0x110c] sm:$0xf]  ;;  %v11591_v21 = vor.u32 %v14196_v15, %v11588_v19  ;;  %v7713_v35 = vpop.f32.mrf.mxu2 }
 0x3d8   :  { %7952 = vmatpush.bf16.msra.mxu1 %v11383_v48  ;;  %v11316_v48 = vld [vmem:[#allocation5 + $0x1118] sm:$0xf0]  ;;  %v14192_v54 = vld [vmem:[#allocation5 + $0x130c] sm:$0xf]  ;;  %v7726_v62 = vpop.f32.mrf.mxu3  ;;  %v11191_v58 = vor.u32 %v14096_v20, %v11188_v40 }
 0x3d9   :  { %7965 = vmatpush.bf16.msra.mxu2 %v11511_v45  ;;  %v14160_v45 = vld [vmem:[#allocation5 + $0x120c] sm:$0xf]  ;;  %v11444_v42 = vld [vmem:[#allocation5 + $0x1218] sm:$0xf0]  ;;  %v11319_v18 = vor.u32 %v14128_v25, %v11316_v48 }
 0x3da   :  { %7978 = vmatpush.bf16.msra.mxu3 %v11639_v47  ;;  %v11572_v47 = vld [vmem:[#allocation5 + $0x1318] sm:$0xf0]  ;;  %v14252_v3 = vld [vmem:[#allocation5 + $0x14ec] sm:$0xf]  ;;  %v11447_v44 = vor.u32 %v14160_v45, %v11444_v42 }
 0x3db   :  { %7940 = vmatpush.bf16.msra.mxu0 %v11239_v46  ;;  %v11812_v12 = vld [vmem:[#allocation5 + $0x14f8] sm:$0xf0]  ;;  %v14284_v57 = vld [vmem:[#allocation5 + $0x15ec] sm:$0xf]  ;;  %v11575_v16 = vor.u32 %v14192_v54, %v11572_v47 }
 0x3dc   :  { %7953 = vmatpush.bf16.msra.mxu1 %v11367_v39  ;;  %v11940_v46 = vld [vmem:[#allocation5 + $0x15f8] sm:$0xf0]  ;;  %v14316_v39 = vld [vmem:[#allocation5 + $0x16ec] sm:$0xf]  ;;  %v11815_v22 = vor.u32 %v14252_v3, %v11812_v12 }
 0x3dd   :  { %7966 = vmatpush.bf16.msra.mxu2 %v11495_v6  ;;  %v12068_v6 = vld [vmem:[#allocation5 + $0x16f8] sm:$0xf0]  ;;  %v14348_v63 = vld [vmem:[#allocation5 + $0x17ec] sm:$0xf]  ;;  %v11943_v56 = vor.u32 %v14284_v57, %v11940_v46 }
 0x3de   :  { %7979 = vmatpush.bf16.msra.mxu3 %v11623_v33  ;;  %v12196_v33 = vld [vmem:[#allocation5 + $0x17f8] sm:$0xf0]  ;;  %v12071_v23 = vor.u32 %v14316_v39, %v12068_v6  ;;  %v14248_v50 = vld [vmem:[#allocation5 + $0x14cc] sm:$0xf] }
 0x3df   :  { %7941 = vmatpush.bf16.msra.mxu0 %v11223_v30  ;;  %v11796_v27 = vld [vmem:[#allocation5 + $0x14d8] sm:$0xf0]  ;;  %v14280_v29 = vld [vmem:[#allocation5 + $0x15cc] sm:$0xf]  ;;  %v12199_v7 = vor.u32 %v14348_v63, %v12196_v33 }
 0x3e0   :  { %7954 = vmatpush.bf16.msra.mxu1 %v11351_v34  ;;  %v11924_v49 = vld [vmem:[#allocation5 + $0x15d8] sm:$0xf0]  ;;  %v14312_v30 = vld [vmem:[#allocation5 + $0x16cc] sm:$0xf]  ;;  %v11799_v53 = vor.u32 %v14248_v50, %v11796_v27 }
 0x3e1   :  { %7967 = vmatpush.bf16.msra.mxu2 %v11479_v8  ;;  %v12052_v41 = vld [vmem:[#allocation5 + $0x16d8] sm:$0xf0]  ;;  %v14344_v34 = vld [vmem:[#allocation5 + $0x17cc] sm:$0xf]  ;;  %v11927_v14 = vor.u32 %v14280_v29, %v11924_v49 }
 0x3e2   :  { %7980 = vmatpush.bf16.msra.mxu3 %v11607_v13  ;;  %v12180_v8 = vld [vmem:[#allocation5 + $0x17d8] sm:$0xf0]  ;;  %v12055_v9 = vor.u32 %v14312_v30, %v12052_v41  ;;  %v14244_v13 = vld [vmem:[#allocation5 + $0x14ac] sm:$0xf] }
 0x3e3   :  { %7942 = vmatpush.bf16.msra.mxu0 %v11207_v28  ;;  %v11780_v37 = vld [vmem:[#allocation5 + $0x14b8] sm:$0xf0]  ;;  %v14276_v51 = vld [vmem:[#allocation5 + $0x15ac] sm:$0xf]  ;;  %v12183_v38 = vor.u32 %v14344_v34, %v12180_v8 }
 0x3e4   :  { %7955 = vmatpush.bf16.msra.mxu1 %v11335_v26  ;;  %v11908_v15 = vld [vmem:[#allocation5 + $0x15b8] sm:$0xf0]  ;;  %v14308_v19 = vld [vmem:[#allocation5 + $0x16ac] sm:$0xf]  ;;  %v11783_v26 = vor.u32 %v14244_v13, %v11780_v37 }
 0x3e5   :  { %7968 = vmatpush.bf16.msra.mxu2 %v11463_v10  ;;  %v12036_v28 = vld [vmem:[#allocation5 + $0x16b8] sm:$0xf0]  ;;  %v14340_v20 = vld [vmem:[#allocation5 + $0x17ac] sm:$0xf]  ;;  %v11911_v25 = vor.u32 %v14276_v51, %v11908_v15 }
 0x3e6   :  { %7981 = vmatpush.bf16.msra.mxu3 %v11591_v21  ;;  %v12164_v40 = vld [vmem:[#allocation5 + $0x17b8] sm:$0xf0]  ;;  %v14240_v10 = vld [vmem:[#allocation5 + $0x148c] sm:$0xf]  ;;  %v12039_v48 = vor.u32 %v14308_v19, %v12036_v28  ;;  %v14756_v21 = vld [vmem:[#allocation7] sm:$0xf] }
 0x3e7   :  { %7943 = vmatpush.bf16.msra.mxu0 %v11191_v58  ;;  %v14272_v45 = vld [vmem:[#allocation5 + $0x158c] sm:$0xf]  ;;  %v1355_v42 = vperm.slane %v14756_v21, 3  ;;  %v12167_v54 = vor.u32 %v14340_v20, %v12164_v40  ;;  %v12148_v3 = vld [vmem:[#allocation5 + $0x1798] sm:$0xf0]  ;;  %v7737_v12 = vpop.f32.mrf.mxu0 }
 0x3e8   :  { %7956 = vmatpush.bf16.msra.mxu1 %v11319_v18  ;;  %v14304_v47 = vld [vmem:[#allocation5 + $0x168c] sm:$0xf]  ;;  %v11748_v46 = vld [vmem:[#allocation5 + $0x1478] sm:$0xf0]  ;;  %v7750_v18 = vpop.f32.mrf.mxu1 }
 0x3e9   :  { %7969 = vmatpush.bf16.msra.mxu2 %v11447_v44  ;;  %v14336_v35 = vld [vmem:[#allocation5 + $0x178c] sm:$0xf]  ;;  %v7738_v6 = vadd.f32 %v7737_v12, %v1355_v42  ;;  %v11876_v63 = vld [vmem:[#allocation5 + $0x1578] sm:$0xf0] }
 0x3ea   :  { %7982 = vmatpush.bf16.msra.mxu3 %v11575_v16  ;;  %7944 = vmatmul.bf16.vlgmr.msra.gmra.mxu0 %v15357_v24  ;;  %v11764_v24 = vld [vmem:[#allocation5 + $0x1498] sm:$0xf0]  ;;  %v14236_v58 = vld [vmem:[#allocation5 + $0x146c] sm:$0xf]  ;;  %v12151_v44 = vor.u32 %v14336_v35, %v12148_v3 }
 0x3eb   :  { %7988 = vmatpush.bf16.msrb.mxu0 %v11815_v22  ;;  %7957 = vmatmul.bf16.vlgmr.msra.gmra.mxu1 %v15361_v32  ;;  %v12020_v32 = vld [vmem:[#allocation5 + $0x1698] sm:$0xf0]  ;;  %v14268_v39 = vld [vmem:[#allocation5 + $0x156c] sm:$0xf]  ;;  %v11751_v50 = vor.u32 %v14236_v58, %v11748_v46 }
 0x3ec   :  { %8001 = vmatpush.bf16.msrb.mxu1 %v11943_v56  ;;  %7970 = vmatmul.bf16.vlgmr.msra.gmra.mxu2 %v15359_v31  ;;  %v11892_v31 = vld [vmem:[#allocation5 + $0x1598] sm:$0xf0]  ;;  %v12023_v62 = vor.u32 %v14304_v47, %v12020_v32  ;;  %v14300_v33 = vld [vmem:[#allocation5 + $0x166c] sm:$0xf]  ;;  %v11879_v27 = vor.u32 %v14268_v39, %v11876_v63 }
 0x3ed   :  { %8014 = vmatpush.bf16.msrb.mxu2 %v12071_v23  ;;  %7983 = vmatmul.bf16.vlgmr.msra.gmra.mxu3 %v15363_v36  ;;  %v11767_v36 = vor.u32 %v14240_v10, %v11764_v24  ;;  %v11895_v57 = vor.u32 %v14272_v45, %v11892_v31  ;;  %v12004_v16 = vld [vmem:[#allocation5 + $0x1678] sm:$0xf0]  ;;  %v14332_v22 = vld [vmem:[#allocation5 + $0x176c] sm:$0xf]  ;;  %v7751_v23 = vadd.f32 %v7750_v18, %v7738_v6 }
 0x3ee   :  { %8027 = vmatpush.bf16.msrb.mxu3 %v12199_v7  ;;  %v12132_v56 = vld [vmem:[#allocation5 + $0x1778] sm:$0xf0]  ;;  %v12007_v29 = vor.u32 %v14300_v33, %v12004_v16  ;;  %v14232_v7 = vld [vmem:[#allocation5 + $0x144c] sm:$0xf] }
 0x3ef   :  { %7989 = vmatpush.bf16.msrb.mxu0 %v11799_v53  ;;  %v11732_v49 = vld [vmem:[#allocation5 + $0x1458] sm:$0xf0]  ;;  %v14264_v30 = vld [vmem:[#allocation5 + $0x154c] sm:$0xf]  ;;  %v7763_v41 = vpop.f32.mrf.mxu2  ;;  %v12135_v34 = vor.u32 %v14332_v22, %v12132_v56  ;;  %v7739_v19 = vpop.f32.mrf.mxu0 }
 0x3f0   :  { %8002 = vmatpush.bf16.msrb.mxu1 %v11927_v14  ;;  %v11860_v8 = vld [vmem:[#allocation5 + $0x1558] sm:$0xf0]  ;;  %v14296_v53 = vld [vmem:[#allocation5 + $0x164c] sm:$0xf]  ;;  %v7776_v13 = vpop.f32.mrf.mxu3 }
 0x3f1   :  { %8015 = vmatpush.bf16.msrb.mxu2 %v12055_v9  ;;  %v11988_v14 = vld [vmem:[#allocation5 + $0x1658] sm:$0xf0]  ;;  %v7764_v9 = vadd.f32 %v7763_v41, %v7751_v23  ;;  %v14328_v37 = vld [vmem:[#allocation5 + $0x174c] sm:$0xf]  ;;  %v11863_v28 = vor.u32 %v14264_v30, %v11860_v8 }
 0x3f2   :  { %8028 = vmatpush.bf16.msrb.mxu3 %v12183_v38  ;;  %v12116_v51 = vld [vmem:[#allocation5 + $0x1758] sm:$0xf0]  ;;  %v11735_v38 = vor.u32 %v14232_v7, %v11732_v49  ;;  %v11991_v20 = vor.u32 %v14296_v53, %v11988_v14  ;;  %v14228_v40 = vld [vmem:[#allocation5 + $0x142c] sm:$0xf] }
 0x3f3   :  { %7990 = vmatpush.bf16.msrb.mxu0 %v11783_v26  ;;  %v15558_v15 = vadd.f32 %v7776_v13, %v7764_v9  ;;  %v11716_v26 = vld [vmem:[#allocation5 + $0x1438] sm:$0xf0]  ;;  %v14260_v10 = vld [vmem:[#allocation5 + $0x152c] sm:$0xf] }
 0x3f4   :  { %8003 = vmatpush.bf16.msrb.mxu1 %v11911_v25  ;;  %v7752_v25 = vpop.f32.mrf.mxu1  ;;  %v11844_v24 = vld [vmem:[#allocation5 + $0x1538] sm:$0xf0]  ;;  %v14292_v45 = vld [vmem:[#allocation5 + $0x162c] sm:$0xf]  ;;  %v11719_v31 = vor.u32 %v14228_v40, %v11716_v26 }
 0x3f5   :  { %8016 = vmatpush.bf16.msrb.mxu2 %v12039_v48  ;;  %v12119_v48 = vor.u32 %v14328_v37, %v12116_v51  ;;  %v11972_v21 = vld [vmem:[#allocation5 + $0x1638] sm:$0xf0]  ;;  %v14324_v42 = vld [vmem:[#allocation5 + $0x172c] sm:$0xf]  ;;  %v11847_v35 = vor.u32 %v14260_v10, %v11844_v24 }
 0x3f6   :  { %8029 = vmatpush.bf16.msrb.mxu3 %v12167_v54  ;;  %v12100_v54 = vld [vmem:[#allocation5 + $0x1738] sm:$0xf0]  ;;  %v14224_v47 = vld [vmem:[#allocation5 + $0x140c] sm:$0xf]  ;;  %v11975_v3 = vor.u32 %v14292_v45, %v11972_v21 }
 0x3f7   :  { %7991 = vmatpush.bf16.msrb.mxu0 %v11767_v36  ;;  %v11700_v32 = vld [vmem:[#allocation5 + $0x1418] sm:$0xf0]  ;;  %v14256_v36 = vld [vmem:[#allocation5 + $0x150c] sm:$0xf]  ;;  %v12103_v58 = vor.u32 %v14324_v42, %v12100_v54 }
 0x3f8   :  { %8004 = vmatpush.bf16.msrb.mxu1 %v11895_v57  ;;  %v11828_v12 = vld [vmem:[#allocation5 + $0x1518] sm:$0xf0]  ;;  %v14288_v57 = vld [vmem:[#allocation5 + $0x160c] sm:$0xf]  ;;  %v7778_v18 = vpop.f32.mrf.mxu3  ;;  %v11703_v16 = vor.u32 %v14224_v47, %v11700_v32 }
 0x3f9   :  { %8017 = vmatpush.bf16.msrb.mxu2 %v12023_v62  ;;  %v7765_v62 = vpop.f32.mrf.mxu2  ;;  %v11956_v46 = vld [vmem:[#allocation5 + $0x1618] sm:$0xf0]  ;;  %v14320_v39 = vld [vmem:[#allocation5 + $0x170c] sm:$0xf] }
 0x3fa   :  { %8030 = vmatpush.bf16.msrb.mxu3 %v12151_v44  ;;  %v12084_v6 = vld [vmem:[#allocation5 + $0x1718] sm:$0xf0]  ;;  %v14380_v44 = vld [vmem:[#allocation5 + $0x18ec] sm:$0xf] }
 0x3fb   :  { %7992 = vmatpush.bf16.msrb.mxu0 %v11751_v50  ;;  %v12324_v63 = vld [vmem:[#allocation5 + $0x18f8] sm:$0xf0]  ;;  %v14412_v33 = vld [vmem:[#allocation5 + $0x19ec] sm:$0xf]  ;;  %v11831_v50 = vor.u32 %v14256_v36, %v11828_v12  ;;  %v12087_v49 = vor.u32 %v14320_v39, %v12084_v6 }
 0x3fc   :  { %8005 = vmatpush.bf16.msrb.mxu1 %v11879_v27  ;;  %v12452_v22 = vld [vmem:[#allocation5 + $0x19f8] sm:$0xf0]  ;;  %v14444_v56 = vld [vmem:[#allocation5 + $0x1aec] sm:$0xf]  ;;  %v11959_v27 = vor.u32 %v14288_v57, %v11956_v46  ;;  %v12327_v30 = vor.u32 %v14380_v44, %v12324_v63 }
 0x3fd   :  { %8018 = vmatpush.bf16.msrb.mxu2 %v12007_v29  ;;  %v12580_v23 = vld [vmem:[#allocation5 + $0x1af8] sm:$0xf0]  ;;  %v14476_v29 = vld [vmem:[#allocation5 + $0x1bec] sm:$0xf]  ;;  %v12455_v41 = vor.u32 %v14412_v33, %v12452_v22 }
 0x3fe   :  { %8031 = vmatpush.bf16.msrb.mxu3 %v12135_v34  ;;  %v12708_v7 = vld [vmem:[#allocation5 + $0x1bf8] sm:$0xf0]  ;;  %v12583_v34 = vor.u32 %v14444_v56, %v12580_v23  ;;  %v14376_v8 = vld [vmem:[#allocation5 + $0x18cc] sm:$0xf] }
 0x3ff   :  { %7993 = vmatpush.bf16.msrb.mxu0 %v11735_v38  ;;  %v12308_v53 = vld [vmem:[#allocation5 + $0x18d8] sm:$0xf0]  ;;  %v14408_v14 = vld [vmem:[#allocation5 + $0x19cc] sm:$0xf]  ;;  %v12711_v9 = vor.u32 %v14476_v29, %v12708_v7 }
 0x400   :  { %8006 = vmatpush.bf16.msrb.mxu1 %v11863_v28  ;;  %v12436_v13 = vld [vmem:[#allocation5 + $0x19d8] sm:$0xf0]  ;;  %v14440_v37 = vld [vmem:[#allocation5 + $0x1acc] sm:$0xf]  ;;  %v12311_v28 = vor.u32 %v14376_v8, %v12308_v53 }
 0x401   :  { %8019 = vmatpush.bf16.msrb.mxu2 %v11991_v20  ;;  %v12564_v51 = vld [vmem:[#allocation5 + $0x1ad8] sm:$0xf0]  ;;  %v14472_v38 = vld [vmem:[#allocation5 + $0x1bcc] sm:$0xf]  ;;  %v12439_v20 = vor.u32 %v14408_v14, %v12436_v13 }
 0x402   :  { %8032 = vmatpush.bf16.msrb.mxu3 %v12119_v48  ;;  %v12692_v19 = vld [vmem:[#allocation5 + $0x1bd8] sm:$0xf0]  ;;  %v12567_v40 = vor.u32 %v14440_v37, %v12564_v51  ;;  %v14372_v26 = vld [vmem:[#allocation5 + $0x18ac] sm:$0xf] }
 0x403   :  { %7994 = vmatpush.bf16.msrb.mxu0 %v11719_v31  ;;  %v12292_v10 = vld [vmem:[#allocation5 + $0x18b8] sm:$0xf0]  ;;  %v14404_v25 = vld [vmem:[#allocation5 + $0x19ac] sm:$0xf]  ;;  %v12695_v48 = vor.u32 %v14472_v38, %v12692_v19 }
 0x404   :  { %8007 = vmatpush.bf16.msrb.mxu1 %v11847_v35  ;;  %v12420_v24 = vld [vmem:[#allocation5 + $0x19b8] sm:$0xf0]  ;;  %v14436_v45 = vld [vmem:[#allocation5 + $0x1aac] sm:$0xf]  ;;  %v12295_v31 = vor.u32 %v14372_v26, %v12292_v10 }
 0x405   :  { %8020 = vmatpush.bf16.msrb.mxu2 %v11975_v3  ;;  %v12548_v21 = vld [vmem:[#allocation5 + $0x1ab8] sm:$0xf0]  ;;  %v14468_v42 = vld [vmem:[#allocation5 + $0x1bac] sm:$0xf]  ;;  %v12423_v47 = vor.u32 %v14404_v25, %v12420_v24 }
 0x406   :  { %8033 = vmatpush.bf16.msrb.mxu3 %v12103_v58  ;;  %v12676_v54 = vld [vmem:[#allocation5 + $0x1bb8] sm:$0xf0]  ;;  %v12551_v32 = vor.u32 %v14436_v45, %v12548_v21  ;;  %v14368_v35 = vld [vmem:[#allocation5 + $0x188c] sm:$0xf] }
 0x407   :  { %7995 = vmatpush.bf16.msrb.mxu0 %v11703_v16  ;;  %v14400_v3 = vld [vmem:[#allocation5 + $0x198c] sm:$0xf]  ;;  %v12679_v36 = vor.u32 %v14468_v42, %v12676_v54  ;;  %v12404_v12 = vld [vmem:[#allocation5 + $0x1998] sm:$0xf0]  ;;  %v7789_v46 = vpop.f32.mrf.mxu0 }
 0x408   :  { %8008 = vmatpush.bf16.msrb.mxu1 %v11831_v50  ;;  %v14432_v57 = vld [vmem:[#allocation5 + $0x1a8c] sm:$0xf]  ;;  %v12260_v18 = vld [vmem:[#allocation5 + $0x1878] sm:$0xf0]  ;;  %v7790_v63 = vadd.f32 %v7789_v46, %v15558_v15  ;;  %v7802_v33 = vpop.f32.mrf.mxu1 }
 0x409   :  { %8021 = vmatpush.bf16.msrb.mxu2 %v11959_v27  ;;  %v14464_v62 = vld [vmem:[#allocation5 + $0x1b8c] sm:$0xf]  ;;  %v12388_v22 = vld [vmem:[#allocation5 + $0x1978] sm:$0xf0] }
 0x40a   :  { %8034 = vmatpush.bf16.msrb.mxu3 %v12087_v49  ;;  %7996 = vmatmul.bf16.vlgmr.msrb.gmra.mxu0 %v15371_v61  ;;  %v12276_v61 = vld [vmem:[#allocation5 + $0x1898] sm:$0xf0]  ;;  %v14364_v6 = vld [vmem:[#allocation5 + $0x186c] sm:$0xf]  ;;  %v7803_v29 = vadd.f32 %v7802_v33, %v7790_v63 }
 0x40b   :  { %8040 = vmatpush.bf16.msra.mxu0 %v12327_v30  ;;  %8009 = vmatmul.bf16.vlgmr.msrb.gmra.mxu1 %v15375_v2  ;;  %v12660_v2 = vld [vmem:[#allocation5 + $0x1b98] sm:$0xf0]  ;;  %v12279_v58 = vor.u32 %v14368_v35, %v12276_v61  ;;  %v14396_v44 = vld [vmem:[#allocation5 + $0x196c] sm:$0xf]  ;;  %v12263_v7 = vor.u32 %v14364_v6, %v12260_v18 }
 0x40c   :  { %8053 = vmatpush.bf16.msra.mxu1 %v12455_v41  ;;  %8022 = vmatmul.bf16.vlgmr.msrb.gmra.mxu2 %v15373_v1  ;;  %v12532_v1 = vld [vmem:[#allocation5 + $0x1a98] sm:$0xf0]  ;;  %v12663_v16 = vor.u32 %v14464_v62, %v12660_v2  ;;  %v14428_v56 = vld [vmem:[#allocation5 + $0x1a6c] sm:$0xf]  ;;  %v12391_v49 = vor.u32 %v14396_v44, %v12388_v22 }
 0x40d   :  { %8066 = vmatpush.bf16.msra.mxu2 %v12583_v34  ;;  %8035 = vmatmul.bf16.vlgmr.msrb.gmra.mxu3 %v15377_v5  ;;  %v12407_v5 = vor.u32 %v14400_v3, %v12404_v12  ;;  %v12535_v39 = vor.u32 %v14432_v57, %v12532_v1  ;;  %v12516_v23 = vld [vmem:[#allocation5 + $0x1a78] sm:$0xf0]  ;;  %v14460_v50 = vld [vmem:[#allocation5 + $0x1b6c] sm:$0xf] }
 0x40e   :  { %8079 = vmatpush.bf16.msra.mxu3 %v12711_v9  ;;  %v12644_v27 = vld [vmem:[#allocation5 + $0x1b78] sm:$0xf0]  ;;  %v12519_v30 = vor.u32 %v14428_v56, %v12516_v23  ;;  %v14360_v41 = vld [vmem:[#allocation5 + $0x184c] sm:$0xf] }
 0x40f   :  { %8041 = vmatpush.bf16.msra.mxu0 %v12311_v28  ;;  %v12244_v34 = vld [vmem:[#allocation5 + $0x1858] sm:$0xf0]  ;;  %v14392_v8 = vld [vmem:[#allocation5 + $0x194c] sm:$0xf]  ;;  %v7815_v53 = vpop.f32.mrf.mxu2  ;;  %v12647_v15 = vor.u32 %v14460_v50, %v12644_v27 }
 0x410   :  { %8054 = vmatpush.bf16.msra.mxu1 %v12439_v20  ;;  %v12372_v14 = vld [vmem:[#allocation5 + $0x1958] sm:$0xf0]  ;;  %v14424_v9 = vld [vmem:[#allocation5 + $0x1a4c] sm:$0xf]  ;;  %v7816_v37 = vadd.f32 %v7815_v53, %v7803_v29  ;;  %v7828_v51 = vpop.f32.mrf.mxu3  ;;  %v12247_v28 = vor.u32 %v14360_v41, %v12244_v34  ;;  %v7804_v45 = vpop.f32.mrf.mxu1 }
 0x411   :  { %8067 = vmatpush.bf16.msra.mxu2 %v12567_v40  ;;  %v12500_v13 = vld [vmem:[#allocation5 + $0x1a58] sm:$0xf0]  ;;  %v14456_v38 = vld [vmem:[#allocation5 + $0x1b4c] sm:$0xf]  ;;  %v7791_v40 = vpop.f32.mrf.mxu0  ;;  %v12375_v26 = vor.u32 %v14392_v8, %v12372_v14 }
 0x412   :  { %8080 = vmatpush.bf16.msra.mxu3 %v12695_v48  ;;  %v12628_v19 = vld [vmem:[#allocation5 + $0x1b58] sm:$0xf0]  ;;  %v15565_v20 = vadd.f32 %v7828_v51, %v7816_v37  ;;  %v12503_v10 = vor.u32 %v14424_v9, %v12500_v13  ;;  %v14356_v25 = vld [vmem:[#allocation5 + $0x182c] sm:$0xf] }
 0x413   :  { %8042 = vmatpush.bf16.msra.mxu0 %v12295_v31  ;;  %v12228_v48 = vld [vmem:[#allocation5 + $0x1838] sm:$0xf0]  ;;  %v14388_v24 = vld [vmem:[#allocation5 + $0x192c] sm:$0xf]  ;;  %v12631_v21 = vor.u32 %v14456_v38, %v12628_v19 }
 0x414   :  { %8055 = vmatpush.bf16.msra.mxu1 %v12423_v47  ;;  %v12356_v42 = vld [vmem:[#allocation5 + $0x1938] sm:$0xf0]  ;;  %v14420_v54 = vld [vmem:[#allocation5 + $0x1a2c] sm:$0xf]  ;;  %v12231_v35 = vor.u32 %v14356_v25, %v12228_v48 }
 0x415   :  { %8068 = vmatpush.bf16.msra.mxu2 %v12551_v32  ;;  %v12484_v31 = vld [vmem:[#allocation5 + $0x1a38] sm:$0xf0]  ;;  %v14452_v47 = vld [vmem:[#allocation5 + $0x1b2c] sm:$0xf] }
 0x416   :  { %8081 = vmatpush.bf16.msra.mxu3 %v12679_v36  ;;  %v12612_v32 = vld [vmem:[#allocation5 + $0x1b38] sm:$0xf0]  ;;  %v14352_v61 = vld [vmem:[#allocation5 + $0x180c] sm:$0xf]  ;;  %v12359_v36 = vor.u32 %v14388_v24, %v12356_v42  ;;  %v12487_v12 = vor.u32 %v14420_v54, %v12484_v31 }
 0x417   :  { %8043 = vmatpush.bf16.msra.mxu0 %v12279_v58  ;;  %v12212_v3 = vld [vmem:[#allocation5 + $0x1818] sm:$0xf0]  ;;  %v14384_v57 = vld [vmem:[#allocation5 + $0x190c] sm:$0xf]  ;;  %v7817_v2 = vpop.f32.mrf.mxu2  ;;  %v12615_v58 = vor.u32 %v14452_v47, %v12612_v32 }
 0x418   :  { %8056 = vmatpush.bf16.msra.mxu1 %v12407_v5  ;;  %v12340_v1 = vld [vmem:[#allocation5 + $0x1918] sm:$0xf0]  ;;  %v14416_v62 = vld [vmem:[#allocation5 + $0x1a0c] sm:$0xf]  ;;  %v7830_v6 = vpop.f32.mrf.mxu3  ;;  %v12215_v33 = vor.u32 %v14352_v61, %v12212_v3 }
 0x419   :  { %8069 = vmatpush.bf16.msra.mxu2 %v12535_v39  ;;  %v12468_v46 = vld [vmem:[#allocation5 + $0x1a18] sm:$0xf0]  ;;  %v14448_v5 = vld [vmem:[#allocation5 + $0x1b0c] sm:$0xf]  ;;  %v12343_v23 = vor.u32 %v14384_v57, %v12340_v1 }
 0x41a   :  { %8082 = vmatpush.bf16.msra.mxu3 %v12663_v16  ;;  %v12596_v39 = vld [vmem:[#allocation5 + $0x1b18] sm:$0xf0]  ;;  %v14508_v18 = vld [vmem:[#allocation5 + $0x1cec] sm:$0xf]  ;;  %v12471_v50 = vor.u32 %v14416_v62, %v12468_v46 }
 0x41b   :  { %8044 = vmatpush.bf16.msra.mxu0 %v12263_v7  ;;  %v12836_v44 = vld [vmem:[#allocation5 + $0x1cf8] sm:$0xf0]  ;;  %v14540_v63 = vld [vmem:[#allocation5 + $0x1dec] sm:$0xf]  ;;  %v12599_v7 = vor.u32 %v14448_v5, %v12596_v39 }
 0x41c   :  { %8057 = vmatpush.bf16.msra.mxu1 %v12391_v49  ;;  %v12964_v16 = vld [vmem:[#allocation5 + $0x1df8] sm:$0xf0]  ;;  %v14572_v22 = vld [vmem:[#allocation5 + $0x1eec] sm:$0xf]  ;;  %v12839_v49 = vor.u32 %v14508_v18, %v12836_v44 }
 0x41d   :  { %8070 = vmatpush.bf16.msra.mxu2 %v12519_v30  ;;  %v13092_v56 = vld [vmem:[#allocation5 + $0x1ef8] sm:$0xf0]  ;;  %v14604_v27 = vld [vmem:[#allocation5 + $0x1fec] sm:$0xf]  ;;  %v12967_v30 = vor.u32 %v14540_v63, %v12964_v16 }
 0x41e   :  { %8083 = vmatpush.bf16.msra.mxu3 %v12647_v15  ;;  %v13220_v29 = vld [vmem:[#allocation5 + $0x1ff8] sm:$0xf0]  ;;  %v13095_v41 = vor.u32 %v14572_v22, %v13092_v56  ;;  %v14504_v34 = vld [vmem:[#allocation5 + $0x1ccc] sm:$0xf] }
 0x41f   :  { %8045 = vmatpush.bf16.msra.mxu0 %v12247_v28  ;;  %v12820_v8 = vld [vmem:[#allocation5 + $0x1cd8] sm:$0xf0]  ;;  %v14536_v53 = vld [vmem:[#allocation5 + $0x1dcc] sm:$0xf]  ;;  %v13223_v15 = vor.u32 %v14604_v27, %v13220_v29 }
 0x420   :  { %8058 = vmatpush.bf16.msra.mxu1 %v12375_v26  ;;  %v12948_v14 = vld [vmem:[#allocation5 + $0x1dd8] sm:$0xf0]  ;;  %v14568_v9 = vld [vmem:[#allocation5 + $0x1ecc] sm:$0xf]  ;;  %v12823_v38 = vor.u32 %v14504_v34, %v12820_v8 }
 0x421   :  { %8071 = vmatpush.bf16.msra.mxu2 %v12503_v10  ;;  %v13076_v13 = vld [vmem:[#allocation5 + $0x1ed8] sm:$0xf0]  ;;  %v14600_v37 = vld [vmem:[#allocation5 + $0x1fcc] sm:$0xf]  ;;  %v12951_v19 = vor.u32 %v14536_v53, %v12948_v14 }
 0x422   :  { %8084 = vmatpush.bf16.msra.mxu3 %v12631_v21  ;;  %v13204_v51 = vld [vmem:[#allocation5 + $0x1fd8] sm:$0xf0]  ;;  %v13079_v28 = vor.u32 %v14568_v9, %v13076_v13  ;;  %v14500_v40 = vld [vmem:[#allocation5 + $0x1cac] sm:$0xf] }
 0x423   :  { %8046 = vmatpush.bf16.msra.mxu0 %v12231_v35  ;;  %v12804_v26 = vld [vmem:[#allocation5 + $0x1cb8] sm:$0xf0]  ;;  %v14532_v10 = vld [vmem:[#allocation5 + $0x1dac] sm:$0xf]  ;;  %v13207_v25 = vor.u32 %v14600_v37, %v13204_v51 }
 0x424   :  { %8059 = vmatpush.bf16.msra.mxu1 %v12359_v36  ;;  %v12932_v48 = vld [vmem:[#allocation5 + $0x1db8] sm:$0xf0]  ;;  %v14564_v24 = vld [vmem:[#allocation5 + $0x1eac] sm:$0xf]  ;;  %v12807_v54 = vor.u32 %v14500_v40, %v12804_v26 }
 0x425   :  { %8072 = vmatpush.bf16.msra.mxu2 %v12487_v12  ;;  %v13060_v45 = vld [vmem:[#allocation5 + $0x1eb8] sm:$0xf0]  ;;  %v14596_v21 = vld [vmem:[#allocation5 + $0x1fac] sm:$0xf]  ;;  %v12935_v31 = vor.u32 %v14532_v10, %v12932_v48 }
 0x426   :  { %8085 = vmatpush.bf16.msra.mxu3 %v12615_v58  ;;  %v13188_v42 = vld [vmem:[#allocation5 + $0x1fb8] sm:$0xf0]  ;;  %v13063_v47 = vor.u32 %v14564_v24, %v13060_v45  ;;  %v14496_v32 = vld [vmem:[#allocation5 + $0x1c8c] sm:$0xf] }
 0x427   :  { %8047 = vmatpush.bf16.msra.mxu0 %v12215_v33  ;;  %v14528_v35 = vld [vmem:[#allocation5 + $0x1d8c] sm:$0xf]  ;;  %v13191_v61 = vor.u32 %v14596_v21, %v13188_v42  ;;  %v12916_v3 = vld [vmem:[#allocation5 + $0x1d98] sm:$0xf0]  ;;  %v7841_v12 = vpop.f32.mrf.mxu0 }
 0x428   :  { %8060 = vmatpush.bf16.msra.mxu1 %v12343_v23  ;;  %v14560_v36 = vld [vmem:[#allocation5 + $0x1e8c] sm:$0xf]  ;;  %v13172_v57 = vld [vmem:[#allocation5 + $0x1f98] sm:$0xf0]  ;;  %v7854_v62 = vpop.f32.mrf.mxu1  ;;  %v12919_v2 = vor.u32 %v14528_v35, %v12916_v3 }
 0x429   :  { %8073 = vmatpush.bf16.msra.mxu2 %v12471_v50  ;;  %v14492_v46 = vld [vmem:[#allocation5 + $0x1c6c] sm:$0xf]  ;;  %v12772_v5 = vld [vmem:[#allocation5 + $0x1c78] sm:$0xf0] }
 0x42a   :  { %8086 = vmatpush.bf16.msra.mxu3 %v12599_v7  ;;  %8048 = vmatmul.bf16.vlgmr.msra.gmra.mxu0 %v15386_v55  ;;  %v12788_v55 = vld [vmem:[#allocation5 + $0x1c98] sm:$0xf0]  ;;  %v14524_v39 = vld [vmem:[#allocation5 + $0x1d6c] sm:$0xf]  ;;  %v12775_v56 = vor.u32 %v14492_v46, %v12772_v5 }
 0x42b   :  { %8092 = vmatpush.bf16.msrb.mxu0 %v12839_v49  ;;  %8061 = vmatmul.bf16.vlgmr.msra.gmra.mxu1 %v15390_v60  ;;  %v14592_v60 = vld [vmem:[#allocation5 + $0x1f8c] sm:$0xf]  ;;  %v12791_v1 = vor.u32 %v14496_v32, %v12788_v55  ;;  %v12900_v44 = vld [vmem:[#allocation5 + $0x1d78] sm:$0xf0] }
 0x42c   :  { %8105 = vmatpush.bf16.msrb.mxu1 %v12967_v30  ;;  %8074 = vmatmul.bf16.vlgmr.msra.gmra.mxu2 %v15388_v59  ;;  %v13044_v59 = vld [vmem:[#allocation5 + $0x1e98] sm:$0xf0]  ;;  %v13175_v6 = vor.u32 %v14592_v60, %v13172_v57  ;;  %v14556_v63 = vld [vmem:[#allocation5 + $0x1e6c] sm:$0xf] }
 0x42d   :  { %8118 = vmatpush.bf16.msrb.mxu2 %v13095_v41  ;;  %8087 = vmatmul.bf16.vlgmr.msra.gmra.mxu3 %v15392_v0  ;;  %v7842_v0 = vadd.f32 %v7841_v12, %v15565_v20  ;;  %v13047_v58 = vor.u32 %v14560_v36, %v13044_v59  ;;  %v13028_v33 = vld [vmem:[#allocation5 + $0x1e78] sm:$0xf0]  ;;  %v14588_v16 = vld [vmem:[#allocation5 + $0x1f6c] sm:$0xf]  ;;  %v12903_v20 = vor.u32 %v14524_v39, %v12900_v44 }
 0x42e   :  { %8131 = vmatpush.bf16.msrb.mxu3 %v13223_v15  ;;  %v13156_v22 = vld [vmem:[#allocation5 + $0x1f78] sm:$0xf0]  ;;  %v13031_v23 = vor.u32 %v14556_v63, %v13028_v33  ;;  %v14488_v50 = vld [vmem:[#allocation5 + $0x1c4c] sm:$0xf] }
 0x42f   :  { %8093 = vmatpush.bf16.msrb.mxu0 %v12823_v38  ;;  %v7855_v18 = vadd.f32 %v7854_v62, %v7842_v0  ;;  %v12756_v27 = vld [vmem:[#allocation5 + $0x1c58] sm:$0xf0]  ;;  %v14520_v29 = vld [vmem:[#allocation5 + $0x1d4c] sm:$0xf]  ;;  %v13159_v7 = vor.u32 %v14588_v16, %v13156_v22  ;;  %v7867_v49 = vpop.f32.mrf.mxu2  ;;  %v7843_v9 = vpop.f32.mrf.mxu0 }
 0x430   :  { %8106 = vmatpush.bf16.msrb.mxu1 %v12951_v19  ;;  %v12884_v30 = vld [vmem:[#allocation5 + $0x1d58] sm:$0xf0]  ;;  %v14552_v41 = vld [vmem:[#allocation5 + $0x1e4c] sm:$0xf]  ;;  %v7880_v53 = vpop.f32.mrf.mxu3  ;;  %v12759_v13 = vor.u32 %v14488_v50, %v12756_v27  ;;  %v7856_v37 = vpop.f32.mrf.mxu1 }
 0x431   :  { %8119 = vmatpush.bf16.msrb.mxu2 %v13079_v28  ;;  %v13012_v34 = vld [vmem:[#allocation5 + $0x1e58] sm:$0xf0]  ;;  %v7868_v8 = vadd.f32 %v7867_v49, %v7855_v18  ;;  %v14584_v15 = vld [vmem:[#allocation5 + $0x1f4c] sm:$0xf]  ;;  %v12887_v38 = vor.u32 %v14520_v29, %v12884_v30 }
 0x432   :  { %8132 = vmatpush.bf16.msrb.mxu3 %v13207_v25  ;;  %v13140_v14 = vld [vmem:[#allocation5 + $0x1f58] sm:$0xf0]  ;;  %v13015_v19 = vor.u32 %v14552_v41, %v13012_v34  ;;  %v14484_v28 = vld [vmem:[#allocation5 + $0x1c2c] sm:$0xf] }
 0x433   :  { %8094 = vmatpush.bf16.msrb.mxu0 %v12807_v54  ;;  %v7881_v51 = vadd.f32 %v7880_v53, %v7868_v8  ;;  %v12740_v40 = vld [vmem:[#allocation5 + $0x1c38] sm:$0xf0]  ;;  %v14516_v26 = vld [vmem:[#allocation5 + $0x1d2c] sm:$0xf]  ;;  %v13143_v10 = vor.u32 %v14584_v15, %v13140_v14 }
 0x434   :  { %8107 = vmatpush.bf16.msrb.mxu1 %v12935_v31  ;;  %v12868_v25 = vld [vmem:[#allocation5 + $0x1d38] sm:$0xf0]  ;;  %v14548_v48 = vld [vmem:[#allocation5 + $0x1e2c] sm:$0xf]  ;;  %v12743_v42 = vor.u32 %v14484_v28, %v12740_v40 }
 0x435   :  { %8120 = vmatpush.bf16.msrb.mxu2 %v13063_v47  ;;  %v12996_v24 = vld [vmem:[#allocation5 + $0x1e38] sm:$0xf0]  ;;  %v14580_v45 = vld [vmem:[#allocation5 + $0x1f2c] sm:$0xf]  ;;  %v12871_v54 = vor.u32 %v14516_v26, %v12868_v25 }
 0x436   :  { %8133 = vmatpush.bf16.msrb.mxu3 %v13191_v61  ;;  %v13124_v21 = vld [vmem:[#allocation5 + $0x1f38] sm:$0xf0]  ;;  %v12999_v31 = vor.u32 %v14548_v48, %v12996_v24  ;;  %v14480_v47 = vld [vmem:[#allocation5 + $0x1c0c] sm:$0xf] }
 0x437   :  { %8095 = vmatpush.bf16.msrb.mxu0 %v12791_v1  ;;  %v12724_v32 = vld [vmem:[#allocation5 + $0x1c18] sm:$0xf0]  ;;  %v14512_v55 = vld [vmem:[#allocation5 + $0x1d0c] sm:$0xf]  ;;  %v13127_v35 = vor.u32 %v14580_v45, %v13124_v21  ;;  %v7869_v59 = vpop.f32.mrf.mxu2 }
 0x438   :  { %8108 = vmatpush.bf16.msrb.mxu1 %v12919_v2  ;;  %v12852_v61 = vld [vmem:[#allocation5 + $0x1d18] sm:$0xf0]  ;;  %v14544_v3 = vld [vmem:[#allocation5 + $0x1e0c] sm:$0xf]  ;;  %v7882_v57 = vpop.f32.mrf.mxu3  ;;  %v12727_v0 = vor.u32 %v14480_v47, %v12724_v32 }
 0x439   :  { %8121 = vmatpush.bf16.msrb.mxu2 %v13047_v58  ;;  %v12980_v36 = vld [vmem:[#allocation5 + $0x1e18] sm:$0xf0]  ;;  %v14576_v12 = vld [vmem:[#allocation5 + $0x1f0c] sm:$0xf]  ;;  %v12855_v1 = vor.u32 %v14512_v55, %v12852_v61 }
 0x43a   :  { %8134 = vmatpush.bf16.msrb.mxu3 %v13175_v6  ;;  %v13108_v60 = vld [vmem:[#allocation5 + $0x1f18] sm:$0xf0]  ;;  %v12983_v62 = vor.u32 %v14544_v3, %v12980_v36  ;;  %v15667_v3 = vld [vmem:[#allocation36_spill] sm:$0xff]  ;;  %v15668_v36 = vld [vmem:[#allocation37_spill] sm:$0xff] }
 0x43b   :  { %8096 = vmatpush.bf16.msrb.mxu0 %v12775_v56  ;;  %v13111_v2 = vor.u32 %v14576_v12, %v13108_v60  ;;  %v8146_v59 = vadd.f32 %v15668_v36, %v15667_v3 }
 0x43c   :  { %8109 = vmatpush.bf16.msrb.mxu1 %v12903_v20 }
 0x43d   :  { %8122 = vmatpush.bf16.msrb.mxu2 %v13031_v23 }
 0x43e   :  { %8135 = vmatpush.bf16.msrb.mxu3 %v13159_v7 }
 0x43f   :  { %8097 = vmatpush.bf16.msrb.mxu0 %v12759_v13 }
 0x440   :  { %8110 = vmatpush.bf16.msrb.mxu1 %v12887_v38 }
 0x441   :  { %8123 = vmatpush.bf16.msrb.mxu2 %v13015_v19 }
 0x442   :  { %8136 = vmatpush.bf16.msrb.mxu3 %v13143_v10 }
 0x443   :  { %8098 = vmatpush.bf16.msrb.mxu0 %v12743_v42 }
 0x444   :  { %8111 = vmatpush.bf16.msrb.mxu1 %v12871_v54 }
 0x445   :  { %8124 = vmatpush.bf16.msrb.mxu2 %v12999_v31 }
 0x446   :  { %8137 = vmatpush.bf16.msrb.mxu3 %v13127_v35 }
 0x447   :  { %8099 = vmatpush.bf16.msrb.mxu0 %v12727_v0  ;;  %v7893_v58 = vpop.f32.mrf.mxu0 }
 0x448   :  { %8112 = vmatpush.bf16.msrb.mxu1 %v12855_v1  ;;  %v7894_v46 = vadd.f32 %v7893_v58, %v7881_v51  ;;  %v7906_v5 = vpop.f32.mrf.mxu1 }
 0x449   :  { %8125 = vmatpush.bf16.msrb.mxu2 %v12983_v62  ;;  %v8147_v62 = vadd.f32 %v8146_v59, %v15552_v52  ;;  %v14666_v59 = vld [vmem:[#allocation11 + $0x1d4] sm:$0xf0] }
 0x44a   :  { %8138 = vmatpush.bf16.msrb.mxu3 %v13111_v2  ;;  %8100 = vmatmul.bf16.vlgmr.msrb.gmra.mxu0 %v15401_v4  ;;  %v7907_v39 = vadd.f32 %v7906_v5, %v7894_v46  ;;  %v15180_v5 = vmov 512.0  }
 0x44b   :  { %8113 = vmatmul.bf16.vlgmr.msrb.gmra.mxu1 %v15405_v43  ;;  %14724 = vrcp.f32 %v15180_v5 }
 0x44c   :  { %8126 = vmatmul.bf16.vlgmr.msrb.gmra.mxu2 %v15403_v11 }
 0x44d   :  { %8139 = vmatmul.bf16.vlgmr.msrb.gmra.mxu3 %v15407_v17 }
 0x44f   :  { %v7919_v6 = vpop.f32.mrf.mxu2  ;;  %v7895_v63 = vpop.f32.mrf.mxu0 }
 0x450   :  { %v7920_v18 = vadd.f32 %v7919_v6, %v7907_v39  ;;  %v7932_v44 = vpop.f32.mrf.mxu3  ;;  %v7908_v33 = vpop.f32.mrf.mxu1 }
 0x451   :  { %v14725_v39 = vpop.eup %14724 }
 0x452   :  { %v7933_v16 = vadd.f32 %v7932_v44, %v7920_v18  ;;  %v8152_v6 = vmul.f32 512.0, %v14725_v39  ;;  %vm8156_vm0 = vweird.f32 %v14725_v39 }
 0x454   :  { %v8153_v18 = vsub.f32 1.0, %v8152_v6  ;;  %v14664_v6 = vld [vmem:[#allocation11 + $0x1c4] sm:$0xf0] }
 0x456   :  { %v8154_v44 = vmul.f32 %v14725_v39, %v8153_v18 }
 0x457   :  { %v7921_v22 = vpop.f32.mrf.mxu2 }
 0x458   :  { %v7934_v56 = vpop.f32.mrf.mxu3  ;;  %v8155_v63 = vadd.f32 %v14725_v39, %v8154_v44  ;;  %v13254_v44 = vld [vmem:[#allocation11 + $0x30] sm:$0xf] }
 0x45a   :  { %v15579_v33 = vsel %vm8156_vm0, %v14725_v39, %v8155_v63  ;;  %v13454_v39 = vld [vmem:[#allocation11 + $0x1c0] sm:$0xf]  ;;  %v14614_v63 = vld [vmem:[#allocation11 + $0x34] sm:$0xf0] }
 0x45b   :  { %v13455_v18 = vor.u32 %v14664_v6, %v13454_v39  ;;  %v14669_v39 = vld [vmem:[#allocation11 + $0x1f4] sm:$0xf]  ;;  %v13480_v6 = vld [vmem:[#allocation11 + $0x1f8] sm:$0xf0] }
 0x467   :  { %v7945_v20 = vpop.f32.mrf.mxu0 }
 0x468   :  { %v7946_v4 = vadd.f32 %v7945_v20, %v7933_v16  ;;  %v7958_v23 = vpop.f32.mrf.mxu1 }
 0x46a   :  { %v7959_v43 = vadd.f32 %v7958_v23, %v7946_v4 }
 0x46f   :  { %v7971_v50 = vpop.f32.mrf.mxu2  ;;  %v7947_v17 = vpop.f32.mrf.mxu0 }
 0x470   :  { %v7972_v11 = vadd.f32 %v7971_v50, %v7959_v43  ;;  %v7984_v27 = vpop.f32.mrf.mxu3  ;;  %v7960_v29 = vpop.f32.mrf.mxu1 }
 0x472   :  { %v7985_v7 = vadd.f32 %v7984_v27, %v7972_v11 }
 0x477   :  { %v7973_v49 = vpop.f32.mrf.mxu2 }
 0x478   :  { %v7986_v30 = vpop.f32.mrf.mxu3  ;;  %v14622_v49 = vld [vmem:[#allocation11 + $0x74] sm:$0xf0] }
 0x479   :  { %v13350_v30 = vld [vmem:[#allocation11 + $0xf0] sm:$0xf] }
 0x487   :  { %v7997_v41 = vpop.f32.mrf.mxu0 }
 0x488   :  { %v8010_v34 = vpop.f32.mrf.mxu1  ;;  %v7998_v38 = vadd.f32 %v7997_v41, %v7985_v7 }
 0x48a   :  { %v8011_v10 = vadd.f32 %v8010_v34, %v7998_v38  ;;  %v14638_v34 = vld [vmem:[#allocation11 + $0xf4] sm:$0xf0]  ;;  %v14620_v38 = vld [vmem:[#allocation11 + $0x64] sm:$0xf0] }
 0x48f   :  { %v8023_v8 = vpop.f32.mrf.mxu2  ;;  %v7999_v15 = vpop.f32.mrf.mxu0 }
 0x490   :  { %v8036_v53 = vpop.f32.mrf.mxu3  ;;  %v8012_v14 = vpop.f32.mrf.mxu1  ;;  %v8024_v25 = vadd.f32 %v8023_v8, %v8011_v10  ;;  %v13414_v8 = vld [vmem:[#allocation11 + $0x170] sm:$0xf]  ;;  %v13351_v15 = vor.u32 %v14638_v34, %v13350_v30  ;;  %v14652_v10 = vld [vmem:[#allocation11 + $0x164] sm:$0xf0] }
 0x491   :  { %v14612_v30 = vld [vmem:[#allocation11 + $0x24] sm:$0xf0] }
 0x492   :  { %v8037_v45 = vadd.f32 %v8036_v53, %v8024_v25  ;;  %v14654_v53 = vld [vmem:[#allocation11 + $0x174] sm:$0xf0]  ;;  %8645 = vmatpush.bf16.msra.mxu1 %v13351_v15  ;;  %v14644_v15 = vld [vmem:[#allocation11 + $0x124] sm:$0xf0] }
 0x493   :  { %v13415_v14 = vor.u32 %v14654_v53, %v13414_v8  ;;  %v14628_v8 = vld [vmem:[#allocation11 + $0xa4] sm:$0xf0]  ;;  %v13374_v53 = vld [vmem:[#allocation11 + $0x120] sm:$0xf] }
 0x495   :  { %8658 = vmatpush.bf16.msra.mxu2 %v13415_v14 }
 0x497   :  { %v8025_v9 = vpop.f32.mrf.mxu2 }
 0x498   :  { %v8038_v13 = vpop.f32.mrf.mxu3  ;;  %v13478_v9 = vld [vmem:[#allocation11 + $0x1f0] sm:$0xf] }
 0x499   :  { %v14670_v13 = vld [vmem:[#allocation11 + $0x1f4] sm:$0xf0] }
 0x4a7   :  { %v8049_v37 = vpop.f32.mrf.mxu0 }
 0x4a8   :  { %v8062_v51 = vpop.f32.mrf.mxu1  ;;  %v8050_v21 = vadd.f32 %v8049_v37, %v8037_v45  ;;  %v13479_v37 = vor.u32 %v14670_v13, %v13478_v9  ;;  %v14668_v45 = vld [vmem:[#allocation11 + $0x1e4] sm:$0xf0]  ;;  %v13375_v9 = vor.u32 %v14644_v15, %v13374_v53  ;;  %v13438_v13 = vld [vmem:[#allocation11 + $0x1a0] sm:$0xf]  ;;  %v14633_v53 = vld [vmem:[#allocation11 + $0xd4] sm:$0xf] }
 0x4a9   :  { %v13336_v15 = vld [vmem:[#allocation11 + $0xd8] sm:$0xf0] }
 0x4aa   :  { %v8063_v42 = vadd.f32 %v8062_v51, %v8050_v21  ;;  %v13278_v51 = vld [vmem:[#allocation11 + $0x60] sm:$0xf]  ;;  %8671 = vmatpush.bf16.msra.mxu3 %v13479_v37  ;;  %v14660_v37 = vld [vmem:[#allocation11 + $0x1a4] sm:$0xf0] }
 0x4af   :  { %v8075_v19 = vpop.f32.mrf.mxu2  ;;  %v8051_v40 = vpop.f32.mrf.mxu0 }
 0x4b0   :  { %v8088_v28 = vpop.f32.mrf.mxu3  ;;  %v8064_v26 = vpop.f32.mrf.mxu1  ;;  %v8076_v54 = vadd.f32 %v8075_v19, %v8063_v42  ;;  %v13342_v19 = vld [vmem:[#allocation11 + $0xe0] sm:$0xf]  ;;  %v14636_v40 = vld [vmem:[#allocation11 + $0xe4] sm:$0xf0]  ;;  %v13270_v42 = vld [vmem:[#allocation11 + $0x50] sm:$0xf] }
 0x4b1   :  { %v13406_v26 = vld [vmem:[#allocation11 + $0x160] sm:$0xf]  ;;  %v13343_v25 = vor.u32 %v14636_v40, %v13342_v19  ;;  %v14610_v19 = vld [vmem:[#allocation11 + $0x14] sm:$0xf0] }
 0x4b2   :  { %v8089_v31 = vadd.f32 %v8088_v28, %v8076_v54  ;;  %v13279_v28 = vor.u32 %v14620_v38, %v13278_v51  ;;  %v14618_v54 = vld [vmem:[#allocation11 + $0x54] sm:$0xf0]  ;;  %v13439_v51 = vor.u32 %v14660_v37, %v13438_v13  ;;  %v13238_v38 = vld [vmem:[#allocation11 + $0x10] sm:$0xf]  ;;  %v13400_v13 = vld [vmem:[#allocation11 + $0x158] sm:$0xf0] }
 0x4b3   :  { %8646 = vmatpush.bf16.msra.mxu1 %v13343_v25  ;;  %v13239_v40 = vor.u32 %v14610_v19, %v13238_v38  ;;  %v14642_v25 = vld [vmem:[#allocation11 + $0x114] sm:$0xf0]  ;;  %v13339_v38 = vor.u32 %v14633_v53, %v13336_v15  ;;  %v13440_v53 = vld [vmem:[#allocation11 + $0x1a8] sm:$0xf0] }
 0x4b7   :  { %v8077_v48 = vpop.f32.mrf.mxu2 }
 0x4b8   :  { %v8090_v24 = vpop.f32.mrf.mxu3  ;;  %v13407_v48 = vor.u32 %v14652_v10, %v13406_v26  ;;  %v14626_v26 = vld [vmem:[#allocation11 + $0x94] sm:$0xf0]  ;;  %v13366_v10 = vld [vmem:[#allocation11 + $0x110] sm:$0xf] }
 0x4b9   :  { %v13470_v24 = vld [vmem:[#allocation11 + $0x1e0] sm:$0xf] }
 0x4ba   :  { %v13471_v21 = vor.u32 %v14668_v45, %v13470_v24  ;;  %8659 = vmatpush.bf16.msra.mxu2 %v13407_v48  ;;  %v13367_v24 = vor.u32 %v14642_v25, %v13366_v10  ;;  %v13430_v45 = vld [vmem:[#allocation11 + $0x190] sm:$0xf]  ;;  %v13328_v25 = vld [vmem:[#allocation11 + $0xc8] sm:$0xf0] }
 0x4bc   :  { %8672 = vmatpush.bf16.msra.mxu3 %v13471_v21  ;;  %v14658_v21 = vld [vmem:[#allocation11 + $0x194] sm:$0xf0] }
 0x4c7   :  { %v8101_v47 = vpop.f32.mrf.mxu0 }
 0x4c8   :  { %v8114_v32 = vpop.f32.mrf.mxu1  ;;  %v8102_v55 = vadd.f32 %v8101_v47, %v8089_v31  ;;  %v13334_v31 = vld [vmem:[#allocation11 + $0xd0] sm:$0xf]  ;;  %v13271_v47 = vor.u32 %v14618_v54, %v13270_v42  ;;  %v13230_v42 = vld [vmem:[#allocation11] sm:$0xf]  ;;  %v13431_v54 = vor.u32 %v14658_v21, %v13430_v45  ;;  %v14663_v45 = vld [vmem:[#allocation11 + $0x1c4] sm:$0xf] }
 0x4c9   :  { %v13456_v21 = vld [vmem:[#allocation11 + $0x1c8] sm:$0xf0] }
 0x4ca   :  { %v8115_v35 = vadd.f32 %v8114_v32, %v8102_v55  ;;  %v14634_v32 = vld [vmem:[#allocation11 + $0xd4] sm:$0xf0]  ;;  %v13398_v55 = vld [vmem:[#allocation11 + $0x150] sm:$0xf] }
 0x4cf   :  { %v8127_v61 = vpop.f32.mrf.mxu2  ;;  %v8103_v57 = vpop.f32.mrf.mxu0 }
 0x4d0   :  { %v8128_v12 = vadd.f32 %v8127_v61, %v8115_v35  ;;  %v8140_v60 = vpop.f32.mrf.mxu3  ;;  %v8116_v0 = vpop.f32.mrf.mxu1  ;;  %v14650_v35 = vld [vmem:[#allocation11 + $0x154] sm:$0xf0]  ;;  %v13335_v61 = vor.u32 %v14634_v32, %v13334_v31  ;;  %v14616_v57 = vld [vmem:[#allocation11 + $0x44] sm:$0xf0] }
 0x4d1   :  { %v13326_v0 = vld [vmem:[#allocation11 + $0xc0] sm:$0xf]  ;;  %v14608_v31 = vld [vmem:[#allocation11 + $0x4] sm:$0xf0] }
 0x4d2   :  { %v8141_v1 = vadd.f32 %v8140_v60, %v8128_v12  ;;  %8647 = vmatpush.bf16.msra.mxu1 %v13335_v61  ;;  %v13262_v60 = vld [vmem:[#allocation11 + $0x40] sm:$0xf]  ;;  %v14624_v32 = vld [vmem:[#allocation11 + $0x84] sm:$0xf0] }
 0x4d3   :  { %v13358_v61 = vld [vmem:[#allocation11 + $0x100] sm:$0xf] }
 0x4d4   :  { %v8148_v2 = vadd.f32 %v8147_v62, %v8141_v1  ;;  %v14632_v62 = vld [vmem:[#allocation11 + $0xc4] sm:$0xf0] }
 0x4d6   :  { %8149 = vadd.xlane.f32.xlu0 %v8148_v2  ;;  %v13390_v2 = vld [vmem:[#allocation11 + $0x140] sm:$0xf] }
 0x4d7   :  { %v8129_v58 = vpop.f32.mrf.mxu2 }
 0x4d8   :  { %v8142_v46 = vpop.f32.mrf.mxu3  ;;  %v14648_v58 = vld [vmem:[#allocation11 + $0x144] sm:$0xf0] }
 0x4d9   :  { %v13327_v46 = vor.u32 %v14632_v62, %v13326_v0  ;;  %v13391_v5 = vor.u32 %v14648_v58, %v13390_v2  ;;  %v14637_v62 = vld [vmem:[#allocation11 + $0xf4] sm:$0xf]  ;;  %v13352_v2 = vld [vmem:[#allocation11 + $0xf8] sm:$0xf0] }
 0x4da   :  { %v14653_v58 = vld [vmem:[#allocation11 + $0x174] sm:$0xf] }
 0x4db   :  { %8648 = vmatpush.bf16.msra.mxu1 %v13327_v46  ;;  %v13355_v46 = vor.u32 %v14637_v62, %v13352_v2  ;;  %v13256_v62 = vld [vmem:[#allocation11 + $0x38] sm:$0xf0]  ;;  %v14629_v2 = vld [vmem:[#allocation11 + $0xb4] sm:$0xf] }
 0x549   :  { %v8150_v16 = vpop.xlane.xlu0 %8149 }
 0x54a   :  { %v8158_v22 = vmul.f32 %v15579_v33, %v8150_v16  ;;  %v13318_v16 = vld [vmem:[#allocation11 + $0xb0] sm:$0xf] }
 0x54c   :  { %v15583_v56 = vsub.f32 %v15667_v3, %v8158_v22  ;;  %v15586_v20 = vsub.f32 %v15668_v36, %v8158_v22  ;;  %v15589_v4 = vsub.f32 %v15552_v52, %v8158_v22  ;;  %v15591_v23 = vsub.f32 %v8141_v1, %v8158_v22  ;;  %v13286_v52 = vld [vmem:[#allocation11 + $0x70] sm:$0xf] }
 0x54d   :  { %v13287_v41 = vor.u32 %v14622_v49, %v13286_v52  ;;  %v13399_v3 = vor.u32 %v14650_v35, %v13398_v55  ;;  %v13462_v36 = vld [vmem:[#allocation11 + $0x1d0] sm:$0xf]  ;;  %v13263_v1 = vor.u32 %v14616_v57, %v13262_v60  ;;  %v13255_v22 = vor.u32 %v14614_v63, %v13254_v44  ;;  %v13246_v49 = vld [vmem:[#allocation11 + $0x20] sm:$0xf]  ;;  %v14621_v60 = vld [vmem:[#allocation11 + $0x74] sm:$0xf] }
 0x54e   :  { %v8163_v43 = vmul.f32 %v15583_v56, %v15583_v56  ;;  %v8164_v50 = vmul.f32 %v15586_v20, %v15586_v20  ;;  %v8165_v11 = vmul.f32 %v15589_v4, %v15589_v4  ;;  %v8166_v17 = vmul.f32 %v15591_v23, %v15591_v23  ;;  %v13288_v57 = vld [vmem:[#allocation11 + $0x78] sm:$0xf0]  ;;  %v14619_v63 = vld [vmem:[#allocation11 + $0x64] sm:$0xf] }
 0x54f   :  { %8632 = vmatpush.bf16.msra.mxu0 %v13287_v41  ;;  %v13463_v12 = vor.u32 %v14666_v59, %v13462_v36  ;;  %8660 = vmatpush.bf16.msra.mxu2 %v13399_v3  ;;  %v13310_v41 = vld [vmem:[#allocation11 + $0xa0] sm:$0xf]  ;;  %v13247_v34 = vor.u32 %v14612_v30, %v13246_v49  ;;  %v13231_v55 = vor.u32 %v14608_v31, %v13230_v42  ;;  %v14640_v3 = vld [vmem:[#allocation11 + $0x104] sm:$0xf0]  ;;  %v14667_v49 = vld [vmem:[#allocation11 + $0x1e4] sm:$0xf] }
 0x550   :  { %v8167_v27 = vadd.f32 %v8164_v50, %v8163_v43  ;;  %v14630_v43 = vld [vmem:[#allocation11 + $0xb4] sm:$0xf0]  ;;  %v13382_v50 = vld [vmem:[#allocation11 + $0x130] sm:$0xf]  ;;  %v13311_v14 = vor.u32 %v14628_v8, %v13310_v41  ;;  %v13422_v36 = vld [vmem:[#allocation11 + $0x180] sm:$0xf]  ;;  %v13359_v59 = vor.u32 %v14640_v3, %v13358_v61  ;;  %v13483_v44 = vor.u32 %v14669_v39, %v13480_v6 }
 0x551   :  { %8673 = vmatpush.bf16.msra.mxu3 %v13463_v12  ;;  %v14656_v12 = vld [vmem:[#allocation11 + $0x184] sm:$0xf0]  ;;  %v13472_v30 = vld [vmem:[#allocation11 + $0x1e8] sm:$0xf0]  ;;  %v14617_v41 = vld [vmem:[#allocation11 + $0x54] sm:$0xf] }
 0x552   :  { %v8168_v29 = vadd.f32 %v8167_v27, %v8165_v11  ;;  %v14646_v11 = vld [vmem:[#allocation11 + $0x134] sm:$0xf0]  ;;  %v13319_v27 = vor.u32 %v14630_v43, %v13318_v16  ;;  %v13423_v0 = vor.u32 %v14656_v12, %v13422_v36  ;;  %v13280_v16 = vld [vmem:[#allocation11 + $0x68] sm:$0xf0]  ;;  %v13272_v8 = vld [vmem:[#allocation11 + $0x58] sm:$0xf0] }
 0x553   :  { %8633 = vmatpush.bf16.msra.mxu0 %v13279_v28  ;;  %8661 = vmatpush.bf16.msra.mxu2 %v13391_v5  ;;  %v13302_v28 = vld [vmem:[#allocation11 + $0x90] sm:$0xf]  ;;  %v13416_v5 = vld [vmem:[#allocation11 + $0x178] sm:$0xf0]  ;;  %v13275_v37 = vor.u32 %v14617_v41, %v13272_v8  ;;  %v14659_v8 = vld [vmem:[#allocation11 + $0x1a4] sm:$0xf] }
 0x554   :  { %v8169_v7 = vadd.f32 %v8168_v29, %v8166_v17  ;;  %v13383_v17 = vor.u32 %v14646_v11, %v13382_v50  ;;  %v13446_v29 = vld [vmem:[#allocation11 + $0x1b0] sm:$0xf]  ;;  %8649 = vmatpush.bf16.msra.mxu1 %v13319_v27  ;;  %v13303_v48 = vor.u32 %v14626_v26, %v13302_v28  ;;  %v13283_v50 = vor.u32 %v14619_v63, %v13280_v16  ;;  %v13344_v11 = vld [vmem:[#allocation11 + $0xe8] sm:$0xf0]  ;;  %v14651_v27 = vld [vmem:[#allocation11 + $0x164] sm:$0xf] }
 0x555   :  { %8674 = vmatpush.bf16.msra.mxu3 %v13455_v18  ;;  %v13419_v18 = vor.u32 %v14653_v58, %v13416_v5  ;;  %v14615_v28 = vld [vmem:[#allocation11 + $0x44] sm:$0xf]  ;;  %v14645_v5 = vld [vmem:[#allocation11 + $0x134] sm:$0xf]  ;;  %v13384_v39 = vld [vmem:[#allocation11 + $0x138] sm:$0xf0] }
 0x556   :  { %8170 = vadd.xlane.f32.xlu0 %v8169_v7  ;;  %v14662_v7 = vld [vmem:[#allocation11 + $0x1b4] sm:$0xf0]  ;;  %v14631_v26 = vld [vmem:[#allocation11 + $0xc4] sm:$0xf]  ;;  %v13387_v63 = vor.u32 %v14645_v5, %v13384_v39  ;;  %v14661_v16 = vld [vmem:[#allocation11 + $0x1b4] sm:$0xf] }
 0x557   :  { %8634 = vmatpush.bf16.msra.mxu0 %v13271_v47  ;;  %v13447_v52 = vor.u32 %v14662_v7, %v13446_v29  ;;  %8662 = vmatpush.bf16.msra.mxu2 %v13383_v17  ;;  %v13294_v47 = vld [vmem:[#allocation11 + $0x80] sm:$0xf]  ;;  %v13408_v17 = vld [vmem:[#allocation11 + $0x168] sm:$0xf0]  ;;  %v13331_v31 = vor.u32 %v14631_v26, %v13328_v25  ;;  %v14657_v25 = vld [vmem:[#allocation11 + $0x194] sm:$0xf] }
 0x558   :  { %8650 = vmatpush.bf16.msra.mxu1 %v13311_v14  ;;  %v13295_v35 = vor.u32 %v14624_v32, %v13294_v47  ;;  %v13459_v32 = vor.u32 %v14663_v45, %v13456_v21 }
 0x559   :  { %8675 = vmatpush.bf16.msra.mxu3 %v13447_v52  ;;  %v13411_v52 = vor.u32 %v14651_v27, %v13408_v17  ;;  %v14627_v27 = vld [vmem:[#allocation11 + $0xa4] sm:$0xf] }
 0x55b   :  { %8635 = vmatpush.bf16.msra.mxu0 %v13263_v1  ;;  %8663 = vmatpush.bf16.msra.mxu2 %v13375_v9  ;;  %v13291_v1 = vor.u32 %v14621_v60, %v13288_v57  ;;  %v14649_v9 = vld [vmem:[#allocation11 + $0x154] sm:$0xf] }
 0x55c   :  { %8651 = vmatpush.bf16.msra.mxu1 %v13303_v48  ;;  %v13403_v19 = vor.u32 %v14649_v9, %v13400_v13  ;;  %v14647_v48 = vld [vmem:[#allocation11 + $0x144] sm:$0xf]  ;;  %v13443_v9 = vor.u32 %v14659_v8, %v13440_v53  ;;  %v14609_v13 = vld [vmem:[#allocation11 + $0x14] sm:$0xf] }
 0x55d   :  { %8676 = vmatpush.bf16.msra.mxu3 %v13439_v51  ;;  %v14665_v51 = vld [vmem:[#allocation11 + $0x1d4] sm:$0xf] }
 0x55f   :  { %8636 = vmatpush.bf16.msra.mxu0 %v13255_v22  ;;  %8664 = vmatpush.bf16.msra.mxu2 %v13367_v24  ;;  %v14635_v22 = vld [vmem:[#allocation11 + $0xe4] sm:$0xf]  ;;  %v13392_v24 = vld [vmem:[#allocation11 + $0x148] sm:$0xf0] }
 0x560   :  { %8652 = vmatpush.bf16.msra.mxu1 %v13295_v35  ;;  %v13347_v7 = vor.u32 %v14635_v22, %v13344_v11  ;;  %v13395_v47 = vor.u32 %v14647_v48, %v13392_v24  ;;  %v13448_v22 = vld [vmem:[#allocation11 + $0x1b8] sm:$0xf0]  ;;  %v13248_v11 = vld [vmem:[#allocation11 + $0x28] sm:$0xf0]  ;;  %v14607_v24 = vld [vmem:[#allocation11 + $0x4] sm:$0xf] }
 0x561   :  { %8677 = vmatpush.bf16.msra.mxu3 %v13431_v54  ;;  %v15605_v54 = vld [vmem:[#allocation8] sm:$0xf]  ;;  %v13432_v48 = vld [vmem:[#allocation11 + $0x198] sm:$0xf0] }
 0x562   :  { %v8189_v61 = vperm.slane %v15605_v54, 0  ;;  %v8190_v3 = vperm.slane %v15605_v54, 1  ;;  %v8192_v12 = vperm.slane %v15605_v54, 3 }
 0x563   :  { %8637 = vmatpush.bf16.msra.mxu0 %v13247_v34  ;;  %8665 = vmatpush.bf16.msra.mxu2 %v13359_v59  ;;  %v13475_v34 = vor.u32 %v14667_v49, %v13472_v30  ;;  %v8191_v59 = vperm.slane %v15605_v54, 2  ;;  %v13312_v49 = vld [vmem:[#allocation11 + $0xa8] sm:$0xf0]  ;;  %v14643_v30 = vld [vmem:[#allocation11 + $0x124] sm:$0xf] }
 0x564   :  { %8697 = vmatpush.bf16.msrb.mxu1 %v13355_v46  ;;  %v13320_v46 = vld [vmem:[#allocation11 + $0xb8] sm:$0xf0]  ;;  %v13315_v41 = vor.u32 %v14627_v27, %v13312_v49 }
 0x565   :  { %8678 = vmatpush.bf16.msra.mxu3 %v13423_v0 }
 0x567   :  { %8638 = vmatpush.bf16.msra.mxu0 %v13239_v40  ;;  %8710 = vmatpush.bf16.msrb.mxu2 %v13419_v18  ;;  %v13264_v40 = vld [vmem:[#allocation11 + $0x48] sm:$0xf0] }
 0x568   :  { %8698 = vmatpush.bf16.msrb.mxu1 %v13347_v7  ;;  %v13267_v42 = vor.u32 %v14615_v28, %v13264_v40  ;;  %v13368_v28 = vld [vmem:[#allocation11 + $0x118] sm:$0xf0] }
 0x569   :  { %8723 = vmatpush.bf16.msrb.mxu3 %v13483_v44  ;;  %v13323_v44 = vor.u32 %v14629_v2, %v13320_v46  ;;  %v14655_v2 = vld [vmem:[#allocation11 + $0x184] sm:$0xf] }
 0x56b   :  { %8639 = vmatpush.bf16.msra.mxu0 %v13231_v55  ;;  %8711 = vmatpush.bf16.msrb.mxu2 %v13411_v52  ;;  %v15607_v55 = vld [vmem:[#allocation10] sm:$0xf] }
 0x56c   :  { %8699 = vmatpush.bf16.msrb.mxu1 %v13339_v38  ;;  %v8202_v60 = vperm.slane %v15607_v55, 0  ;;  %v8203_v57 = vperm.slane %v15607_v55, 1  ;;  %v8204_v18 = vperm.slane %v15607_v55, 2  ;;  %v8205_v7 = vperm.slane %v15607_v55, 3  ;;  %v13304_v38 = vld [vmem:[#allocation11 + $0x98] sm:$0xf0] }
 0x56d   :  { %8724 = vmatpush.bf16.msrb.mxu3 %v13475_v34  ;;  %v13376_v34 = vld [vmem:[#allocation11 + $0x128] sm:$0xf0] }
 0x56f   :  { %8684 = vmatpush.bf16.msrb.mxu0 %v13291_v1  ;;  %8712 = vmatpush.bf16.msrb.mxu2 %v13403_v19  ;;  %v14613_v1 = vld [vmem:[#allocation11 + $0x34] sm:$0xf] }
 0x570   :  { %8700 = vmatpush.bf16.msrb.mxu1 %v13331_v31  ;;  %v13259_v58 = vor.u32 %v14613_v1, %v13256_v62  ;;  %v14641_v19 = vld [vmem:[#allocation11 + $0x114] sm:$0xf]  ;;  %v14639_v1 = vld [vmem:[#allocation11 + $0x104] sm:$0xf]  ;;  %v13360_v62 = vld [vmem:[#allocation11 + $0x108] sm:$0xf0] }
 0x571   :  { %v13363_v5 = vor.u32 %v14639_v1, %v13360_v62 }
 0x573   :  { %8685 = vmatpush.bf16.msrb.mxu0 %v13283_v50  ;;  %8713 = vmatpush.bf16.msrb.mxu2 %v13395_v47  ;;  %v14611_v50 = vld [vmem:[#allocation11 + $0x24] sm:$0xf]  ;;  %v13232_v47 = vld [vmem:[#allocation11 + $0x8] sm:$0xf0] }
 0x574   :  { %8701 = vmatpush.bf16.msrb.mxu1 %v13323_v44  ;;  %v13251_v52 = vor.u32 %v14611_v50, %v13248_v11 }
 0x577   :  { %8686 = vmatpush.bf16.msrb.mxu0 %v13275_v37  ;;  %8714 = vmatpush.bf16.msrb.mxu2 %v13387_v63  ;;  %v13240_v37 = vld [vmem:[#allocation11 + $0x18] sm:$0xf0] }
 0x578   :  { %8702 = vmatpush.bf16.msrb.mxu1 %v13315_v41 }
 0x57b   :  { %8687 = vmatpush.bf16.msrb.mxu0 %v13267_v42 }
 0x57f   :  { %8688 = vmatpush.bf16.msrb.mxu0 %v13259_v58 }
 0x583   :  { %8689 = vmatpush.bf16.msrb.mxu0 %v13251_v52 }
 0x5c9   :  { %v8171_v43 = vpop.xlane.xlu0 %8170 }
 0x5ca   :  { %v8172_v29 = vmul.f32 %v8171_v43, %v15579_v33  ;;  %v13464_v33 = vld [vmem:[#allocation11 + $0x1d8] sm:$0xf0]  ;;  %v13451_v43 = vor.u32 %v14661_v16, %v13448_v22 }
 0x5cb   :  { %v13467_v10 = vor.u32 %v14665_v51, %v13464_v33  ;;  %v14625_v51 = vld [vmem:[#allocation11 + $0x94] sm:$0xf]  ;;  %v13243_v33 = vor.u32 %v14609_v13, %v13240_v37 }
 0x5cc   :  { %v15602_v14 = vadd.f32 1e-05, %v8172_v29  ;;  %v13307_v26 = vor.u32 %v14625_v51, %v13304_v38 }
 0x5cd   :  { %8725 = vmatpush.bf16.msrb.mxu3 %v13467_v10  ;;  %v13371_v10 = vor.u32 %v14641_v19, %v13368_v28  ;;  %8690 = vmatpush.bf16.msrb.mxu0 %v13243_v33  ;;  %v8306_v33 = vld [vmem:[#allocation13] sm:$0x3] }
 0x5ce   :  { %14726 = vrsqrt.f32 %v15602_v14  ;;  %vm8180_vm2 = vweird.f32 %v15602_v14  ;;  %8703 = vmatpush.bf16.msrb.mxu1 %v13307_v26  ;;  %v8308_v38 = vperm.slane %v8306_v33, 0  ;;  %v8309_v19 = vperm.slane %v8306_v33, 1 }
 0x5d1   :  { %8726 = vmatpush.bf16.msrb.mxu3 %v13459_v32  ;;  %v14623_v32 = vld [vmem:[#allocation11 + $0x84] sm:$0xf] }
 0x5d4   :  { %v14727_v35 = vpop.eup %14726 }
 0x5d5   :  { %v8175_v36 = vmul.f32 %v14727_v35, %v15602_v14  ;;  %vm8181_vm1 = vweird.f32 %v14727_v35  ;;  %8727 = vmatpush.bf16.msrb.mxu3 %v13451_v43  ;;  %v13379_v14 = vor.u32 %v14643_v30, %v13376_v34 }
 0x5d6   :  { %vm15619_vm3 = vmor %vm8180_vm2, %vm8181_vm1 }
 0x5d7   :  { %v8176_v0 = vmul.f32 %v14727_v35, %v8175_v36  ;;  %8715 = vmatpush.bf16.msrb.mxu2 %v13379_v14  ;;  %v13296_v36 = vld [vmem:[#allocation11 + $0x88] sm:$0xf0] }
 0x5d8   :  { %v13299_v46 = vor.u32 %v14623_v32, %v13296_v36 }
 0x5d9   :  { %v8177_v6 = vmul.f32 0.5, %v8176_v0  ;;  %8728 = vmatpush.bf16.msrb.mxu3 %v13443_v9  ;;  %v13235_v0 = vor.u32 %v14607_v24, %v13232_v47 }
 0x5da   :  { %8704 = vmatpush.bf16.msrb.mxu1 %v13299_v46 }
 0x5db   :  { %v8178_v17 = vsub.f32 1.5, %v8177_v6  ;;  %8716 = vmatpush.bf16.msrb.mxu2 %v13371_v10  ;;  %8691 = vmatpush.bf16.msrb.mxu0 %v13235_v0 }
 0x5dd   :  { %v8179_v15 = vmul.f32 %v14727_v35, %v8178_v17 }
 0x5df   :  { %v8183_v40 = vsel %vm15619_vm3, %v14727_v35, %v8179_v15  ;;  %v13435_v35 = vor.u32 %v14657_v25, %v13432_v48  ;;  %8717 = vmatpush.bf16.msrb.mxu2 %v13363_v5 }
 0x5e0   :  { %v8184_v45 = vmul.f32 %v8183_v40, %v15583_v56  ;;  %v8185_v21 = vmul.f32 %v8183_v40, %v15586_v20  ;;  %v8186_v42 = vmul.f32 %v8183_v40, %v15589_v4  ;;  %v8187_v31 = vmul.f32 %v8183_v40, %v15591_v23  ;;  %v13424_v23 = vld [vmem:[#allocation11 + $0x188] sm:$0xf0] }
 0x5e1   :  { %v13427_v39 = vor.u32 %v14655_v2, %v13424_v23  ;;  %8729 = vmatpush.bf16.msrb.mxu3 %v13435_v35 }
 0x5e2   :  { %v8197_v58 = vmul.f32 %v8189_v61, %v8184_v45  ;;  %v8198_v56 = vmul.f32 %v8190_v3, %v8185_v21  ;;  %v8199_v20 = vmul.f32 %v8191_v59, %v8186_v42  ;;  %v8200_v4 = vmul.f32 %v8192_v12, %v8187_v31 }
 0x5e4   :  { %v8210_v6 = vadd.f32 %v8202_v60, %v8197_v58  ;;  %v8211_v61 = vadd.f32 %v8203_v57, %v8198_v56  ;;  %v8212_v3 = vadd.f32 %v8204_v18, %v8199_v20  ;;  %v8213_v59 = vadd.f32 %v8205_v7, %v8200_v4 }
 0x5e5   :  { %8730 = vmatpush.bf16.msrb.mxu3 %v13427_v39  ;;  %v15181_v58 = vmov 256.0  }
 0x5e6   :  { %v8218_v54 = vmin.f32 %v8210_v6, 0.0  ;;  %v8219_v12 = vmin.f32 %v8211_v61, 0.0  ;;  %v8220_v44 = vmin.f32 %v8212_v3, 0.0  ;;  %v8221_v63 = vmin.f32 %v8213_v59, 0.0 }
 0x5e7   :  { %vm8214_vm4 = vcmp.gt.f32.partialorder %v8210_v6, 0.0  ;;  %vm8215_vm5 = vcmp.gt.f32.partialorder %v8211_v61, 0.0  ;;  %vm8216_vm6 = vcmp.gt.f32.partialorder %v8212_v3, 0.0  ;;  %vm8217_vm7 = vcmp.gt.f32.partialorder %v8213_v59, 0.0 }
 0x5e8   :  { %v8222_v16 = vmul.f32 1.442695, %v8218_v54  ;;  %v8224_v22 = vmul.f32 1.442695, %v8219_v12  ;;  %v8226_v43 = vmul.f32 1.442695, %v8220_v44 }
 0x5e9   :  { %v8228_v60 = vmul.f32 1.442695, %v8221_v63  ;;  %v14678_v44 = vld [vmem:[#allocation17 + $0x38] sm:$0xff] }
 0x5ea   :  { %14728 = vpow2.f32 %v8222_v16  ;;  %v14686_v63 = vld [vmem:[#allocation17 + $0x78] sm:$0xff]  ;;  %v14677_v16 = vld [vmem:[#allocation17 + $0x30] sm:$0xff] }
 0x5eb   :  { %14730 = vpow2.f32 %v8224_v22  ;;  %v14685_v22 = vld [vmem:[#allocation17 + $0x70] sm:$0xff] }
 0x5ec   :  { %14732 = vpow2.f32 %v8226_v43  ;;  %v14676_v43 = vld [vmem:[#allocation17 + $0x28] sm:$0xff] }
 0x5ed   :  { %14734 = vpow2.f32 %v8228_v60  ;;  %v14684_v60 = vld [vmem:[#allocation17 + $0x68] sm:$0xff] }
 0x5ee   :  { %14736 = vrcp.f32 %v15181_v58  ;;  %v14720_v58 = vld [vmem:[#allocation19] ss:$0 sm:$0xff] }
 0x5f0   :  { %v14729_v55 = vpop.eup %14728 }
 0x5f1   :  { %v14731_v57 = vpop.eup %14730  ;;  %v13224_v18 = vadd.f32 -1.0, %v14729_v55  ;;  %v14675_v55 = vld [vmem:[#allocation17 + $0x20] sm:$0xff] }
 0x5f2   :  { %v14733_v50 = vpop.eup %14732  ;;  %v13225_v11 = vadd.f32 -1.0, %v14731_v57  ;;  %v14683_v57 = vld [vmem:[#allocation17 + $0x60] sm:$0xff] }
 0x5f3   :  { %v14735_v27 = vpop.eup %14734  ;;  %v8234_v17 = vsel %vm8214_vm4, %v8210_v6, %v13224_v18  ;;  %v13226_v29 = vadd.f32 -1.0, %v14733_v50  ;;  %v14674_v18 = vld [vmem:[#allocation17 + $0x18] sm:$0xff] }
 0x5f4   :  { %v8238_v7 = vpack.c.bf16 %v8234_v17, %v8234_v17  ;;  %v8235_v52 = vsel %vm8215_vm5, %v8211_v61, %v13225_v11  ;;  %v13227_v49 = vadd.f32 -1.0, %v14735_v27  ;;  %v14737_v56 = vpop.eup %14736  ;;  %v14682_v50 = vld [vmem:[#allocation17 + $0x58] sm:$0xff]  ;;  %v14673_v11 = vld [vmem:[#allocation17 + $0x10] sm:$0xff] }
 0x5f5   :  { %v8239_v30 = vpack.c.bf16 %v8235_v52, %v8235_v52  ;;  %v8236_v41 = vsel %vm8216_vm6, %v8212_v3, %v13226_v29  ;;  %v8742_v20 = vmul.f32 256.0, %v14737_v56  ;;  %vm8746_vm8 = vweird.f32 %v14737_v56  ;;  %v14681_v27 = vld [vmem:[#allocation17 + $0x50] sm:$0xff]  ;;  %v14672_v52 = vld [vmem:[#allocation17 + $0x8] sm:$0xff] }
 0x5f6   :  { %8640 = vmatmul.bf16.vlgmr.msra.gmra.mxu0 %v8238_v7  ;;  %v8240_v34 = vpack.c.bf16 %v8236_v41, %v8236_v41  ;;  %v8237_v8 = vsel %vm8217_vm7, %v8213_v59, %v13227_v49  ;;  %v14680_v49 = vld [vmem:[#allocation17 + $0x48] sm:$0xff]  ;;  %v14679_v41 = vld [vmem:[#allocation17 + $0x40] sm:$0xff] }
 0x5f7   :  { %8653 = vmatmul.bf16.vlgmr.msra.gmra.mxu1 %v8239_v30  ;;  %v8241_v53 = vpack.c.bf16 %v8237_v8, %v8237_v8  ;;  %v8743_v4 = vsub.f32 1.0, %v8742_v20  ;;  %8930 = vmatpush.bf16.msra.mxu0 %v14678_v44 }
 0x5f8   :  { %8666 = vmatmul.bf16.vlgmr.msra.gmra.mxu2 %v8240_v34  ;;  %8943 = vmatpush.bf16.msra.mxu1 %v14686_v63 }
 0x5f9   :  { %8679 = vmatmul.bf16.vlgmr.msra.gmra.mxu3 %v8241_v53  ;;  %v8744_v23 = vmul.f32 %v14737_v56, %v8743_v4 }
 0x5fb   :  { %v8745_v46 = vadd.f32 %v14737_v56, %v8744_v23  ;;  %8931 = vmatpush.bf16.msra.mxu0 %v14677_v16 }
 0x5fc   :  { %8944 = vmatpush.bf16.msra.mxu1 %v14685_v22 }
 0x5fd   :  { %v8747_v5 = vsel %vm8746_vm8, %v14737_v56, %v8745_v46 }
 0x5ff   :  { %8932 = vmatpush.bf16.msra.mxu0 %v14676_v43  ;;  %v14694_v43 = vld [vmem:[#allocation23 + $0x38] sm:$0xff] }
 0x600   :  { %8945 = vmatpush.bf16.msra.mxu1 %v14684_v60  ;;  %9068 = vmatpush.bf16.msra.mxu2 %v14694_v43  ;;  %v14693_v60 = vld [vmem:[#allocation23 + $0x30] sm:$0xff] }
 0x603   :  { %8933 = vmatpush.bf16.msra.mxu0 %v14675_v55  ;;  %v14692_v55 = vld [vmem:[#allocation23 + $0x28] sm:$0xff] }
 0x604   :  { %8946 = vmatpush.bf16.msra.mxu1 %v14683_v57  ;;  %9069 = vmatpush.bf16.msra.mxu2 %v14693_v60  ;;  %v14691_v57 = vld [vmem:[#allocation23 + $0x20] sm:$0xff] }
 0x606   :  { %8692 = vmatmul.bf16.vlgmr.msrb.gmra.mxu0 %v8238_v7 }
 0x607   :  { %8705 = vmatmul.bf16.vlgmr.msrb.gmra.mxu1 %v8239_v30  ;;  %8934 = vmatpush.bf16.msra.mxu0 %v14674_v18  ;;  %v14671_v30 = vld [vmem:[#allocation17] sm:$0xff] }
 0x608   :  { %8718 = vmatmul.bf16.vlgmr.msrb.gmra.mxu2 %v8240_v34  ;;  %8947 = vmatpush.bf16.msra.mxu1 %v14682_v50  ;;  %v14690_v18 = vld [vmem:[#allocation23 + $0x18] sm:$0xff]  ;;  %v14689_v50 = vld [vmem:[#allocation23 + $0x10] sm:$0xff] }
 0x609   :  { %8731 = vmatmul.bf16.vlgmr.msrb.gmra.mxu3 %v8241_v53  ;;  %9070 = vmatpush.bf16.msra.mxu2 %v14692_v55 }
 0x60b   :  { %8935 = vmatpush.bf16.msra.mxu0 %v14673_v11 }
 0x60c   :  { %8948 = vmatpush.bf16.msra.mxu1 %v14681_v27 }
 0x60d   :  { %9071 = vmatpush.bf16.msra.mxu2 %v14691_v57 }
 0x60f   :  { %8936 = vmatpush.bf16.msra.mxu0 %v14672_v52 }
 0x610   :  { %8949 = vmatpush.bf16.msra.mxu1 %v14680_v49 }
 0x611   :  { %9072 = vmatpush.bf16.msra.mxu2 %v14690_v18 }
 0x613   :  { %8937 = vmatpush.bf16.msra.mxu0 %v14671_v30 }
 0x614   :  { %8950 = vmatpush.bf16.msra.mxu1 %v14679_v41 }
 0x615   :  { %9073 = vmatpush.bf16.msra.mxu2 %v14689_v50 }
 0x673   :  { %v8641_v15 = vpop.f32.mrf.mxu0 }
 0x674   :  { %v8654_v14 = vpop.f32.mrf.mxu1  ;;  %v8642_v26 = vadd.f32 %v8641_v15, %v8308_v38 }
 0x676   :  { %v8655_v24 = vadd.f32 %v8654_v14, %v8642_v26  ;;  %v8736_v14 = vld [vmem:[#allocation14] sm:$0x3] }
 0x677   :  { %v8772_v33 = vperm.slane %v8736_v14, 1 }
 0x67b   :  { %v8667_v9 = vpop.f32.mrf.mxu2  ;;  %v8643_v13 = vpop.f32.mrf.mxu0 }
 0x67c   :  { %v8680_v37 = vpop.f32.mrf.mxu3  ;;  %v8656_v51 = vpop.f32.mrf.mxu1  ;;  %v8668_v45 = vadd.f32 %v8667_v9, %v8655_v24  ;;  %v8737_v13 = vld [vmem:[#allocation16] sm:$0x3] }
 0x67d   :  { %v8771_v51 = vperm.slane %v8736_v14, 0  ;;  %v14722_v14 = vld [vmem:[#allocation22] ss:$0 sm:$0xff] }
 0x67e   :  { %v8681_v35 = vadd.f32 %v8680_v37, %v8668_v45 }
 0x683   :  { %v8669_v28 = vpop.f32.mrf.mxu2  ;;  %v8693_v40 = vpop.f32.mrf.mxu0 }
 0x684   :  { %v8682_v10 = vpop.f32.mrf.mxu3  ;;  %v8706_v25 = vpop.f32.mrf.mxu1  ;;  %v8694_v48 = vadd.f32 %v8693_v40, %v8309_v19  ;;  %v8778_v19 = vperm.slane %v8737_v13, 0  ;;  %v8779_v28 = vperm.slane %v8737_v13, 1 }
 0x686   :  { %v8707_v21 = vadd.f32 %v8706_v25, %v8694_v48 }
 0x68b   :  { %v8719_v42 = vpop.f32.mrf.mxu2  ;;  %v8695_v31 = vpop.f32.mrf.mxu0 }
 0x68c   :  { %v8720_v47 = vadd.f32 %v8719_v42, %v8707_v21  ;;  %v8732_v32 = vpop.f32.mrf.mxu3  ;;  %v8708_v36 = vpop.f32.mrf.mxu1 }
 0x68e   :  { %v8733_v0 = vadd.f32 %v8732_v32, %v8720_v47 }
 0x690   :  { %v8738_v1 = vadd.f32 %v8733_v0, %v8681_v35 }
 0x692   :  { %8739 = vadd.xlane.f32.xlu1 %v8738_v1 }
 0x693   :  { %v8721_v62 = vpop.f32.mrf.mxu2 }
 0x694   :  { %v8734_v2 = vpop.f32.mrf.mxu3 }
 0x705   :  { %v8740_v39 = vpop.xlane.xlu1 %8739 }
 0x706   :  { %v8748_v6 = vmul.f32 %v8747_v5, %v8740_v39  ;;  %v15182_v39 = vmov 128.0  }
 0x708   :  { %v8749_v61 = vsub.f32 %v8681_v35, %v8748_v6  ;;  %v8750_v3 = vsub.f32 %v8733_v0, %v8748_v6 }
 0x70a   :  { %v8751_v59 = vmul.f32 %v8749_v61, %v8749_v61  ;;  %v8752_v54 = vmul.f32 %v8750_v3, %v8750_v3 }
 0x70c   :  { %v8753_v12 = vadd.f32 %v8752_v54, %v8751_v59 }
 0x70e   :  { %8754 = vadd.xlane.f32.xlu1 %v8753_v12 }
 0x781   :  { %v8755_v17 = vpop.xlane.xlu1 %8754 }
 0x782   :  { %v8756_v29 = vmul.f32 %v8755_v17, %v8747_v5 }
 0x784   :  { %v8757_v7 = vadd.f32 1e-05, %v8756_v29  ;;  %v14688_v29 = vld [vmem:[#allocation23 + $0x8] sm:$0xff] }
 0x785   :  { %9074 = vmatpush.bf16.msra.mxu2 %v14688_v29 }
 0x786   :  { %14738 = vrsqrt.f32 %v8757_v7  ;;  %vm8764_vm10 = vweird.f32 %v8757_v7 }
 0x78c   :  { %v14739_v34 = vpop.eup %14738 }
 0x78d   :  { %v8759_v8 = vmul.f32 %v14739_v34, %v8757_v7  ;;  %vm8765_vm9 = vweird.f32 %v14739_v34  ;;  %v14687_v7 = vld [vmem:[#allocation23] sm:$0xff] }
 0x78e   :  { %vm8766_vm11 = vmor %vm8764_vm10, %vm8765_vm9  ;;  %9075 = vmatpush.bf16.msra.mxu2 %v14687_v7 }
 0x78f   :  { %v8760_v53 = vmul.f32 %v14739_v34, %v8759_v8 }
 0x791   :  { %v8761_v15 = vmul.f32 0.5, %v8760_v53  ;;  %v14721_v53 = vld [vmem:[#allocation20] ss:$0 sm:$0xff] }
 0x793   :  { %v8762_v9 = vsub.f32 1.5, %v8761_v15 }
 0x795   :  { %v8763_v37 = vmul.f32 %v14739_v34, %v8762_v9 }
 0x797   :  { %v8767_v38 = vsel %vm8766_vm11, %v14739_v34, %v8763_v37 }
 0x798   :  { %v8768_v40 = vmul.f32 %v8767_v38, %v8749_v61  ;;  %v8769_v26 = vmul.f32 %v8767_v38, %v8750_v3 }
 0x79a   :  { %v8775_v10 = vmul.f32 %v8771_v51, %v8768_v40  ;;  %v8776_v25 = vmul.f32 %v8772_v33, %v8769_v26  ;;  %v14723_v26 = vld [vmem:[#allocation25] ss:$0 sm:$0xff] }
 0x79c   :  { %v8782_v48 = vadd.f32 %v8778_v19, %v8775_v10  ;;  %v8783_v24 = vadd.f32 %v8779_v28, %v8776_v25 }
 0x79e   :  { %v8786_v45 = vmin.f32 %v8782_v48, 0.0  ;;  %v8787_v21 = vmin.f32 %v8783_v24, 0.0  ;;  %vm8784_vm12 = vcmp.gt.f32.partialorder %v8782_v48, 0.0  ;;  %vm8785_vm13 = vcmp.gt.f32.partialorder %v8783_v24, 0.0 }
 0x7a0   :  { %v8788_v42 = vmul.f32 1.442695, %v8786_v45  ;;  %v8790_v31 = vmul.f32 1.442695, %v8787_v21 }
 0x7a2   :  { %14740 = vpow2.f32 %v8788_v42 }
 0x7a3   :  { %14742 = vpow2.f32 %v8790_v31 }
 0x7a4   :  { %14744 = vrcp.f32 %v15182_v39 }
 0x7a8   :  { %v14741_v47 = vpop.eup %14740 }
 0x7a9   :  { %v14743_v32 = vpop.eup %14742  ;;  %v13484_v36 = vadd.f32 -1.0, %v14741_v47 }
 0x7aa   :  { %v13485_v35 = vadd.f32 -1.0, %v14743_v32  ;;  %v14745_v6 = vpop.eup %14744 }
 0x7ab   :  { %v8794_v0 = vsel %vm8784_vm12, %v8782_v48, %v13484_v36  ;;  %v8961_v61 = vmul.f32 128.0, %v14745_v6  ;;  %vm8965_vm14 = vweird.f32 %v14745_v6 }
 0x7ac   :  { %v8796_v1 = vpack.c.bf16 %v8794_v0, %v8794_v0  ;;  %v8795_v62 = vsel %vm8785_vm13, %v8783_v24, %v13485_v35 }
 0x7ad   :  { %v8797_v2 = vpack.c.bf16 %v8795_v62, %v8795_v62  ;;  %v8962_v3 = vsub.f32 1.0, %v8961_v61 }
 0x7ae   :  { %8938 = vmatmul.bf16.vlgmr.msra.gmra.mxu0 %v8796_v1 }
 0x7af   :  { %8951 = vmatmul.bf16.vlgmr.msra.gmra.mxu1 %v8797_v2  ;;  %v8963_v59 = vmul.f32 %v14745_v6, %v8962_v3 }
 0x7b1   :  { %v8964_v54 = vadd.f32 %v14745_v6, %v8963_v59 }
 0x7b3   :  { %v8966_v12 = vsel %vm8965_vm14, %v14745_v6, %v8964_v54 }
 0x82b   :  { %v8939_v56 = vpop.f32.mrf.mxu0 }
 0x82c   :  { %v8940_v20 = vadd.f32 %v14720_v58, %v8939_v56  ;;  %v8952_v4 = vpop.f32.mrf.mxu1 }
 0x82e   :  { %v8953_v23 = vadd.f32 %v8952_v4, %v8940_v20 }
 0x830   :  { %8958 = vadd.xlane.f32.xlu2 %v8953_v23 }
 0x833   :  { %v8941_v46 = vpop.f32.mrf.mxu0 }
 0x834   :  { %v8954_v5 = vpop.f32.mrf.mxu1 }
 0x8a3   :  { %v8959_v44 = vpop.xlane.xlu2 %8958 }
 0x8a4   :  { %v8967_v63 = vmul.f32 %v8966_v12, %v8959_v44 }
 0x8a6   :  { %v8968_v16 = vsub.f32 %v8953_v23, %v8967_v63 }
 0x8a8   :  { %v8969_v22 = vmul.f32 %v8968_v16, %v8968_v16 }
 0x8aa   :  { %8970 = vadd.xlane.f32.xlu2 %v8969_v22 }
 0x91d   :  { %v8971_v11 = vpop.xlane.xlu2 %8970 }
 0x91e   :  { %v8972_v27 = vmul.f32 %v8971_v11, %v8966_v12 }
 0x920   :  { %v8973_v17 = vadd.f32 1e-05, %v8972_v27 }
 0x922   :  { %14746 = vrsqrt.f32 %v8973_v17  ;;  %vm8980_vm0 = vweird.f32 %v8973_v17 }
 0x928   :  { %v14747_v52 = vpop.eup %14746 }
 0x929   :  { %v8975_v49 = vmul.f32 %v14747_v52, %v8973_v17  ;;  %vm8981_vm15 = vweird.f32 %v14747_v52 }
 0x92a   :  { %vm8982_vm1 = vmor %vm8980_vm0, %vm8981_vm15 }
 0x92b   :  { %v8976_v30 = vmul.f32 %v14747_v52, %v8975_v49 }
 0x92d   :  { %v8977_v41 = vmul.f32 0.5, %v8976_v30 }
 0x92f   :  { %v8978_v34 = vsub.f32 1.5, %v8977_v41 }
 0x931   :  { %v8979_v8 = vmul.f32 %v14747_v52, %v8978_v34 }
 0x933   :  { %v8983_v15 = vsel %vm8982_vm1, %v14747_v52, %v8979_v8 }
 0x934   :  { %v8984_v9 = vmul.f32 %v8983_v15, %v8968_v16 }
 0x936   :  { %v8988_v13 = vmul.f32 %v14721_v53, %v8984_v9 }
 0x938   :  { %v8992_v37 = vadd.f32 %v14722_v14, %v8988_v13 }
 0x93a   :  { %v8994_v51 = vmin.f32 %v8992_v37, 0.0  ;;  %vm8993_vm2 = vcmp.gt.f32.partialorder %v8992_v37, 0.0 }
 0x93c   :  { %v8995_v33 = vmul.f32 1.442695, %v8994_v51 }
 0x93e   :  { %14748 = vpow2.f32 %v8995_v33 }
 0x944   :  { %v14749_v38 = vpop.eup %14748 }
 0x945   :  { %v13550_v19 = vadd.f32 -1.0, %v14749_v38 }
 0x947   :  { %v8998_v28 = vsel %vm8993_vm2, %v8992_v37, %v13550_v19 }
 0x948   :  { %v8999_v40 = vpack.c.bf16 %v8998_v28, %v8998_v28 }
 0x94a   :  { %9076 = vmatmul.bf16.vlgmr.msra.gmra.mxu2 %v8999_v40 }
 0x9cd   :  { %v9077_v10 = vpop.f32.mrf.mxu2 }
 0x9ce   :  { %v9078_v25 = vadd.f32 %v14723_v26, %v9077_v10 }
 0x9d0   :  { %9081 = vmax.xlane.f32.xlu0 %v9078_v25 }
 0x9d5   :  { %v9079_v48 = vpop.f32.mrf.mxu2 }
 0xa43   :  { %v9082_v24 = vpop.xlane.xlu0 %9081 }
 0xa44   :  { %v9083_v45 = vsub.f32 %v9078_v25, %v9082_v24 }
 0xa46   :  { %v9084_v21 = vmul.f32 1.442695, %v9083_v45 }
 0xa48   :  { %14750 = vpow2.f32 %v9084_v21 }
 0xa4e   :  { %v14751_v42 = vpop.eup %14750 }
 0xa4f   :  { %9086 = vadd.xlane.f32.xlu1 %v14751_v42 }
 0xac2   :  { %v9087_v31 = vpop.xlane.xlu1 %9086 }
 0xac3   :  { %14752 = vrcp.f32 %v9087_v31  ;;  %v9099_v35 = vand.u32 2147483648, %v9087_v31  ;;  %v9097_v1 = vand.u32 2147483647, %v9087_v31  ;;  %vm9093_vm4 = vweird.f32 %v9087_v31 }
 0xac5   :  { %v9100_v2 = vor.u32 1.1754944e-38, %v9099_v35  ;;  %vm9098_vm6 = vcmp.eq.f32.partialorder %v9097_v1, 8.507059e+37 }
 0xac9   :  { %v14753_v47 = vpop.eup %14752 }
 0xaca   :  { %v9089_v32 = vmul.f32 %v14753_v47, %v9087_v31  ;;  %vm9094_vm3 = vweird.f32 %v14753_v47 }
 0xacb   :  { %vm9095_vm5 = vmor %vm9093_vm4, %vm9094_vm3 }
 0xacc   :  { %v9090_v36 = vsub.f32 1.0, %v9089_v32 }
 0xace   :  { %v9091_v0 = vmul.f32 %v14753_v47, %v9090_v36 }
 0xad0   :  { %v9092_v62 = vadd.f32 %v14753_v47, %v9091_v0 }
 0xad2   :  { %v9096_v58 = vsel %vm9095_vm5, %v14753_v47, %v9092_v62 }
 0xad3   :  { %v9101_v56 = vsel %vm9098_vm6, %v9100_v2, %v9096_v58 }
 0xad4   :  { %v9102_v20 = vmul.f32 %v14751_v42, %v9101_v56 }
 0xad6   :  { %9103 = vst [vmem:[#allocation26] sm:$0xff] %v9102_v20 }
 0xad7   :  { %9114 = dma.vmem_to_hbm [thread:$0]  %s9110_s14, 128, %s9112_s16, [#allocation4]  }
 0xad8   :  { %15157 = dma.done.wait [#allocation4], 128  }
 0xad9   :  { %15158 = vsyncadd [#allocation4], 4294967168 }
 0xada   :  { %9119 = vsyncpa [#allocation3], 1 }
 0xadb   :  { %9120 = vsyncpa [#allocation6], 1 }
 0xadc   :  { %9121 = vsyncpa [#allocation9], 1 }
 0xadd   :  { %9122 = vsyncpa [#allocation12], 1 }
 0xade   :  { %9123 = vsyncpa [#allocation15], 1 }
 0xadf   :  { %9124 = vsyncpa [#allocation18], 1 }
 0xae0   :  { %9125 = vsyncpa [#allocation21], 1 }
 0xae1   :  { %9126 = vsyncpa [#allocation24], 1 }
 0xae2   :  { %9127 = vsyncpa [#allocation4], 1 }

</bundles_post_ra>
